<compile_context>
chip_gen: v5e
topology: v5e:2x2
jax: 0.10.0
libtpu: 0.0.40
codegen_flags: <defaults>
</compile_context>

<pallas_src>
import functools

import jax
import jax.numpy as jnp
from jax import lax
from jax.experimental import pallas as pl
from jax.experimental.pallas import tpu as pltpu


# ----------------------------- fused Pallas kernel -----------------------------

def _fused_up_kernel(x1i_ref, x2p_ref, wup_ref, upb_ref, cw_ref, cb_ref, msk_ref,
                     o_ref, *bufs, rep, Wpa, span, H1, W1, oy, ox, Sa, cols):
    f32 = jnp.float32
    buf_a = bufs[0]
    two_w1 = 2 * W1

    # ---- slab init: zero-padded skip tensor x2 (host supplies all pad zeros) ----
    buf_a[...] = x2p_ref[0]

    # ---- ping-pong buffer: zero ONLY the border rows, once per grid step ----
    # (interior rows [Wpa+1, Wpa+1+span) are fully overwritten by every layer's masked output;
    #  done unconditionally each step so each TensorCore's private scratch is initialized)
    if rep > 1:
        buf_b = bufs[1]
        buf_b[pl.ds(0, Wpa + 1), :] = jnp.zeros((Wpa + 1, cols), f32)
        tail = Sa - (Wpa + 1 + span)
        if tail > 0:
            buf_b[pl.ds(Wpa + 1 + span, tail), :] = jnp.zeros((tail, cols), f32)

    # ---- ConvTranspose2d(2x2, stride 2) + bias + F.pad + skip-add ----
    # Y_a = x1_dup @ W_a gives, for sub-row parity a, all (sj, b) sub-pixels of source row si in
    # the contiguous row range [2*si*W1, 2*si*W1 + 2*W1) -- already interleaved in b -- so each
    # (a, si) is one contiguous += into the padded slab.  Offsets are compile-time constants.
    x1i = x1i_ref[0]                                            # (2*H1*W1, B*2*Cin)
    for a in range(2):
        ya = jnp.dot(x1i, wup_ref[a], preferred_element_type=f32) + upb_ref[...]
        for si in range(H1):
            dst0 = (2 * si + a + 1 + oy) * Wpa + (ox + 1)
            src0 = 2 * si * W1
            buf_a[pl.ds(dst0, two_w1), :] += ya[src0:src0 + two_w1, :]

    if rep == 0:
        o_ref[0] = buf_a[pl.ds(Wpa + 1, span), :]
        return

    # ---- rep x (3x3 conv, pad=1, ReLU); activations never leave VMEM ----
    # acc row t = i*Wpa + j is output pixel (i, j); tap (dy, dx) is the contiguous slab slice
    # starting at dy*Wpa + dx (Wpa multiple of 8 -> dy bases sublane-aligned).
    for l in range(rep):
        src = bufs[l % len(bufs)]
        acc = jnp.zeros((span, cols), f32)
        for dy in range(3):
            for dx in range(3):
                tap = src[pl.ds(dy * Wpa + dx, span), :]
                acc = acc + jnp.dot(tap, cw_ref[l * 9 + dy * 3 + dx],
                                    preferred_element_type=f32)
        y = jnp.maximum(acc + cb_ref[l], 0.0) * msk_ref[...]     # zero the junk columns (j >= W2)
        if l + 1 < rep:
            # write interior of the next padded slab: row t lands at padded (i+1, j+1); the masked
            # junk columns provide all inter-row zero padding, so no slab memset is needed.
            bufs[(l + 1) % len(bufs)][pl.ds(Wpa + 1, span), :] = y
        else:
            o_ref[0] = y.astype(o_ref.dtype)


# ----------------------------- wrapper -----------------------------------------

def up_forward(params, x1_nchw, x2_nchw, *, batch_tile=2):
    N, Cin, H1, W1 = x1_nchw.shape
    _, Cout, H2, W2 = x2_nchw.shape
    rep = len(params["blocks"])

    diffY, diffX = H2 - 2 * H1, W2 - 2 * W1
    # TODO(synk): negative diffY/diffX (F.pad crop semantics) unsupported; standard UNet has diff >= 0.
    oy, ox = diffY // 2, diffX // 2

    B = batch_tile if (batch_tile > 0 and N % batch_tile == 0) else 1
    n_t = N // B
    BC = B * Cout            # lane width of slab / acc / output (batch-fold for lane density)
    Kin = B * 2 * Cin
    HW1 = H1 * W1

    # padded-slab geometry: flat row r = y*Wpa + x (padded coords), column = (image-in-tile, channel)
    Wpa = ((W2 + 2 + 7) // 8) * 8          # row pitch, multiple of 8 (sublane-aligned dy taps)
    Hp = H2 + 2
    span = H2 * Wpa
    S = Hp * Wpa
    Sa = ((max(S, span + 2 * Wpa + 2) + 7) // 8) * 8    # spare rows so every tap stays in bounds

    f32 = jnp.float32

    # ---- x1 in "sub-pixel duplicated" layout: row p = 2*m + b, col (t, b', cin), data iff b'==b ----
    x1_t = (x1_nchw.astype(f32).reshape(n_t, B, Cin, H1, W1)
            .transpose(0, 3, 4, 1, 2).reshape(n_t, HW1, B, Cin))
    x1i = jnp.zeros((n_t, HW1, 2, B, 2, Cin), f32)
    x1i = x1i.at[:, :, 0, :, 0, :].set(x1_t)
    x1i = x1i.at[:, :, 1, :, 1, :].set(x1_t)
    x1i = x1i.reshape(n_t, 2 * HW1, Kin)

    # ---- x2 as a fully zero-padded flat slab (rows padded to Sa) ----
    x2_t = (x2_nchw.astype(f32).reshape(n_t, B, Cout, H2, W2)
            .transpose(0, 3, 4, 1, 2))                                   # (n_t, H2, W2, B, Cout)
    x2p = jnp.pad(x2_t, ((0, 0), (1, 1), (1, Wpa - W2 - 1), (0, 0), (0, 0)))
    x2p = x2p.reshape(n_t, S, BC)
    x2p = jnp.pad(x2p, ((0, 0), (0, Sa - S), (0, 0)))

    # ---- ConvTranspose weights: per sub-row-parity a, rows (t, b, cin) -> cols (t, cout), block-diag
    w_block = jnp.transpose(params["up_w"].astype(f32), (3, 0, 2, 1))    # (b, cin, a, cout)
    eye_b = jnp.eye(B, dtype=f32)
    wup = jnp.einsum("biac,ts->atbisc", w_block, eye_b).reshape(2, Kin, BC)
    upb = jnp.tile(params["up_b"].astype(f32), B).reshape(1, BC)

    # ---- 3x3 conv weights: one (BC, BC) block-diagonal slice per tap (dy*3+dx), all layers stacked
    if rep:
        cws, cbs = [], []
        for (w, b) in params["blocks"]:
            w9 = jnp.transpose(w.astype(f32), (2, 3, 1, 0)).reshape(9, Cout, Cout)
            cws.append(jnp.einsum("kio,ts->ktiso", w9, eye_b).reshape(9, BC, BC))
            cbs.append(jnp.tile(b.astype(f32), B).reshape(1, BC))
        cw = jnp.concatenate(cws, axis=0)                                # (rep*9, BC, BC)
        cb = jnp.stack(cbs, axis=0)                                      # (rep, 1, BC)
    else:
        cw = jnp.zeros((1, BC, BC), f32)
        cb = jnp.zeros((1, 1, BC), f32)

    # interior-column mask: acc row t = i*Wpa + j is a real output pixel iff j < W2
    msk = ((jnp.arange(span) % Wpa) < W2).astype(f32).reshape(span, 1)

    kernel = functools.partial(_fused_up_kernel, rep=rep, Wpa=Wpa, span=span,
                               H1=H1, W1=W1, oy=oy, ox=ox, Sa=Sa, cols=BC)

    scratch = [pltpu.VMEM((Sa, BC), f32)]
    if rep > 1:
        scratch.append(pltpu.VMEM((Sa, BC), f32))    # ping-pong buffer only when needed

    out_flat = pl.pallas_call(
        kernel,
        out_shape=jax.ShapeDtypeStruct((n_t, span, BC), f32),
        grid=(n_t,),
        in_specs=[
            pl.BlockSpec((1, 2 * HW1, Kin), lambda g: (g, 0, 0)),   # x1 (sub-pixel duplicated)
            pl.BlockSpec((1, Sa, BC), lambda g: (g, 0, 0)),         # x2 padded slab
            pl.BlockSpec((2, Kin, BC), lambda g: (0, 0, 0)),        # convtranspose weights
            pl.BlockSpec((1, BC), lambda g: (0, 0)),                # convtranspose bias
            pl.BlockSpec(cw.shape, lambda g: (0, 0, 0)),            # conv3x3 weights (all layers)
            pl.BlockSpec(cb.shape, lambda g: (0, 0, 0)),            # conv3x3 biases
            pl.BlockSpec((span, 1), lambda g: (0, 0)),              # interior-column mask
        ],
        out_specs=pl.BlockSpec((1, span, BC), lambda g: (g, 0, 0)),
        scratch_shapes=scratch,
        compiler_params=pltpu.CompilerParams(
            dimension_semantics=("parallel",),
            vmem_limit_bytes=48 * 1024 * 1024,   # explicit; stays under v7x's 64 MiB physical cap
        ),
    )(x1i, x2p, wup, upb, cw, cb, msk)

    # drop the junk columns per row and return NCHW (tiny XLA glue on the final output)
    out = out_flat.reshape(n_t, H2, Wpa, B, Cout)[:, :, :W2]
    out = out.transpose(0, 3, 4, 1, 2).reshape(N, Cout, H2, W2)
    return out


# ----------------------------- pure-JAX reference --------------------------

def ref_forward(params, x1, x2):
    w, b = params["up_w"], params["up_b"]
    y = jnp.einsum("ncij,coab->noiajb", x1, w)
    N, Co, H, _, W, _ = y.shape
    y = y.reshape(N, Co, 2 * H, 2 * W) + b[None, :, None, None]
    diffY = x2.shape[2] - y.shape[2]
    diffX = x2.shape[3] - y.shape[3]
    y = jnp.pad(y, ((0, 0), (0, 0), (diffY // 2, diffY - diffY // 2),
                    (diffX // 2, diffX - diffX // 2)))
    x = x2 + y
    for (wc, bc) in params["blocks"]:
        x = lax.conv_general_dilated(x, wc, (1, 1), ((1, 1), (1, 1)),
                                     dimension_numbers=("NCHW", "OIHW", "NCHW"))
        x = jnp.maximum(x + bc[None, :, None, None], 0.0)
    return x


# ----------------------------- main ----------------------------------------

if __name__ == "__main__":
    N, in_ch, out_ch, rep = 8, 16, 8, 2
    H1 = W1 = 8  # x1 spatial; x2 spatial = 16

    key = jax.random.PRNGKey(0)
    keys = jax.random.split(key, 4 + 2 * rep)

    up_w = 0.1 * jax.random.normal(keys[0], (in_ch, out_ch, 2, 2), jnp.float32)
    up_b = 0.1 * jax.random.normal(keys[1], (out_ch,), jnp.float32)
    blocks = []
    for r in range(rep):
        wc = 0.1 * jax.random.normal(keys[2 + 2 * r], (out_ch, out_ch, 3, 3), jnp.float32)
        bc = 0.1 * jax.random.normal(keys[3 + 2 * r], (out_ch,), jnp.float32)
        blocks.append((wc, bc))
    params = {"up_w": up_w, "up_b": up_b, "blocks": blocks}

    x1 = jax.random.normal(keys[2 + 2 * rep], (N, in_ch, H1, W1), jnp.float32)
    x2 = jax.random.normal(keys[3 + 2 * rep], (N, out_ch, 2 * H1, 2 * W1), jnp.float32)

    out = jax.block_until_ready(up_forward(params, x1, x2, batch_tile=2))

    ref = ref_forward(params, x1, x2)
    assert out.shape == (N, out_ch, 2 * H1, 2 * W1)
    err = float(jnp.max(jnp.abs(out - ref)))
    assert jnp.allclose(out, ref, atol=1e-4, rtol=1e-4), err
    print("KERNEL_OK")
</pallas_src>

<mosaic_0001>
module attributes {stable_mosaic.version = 11 : i64} {
  func.func @_fused_up_kernel(%arg0: i32, %arg1: memref<1x128x64xf32, #tpu.memory_space<vmem>>, %arg2: memref<1x440x16xf32, #tpu.memory_space<vmem>>, %arg3: memref<2x64x16xf32, #tpu.memory_space<vmem>>, %arg4: memref<1x16xf32, #tpu.memory_space<vmem>>, %arg5: memref<18x16x16xf32, #tpu.memory_space<vmem>>, %arg6: memref<2x1x16xf32, #tpu.memory_space<vmem>>, %arg7: memref<384x1xf32, #tpu.memory_space<vmem>>, %arg8: memref<1x384x16xf32, #tpu.memory_space<vmem>>, %arg9: memref<440x16xf32, #tpu.memory_space<vmem>>, %arg10: memref<440x16xf32, #tpu.memory_space<vmem>>) attributes {dimension_semantics = [#tpu.dimension_semantics<parallel>], iteration_bounds = array<i64: 4>, scalar_prefetch = 0 : i64, scratch_operands = 2 : i64, tpu.core_type = #tpu.core_type<tc>, window_params = [{transform_indices = @transform_0, window_bounds = array<i64: 1, 128, 64>}, {transform_indices = @transform_1, window_bounds = array<i64: 1, 440, 16>}, {pipeline_mode = #tpu.pipeline_mode<synchronous>, transform_indices = @transform_2, window_bounds = array<i64: 2, 64, 16>}, {pipeline_mode = #tpu.pipeline_mode<synchronous>, transform_indices = @transform_3, window_bounds = array<i64: 1, 16>}, {pipeline_mode = #tpu.pipeline_mode<synchronous>, transform_indices = @transform_4, window_bounds = array<i64: 18, 16, 16>}, {pipeline_mode = #tpu.pipeline_mode<synchronous>, transform_indices = @transform_5, window_bounds = array<i64: 2, 1, 16>}, {pipeline_mode = #tpu.pipeline_mode<synchronous>, transform_indices = @transform_6, window_bounds = array<i64: 384, 1>}, {transform_indices = @transform_7, window_bounds = array<i64: 1, 384, 16>}]} {
    %c0 = arith.constant 0 : index
    %c0_0 = arith.constant 0 : index
    %c0_1 = arith.constant 0 : index
    %0 = vector.load %arg2[%c0, %c0_0, %c0_1] : memref<1x440x16xf32, #tpu.memory_space<vmem>>, vector<1x440x16xf32>
    %1 = vector.shape_cast %0 : vector<1x440x16xf32> to vector<440x16xf32>
    %c0_2 = arith.constant 0 : index
    %c0_3 = arith.constant 0 : index
    %2 = vector.load %arg9[%c0_2, %c0_3] : memref<440x16xf32, #tpu.memory_space<vmem>>, vector<440x16xf32>
    tpu.vector_store %arg9[%c0_2, %c0_3], %1 {strides = array<i32>} : memref<440x16xf32, #tpu.memory_space<vmem>>, vector<440x16xf32>,
    %cst = arith.constant 0.000000e+00 : f32
    %3 = vector.broadcast %cst : f32 to vector<25x16xf32>
    %c0_4 = arith.constant 0 : index
    %c0_5 = arith.constant 0 : index
    %4 = vector.load %arg10[%c0_4, %c0_5] : memref<440x16xf32, #tpu.memory_space<vmem>>, vector<25x16xf32>
    tpu.vector_store %arg10[%c0_4, %c0_5], %3 {strides = array<i32>} : memref<440x16xf32, #tpu.memory_space<vmem>>, vector<25x16xf32>,
    %cst_6 = arith.constant 0.000000e+00 : f32
    %5 = vector.broadcast %cst_6 : f32 to vector<31x16xf32>
    %c409 = arith.constant 409 : index
    %c0_7 = arith.constant 0 : index
    %6 = vector.load %arg10[%c409, %c0_7] : memref<440x16xf32, #tpu.memory_space<vmem>>, vector<31x16xf32>
    tpu.vector_store %arg10[%c409, %c0_7], %5 {strides = array<i32>} : memref<440x16xf32, #tpu.memory_space<vmem>>, vector<31x16xf32>,
    %c0_8 = arith.constant 0 : index
    %c0_9 = arith.constant 0 : index
    %c0_10 = arith.constant 0 : index
    %7 = vector.load %arg1[%c0_8, %c0_9, %c0_10] : memref<1x128x64xf32, #tpu.memory_space<vmem>>, vector<1x128x64xf32>
    %8 = vector.shape_cast %7 : vector<1x128x64xf32> to vector<128x64xf32>
    %c0_11 = arith.constant 0 : index
    %c0_12 = arith.constant 0 : index
    %c0_13 = arith.constant 0 : index
    %9 = vector.load %arg3[%c0_11, %c0_12, %c0_13] : memref<2x64x16xf32, #tpu.memory_space<vmem>>, vector<1x64x16xf32>
    %10 = vector.shape_cast %9 : vector<1x64x16xf32> to vector<64x16xf32>
    %cst_14 = arith.constant dense<0.000000e+00> : vector<128x16xf32>
    %11 = tpu.matmul %8, %10, %cst_14 {dimension_numbers = #tpu.dot_dimension_numbers<[1], [0], [0], [1], [0, 0, 1, 1], [], []>} : vector<128x64xf32>, vector<64x16xf32>, vector<128x16xf32> -> vector<128x16xf32>
    %c0_15 = arith.constant 0 : index
    %c0_16 = arith.constant 0 : index
    %12 = vector.load %arg4[%c0_15, %c0_16] : memref<1x16xf32, #tpu.memory_space<vmem>>, vector<1x16xf32>
    %13 = vector.broadcast %12 : vector<1x16xf32> to vector<128x16xf32>
    %14 = arith.addf %11, %13 : vector<128x16xf32>
    %c25 = arith.constant 25 : index
    %c0_17 = arith.constant 0 : index
    %15 = vector.load %arg9[%c25, %c0_17] : memref<440x16xf32, #tpu.memory_space<vmem>>, vector<16x16xf32>
    %16 = vector.extract_strided_slice %14 {offsets = [0, 0], sizes = [16, 16], strides = [1, 1]} : vector<128x16xf32> to vector<16x16xf32>
    %17 = arith.addf %15, %16 : vector<16x16xf32>
    %c25_18 = arith.constant 25 : index
    %c0_19 = arith.constant 0 : index
    %18 = vector.load %arg9[%c25_18, %c0_19] : memref<440x16xf32, #tpu.memory_space<vmem>>, vector<16x16xf32>
    tpu.vector_store %arg9[%c25_18, %c0_19], %17 {strides = array<i32>} : memref<440x16xf32, #tpu.memory_space<vmem>>, vector<16x16xf32>,
    %c73 = arith.constant 73 : index
    %c0_20 = arith.constant 0 : index
    %19 = vector.load %arg9[%c73, %c0_20] : memref<440x16xf32, #tpu.memory_space<vmem>>, vector<16x16xf32>
    %20 = vector.extract_strided_slice %14 {offsets = [16, 0], sizes = [16, 16], strides = [1, 1]} : vector<128x16xf32> to vector<16x16xf32>
    %21 = arith.addf %19, %20 : vector<16x16xf32>
    %c73_21 = arith.constant 73 : index
    %c0_22 = arith.constant 0 : index
    %22 = vector.load %arg9[%c73_21, %c0_22] : memref<440x16xf32, #tpu.memory_space<vmem>>, vector<16x16xf32>
    tpu.vector_store %arg9[%c73_21, %c0_22], %21 {strides = array<i32>} : memref<440x16xf32, #tpu.memory_space<vmem>>, vector<16x16xf32>,
    %c121 = arith.constant 121 : index
    %c0_23 = arith.constant 0 : index
    %23 = vector.load %arg9[%c121, %c0_23] : memref<440x16xf32, #tpu.memory_space<vmem>>, vector<16x16xf32>
    %24 = vector.extract_strided_slice %14 {offsets = [32, 0], sizes = [16, 16], strides = [1, 1]} : vector<128x16xf32> to vector<16x16xf32>
    %25 = arith.addf %23, %24 : vector<16x16xf32>
    %c121_24 = arith.constant 121 : index
    %c0_25 = arith.constant 0 : index
    %26 = vector.load %arg9[%c121_24, %c0_25] : memref<440x16xf32, #tpu.memory_space<vmem>>, vector<16x16xf32>
    tpu.vector_store %arg9[%c121_24, %c0_25], %25 {strides = array<i32>} : memref<440x16xf32, #tpu.memory_space<vmem>>, vector<16x16xf32>,
    %c169 = arith.constant 169 : index
    %c0_26 = arith.constant 0 : index
    %27 = vector.load %arg9[%c169, %c0_26] : memref<440x16xf32, #tpu.memory_space<vmem>>, vector<16x16xf32>
    %28 = vector.extract_strided_slice %14 {offsets = [48, 0], sizes = [16, 16], strides = [1, 1]} : vector<128x16xf32> to vector<16x16xf32>
    %29 = arith.addf %27, %28 : vector<16x16xf32>
    %c169_27 = arith.constant 169 : index
    %c0_28 = arith.constant 0 : index
    %30 = vector.load %arg9[%c169_27, %c0_28] : memref<440x16xf32, #tpu.memory_space<vmem>>, vector<16x16xf32>
    tpu.vector_store %arg9[%c169_27, %c0_28], %29 {strides = array<i32>} : memref<440x16xf32, #tpu.memory_space<vmem>>, vector<16x16xf32>,
    %c217 = arith.constant 217 : index
    %c0_29 = arith.constant 0 : index
    %31 = vector.load %arg9[%c217, %c0_29] : memref<440x16xf32, #tpu.memory_space<vmem>>, vector<16x16xf32>
    %32 = vector.extract_strided_slice %14 {offsets = [64, 0], sizes = [16, 16], strides = [1, 1]} : vector<128x16xf32> to vector<16x16xf32>
    %33 = arith.addf %31, %32 : vector<16x16xf32>
    %c217_30 = arith.constant 217 : index
    %c0_31 = arith.constant 0 : index
    %34 = vector.load %arg9[%c217_30, %c0_31] : memref<440x16xf32, #tpu.memory_space<vmem>>, vector<16x16xf32>
    tpu.vector_store %arg9[%c217_30, %c0_31], %33 {strides = array<i32>} : memref<440x16xf32, #tpu.memory_space<vmem>>, vector<16x16xf32>,
    %c265 = arith.constant 265 : index
    %c0_32 = arith.constant 0 : index
    %35 = vector.load %arg9[%c265, %c0_32] : memref<440x16xf32, #tpu.memory_space<vmem>>, vector<16x16xf32>
    %36 = vector.extract_strided_slice %14 {offsets = [80, 0], sizes = [16, 16], strides = [1, 1]} : vector<128x16xf32> to vector<16x16xf32>
    %37 = arith.addf %35, %36 : vector<16x16xf32>
    %c265_33 = arith.constant 265 : index
    %c0_34 = arith.constant 0 : index
    %38 = vector.load %arg9[%c265_33, %c0_34] : memref<440x16xf32, #tpu.memory_space<vmem>>, vector<16x16xf32>
    tpu.vector_store %arg9[%c265_33, %c0_34], %37 {strides = array<i32>} : memref<440x16xf32, #tpu.memory_space<vmem>>, vector<16x16xf32>,
    %c313 = arith.constant 313 : index
    %c0_35 = arith.constant 0 : index
    %39 = vector.load %arg9[%c313, %c0_35] : memref<440x16xf32, #tpu.memory_space<vmem>>, vector<16x16xf32>
    %40 = vector.extract_strided_slice %14 {offsets = [96, 0], sizes = [16, 16], strides = [1, 1]} : vector<128x16xf32> to vector<16x16xf32>
    %41 = arith.addf %39, %40 : vector<16x16xf32>
    %c313_36 = arith.constant 313 : index
    %c0_37 = arith.constant 0 : index
    %42 = vector.load %arg9[%c313_36, %c0_37] : memref<440x16xf32, #tpu.memory_space<vmem>>, vector<16x16xf32>
    tpu.vector_store %arg9[%c313_36, %c0_37], %41 {strides = array<i32>} : memref<440x16xf32, #tpu.memory_space<vmem>>, vector<16x16xf32>,
    %c361 = arith.constant 361 : index
    %c0_38 = arith.constant 0 : index
    %43 = vector.load %arg9[%c361, %c0_38] : memref<440x16xf32, #tpu.memory_space<vmem>>, vector<16x16xf32>
    %44 = vector.extract_strided_slice %14 {offsets = [112, 0], sizes = [16, 16], strides = [1, 1]} : vector<128x16xf32> to vector<16x16xf32>
    %45 = arith.addf %43, %44 : vector<16x16xf32>
    %c361_39 = arith.constant 361 : index
    %c0_40 = arith.constant 0 : index
    %46 = vector.load %arg9[%c361_39, %c0_40] : memref<440x16xf32, #tpu.memory_space<vmem>>, vector<16x16xf32>
    tpu.vector_store %arg9[%c361_39, %c0_40], %45 {strides = array<i32>} : memref<440x16xf32, #tpu.memory_space<vmem>>, vector<16x16xf32>,
    %c1 = arith.constant 1 : index
    %c0_41 = arith.constant 0 : index
    %c0_42 = arith.constant 0 : index
    %47 = vector.load %arg3[%c1, %c0_41, %c0_42] : memref<2x64x16xf32, #tpu.memory_space<vmem>>, vector<1x64x16xf32>
    %48 = vector.shape_cast %47 : vector<1x64x16xf32> to vector<64x16xf32>
    %cst_43 = arith.constant dense<0.000000e+00> : vector<128x16xf32>
    %49 = tpu.matmul %8, %48, %cst_43 {dimension_numbers = #tpu.dot_dimension_numbers<[1], [0], [0], [1], [0, 0, 1, 1], [], []>} : vector<128x64xf32>, vector<64x16xf32>, vector<128x16xf32> -> vector<128x16xf32>
    %c0_44 = arith.constant 0 : index
    %c0_45 = arith.constant 0 : index
    %50 = vector.load %arg4[%c0_44, %c0_45] : memref<1x16xf32, #tpu.memory_space<vmem>>, vector<1x16xf32>
    %51 = vector.broadcast %50 : vector<1x16xf32> to vector<128x16xf32>
    %52 = arith.addf %49, %51 : vector<128x16xf32>
    %c49 = arith.constant 49 : index
    %c0_46 = arith.constant 0 : index
    %53 = vector.load %arg9[%c49, %c0_46] : memref<440x16xf32, #tpu.memory_space<vmem>>, vector<16x16xf32>
    %54 = vector.extract_strided_slice %52 {offsets = [0, 0], sizes = [16, 16], strides = [1, 1]} : vector<128x16xf32> to vector<16x16xf32>
    %55 = arith.addf %53, %54 : vector<16x16xf32>
    %c49_47 = arith.constant 49 : index
    %c0_48 = arith.constant 0 : index
    %56 = vector.load %arg9[%c49_47, %c0_48] : memref<440x16xf32, #tpu.memory_space<vmem>>, vector<16x16xf32>
    tpu.vector_store %arg9[%c49_47, %c0_48], %55 {strides = array<i32>} : memref<440x16xf32, #tpu.memory_space<vmem>>, vector<16x16xf32>,
    %c97 = arith.constant 97 : index
    %c0_49 = arith.constant 0 : index
    %57 = vector.load %arg9[%c97, %c0_49] : memref<440x16xf32, #tpu.memory_space<vmem>>, vector<16x16xf32>
    %58 = vector.extract_strided_slice %52 {offsets = [16, 0], sizes = [16, 16], strides = [1, 1]} : vector<128x16xf32> to vector<16x16xf32>
    %59 = arith.addf %57, %58 : vector<16x16xf32>
    %c97_50 = arith.constant 97 : index
    %c0_51 = arith.constant 0 : index
    %60 = vector.load %arg9[%c97_50, %c0_51] : memref<440x16xf32, #tpu.memory_space<vmem>>, vector<16x16xf32>
    tpu.vector_store %arg9[%c97_50, %c0_51], %59 {strides = array<i32>} : memref<440x16xf32, #tpu.memory_space<vmem>>, vector<16x16xf32>,
    %c145 = arith.constant 145 : index
    %c0_52 = arith.constant 0 : index
    %61 = vector.load %arg9[%c145, %c0_52] : memref<440x16xf32, #tpu.memory_space<vmem>>, vector<16x16xf32>
    %62 = vector.extract_strided_slice %52 {offsets = [32, 0], sizes = [16, 16], strides = [1, 1]} : vector<128x16xf32> to vector<16x16xf32>
    %63 = arith.addf %61, %62 : vector<16x16xf32>
    %c145_53 = arith.constant 145 : index
    %c0_54 = arith.constant 0 : index
    %64 = vector.load %arg9[%c145_53, %c0_54] : memref<440x16xf32, #tpu.memory_space<vmem>>, vector<16x16xf32>
    tpu.vector_store %arg9[%c145_53, %c0_54], %63 {strides = array<i32>} : memref<440x16xf32, #tpu.memory_space<vmem>>, vector<16x16xf32>,
    %c193 = arith.constant 193 : index
    %c0_55 = arith.constant 0 : index
    %65 = vector.load %arg9[%c193, %c0_55] : memref<440x16xf32, #tpu.memory_space<vmem>>, vector<16x16xf32>
    %66 = vector.extract_strided_slice %52 {offsets = [48, 0], sizes = [16, 16], strides = [1, 1]} : vector<128x16xf32> to vector<16x16xf32>
    %67 = arith.addf %65, %66 : vector<16x16xf32>
    %c193_56 = arith.constant 193 : index
    %c0_57 = arith.constant 0 : index
    %68 = vector.load %arg9[%c193_56, %c0_57] : memref<440x16xf32, #tpu.memory_space<vmem>>, vector<16x16xf32>
    tpu.vector_store %arg9[%c193_56, %c0_57], %67 {strides = array<i32>} : memref<440x16xf32, #tpu.memory_space<vmem>>, vector<16x16xf32>,
    %c241 = arith.constant 241 : index
    %c0_58 = arith.constant 0 : index
    %69 = vector.load %arg9[%c241, %c0_58] : memref<440x16xf32, #tpu.memory_space<vmem>>, vector<16x16xf32>
    %70 = vector.extract_strided_slice %52 {offsets = [64, 0], sizes = [16, 16], strides = [1, 1]} : vector<128x16xf32> to vector<16x16xf32>
    %71 = arith.addf %69, %70 : vector<16x16xf32>
    %c241_59 = arith.constant 241 : index
    %c0_60 = arith.constant 0 : index
    %72 = vector.load %arg9[%c241_59, %c0_60] : memref<440x16xf32, #tpu.memory_space<vmem>>, vector<16x16xf32>
    tpu.vector_store %arg9[%c241_59, %c0_60], %71 {strides = array<i32>} : memref<440x16xf32, #tpu.memory_space<vmem>>, vector<16x16xf32>,
    %c289 = arith.constant 289 : index
    %c0_61 = arith.constant 0 : index
    %73 = vector.load %arg9[%c289, %c0_61] : memref<440x16xf32, #tpu.memory_space<vmem>>, vector<16x16xf32>
    %74 = vector.extract_strided_slice %52 {offsets = [80, 0], sizes = [16, 16], strides = [1, 1]} : vector<128x16xf32> to vector<16x16xf32>
    %75 = arith.addf %73, %74 : vector<16x16xf32>
    %c289_62 = arith.constant 289 : index
    %c0_63 = arith.constant 0 : index
    %76 = vector.load %arg9[%c289_62, %c0_63] : memref<440x16xf32, #tpu.memory_space<vmem>>, vector<16x16xf32>
    tpu.vector_store %arg9[%c289_62, %c0_63], %75 {strides = array<i32>} : memref<440x16xf32, #tpu.memory_space<vmem>>, vector<16x16xf32>,
    %c337 = arith.constant 337 : index
    %c0_64 = arith.constant 0 : index
    %77 = vector.load %arg9[%c337, %c0_64] : memref<440x16xf32, #tpu.memory_space<vmem>>, vector<16x16xf32>
    %78 = vector.extract_strided_slice %52 {offsets = [96, 0], sizes = [16, 16], strides = [1, 1]} : vector<128x16xf32> to vector<16x16xf32>
    %79 = arith.addf %77, %78 : vector<16x16xf32>
    %c337_65 = arith.constant 337 : index
    %c0_66 = arith.constant 0 : index
    %80 = vector.load %arg9[%c337_65, %c0_66] : memref<440x16xf32, #tpu.memory_space<vmem>>, vector<16x16xf32>
    tpu.vector_store %arg9[%c337_65, %c0_66], %79 {strides = array<i32>} : memref<440x16xf32, #tpu.memory_space<vmem>>, vector<16x16xf32>,
    %c385 = arith.constant 385 : index
    %c0_67 = arith.constant 0 : index
    %81 = vector.load %arg9[%c385, %c0_67] : memref<440x16xf32, #tpu.memory_space<vmem>>, vector<16x16xf32>
    %82 = vector.extract_strided_slice %52 {offsets = [112, 0], sizes = [16, 16], strides = [1, 1]} : vector<128x16xf32> to vector<16x16xf32>
    %83 = arith.addf %81, %82 : vector<16x16xf32>
    %c385_68 = arith.constant 385 : index
    %c0_69 = arith.constant 0 : index
    %84 = vector.load %arg9[%c385_68, %c0_69] : memref<440x16xf32, #tpu.memory_space<vmem>>, vector<16x16xf32>
    tpu.vector_store %arg9[%c385_68, %c0_69], %83 {strides = array<i32>} : memref<440x16xf32, #tpu.memory_space<vmem>>, vector<16x16xf32>,
    %cst_70 = arith.constant 0.000000e+00 : f32
    %85 = vector.broadcast %cst_70 : f32 to vector<384x16xf32>
    %c0_71 = arith.constant 0 : index
    %c0_72 = arith.constant 0 : index
    %86 = vector.load %arg9[%c0_71, %c0_72] : memref<440x16xf32, #tpu.memory_space<vmem>>, vector<384x16xf32>
    %c0_73 = arith.constant 0 : index
    %c0_74 = arith.constant 0 : index
    %c0_75 = arith.constant 0 : index
    %87 = vector.load %arg5[%c0_73, %c0_74, %c0_75] : memref<18x16x16xf32, #tpu.memory_space<vmem>>, vector<1x16x16xf32>
    %88 = vector.shape_cast %87 : vector<1x16x16xf32> to vector<16x16xf32>
    %cst_76 = arith.constant dense<0.000000e+00> : vector<384x16xf32>
    %89 = tpu.matmul %86, %88, %cst_76 {dimension_numbers = #tpu.dot_dimension_numbers<[1], [0], [0], [1], [0, 0, 1, 1], [], []>} : vector<384x16xf32>, vector<16x16xf32>, vector<384x16xf32> -> vector<384x16xf32>
    %90 = arith.addf %85, %89 : vector<384x16xf32>
    %c1_77 = arith.constant 1 : index
    %c0_78 = arith.constant 0 : index
    %91 = vector.load %arg9[%c1_77, %c0_78] : memref<440x16xf32, #tpu.memory_space<vmem>>, vector<384x16xf32>
    %c1_79 = arith.constant 1 : index
    %c0_80 = arith.constant 0 : index
    %c0_81 = arith.constant 0 : index
    %92 = vector.load %arg5[%c1_79, %c0_80, %c0_81] : memref<18x16x16xf32, #tpu.memory_space<vmem>>, vector<1x16x16xf32>
    %93 = vector.shape_cast %92 : vector<1x16x16xf32> to vector<16x16xf32>
    %cst_82 = arith.constant dense<0.000000e+00> : vector<384x16xf32>
    %94 = tpu.matmul %91, %93, %cst_82 {dimension_numbers = #tpu.dot_dimension_numbers<[1], [0], [0], [1], [0, 0, 1, 1], [], []>} : vector<384x16xf32>, vector<16x16xf32>, vector<384x16xf32> -> vector<384x16xf32>
    %95 = arith.addf %90, %94 : vector<384x16xf32>
    %c2 = arith.constant 2 : index
    %c0_83 = arith.constant 0 : index
    %96 = vector.load %arg9[%c2, %c0_83] : memref<440x16xf32, #tpu.memory_space<vmem>>, vector<384x16xf32>
    %c2_84 = arith.constant 2 : index
    %c0_85 = arith.constant 0 : index
    %c0_86 = arith.constant 0 : index
    %97 = vector.load %arg5[%c2_84, %c0_85, %c0_86] : memref<18x16x16xf32, #tpu.memory_space<vmem>>, vector<1x16x16xf32>
    %98 = vector.shape_cast %97 : vector<1x16x16xf32> to vector<16x16xf32>
    %cst_87 = arith.constant dense<0.000000e+00> : vector<384x16xf32>
    %99 = tpu.matmul %96, %98, %cst_87 {dimension_numbers = #tpu.dot_dimension_numbers<[1], [0], [0], [1], [0, 0, 1, 1], [], []>} : vector<384x16xf32>, vector<16x16xf32>, vector<384x16xf32> -> vector<384x16xf32>
    %100 = arith.addf %95, %99 : vector<384x16xf32>
    %c24 = arith.constant 24 : index
    %c0_88 = arith.constant 0 : index
    %101 = vector.load %arg9[%c24, %c0_88] : memref<440x16xf32, #tpu.memory_space<vmem>>, vector<384x16xf32>
    %c3 = arith.constant 3 : index
    %c0_89 = arith.constant 0 : index
    %c0_90 = arith.constant 0 : index
    %102 = vector.load %arg5[%c3, %c0_89, %c0_90] : memref<18x16x16xf32, #tpu.memory_space<vmem>>, vector<1x16x16xf32>
    %103 = vector.shape_cast %102 : vector<1x16x16xf32> to vector<16x16xf32>
    %cst_91 = arith.constant dense<0.000000e+00> : vector<384x16xf32>
    %104 = tpu.matmul %101, %103, %cst_91 {dimension_numbers = #tpu.dot_dimension_numbers<[1], [0], [0], [1], [0, 0, 1, 1], [], []>} : vector<384x16xf32>, vector<16x16xf32>, vector<384x16xf32> -> vector<384x16xf32>
    %105 = arith.addf %100, %104 : vector<384x16xf32>
    %c25_92 = arith.constant 25 : index
    %c0_93 = arith.constant 0 : index
    %106 = vector.load %arg9[%c25_92, %c0_93] : memref<440x16xf32, #tpu.memory_space<vmem>>, vector<384x16xf32>
    %c4 = arith.constant 4 : index
    %c0_94 = arith.constant 0 : index
    %c0_95 = arith.constant 0 : index
    %107 = vector.load %arg5[%c4, %c0_94, %c0_95] : memref<18x16x16xf32, #tpu.memory_space<vmem>>, vector<1x16x16xf32>
    %108 = vector.shape_cast %107 : vector<1x16x16xf32> to vector<16x16xf32>
    %cst_96 = arith.constant dense<0.000000e+00> : vector<384x16xf32>
    %109 = tpu.matmul %106, %108, %cst_96 {dimension_numbers = #tpu.dot_dimension_numbers<[1], [0], [0], [1], [0, 0, 1, 1], [], []>} : vector<384x16xf32>, vector<16x16xf32>, vector<384x16xf32> -> vector<384x16xf32>
    %110 = arith.addf %105, %109 : vector<384x16xf32>
    %c26 = arith.constant 26 : index
    %c0_97 = arith.constant 0 : index
    %111 = vector.load %arg9[%c26, %c0_97] : memref<440x16xf32, #tpu.memory_space<vmem>>, vector<384x16xf32>
    %c5 = arith.constant 5 : index
    %c0_98 = arith.constant 0 : index
    %c0_99 = arith.constant 0 : index
    %112 = vector.load %arg5[%c5, %c0_98, %c0_99] : memref<18x16x16xf32, #tpu.memory_space<vmem>>, vector<1x16x16xf32>
    %113 = vector.shape_cast %112 : vector<1x16x16xf32> to vector<16x16xf32>
    %cst_100 = arith.constant dense<0.000000e+00> : vector<384x16xf32>
    %114 = tpu.matmul %111, %113, %cst_100 {dimension_numbers = #tpu.dot_dimension_numbers<[1], [0], [0], [1], [0, 0, 1, 1], [], []>} : vector<384x16xf32>, vector<16x16xf32>, vector<384x16xf32> -> vector<384x16xf32>
    %115 = arith.addf %110, %114 : vector<384x16xf32>
    %c48 = arith.constant 48 : index
    %c0_101 = arith.constant 0 : index
    %116 = vector.load %arg9[%c48, %c0_101] : memref<440x16xf32, #tpu.memory_space<vmem>>, vector<384x16xf32>
    %c6 = arith.constant 6 : index
    %c0_102 = arith.constant 0 : index
    %c0_103 = arith.constant 0 : index
    %117 = vector.load %arg5[%c6, %c0_102, %c0_103] : memref<18x16x16xf32, #tpu.memory_space<vmem>>, vector<1x16x16xf32>
    %118 = vector.shape_cast %117 : vector<1x16x16xf32> to vector<16x16xf32>
    %cst_104 = arith.constant dense<0.000000e+00> : vector<384x16xf32>
    %119 = tpu.matmul %116, %118, %cst_104 {dimension_numbers = #tpu.dot_dimension_numbers<[1], [0], [0], [1], [0, 0, 1, 1], [], []>} : vector<384x16xf32>, vector<16x16xf32>, vector<384x16xf32> -> vector<384x16xf32>
    %120 = arith.addf %115, %119 : vector<384x16xf32>
    %c49_105 = arith.constant 49 : index
    %c0_106 = arith.constant 0 : index
    %121 = vector.load %arg9[%c49_105, %c0_106] : memref<440x16xf32, #tpu.memory_space<vmem>>, vector<384x16xf32>
    %c7 = arith.constant 7 : index
    %c0_107 = arith.constant 0 : index
    %c0_108 = arith.constant 0 : index
    %122 = vector.load %arg5[%c7, %c0_107, %c0_108] : memref<18x16x16xf32, #tpu.memory_space<vmem>>, vector<1x16x16xf32>
    %123 = vector.shape_cast %122 : vector<1x16x16xf32> to vector<16x16xf32>
    %cst_109 = arith.constant dense<0.000000e+00> : vector<384x16xf32>
    %124 = tpu.matmul %121, %123, %cst_109 {dimension_numbers = #tpu.dot_dimension_numbers<[1], [0], [0], [1], [0, 0, 1, 1], [], []>} : vector<384x16xf32>, vector<16x16xf32>, vector<384x16xf32> -> vector<384x16xf32>
    %125 = arith.addf %120, %124 : vector<384x16xf32>
    %c50 = arith.constant 50 : index
    %c0_110 = arith.constant 0 : index
    %126 = vector.load %arg9[%c50, %c0_110] : memref<440x16xf32, #tpu.memory_space<vmem>>, vector<384x16xf32>
    %c8 = arith.constant 8 : index
    %c0_111 = arith.constant 0 : index
    %c0_112 = arith.constant 0 : index
    %127 = vector.load %arg5[%c8, %c0_111, %c0_112] : memref<18x16x16xf32, #tpu.memory_space<vmem>>, vector<1x16x16xf32>
    %128 = vector.shape_cast %127 : vector<1x16x16xf32> to vector<16x16xf32>
    %cst_113 = arith.constant dense<0.000000e+00> : vector<384x16xf32>
    %129 = tpu.matmul %126, %128, %cst_113 {dimension_numbers = #tpu.dot_dimension_numbers<[1], [0], [0], [1], [0, 0, 1, 1], [], []>} : vector<384x16xf32>, vector<16x16xf32>, vector<384x16xf32> -> vector<384x16xf32>
    %130 = arith.addf %125, %129 : vector<384x16xf32>
    %c0_114 = arith.constant 0 : index
    %c0_115 = arith.constant 0 : index
    %c0_116 = arith.constant 0 : index
    %131 = vector.load %arg6[%c0_114, %c0_115, %c0_116] : memref<2x1x16xf32, #tpu.memory_space<vmem>>, vector<1x1x16xf32>
    %132 = vector.shape_cast %131 : vector<1x1x16xf32> to vector<1x16xf32>
    %133 = vector.broadcast %132 : vector<1x16xf32> to vector<384x16xf32>
    %134 = arith.addf %130, %133 : vector<384x16xf32>
    %cst_117 = arith.constant 0.000000e+00 : f32
    %135 = vector.broadcast %cst_117 : f32 to vector<384x16xf32>
    %136 = arith.maximumf %134, %135 : vector<384x16xf32>
    %c0_118 = arith.constant 0 : index
    %c0_119 = arith.constant 0 : index
    %137 = vector.load %arg7[%c0_118, %c0_119] : memref<384x1xf32, #tpu.memory_space<vmem>>, vector<384x1xf32>
    %138 = vector.broadcast %137 : vector<384x1xf32> to vector<384x16xf32>
    %139 = arith.mulf %136, %138 : vector<384x16xf32>
    %c25_120 = arith.constant 25 : index
    %c0_121 = arith.constant 0 : index
    %140 = vector.load %arg10[%c25_120, %c0_121] : memref<440x16xf32, #tpu.memory_space<vmem>>, vector<384x16xf32>
    tpu.vector_store %arg10[%c25_120, %c0_121], %139 {strides = array<i32>} : memref<440x16xf32, #tpu.memory_space<vmem>>, vector<384x16xf32>,
    %cst_122 = arith.constant 0.000000e+00 : f32
    %141 = vector.broadcast %cst_122 : f32 to vector<384x16xf32>
    %c0_123 = arith.constant 0 : index
    %c0_124 = arith.constant 0 : index
    %142 = vector.load %arg10[%c0_123, %c0_124] : memref<440x16xf32, #tpu.memory_space<vmem>>, vector<384x16xf32>
    %c9 = arith.constant 9 : index
    %c0_125 = arith.constant 0 : index
    %c0_126 = arith.constant 0 : index
    %143 = vector.load %arg5[%c9, %c0_125, %c0_126] : memref<18x16x16xf32, #tpu.memory_space<vmem>>, vector<1x16x16xf32>
    %144 = vector.shape_cast %143 : vector<1x16x16xf32> to vector<16x16xf32>
    %cst_127 = arith.constant dense<0.000000e+00> : vector<384x16xf32>
    %145 = tpu.matmul %142, %144, %cst_127 {dimension_numbers = #tpu.dot_dimension_numbers<[1], [0], [0], [1], [0, 0, 1, 1], [], []>} : vector<384x16xf32>, vector<16x16xf32>, vector<384x16xf32> -> vector<384x16xf32>
    %146 = arith.addf %141, %145 : vector<384x16xf32>
    %c1_128 = arith.constant 1 : index
    %c0_129 = arith.constant 0 : index
    %147 = vector.load %arg10[%c1_128, %c0_129] : memref<440x16xf32, #tpu.memory_space<vmem>>, vector<384x16xf32>
    %c10 = arith.constant 10 : index
    %c0_130 = arith.constant 0 : index
    %c0_131 = arith.constant 0 : index
    %148 = vector.load %arg5[%c10, %c0_130, %c0_131] : memref<18x16x16xf32, #tpu.memory_space<vmem>>, vector<1x16x16xf32>
    %149 = vector.shape_cast %148 : vector<1x16x16xf32> to vector<16x16xf32>
    %cst_132 = arith.constant dense<0.000000e+00> : vector<384x16xf32>
    %150 = tpu.matmul %147, %149, %cst_132 {dimension_numbers = #tpu.dot_dimension_numbers<[1], [0], [0], [1], [0, 0, 1, 1], [], []>} : vector<384x16xf32>, vector<16x16xf32>, vector<384x16xf32> -> vector<384x16xf32>
    %151 = arith.addf %146, %150 : vector<384x16xf32>
    %c2_133 = arith.constant 2 : index
    %c0_134 = arith.constant 0 : index
    %152 = vector.load %arg10[%c2_133, %c0_134] : memref<440x16xf32, #tpu.memory_space<vmem>>, vector<384x16xf32>
    %c11 = arith.constant 11 : index
    %c0_135 = arith.constant 0 : index
    %c0_136 = arith.constant 0 : index
    %153 = vector.load %arg5[%c11, %c0_135, %c0_136] : memref<18x16x16xf32, #tpu.memory_space<vmem>>, vector<1x16x16xf32>
    %154 = vector.shape_cast %153 : vector<1x16x16xf32> to vector<16x16xf32>
    %cst_137 = arith.constant dense<0.000000e+00> : vector<384x16xf32>
    %155 = tpu.matmul %152, %154, %cst_137 {dimension_numbers = #tpu.dot_dimension_numbers<[1], [0], [0], [1], [0, 0, 1, 1], [], []>} : vector<384x16xf32>, vector<16x16xf32>, vector<384x16xf32> -> vector<384x16xf32>
    %156 = arith.addf %151, %155 : vector<384x16xf32>
    %c24_138 = arith.constant 24 : index
    %c0_139 = arith.constant 0 : index
    %157 = vector.load %arg10[%c24_138, %c0_139] : memref<440x16xf32, #tpu.memory_space<vmem>>, vector<384x16xf32>
    %c12 = arith.constant 12 : index
    %c0_140 = arith.constant 0 : index
    %c0_141 = arith.constant 0 : index
    %158 = vector.load %arg5[%c12, %c0_140, %c0_141] : memref<18x16x16xf32, #tpu.memory_space<vmem>>, vector<1x16x16xf32>
    %159 = vector.shape_cast %158 : vector<1x16x16xf32> to vector<16x16xf32>
    %cst_142 = arith.constant dense<0.000000e+00> : vector<384x16xf32>
    %160 = tpu.matmul %157, %159, %cst_142 {dimension_numbers = #tpu.dot_dimension_numbers<[1], [0], [0], [1], [0, 0, 1, 1], [], []>} : vector<384x16xf32>, vector<16x16xf32>, vector<384x16xf32> -> vector<384x16xf32>
    %161 = arith.addf %156, %160 : vector<384x16xf32>
    %c25_143 = arith.constant 25 : index
    %c0_144 = arith.constant 0 : index
    %162 = vector.load %arg10[%c25_143, %c0_144] : memref<440x16xf32, #tpu.memory_space<vmem>>, vector<384x16xf32>
    %c13 = arith.constant 13 : index
    %c0_145 = arith.constant 0 : index
    %c0_146 = arith.constant 0 : index
    %163 = vector.load %arg5[%c13, %c0_145, %c0_146] : memref<18x16x16xf32, #tpu.memory_space<vmem>>, vector<1x16x16xf32>
    %164 = vector.shape_cast %163 : vector<1x16x16xf32> to vector<16x16xf32>
    %cst_147 = arith.constant dense<0.000000e+00> : vector<384x16xf32>
    %165 = tpu.matmul %162, %164, %cst_147 {dimension_numbers = #tpu.dot_dimension_numbers<[1], [0], [0], [1], [0, 0, 1, 1], [], []>} : vector<384x16xf32>, vector<16x16xf32>, vector<384x16xf32> -> vector<384x16xf32>
    %166 = arith.addf %161, %165 : vector<384x16xf32>
    %c26_148 = arith.constant 26 : index
    %c0_149 = arith.constant 0 : index
    %167 = vector.load %arg10[%c26_148, %c0_149] : memref<440x16xf32, #tpu.memory_space<vmem>>, vector<384x16xf32>
    %c14 = arith.constant 14 : index
    %c0_150 = arith.constant 0 : index
    %c0_151 = arith.constant 0 : index
    %168 = vector.load %arg5[%c14, %c0_150, %c0_151] : memref<18x16x16xf32, #tpu.memory_space<vmem>>, vector<1x16x16xf32>
    %169 = vector.shape_cast %168 : vector<1x16x16xf32> to vector<16x16xf32>
    %cst_152 = arith.constant dense<0.000000e+00> : vector<384x16xf32>
    %170 = tpu.matmul %167, %169, %cst_152 {dimension_numbers = #tpu.dot_dimension_numbers<[1], [0], [0], [1], [0, 0, 1, 1], [], []>} : vector<384x16xf32>, vector<16x16xf32>, vector<384x16xf32> -> vector<384x16xf32>
    %171 = arith.addf %166, %170 : vector<384x16xf32>
    %c48_153 = arith.constant 48 : index
    %c0_154 = arith.constant 0 : index
    %172 = vector.load %arg10[%c48_153, %c0_154] : memref<440x16xf32, #tpu.memory_space<vmem>>, vector<384x16xf32>
    %c15 = arith.constant 15 : index
    %c0_155 = arith.constant 0 : index
    %c0_156 = arith.constant 0 : index
    %173 = vector.load %arg5[%c15, %c0_155, %c0_156] : memref<18x16x16xf32, #tpu.memory_space<vmem>>, vector<1x16x16xf32>
    %174 = vector.shape_cast %173 : vector<1x16x16xf32> to vector<16x16xf32>
    %cst_157 = arith.constant dense<0.000000e+00> : vector<384x16xf32>
    %175 = tpu.matmul %172, %174, %cst_157 {dimension_numbers = #tpu.dot_dimension_numbers<[1], [0], [0], [1], [0, 0, 1, 1], [], []>} : vector<384x16xf32>, vector<16x16xf32>, vector<384x16xf32> -> vector<384x16xf32>
    %176 = arith.addf %171, %175 : vector<384x16xf32>
    %c49_158 = arith.constant 49 : index
    %c0_159 = arith.constant 0 : index
    %177 = vector.load %arg10[%c49_158, %c0_159] : memref<440x16xf32, #tpu.memory_space<vmem>>, vector<384x16xf32>
    %c16 = arith.constant 16 : index
    %c0_160 = arith.constant 0 : index
    %c0_161 = arith.constant 0 : index
    %178 = vector.load %arg5[%c16, %c0_160, %c0_161] : memref<18x16x16xf32, #tpu.memory_space<vmem>>, vector<1x16x16xf32>
    %179 = vector.shape_cast %178 : vector<1x16x16xf32> to vector<16x16xf32>
    %cst_162 = arith.constant dense<0.000000e+00> : vector<384x16xf32>
    %180 = tpu.matmul %177, %179, %cst_162 {dimension_numbers = #tpu.dot_dimension_numbers<[1], [0], [0], [1], [0, 0, 1, 1], [], []>} : vector<384x16xf32>, vector<16x16xf32>, vector<384x16xf32> -> vector<384x16xf32>
    %181 = arith.addf %176, %180 : vector<384x16xf32>
    %c50_163 = arith.constant 50 : index
    %c0_164 = arith.constant 0 : index
    %182 = vector.load %arg10[%c50_163, %c0_164] : memref<440x16xf32, #tpu.memory_space<vmem>>, vector<384x16xf32>
    %c17 = arith.constant 17 : index
    %c0_165 = arith.constant 0 : index
    %c0_166 = arith.constant 0 : index
    %183 = vector.load %arg5[%c17, %c0_165, %c0_166] : memref<18x16x16xf32, #tpu.memory_space<vmem>>, vector<1x16x16xf32>
    %184 = vector.shape_cast %183 : vector<1x16x16xf32> to vector<16x16xf32>
    %cst_167 = arith.constant dense<0.000000e+00> : vector<384x16xf32>
    %185 = tpu.matmul %182, %184, %cst_167 {dimension_numbers = #tpu.dot_dimension_numbers<[1], [0], [0], [1], [0, 0, 1, 1], [], []>} : vector<384x16xf32>, vector<16x16xf32>, vector<384x16xf32> -> vector<384x16xf32>
    %186 = arith.addf %181, %185 : vector<384x16xf32>
    %c1_168 = arith.constant 1 : index
    %c0_169 = arith.constant 0 : index
    %c0_170 = arith.constant 0 : index
    %187 = vector.load %arg6[%c1_168, %c0_169, %c0_170] : memref<2x1x16xf32, #tpu.memory_space<vmem>>, vector<1x1x16xf32>
    %188 = vector.shape_cast %187 : vector<1x1x16xf32> to vector<1x16xf32>
    %189 = vector.broadcast %188 : vector<1x16xf32> to vector<384x16xf32>
    %190 = arith.addf %186, %189 : vector<384x16xf32>
    %cst_171 = arith.constant 0.000000e+00 : f32
    %191 = vector.broadcast %cst_171 : f32 to vector<384x16xf32>
    %192 = arith.maximumf %190, %191 : vector<384x16xf32>
    %c0_172 = arith.constant 0 : index
    %c0_173 = arith.constant 0 : index
    %193 = vector.load %arg7[%c0_172, %c0_173] : memref<384x1xf32, #tpu.memory_space<vmem>>, vector<384x1xf32>
    %194 = vector.broadcast %193 : vector<384x1xf32> to vector<384x16xf32>
    %195 = arith.mulf %192, %194 : vector<384x16xf32>
    %c0_174 = arith.constant 0 : index
    %c0_175 = arith.constant 0 : index
    %c0_176 = arith.constant 0 : index
    %196 = vector.load %arg8[%c0_174, %c0_175, %c0_176] : memref<1x384x16xf32, #tpu.memory_space<vmem>>, vector<1x384x16xf32>
    %197 = vector.shape_cast %196 : vector<1x384x16xf32> to vector<384x16xf32>
    %198 = vector.shape_cast %195 : vector<384x16xf32> to vector<1x384x16xf32>
    tpu.vector_store %arg8[%c0_174, %c0_175, %c0_176], %198 {strides = array<i32>} : memref<1x384x16xf32, #tpu.memory_space<vmem>>, vector<1x384x16xf32>,
    return
  }
  func.func @transform_0(%arg0: i32) -> (i32, i32, i32) {
    %c0_i32 = arith.constant 0 : i32
    %c0_i32_0 = arith.constant 0 : i32
    %c0_i32_1 = arith.constant 0 : i32
    return %arg0, %c0_i32, %c0_i32_0 : i32, i32, i32
  }
  func.func @transform_1(%arg0: i32) -> (i32, i32, i32) {
    %c0_i32 = arith.constant 0 : i32
    %c0_i32_0 = arith.constant 0 : i32
    %c0_i32_1 = arith.constant 0 : i32
    return %arg0, %c0_i32, %c0_i32_0 : i32, i32, i32
  }
  func.func @transform_2(%arg0: i32) -> (i32, i32, i32) {
    %c0_i32 = arith.constant 0 : i32
    %c0_i32_0 = arith.constant 0 : i32
    %c0_i32_1 = arith.constant 0 : i32
    %c0_i32_2 = arith.constant 0 : i32
    return %c0_i32, %c0_i32_0, %c0_i32_1 : i32, i32, i32
  }
  func.func @transform_3(%arg0: i32) -> (i32, i32) {
    %c0_i32 = arith.constant 0 : i32
    %c0_i32_0 = arith.constant 0 : i32
    %c0_i32_1 = arith.constant 0 : i32
    return %c0_i32, %c0_i32_0 : i32, i32
  }
  func.func @transform_4(%arg0: i32) -> (i32, i32, i32) {
    %c0_i32 = arith.constant 0 : i32
    %c0_i32_0 = arith.constant 0 : i32
    %c0_i32_1 = arith.constant 0 : i32
    %c0_i32_2 = arith.constant 0 : i32
    return %c0_i32, %c0_i32_0, %c0_i32_1 : i32, i32, i32
  }
  func.func @transform_5(%arg0: i32) -> (i32, i32, i32) {
    %c0_i32 = arith.constant 0 : i32
    %c0_i32_0 = arith.constant 0 : i32
    %c0_i32_1 = arith.constant 0 : i32
    %c0_i32_2 = arith.constant 0 : i32
    return %c0_i32, %c0_i32_0, %c0_i32_1 : i32, i32, i32
  }
  func.func @transform_6(%arg0: i32) -> (i32, i32) {
    %c0_i32 = arith.constant 0 : i32
    %c0_i32_0 = arith.constant 0 : i32
    %c0_i32_1 = arith.constant 0 : i32
    return %c0_i32, %c0_i32_0 : i32, i32
  }
  func.func @transform_7(%arg0: i32) -> (i32, i32, i32) {
    %c0_i32 = arith.constant 0 : i32
    %c0_i32_0 = arith.constant 0 : i32
    %c0_i32_1 = arith.constant 0 : i32
    return %arg0, %c0_i32, %c0_i32_0 : i32, i32, i32
  }
}

</mosaic_0001>

<bundles_post_ra>
// kernel: tpu_custom_call.1
= control target key start
LH: loop header
LB: loop body
LE: loop exit
PB: predicated region body
PF: predicated region fallthrough
CT: control target
= control target key end

     0   :  { %s9877_s24 = smov 0   ;;  %s14228_s0 = inlined_call_operand.vmem [shape: f32[4,128,64], index: 0, kind: input, shape index: {}]   ;;  %s14229_s1 = inlined_call_operand.vmem [shape: f32[4,440,16], index: 1, kind: input, shape index: {}]   ;;  %s14230_s2 = inlined_call_operand.vmem [shape: f32[2,64,16], index: 2, kind: input, shape index: {}]   ;;  %s14231_s3 = inlined_call_operand.vmem [shape: f32[1,16], index: 3, kind: input, shape index: {}]   ;;  %s14232_s4 = inlined_call_operand.vmem [shape: f32[18,16,16], index: 4, kind: input, shape index: {}]   ;;  %s14233_s5 = inlined_call_operand.vmem [shape: f32[2,1,16], index: 5, kind: input, shape index: {}]   ;;  %s14234_s6 = inlined_call_operand.vmem [shape: f32[384,1], index: 6, kind: input, shape index: {}]   ;;  %s14235_s7 = inlined_call_operand.vmem [shape: f32[4,384,16], index: 7, kind: output, shape index: {}]  }
   0x1 LB: > { %s8851_s25 = sadd.s32 4294967295, %s9833_s24   ;;  %p8855_p0 = scmp.ge.s32.totalorder %s9833_s24, 1  ;;  %s9833_s24 = sphi %s9877_s24, %s17_s24  }
   0x2   : > { %p247_p1 = scmp.lt.s32.totalorder %s9833_s24, 5 }
   0x4   : > { %p248_p2 = pnand %p8855_p0, %p247_p1 }
   0x6   : > { %251 = sbr.rel (%p248_p2) target bundleno = 2255 (0x8cf), region = 48 }
   0xb   : > { %v443_v0 = vld [vmem:[%s14230_s2 + $0x38] sm:$0xff]  ;;  %v442_v2 = vld [vmem:[%s14230_s2 + $0x30] sm:$0xff]  ;;  %p284_p3 = scmp.lt.s32.totalorder %s8851_s25, 3  ;;  %v441_v4 = vld [vmem:[%s14230_s2 + $0x28] sm:$0xff]  ;;  %vm448_vm0 = vcmask 523264   ;;  %vm354_vm1 = vcmask 130048  }
   0xc   : > { %v8883_v1 = vld [vmem:[%s14230_s2 + $0x78] sm:$0xff]  ;;  %505 = vmatpush.msra.mxu0 %v443_v0  ;;  %v8882_v3 = vld [vmem:[%s14230_s2 + $0x70] sm:$0xff]  ;;  %v8881_v5 = vld [vmem:[%s14230_s2 + $0x68] sm:$0xff]  ;;  %vm413_vm2 = vcmask 122880   ;;  %vm418_vm3 = vcmask 129024  }
   0xd   : > { %631 = vmatpush.msra.mxu1 %v8883_v1  ;;  %s14735_s25 = smov (!%p284_p3, %s8851_s25), 3  ;;  %v440_v6 = vld [vmem:[%s14230_s2 + $0x20] sm:$0xff]  ;;  %v439_v8 = vld [vmem:[%s14230_s2 + $0x18] sm:$0xff]  ;;  %v438_v10 = vld [vmem:[%s14230_s2 + $0x10] sm:$0xff] }
   0xe   : > { %506 = vmatpush.msra.mxu0 %v442_v2  ;;  %v8880_v7 = vld [vmem:[%s14230_s2 + $0x60] sm:$0xff]  ;;  %v8879_v9 = vld [vmem:[%s14230_s2 + $0x58] sm:$0xff]  ;;  %s9801_s23 = sshll.u32 %s14735_s25, 7  ;;  %v8878_v11 = vld [vmem:[%s14230_s2 + $0x50] sm:$0xff]  ;;  %s9806_s18 = smul.u32 440, %s14735_s25 }
   0xf   : > { %632 = vmatpush.msra.mxu1 %v8882_v3  ;;  %v437_v12 = vld [vmem:[%s14230_s2 + $0x8] sm:$0xff]  ;;  %s9933_s13 = scalar_lea.vmem %s14228_s0, %s9801_s23  ;;  %v436_v14 = vld [vmem:[%s14230_s2] sm:$0xff]  ;;  %v8901_v32 = vld [vmem:[%s14232_s4 + $0x18] sm:$0xff]  ;;  %s9807_s17 = smul.u32 384, %s14735_s25 }
  0x10   : > { %507 = vmatpush.msra.mxu0 %v441_v4  ;;  %v8877_v13 = vld [vmem:[%s14230_s2 + $0x48] sm:$0xff]  ;;  %v8876_v15 = vld [vmem:[%s14230_s2 + $0x40] sm:$0xff]  ;;  %v422_v18 = vld [vmem:[%s9933_s13 + $0x10] sm:$0xff]  ;;  %s9978_s21 = scalar_lea.vmem %s14229_s1, %s9806_s18  ;;  %9802 = vmatpush.msra.mxu2 %v8901_v32 }
  0x11   : > { %633 = vmatpush.msra.mxu1 %v8881_v5  ;;  %v420_v16 = vld [vmem:[%s9933_s13] sm:$0xff]  ;;  %v421_v17 = vld [vmem:[%s9933_s13 + $0x8] sm:$0xff]  ;;  %v423_v19 = vld [vmem:[%s9933_s13 + $0x18] sm:$0xff]  ;;  %s13845_s20 = scalar_lea.vmem %s14235_s7, %s9807_s17 }
  0x12   : > { %508 = vmatpush.msra.mxu0 %v440_v6  ;;  %v424_v20 = vld [vmem:[%s9933_s13 + $0x20] sm:$0xff]  ;;  %v425_v21 = vld [vmem:[%s9933_s13 + $0x28] sm:$0xff]  ;;  %v426_v22 = vld [vmem:[%s9933_s13 + $0x30] sm:$0xff] }
  0x13   : > { %634 = vmatpush.msra.mxu1 %v8880_v7  ;;  %v427_v23 = vld [vmem:[%s9933_s13 + $0x38] sm:$0xff]  ;;  %v428_v24 = vld [vmem:[%s9933_s13 + $0x40] sm:$0xff]  ;;  %v429_v25 = vld [vmem:[%s9933_s13 + $0x48] sm:$0xff] }
  0x14   : > { %509 = vmatpush.msra.mxu0 %v439_v8  ;;  %v430_v26 = vld [vmem:[%s9933_s13 + $0x50] sm:$0xff]  ;;  %v431_v27 = vld [vmem:[%s9933_s13 + $0x58] sm:$0xff]  ;;  %v303_v29 = vld [vmem:[%s9978_s21 + $0x20] sm:$0xff] }
  0x15   : > { %635 = vmatpush.msra.mxu1 %v8879_v9  ;;  %v302_v28 = vld [vmem:[%s9978_s21 + $0x18] sm:$0xff]  ;;  %v299_v30 = vld [vmem:[%s9978_s21] sm:$0xff]  ;;  %v300_v31 = vld [vmem:[%s9978_s21 + $0x8] sm:$0xff]  ;;  %359 = vst.msk [vmem:[#allocation2 + $0x20] sm:$0xff] %vm354_vm1, %v303_v29 }
  0x16   : > { %510 = vmatpush.msra.mxu0 %v438_v10  ;;  %358 = vst.msk [vmem:[#allocation2 + $0x18] sm:$0xff] %vm354_vm1, %v302_v28  ;;  %v785_v33 = vld [vmem:[%s14232_s4 + $0x8] sm:$0xff]  ;;  %v432_v34 = vld [vmem:[%s9933_s13 + $0x60] sm:$0xff]  ;;  %v8900_v35 = vld [vmem:[%s14232_s4 + $0x10] sm:$0xff] }
  0x17   : > { %636 = vmatpush.msra.mxu1 %v8878_v11  ;;  %355 = vst.msk [vmem:[#allocation2] sm:$0xff] %vm354_vm1, %v299_v30  ;;  %v784_v36 = vld [vmem:[%s14232_s4] sm:$0xff]  ;;  %9804 = vmatpush.msra.mxu3 %v785_v33  ;;  %v304_v37 = vld [vmem:[%s9978_s21 + $0x28] sm:$0xff]  ;;  %v301_v38 = vld [vmem:[%s9978_s21 + $0x10] sm:$0xff] }
  0x18   : > { %511 = vmatpush.msra.mxu0 %v437_v12  ;;  %356 = vst.msk [vmem:[#allocation2 + $0x8] sm:$0xff] %vm354_vm1, %v300_v31  ;;  %9803 = vmatpush.msra.mxu2 %v8900_v35  ;;  %v305_v39 = vld [vmem:[%s9978_s21 + $0x30] sm:$0xff]  ;;  %v306_v40 = vld [vmem:[%s9978_s21 + $0x38] sm:$0xff]  ;;  %v433_v41 = vld [vmem:[%s9933_s13 + $0x68] sm:$0xff] }
  0x19   : > { %637 = vmatpush.msra.mxu1 %v8877_v13  ;;  %360 = vst.msk [vmem:[#allocation2 + $0x28] sm:$0xff] %vm354_vm1, %v304_v37  ;;  %9805 = vmatpush.msra.mxu3 %v784_v36  ;;  %v308_v42 = vld [vmem:[%s9978_s21 + $0x48] sm:$0xff]  ;;  %v309_v43 = vld [vmem:[%s9978_s21 + $0x50] sm:$0xff]  ;;  %v307_v44 = vld [vmem:[%s9978_s21 + $0x40] sm:$0xff] }
  0x1a   : > { %512 = vmatpush.msra.mxu0 %v436_v14  ;;  %357 = vst.msk [vmem:[#allocation2 + $0x10] sm:$0xff] %vm354_vm1, %v301_v38  ;;  %v434_v45 = vld [vmem:[%s9933_s13 + $0x70] sm:$0xff]  ;;  %v310_v46 = vld [vmem:[%s9978_s21 + $0x58] sm:$0xff]  ;;  %v311_v47 = vld [vmem:[%s9978_s21 + $0x60] sm:$0xff] }
  0x1b   : > { %638 = vmatpush.msra.mxu1 %v8876_v15  ;;  %8860 = vmatmul.msk.f32.vlgmr.msra.gmra.mxu0 %vm448_vm0, %v420_v16  ;;  %361 = vst.msk [vmem:[#allocation2 + $0x30] sm:$0xff] %vm354_vm1, %v305_v39  ;;  %v312_v48 = vld [vmem:[%s9978_s21 + $0x68] sm:$0xff]  ;;  %v435_v49 = vld [vmem:[%s9933_s13 + $0x78] sm:$0xff]  ;;  %v315_v51 = vld [vmem:[%s9978_s21 + $0x80] sm:$0xff] }
  0x1c   : > { %8884 = vmatmul.msk.f32.vlgmr.msra.gmra.mxu1 %vm448_vm0, %v420_v16  ;;  %995 = vmatpush.msrb.mxu0 %v8901_v32  ;;  %362 = vst.msk [vmem:[#allocation2 + $0x38] sm:$0xff] %vm354_vm1, %v306_v40  ;;  %v314_v50 = vld [vmem:[%s9978_s21 + $0x78] sm:$0xff]  ;;  %v10042_v52 = vld [vmem:[%s14231_s3] ss:$0 sm:$0xff]  ;;  %v313_v54 = vld [vmem:[%s9978_s21 + $0x70] sm:$0xff] }
  0x1d   : > { %1300 = vmatpush.msrb.mxu1 %v785_v33  ;;  %364 = vst.msk [vmem:[#allocation2 + $0x48] sm:$0xff] %vm354_vm1, %v308_v42  ;;  %v10047_v53 = vld [vmem:[%s14231_s3] ss:$0 sm:$0xff]  ;;  %v316_v63 = vld [vmem:[%s9978_s21 + $0x88] sm:$0xff]  ;;  %v317_v2 = vld [vmem:[%s9978_s21 + $0x90] sm:$0xff] }
  0x1e   : > { %996 = vmatpush.msrb.mxu0 %v8900_v35  ;;  %365 = vst.msk [vmem:[#allocation2 + $0x50] sm:$0xff] %vm354_vm1, %v309_v43  ;;  %v562_v55 = vld [vmem:[#allocation2 + $0x19] sm:$0xff]  ;;  %v9099_v15 = vld [vmem:[%s14232_s4 + $0x48] sm:$0xff] }
  0x1f   : > { %1301 = vmatpush.msrb.mxu1 %v784_v36  ;;  %363 = vst.msk [vmem:[#allocation2 + $0x40] sm:$0xff] %vm354_vm1, %v307_v44  ;;  %v786_v59 = vld [vmem:[#allocation2 + $0x1] sm:$0xff]  ;;  %v318_v3 = vld [vmem:[%s9978_s21 + $0x98] sm:$0xff]  ;;  %2464 = vmatpush.msrb.mxu2 %v9099_v15 }
  0x20   : > { %366 = vst.msk [vmem:[#allocation2 + $0x58] sm:$0xff] %vm354_vm1, %v310_v46  ;;  %v736_v60 = vld [vmem:[#allocation2] sm:$0xff]  ;;  %v737_v9 = vld [vmem:[#allocation2 + $0x8] sm:$0xff]  ;;  %v322_v30 = vld [vmem:[%s9978_s21 + $0xb8] sm:$0xff] }
  0x21   : > { %367 = vst.msk [vmem:[#allocation2 + $0x60] sm:$0xff] %vm354_vm1, %v311_v47  ;;  %v563_v4 = vld [vmem:[#allocation2 + $0x21] sm:$0xff]  ;;  %v787_v8 = vld [vmem:[#allocation2 + $0x9] sm:$0xff]  ;;  %v326_v42 = vld [vmem:[%s9978_s21 + $0xd8] sm:$0xff] }
  0x22   : > { %368 = vst.msk [vmem:[#allocation2 + $0x68] sm:$0xff] %vm354_vm1, %v312_v48  ;;  %v319_v14 = vld [vmem:[%s9978_s21 + $0xa0] sm:$0xff]  ;;  %v320_v16 = vld [vmem:[%s9978_s21 + $0xa8] sm:$0xff] }
  0x23   : > { %8861 = vmatmul.msk.f32.gmra.mxu0 %vm448_vm0, %v421_v17  ;;  %370 = vst.msk [vmem:[#allocation2 + $0x78] sm:$0xff] %vm354_vm1, %v314_v50  ;;  %v688_v58 = vld [vmem:[#allocation2 + $0x31] sm:$0xff]  ;;  %v323_v28 = vld [vmem:[%s9978_s21 + $0xc0] sm:$0xff]  ;;  %v324_v29 = vld [vmem:[%s9978_s21 + $0xc8] sm:$0xff] }
  0x24   : > { %8885 = vmatmul.msk.f32.gmra.mxu1 %vm448_vm0, %v421_v17  ;;  %371 = vst.msk [vmem:[#allocation2 + $0x80] sm:$0xff] %vm354_vm1, %v315_v51  ;;  %v321_v17 = vld [vmem:[%s9978_s21 + $0xb0] sm:$0xff]  ;;  %v327_v43 = vld [vmem:[%s9978_s21 + $0xe0] sm:$0xff] }
  0x25   : > { %369 = vst.msk [vmem:[#allocation2 + $0x70] sm:$0xff] %vm354_vm1, %v313_v54 }
  0x26   : > { %372 = vst.msk [vmem:[#allocation2 + $0x88] sm:$0xff] %vm354_vm1, %v316_v63  ;;  %v689_v7 = vld [vmem:[#allocation2 + $0x39] sm:$0xff]  ;;  %v791_v63 = vld [vmem:[#allocation2 + $0x29] sm:$0xff] }
  0x27   : > { %373 = vst.msk [vmem:[#allocation2 + $0x90] sm:$0xff] %vm354_vm1, %v317_v2  ;;  %v569_v32 = vld [vmem:[#allocation2 + $0x51] sm:$0xff] }
  0x28   : > { %374 = vst.msk [vmem:[#allocation2 + $0x98] sm:$0xff] %vm354_vm1, %v318_v3 }
  0x29   : > { %375 = vst.msk [vmem:[#allocation2 + $0xa0] sm:$0xff] %vm354_vm1, %v319_v14 }
  0x2a   : > { %376 = vst.msk [vmem:[#allocation2 + $0xa8] sm:$0xff] %vm354_vm1, %v320_v16 }
  0x2b   : > { %8862 = vmatmul.msk.f32.gmra.mxu0 %vm448_vm0, %v422_v18  ;;  %377 = vst.msk [vmem:[#allocation2 + $0xb0] sm:$0xff] %vm354_vm1, %v321_v17 }
  0x2c   : > { %8886 = vmatmul.msk.f32.gmra.mxu1 %vm448_vm0, %v422_v18  ;;  %v788_v18 = vld [vmem:[#allocation2 + $0x11] sm:$0xff]  ;;  %379 = vst.msk [vmem:[#allocation2 + $0xc0] sm:$0xff] %vm354_vm1, %v323_v28 }
  0x2d   : > { %380 = vst.msk [vmem:[#allocation2 + $0xc8] sm:$0xff] %vm354_vm1, %v324_v29 }
  0x2e   : > { %378 = vst.msk [vmem:[#allocation2 + $0xb8] sm:$0xff] %vm354_vm1, %v322_v30 }
  0x2f   : > { %v700_v47 = vld [vmem:[#allocation2 + $0x91] sm:$0xff]  ;;  %382 = vst.msk [vmem:[#allocation2 + $0xd8] sm:$0xff] %vm354_vm1, %v326_v42 }
  0x30   : > { %383 = vst.msk [vmem:[#allocation2 + $0xe0] sm:$0xff] %vm354_vm1, %v327_v43 }
  0x33   : > { %8863 = vmatmul.msk.f32.gmra.mxu0 %vm448_vm0, %v423_v19 }
  0x34   : > { %8887 = vmatmul.msk.f32.gmra.mxu1 %vm448_vm0, %v423_v19 }
  0x37   : > { %v586_v42 = vld [vmem:[#allocation2 + $0xd9] sm:$0xff] }
  0x3b   : > { %8864 = vmatmul.msk.f32.gmra.mxu0 %vm448_vm0, %v424_v20 }
  0x3c   : > { %8888 = vmatmul.msk.f32.gmra.mxu1 %vm448_vm0, %v424_v20  ;;  %v568_v20 = vld [vmem:[#allocation2 + $0x49] sm:$0xff] }
  0x43   : > { %8865 = vmatmul.msk.f32.gmra.mxu0 %vm448_vm0, %v425_v21 }
  0x44   : > { %8889 = vmatmul.msk.f32.gmra.mxu1 %vm448_vm0, %v425_v21 }
  0x4b   : > { %8866 = vmatmul.msk.f32.gmra.mxu0 %vm448_vm0, %v426_v22 }
  0x4c   : > { %8890 = vmatmul.msk.f32.gmra.mxu1 %vm448_vm0, %v426_v22  ;;  %v694_v22 = vld [vmem:[#allocation2 + $0x61] sm:$0xff] }
  0x53   : > { %8867 = vmatmul.msk.f32.gmra.mxu0 %vm448_vm0, %v427_v23 }
  0x54   : > { %8891 = vmatmul.msk.f32.gmra.mxu1 %vm448_vm0, %v427_v23  ;;  %v738_v23 = vld [vmem:[#allocation2 + $0x10] sm:$0xff] }
  0x5b   : > { %8868 = vmatmul.msk.f32.gmra.mxu0 %vm448_vm0, %v428_v24 }
  0x5c   : > { %8892 = vmatmul.msk.f32.gmra.mxu1 %vm448_vm0, %v428_v24 }
  0x63   : > { %8869 = vmatmul.msk.f32.gmra.mxu0 %vm448_vm0, %v429_v25 }
  0x64   : > { %8893 = vmatmul.msk.f32.gmra.mxu1 %vm448_vm0, %v429_v25 }
  0x6b   : > { %8870 = vmatmul.msk.f32.gmra.mxu0 %vm448_vm0, %v430_v26 }
  0x6c   : > { %8894 = vmatmul.msk.f32.gmra.mxu1 %vm448_vm0, %v430_v26 }
  0x73   : > { %8871 = vmatmul.msk.f32.gmra.mxu0 %vm448_vm0, %v431_v27 }
  0x74   : > { %8895 = vmatmul.msk.f32.gmra.mxu1 %vm448_vm0, %v431_v27 }
  0x7b   : > { %8872 = vmatmul.msk.f32.gmra.mxu0 %vm448_vm0, %v432_v34 }
  0x7c   : > { %8896 = vmatmul.msk.f32.gmra.mxu1 %vm448_vm0, %v432_v34  ;;  %v695_v34 = vld [vmem:[#allocation2 + $0x69] sm:$0xff] }
  0x83   : > { %8873 = vmatmul.msk.f32.gmra.mxu0 %vm448_vm0, %v433_v41 }
  0x84   : > { %8897 = vmatmul.msk.f32.gmra.mxu1 %vm448_vm0, %v433_v41  ;;  %v325_v41 = vld [vmem:[%s9978_s21 + $0xd0] sm:$0xff] }
  0x85   : > { %381 = vst.msk [vmem:[#allocation2 + $0xd0] sm:$0xff] %vm354_vm1, %v325_v41 }
  0x8b   : > { %8874 = vmatmul.msk.f32.gmra.mxu0 %vm448_vm0, %v434_v45 }
  0x8c   : > { %8898 = vmatmul.msk.f32.gmra.mxu1 %vm448_vm0, %v434_v45  ;;  %v574_v45 = vld [vmem:[#allocation2 + $0x79] sm:$0xff]  ;;  %v707_v28 = vld [vmem:[#allocation2 + $0xc9] sm:$0xff] }
  0x93   : > { %8875 = vmatmul.msk.f32.gmra.mxu0 %vm448_vm0, %v435_v49 }
  0x94   : > { %8899 = vmatmul.msk.f32.gmra.mxu1 %vm448_vm0, %v435_v49 }
  0x98   : > { %v514_v56 = vpop.f32.mrf.mxu0 }
  0x99   : > { %v640_v57 = vpop.f32.mrf.mxu1  ;;  %v515_v61 = vadd.f32 %v10042_v52, %v514_v56  ;;  %v329_v56 = vld [vmem:[%s9978_s21 + $0xf0] sm:$0xff] }
  0x9a   : > { %v641_v62 = vadd.f32 %v10047_v53, %v640_v57  ;;  %v330_v57 = vld [vmem:[%s9978_s21 + $0xf8] sm:$0xff]  ;;  %385 = vst.msk [vmem:[#allocation2 + $0xf0] sm:$0xff] %vm354_vm1, %v329_v56  ;;  %v341_v56 = vld [vmem:[%s9978_s21 + $0x150] sm:$0xff] }
  0x9b   : > { %v564_v0 = vadd.f32 %v562_v55, %v515_v61  ;;  %8902 = vmatmul.msk.f32.vlgmr.msrb.gmra.mxu0 %vm354_vm1, %v786_v59  ;;  %386 = vst.msk [vmem:[#allocation2 + $0xf8] sm:$0xff] %vm354_vm1, %v330_v57  ;;  %v342_v57 = vld [vmem:[%s9978_s21 + $0x158] sm:$0xff] }
  0x9c   : > { %v690_v1 = vadd.f32 %v688_v58, %v641_v62  ;;  %8950 = vmatmul.msk.f32.vlgmr.msrb.gmra.mxu1 %vm354_vm1, %v736_v60  ;;  %v328_v58 = vld [vmem:[%s9978_s21 + $0xe8] sm:$0xff]  ;;  %v701_v62 = vld [vmem:[#allocation2 + $0x99] sm:$0xff]  ;;  %397 = vst.msk [vmem:[#allocation2 + $0x150] sm:$0xff] %vm354_vm1, %v341_v56 }
  0x9d   : > { %566 = vst.msk [vmem:[#allocation2 + $0x19] sm:$0xff] %vm354_vm1, %v564_v0  ;;  %v575_v60 = vld [vmem:[#allocation2 + $0x81] sm:$0xff] }
  0x9e   : > { %692 = vst.msk [vmem:[#allocation2 + $0x31] sm:$0xff] %vm354_vm1, %v690_v1 }
  0x9f   : > { %384 = vst.msk [vmem:[#allocation2 + $0xe8] sm:$0xff] %vm354_vm1, %v328_v58  ;;  %v340_v58 = vld [vmem:[%s9978_s21 + $0x148] sm:$0xff] }
  0xa0   : > { %v517_v5 = vpop.f32.mrf.mxu0  ;;  %398 = vst.msk [vmem:[#allocation2 + $0x158] sm:$0xff] %vm354_vm1, %v342_v57 }
  0xa1   : > { %v643_v6 = vpop.f32.mrf.mxu1  ;;  %v518_v10 = vadd.f32 %v10042_v52, %v517_v5  ;;  %396 = vst.msk [vmem:[#allocation2 + $0x148] sm:$0xff] %vm354_vm1, %v340_v58 }
  0xa2   : > { %v644_v11 = vadd.f32 %v10047_v53, %v643_v6 }
  0xa3   : > { %v565_v12 = vadd.f32 %v563_v4, %v518_v10  ;;  %8903 = vmatmul.msk.f32.gmra.mxu0 %vm354_vm1, %v787_v8  ;;  %v332_v8 = vld [vmem:[%s9978_s21 + $0x108] sm:$0xff] }
  0xa4   : > { %v691_v13 = vadd.f32 %v689_v7, %v644_v11  ;;  %8951 = vmatmul.msk.f32.gmra.mxu1 %vm354_vm1, %v737_v9  ;;  %v789_v37 = vld [vmem:[#allocation2 + $0x19] sm:$0xff]  ;;  %v333_v9 = vld [vmem:[%s9978_s21 + $0x110] sm:$0xff]  ;;  %388 = vst.msk [vmem:[#allocation2 + $0x108] sm:$0xff] %vm354_vm1, %v332_v8 }
  0xa5   : > { %567 = vst.msk [vmem:[#allocation2 + $0x21] sm:$0xff] %vm354_vm1, %v565_v12  ;;  %v10092_v38 = vld [vmem:[#allocation2 + $0x18] sm:$0xff]  ;;  %v331_v7 = vld [vmem:[%s9978_s21 + $0x100] sm:$0xff]  ;;  %v580_v11 = vld [vmem:[#allocation2 + $0xa9] sm:$0xff] }
  0xa6   : > { %693 = vst.msk [vmem:[#allocation2 + $0x39] sm:$0xff] %vm354_vm1, %v691_v13  ;;  %v706_v13 = vld [vmem:[#allocation2 + $0xc1] sm:$0xff]  ;;  %v792_v16 = vld [vmem:[#allocation2 + $0x31] sm:$0xff] }
  0xa7   : > { %387 = vst.msk [vmem:[#allocation2 + $0x100] sm:$0xff] %vm354_vm1, %v331_v7  ;;  %v10142_v17 = vld [vmem:[#allocation2 + $0x30] sm:$0xff] }
  0xa8   : > { %v520_v19 = vpop.f32.mrf.mxu0  ;;  %389 = vst.msk [vmem:[#allocation2 + $0x110] sm:$0xff] %vm354_vm1, %v333_v9  ;;  %v343_v9 = vld [vmem:[%s9978_s21 + $0x160] sm:$0xff]  ;;  %v724_v57 = vld [vmem:[#allocation2 + $0x151] sm:$0xff] }
  0xa9   : > { %v646_v21 = vpop.f32.mrf.mxu1  ;;  %v521_v24 = vadd.f32 %v10042_v52, %v520_v19  ;;  %399 = vst.msk [vmem:[#allocation2 + $0x160] sm:$0xff] %vm354_vm1, %v343_v9 }
  0xaa   : > { %v647_v25 = vadd.f32 %v10047_v53, %v646_v21 }
  0xab   : > { %v570_v26 = vadd.f32 %v568_v20, %v521_v24  ;;  %8904 = vmatmul.msk.f32.gmra.mxu0 %vm354_vm1, %v788_v18  ;;  %v334_v24 = vld [vmem:[%s9978_s21 + $0x118] sm:$0xff] }
  0xac   : > { %v696_v27 = vadd.f32 %v694_v22, %v647_v25  ;;  %8952 = vmatmul.msk.f32.gmra.mxu1 %vm354_vm1, %v738_v23  ;;  %v790_v50 = vld [vmem:[#allocation2 + $0x21] sm:$0xff]  ;;  %390 = vst.msk [vmem:[#allocation2 + $0x118] sm:$0xff] %vm354_vm1, %v334_v24 }
  0xad   : > { %572 = vst.msk [vmem:[#allocation2 + $0x49] sm:$0xff] %vm354_vm1, %v570_v26  ;;  %v10107_v51 = vld [vmem:[#allocation2 + $0x20] sm:$0xff]  ;;  %v10122_v2 = vld [vmem:[#allocation2 + $0x28] sm:$0xff]  ;;  %v581_v26 = vld [vmem:[#allocation2 + $0xb1] sm:$0xff] }
  0xae   : > { %698 = vst.msk [vmem:[#allocation2 + $0x61] sm:$0xff] %vm354_vm1, %v696_v27  ;;  %v335_v22 = vld [vmem:[%s9978_s21 + $0x120] sm:$0xff]  ;;  %v336_v23 = vld [vmem:[%s9978_s21 + $0x128] sm:$0xff] }
  0xaf   : > { %391 = vst.msk [vmem:[#allocation2 + $0x120] sm:$0xff] %vm354_vm1, %v335_v22  ;;  %v806_v22 = vld [vmem:[#allocation2 + $0xa1] sm:$0xff] }
  0xb0   : > { %v523_v31 = vpop.f32.mrf.mxu0  ;;  %392 = vst.msk [vmem:[#allocation2 + $0x128] sm:$0xff] %vm354_vm1, %v336_v23  ;;  %v725_v9 = vld [vmem:[#allocation2 + $0x159] sm:$0xff] }
  0xb1   : > { %v649_v33 = vpop.f32.mrf.mxu1  ;;  %v524_v35 = vadd.f32 %v10042_v52, %v523_v31  ;;  %v793_v31 = vld [vmem:[#allocation2 + $0x39] sm:$0xff] }
  0xb2   : > { %v650_v36 = vadd.f32 %v10047_v53, %v649_v33  ;;  %v803_v33 = vld [vmem:[#allocation2 + $0x89] sm:$0xff] }
  0xb3   : > { %v571_v39 = vadd.f32 %v569_v32, %v524_v35  ;;  %8905 = vmatmul.msk.f32.gmra.mxu0 %vm354_vm1, %v789_v37  ;;  %v10162_v32 = vld [vmem:[#allocation2 + $0x38] sm:$0xff]  ;;  %v337_v37 = vld [vmem:[%s9978_s21 + $0x130] sm:$0xff] }
  0xb4   : > { %v697_v40 = vadd.f32 %v695_v34, %v650_v36  ;;  %8953 = vmatmul.msk.f32.gmra.mxu1 %vm354_vm1, %v10092_v38  ;;  %393 = vst.msk [vmem:[#allocation2 + $0x130] sm:$0xff] %vm354_vm1, %v337_v37  ;;  %v797_v37 = vld [vmem:[#allocation2 + $0x59] sm:$0xff] }
  0xb5   : > { %573 = vst.msk [vmem:[#allocation2 + $0x51] sm:$0xff] %vm354_vm1, %v571_v39  ;;  %v338_v39 = vld [vmem:[%s9978_s21 + $0x138] sm:$0xff] }
  0xb6   : > { %699 = vst.msk [vmem:[#allocation2 + $0x69] sm:$0xff] %vm354_vm1, %v697_v40  ;;  %v339_v40 = vld [vmem:[%s9978_s21 + $0x140] sm:$0xff] }
  0xb7   : > { %394 = vst.msk [vmem:[#allocation2 + $0x138] sm:$0xff] %vm354_vm1, %v338_v39 }
  0xb8   : > { %v526_v44 = vpop.f32.mrf.mxu0  ;;  %395 = vst.msk [vmem:[#allocation2 + $0x140] sm:$0xff] %vm354_vm1, %v339_v40 }
  0xb9   : > { %v652_v46 = vpop.f32.mrf.mxu1  ;;  %v527_v48 = vadd.f32 %v10042_v52, %v526_v44  ;;  %v712_v44 = vld [vmem:[#allocation2 + $0xf1] sm:$0xff] }
  0xba   : > { %v653_v49 = vadd.f32 %v10047_v53, %v652_v46 }
  0xbb   : > { %v576_v54 = vadd.f32 %v574_v45, %v527_v48  ;;  %8906 = vmatmul.msk.f32.gmra.mxu0 %vm354_vm1, %v790_v50  ;;  %v794_v45 = vld [vmem:[#allocation2 + $0x41] sm:$0xff] }
  0xbc   : > { %v702_v55 = vadd.f32 %v700_v47, %v653_v49  ;;  %8954 = vmatmul.msk.f32.gmra.mxu1 %vm354_vm1, %v10107_v51  ;;  %v10182_v48 = vld [vmem:[#allocation2 + $0x40] sm:$0xff] }
  0xbd   : > { %578 = vst.msk [vmem:[#allocation2 + $0x79] sm:$0xff] %vm354_vm1, %v576_v54 }
  0xbe   : > { %704 = vst.msk [vmem:[#allocation2 + $0x91] sm:$0xff] %vm354_vm1, %v702_v55 }
  0xc0   : > { %v529_v59 = vpop.f32.mrf.mxu0 }
  0xc1   : > { %v655_v61 = vpop.f32.mrf.mxu1  ;;  %v530_v0 = vadd.f32 %v10042_v52, %v529_v59 }
  0xc2   : > { %v656_v1 = vadd.f32 %v10047_v53, %v655_v61 }
  0xc3   : > { %v577_v3 = vadd.f32 %v575_v60, %v530_v0  ;;  %8907 = vmatmul.msk.f32.gmra.mxu0 %vm354_vm1, %v791_v63  ;;  %v587_v60 = vld [vmem:[#allocation2 + $0xe1] sm:$0xff] }
  0xc4   : > { %v703_v4 = vadd.f32 %v701_v62, %v656_v1  ;;  %8955 = vmatmul.msk.f32.gmra.mxu1 %vm354_vm1, %v10122_v2  ;;  %v801_v5 = vld [vmem:[#allocation2 + $0x79] sm:$0xff]  ;;  %v795_v1 = vld [vmem:[#allocation2 + $0x49] sm:$0xff] }
  0xc5   : > { %v10127_v6 = vld [vmem:[#allocation2 + $0x78] sm:$0xff]  ;;  %579 = vst.msk [vmem:[#allocation2 + $0x81] sm:$0xff] %vm354_vm1, %v577_v3  ;;  %8917 = vmatmul.msk.f32.vlgmr.msra.gmra.mxu2 %vm354_vm1, %v801_v5  ;;  %v10184_v50 = vld [vmem:[#allocation2 + $0x90] sm:$0xff]  ;;  %v10202_v3 = vld [vmem:[#allocation2 + $0x48] sm:$0xff] }
  0xc6   : > { %8965 = vmatmul.msk.f32.vlgmr.msra.gmra.mxu3 %vm354_vm1, %v10127_v6  ;;  %705 = vst.msk [vmem:[#allocation2 + $0x99] sm:$0xff] %vm354_vm1, %v703_v4  ;;  %v804_v49 = vld [vmem:[#allocation2 + $0x91] sm:$0xff]  ;;  %v713_v62 = vld [vmem:[#allocation2 + $0xf9] sm:$0xff] }
  0xc8   : > { %v532_v10 = vpop.f32.mrf.mxu0 }
  0xc9   : > { %v658_v12 = vpop.f32.mrf.mxu1  ;;  %v533_v14 = vadd.f32 %v10042_v52, %v532_v10  ;;  %v344_v10 = vld [vmem:[%s9978_s21 + $0x168] sm:$0xff] }
  0xca   : > { %v659_v15 = vadd.f32 %v10047_v53, %v658_v12  ;;  %400 = vst.msk [vmem:[#allocation2 + $0x168] sm:$0xff] %vm354_vm1, %v344_v10 }
  0xcb   : > { %v582_v18 = vadd.f32 %v580_v11, %v533_v14  ;;  %8908 = vmatmul.msk.f32.gmra.mxu0 %vm354_vm1, %v792_v16  ;;  %v345_v11 = vld [vmem:[%s9978_s21 + $0x170] sm:$0xff] }
  0xcc   : > { %v708_v19 = vadd.f32 %v706_v13, %v659_v15  ;;  %8956 = vmatmul.msk.f32.gmra.mxu1 %vm354_vm1, %v10142_v17  ;;  %v802_v20 = vld [vmem:[#allocation2 + $0x81] sm:$0xff]  ;;  %v592_v13 = vld [vmem:[#allocation2 + $0x109] sm:$0xff]  ;;  %401 = vst.msk [vmem:[#allocation2 + $0x170] sm:$0xff] %vm354_vm1, %v345_v11 }
  0xcd   : > { %v10147_v21 = vld [vmem:[#allocation2 + $0x80] sm:$0xff]  ;;  %584 = vst.msk [vmem:[#allocation2 + $0xa9] sm:$0xff] %vm354_vm1, %v582_v18  ;;  %8918 = vmatmul.msk.f32.gmra.mxu2 %vm354_vm1, %v802_v20  ;;  %v10167_v36 = vld [vmem:[#allocation2 + $0x88] sm:$0xff]  ;;  %v10207_v8 = vld [vmem:[#allocation2 + $0x98] sm:$0xff] }
  0xce   : > { %8966 = vmatmul.msk.f32.gmra.mxu3 %vm354_vm1, %v10147_v21  ;;  %710 = vst.msk [vmem:[#allocation2 + $0xc1] sm:$0xff] %vm354_vm1, %v708_v19  ;;  %v805_v4 = vld [vmem:[#allocation2 + $0x99] sm:$0xff]  ;;  %v718_v15 = vld [vmem:[#allocation2 + $0x121] sm:$0xff]  ;;  %v796_v19 = vld [vmem:[#allocation2 + $0x51] sm:$0xff] }
  0xcf   : > { %v10222_v20 = vld [vmem:[#allocation2 + $0x50] sm:$0xff] }
  0xd0   : > { %v535_v25 = vpop.f32.mrf.mxu0 }
  0xd1   : > { %v661_v27 = vpop.f32.mrf.mxu1  ;;  %v536_v29 = vadd.f32 %v10042_v52, %v535_v25  ;;  %v10227_v25 = vld [vmem:[#allocation2 + $0xa0] sm:$0xff] }
  0xd2   : > { %v662_v30 = vadd.f32 %v10047_v53, %v661_v27  ;;  %v348_v27 = vld [vmem:[%s9978_s21 + $0x188] sm:$0xff] }
  0xd3   : > { %v583_v34 = vadd.f32 %v581_v26, %v536_v29  ;;  %8909 = vmatmul.msk.f32.gmra.mxu0 %vm354_vm1, %v793_v31  ;;  %v347_v26 = vld [vmem:[%s9978_s21 + $0x180] sm:$0xff]  ;;  %v8999_v29 = vld [vmem:[%s14232_s4 + $0x28] sm:$0xff]  ;;  %404 = vst.msk [vmem:[#allocation2 + $0x188] sm:$0xff] %vm354_vm1, %v348_v27 }
  0xd4   : > { %v709_v35 = vadd.f32 %v707_v28, %v662_v30  ;;  %8957 = vmatmul.msk.f32.gmra.mxu1 %vm354_vm1, %v10162_v32  ;;  %v346_v28 = vld [vmem:[%s9978_s21 + $0x178] sm:$0xff]  ;;  %403 = vst.msk [vmem:[#allocation2 + $0x180] sm:$0xff] %vm354_vm1, %v347_v26  ;;  %1656 = vmatpush.msra.mxu0 %v8999_v29  ;;  %v10298_v29 = vld [vmem:[#allocation2 + $0x70] sm:$0xff] }
  0xd5   : > { %585 = vst.msk [vmem:[#allocation2 + $0xb1] sm:$0xff] %vm354_vm1, %v583_v34  ;;  %8919 = vmatmul.msk.f32.gmra.mxu2 %vm354_vm1, %v803_v33  ;;  %v9049_v30 = vld [vmem:[%s14232_s4 + $0x38] sm:$0xff] }
  0xd6   : > { %8967 = vmatmul.msk.f32.gmra.mxu3 %vm354_vm1, %v10167_v36  ;;  %711 = vst.msk [vmem:[#allocation2 + $0xc9] sm:$0xff] %vm354_vm1, %v709_v35  ;;  %v593_v33 = vld [vmem:[#allocation2 + $0x111] sm:$0xff]  ;;  %v719_v35 = vld [vmem:[#allocation2 + $0x129] sm:$0xff]  ;;  %2060 = vmatpush.msra.mxu1 %v9049_v30  ;;  %v810_v30 = vld [vmem:[#allocation2 + $0xc1] sm:$0xff] }
  0xd7   : > { %402 = vst.msk [vmem:[#allocation2 + $0x178] sm:$0xff] %vm354_vm1, %v346_v28  ;;  %v800_v26 = vld [vmem:[#allocation2 + $0x71] sm:$0xff] }
  0xd8   : > { %v538_v41 = vpop.f32.mrf.mxu0 }
  0xd9   : > { %v664_v43 = vpop.f32.mrf.mxu1  ;;  %v539_v46 = vadd.f32 %v10042_v52, %v538_v41  ;;  %v8998_v41 = vld [vmem:[%s14232_s4 + $0x20] sm:$0xff] }
  0xda   : > { %v665_v47 = vadd.f32 %v10047_v53, %v664_v43  ;;  %v10254_v43 = vld [vmem:[#allocation2 + $0x58] sm:$0xff]  ;;  %1657 = vmatpush.msra.mxu0 %v8998_v41  ;;  %v1447_v41 = vld [vmem:[#allocation2 + $0x2] sm:$0xff] }
  0xdb   : > { %v588_v54 = vadd.f32 %v586_v42, %v539_v46  ;;  %8910 = vmatmul.msk.f32.gmra.mxu0 %vm354_vm1, %v794_v45  ;;  %v9048_v42 = vld [vmem:[%s14232_s4 + $0x30] sm:$0xff]  ;;  %v10256_v45 = vld [vmem:[#allocation2 + $0xa8] sm:$0xff] }
  0xdc   : > { %v714_v55 = vadd.f32 %v712_v44, %v665_v47  ;;  %8958 = vmatmul.msk.f32.gmra.mxu1 %vm354_vm1, %v10182_v48  ;;  %v807_v44 = vld [vmem:[#allocation2 + $0xa9] sm:$0xff] }
  0xdd   : > { %590 = vst.msk [vmem:[#allocation2 + $0xd9] sm:$0xff] %vm354_vm1, %v588_v54  ;;  %8920 = vmatmul.msk.f32.gmra.mxu2 %vm354_vm1, %v804_v49  ;;  %2061 = vmatpush.msra.mxu1 %v9048_v42  ;;  %v349_v49 = vld [vmem:[%s9978_s21 + $0x190] sm:$0xff] }
  0xde   : > { %8968 = vmatmul.msk.f32.gmra.mxu3 %vm354_vm1, %v10184_v50  ;;  %716 = vst.msk [vmem:[#allocation2 + $0xf1] sm:$0xff] %vm354_vm1, %v714_v55  ;;  %v598_v55 = vld [vmem:[#allocation2 + $0x139] sm:$0xff] }
  0xdf   : > { %405 = vst.msk [vmem:[#allocation2 + $0x190] sm:$0xff] %vm354_vm1, %v349_v49 }
  0xe0   : > { %v541_v59 = vpop.f32.mrf.mxu0 }
  0xe1   : > { %v667_v61 = vpop.f32.mrf.mxu1  ;;  %v542_v63 = vadd.f32 %v10042_v52, %v541_v59 }
  0xe2   : > { %v668_v0 = vadd.f32 %v10047_v53, %v667_v61  ;;  %v10270_v61 = vld [vmem:[#allocation2 + $0x60] sm:$0xff] }
  0xe3   : > { %v589_v5 = vadd.f32 %v587_v60, %v542_v63  ;;  %8911 = vmatmul.msk.f32.gmra.mxu0 %vm354_vm1, %v795_v1  ;;  %v798_v60 = vld [vmem:[#allocation2 + $0x61] sm:$0xff]  ;;  %v10275_v1 = vld [vmem:[#allocation2 + $0xb0] sm:$0xff] }
  0xe4   : > { %v715_v7 = vadd.f32 %v713_v62, %v668_v0  ;;  %8959 = vmatmul.msk.f32.gmra.mxu1 %vm354_vm1, %v10202_v3  ;;  %v808_v62 = vld [vmem:[#allocation2 + $0xb1] sm:$0xff] }
  0xe5   : > { %591 = vst.msk [vmem:[#allocation2 + $0xe1] sm:$0xff] %vm354_vm1, %v589_v5  ;;  %8921 = vmatmul.msk.f32.gmra.mxu2 %vm354_vm1, %v805_v4  ;;  %v599_v5 = vld [vmem:[#allocation2 + $0x141] sm:$0xff] }
  0xe6   : > { %8969 = vmatmul.msk.f32.gmra.mxu3 %vm354_vm1, %v10207_v8  ;;  %717 = vst.msk [vmem:[#allocation2 + $0xf9] sm:$0xff] %vm354_vm1, %v715_v7 }
  0xe8   : > { %v544_v12 = vpop.f32.mrf.mxu0 }
  0xe9   : > { %v670_v14 = vpop.f32.mrf.mxu1  ;;  %v545_v16 = vadd.f32 %v10042_v52, %v544_v12  ;;  %v799_v12 = vld [vmem:[#allocation2 + $0x69] sm:$0xff] }
  0xea   : > { %v671_v18 = vadd.f32 %v10047_v53, %v670_v14  ;;  %v809_v14 = vld [vmem:[#allocation2 + $0xb9] sm:$0xff] }
  0xeb   : > { %v594_v23 = vadd.f32 %v592_v13, %v545_v16  ;;  %8912 = vmatmul.msk.f32.gmra.mxu0 %vm354_vm1, %v796_v19  ;;  %v10284_v13 = vld [vmem:[#allocation2 + $0x68] sm:$0xff] }
  0xec   : > { %v720_v24 = vadd.f32 %v718_v15, %v671_v18  ;;  %8960 = vmatmul.msk.f32.gmra.mxu1 %vm354_vm1, %v10222_v20  ;;  %v10289_v18 = vld [vmem:[#allocation2 + $0xb8] sm:$0xff] }
  0xed   : > { %596 = vst.msk [vmem:[#allocation2 + $0x109] sm:$0xff] %vm354_vm1, %v594_v23  ;;  %8922 = vmatmul.msk.f32.gmra.mxu2 %vm354_vm1, %v806_v22  ;;  %v604_v22 = vld [vmem:[#allocation2 + $0x169] sm:$0xff] }
  0xee   : > { %8970 = vmatmul.msk.f32.gmra.mxu3 %vm354_vm1, %v10227_v25  ;;  %722 = vst.msk [vmem:[#allocation2 + $0x121] sm:$0xff] %vm354_vm1, %v720_v24  ;;  %v730_v24 = vld [vmem:[#allocation2 + $0x181] sm:$0xff] }
  0xf0   : > { %v547_v31 = vpop.f32.mrf.mxu0 }
  0xf1   : > { %v673_v34 = vpop.f32.mrf.mxu1  ;;  %v548_v39 = vadd.f32 %v10042_v52, %v547_v31  ;;  %v10300_v31 = vld [vmem:[#allocation2 + $0xc0] sm:$0xff] }
  0xf2   : > { %v674_v40 = vadd.f32 %v10047_v53, %v673_v34 }
  0xf3   : > { %v595_v46 = vadd.f32 %v593_v33, %v548_v39  ;;  %8913 = vmatmul.msk.f32.gmra.mxu0 %vm354_vm1, %v797_v37  ;;  %v605_v37 = vld [vmem:[#allocation2 + $0x171] sm:$0xff] }
  0xf4   : > { %v721_v47 = vadd.f32 %v719_v35, %v674_v40  ;;  %8961 = vmatmul.msk.f32.gmra.mxu1 %vm354_vm1, %v10254_v43  ;;  %v731_v40 = vld [vmem:[#allocation2 + $0x189] sm:$0xff] }
  0xf5   : > { %597 = vst.msk [vmem:[#allocation2 + $0x111] sm:$0xff] %vm354_vm1, %v595_v46  ;;  %8923 = vmatmul.msk.f32.gmra.mxu2 %vm354_vm1, %v807_v44  ;;  %v811_v46 = vld [vmem:[#allocation2 + $0xc9] sm:$0xff] }
  0xf6   : > { %8971 = vmatmul.msk.f32.gmra.mxu3 %vm354_vm1, %v10256_v45  ;;  %723 = vst.msk [vmem:[#allocation2 + $0x129] sm:$0xff] %vm354_vm1, %v721_v47 }
  0xf8   : > { %v550_v54 = vpop.f32.mrf.mxu0 }
  0xf9   : > { %v676_v56 = vpop.f32.mrf.mxu1  ;;  %v551_v58 = vadd.f32 %v10042_v52, %v550_v54  ;;  %v10315_v54 = vld [vmem:[#allocation2 + $0xc8] sm:$0xff] }
  0xfa   : > { %v677_v59 = vadd.f32 %v10047_v53, %v676_v56  ;;  %v812_v56 = vld [vmem:[#allocation2 + $0xd1] sm:$0xff] }
  0xfb   : > { %v600_v63 = vadd.f32 %v598_v55, %v551_v58  ;;  %8914 = vmatmul.msk.f32.gmra.mxu0 %vm354_vm1, %v798_v60  ;;  %v1448_v55 = vld [vmem:[#allocation2 + $0xa] sm:$0xff]  ;;  %v1449_v60 = vld [vmem:[#allocation2 + $0x12] sm:$0xff] }
  0xfc   : > { %v726_v0 = vadd.f32 %v724_v57, %v677_v59  ;;  %8962 = vmatmul.msk.f32.gmra.mxu1 %vm354_vm1, %v10270_v61  ;;  %v9149_v59 = vld [vmem:[%s14232_s4 + $0x58] sm:$0xff] }
  0xfd   : > { %602 = vst.msk [vmem:[#allocation2 + $0x139] sm:$0xff] %vm354_vm1, %v600_v63  ;;  %8924 = vmatmul.msk.f32.gmra.mxu2 %vm354_vm1, %v808_v62  ;;  %v813_v62 = vld [vmem:[#allocation2 + $0xd9] sm:$0xff]  ;;  %2868 = vmatpush.msrb.mxu3 %v9149_v59 }
  0xfe   : > { %8972 = vmatmul.msk.f32.gmra.mxu3 %vm354_vm1, %v10275_v1  ;;  %728 = vst.msk [vmem:[#allocation2 + $0x151] sm:$0xff] %vm354_vm1, %v726_v0  ;;  %v10341_v63 = vld [vmem:[#allocation2 + $0xd8] sm:$0xff] }
 0x100   : > { %v553_v4 = vpop.f32.mrf.mxu0 }
 0x101   : > { %v679_v7 = vpop.f32.mrf.mxu1  ;;  %v554_v10 = vadd.f32 %v10042_v52, %v553_v4  ;;  %v10353_v4 = vld [vmem:[#allocation2 + $0x1a] sm:$0xff] }
 0x102   : > { %v680_v11 = vadd.f32 %v10047_v53, %v679_v7  ;;  %v9098_v7 = vld [vmem:[%s14232_s4 + $0x40] sm:$0xff] }
 0x103   : > { %v601_v15 = vadd.f32 %v599_v5, %v554_v10  ;;  %8915 = vmatmul.msk.f32.gmra.mxu0 %vm354_vm1, %v799_v12  ;;  %v814_v5 = vld [vmem:[#allocation2 + $0xe1] sm:$0xff]  ;;  %2465 = vmatpush.msrb.mxu2 %v9098_v7  ;;  %v815_v12 = vld [vmem:[#allocation2 + $0xe9] sm:$0xff] }
 0x104   : > { %v727_v16 = vadd.f32 %v725_v9, %v680_v11  ;;  %8963 = vmatmul.msk.f32.gmra.mxu1 %vm354_vm1, %v10284_v13  ;;  %v10371_v11 = vld [vmem:[#allocation2 + $0x22] sm:$0xff] }
 0x105   : > { %603 = vst.msk [vmem:[#allocation2 + $0x141] sm:$0xff] %vm354_vm1, %v601_v15  ;;  %8925 = vmatmul.msk.f32.gmra.mxu2 %vm354_vm1, %v809_v14 }
 0x106   : > { %8973 = vmatmul.msk.f32.gmra.mxu3 %vm354_vm1, %v10289_v18  ;;  %729 = vst.msk [vmem:[#allocation2 + $0x159] sm:$0xff] %vm354_vm1, %v727_v16  ;;  %v10386_v16 = vld [vmem:[#allocation2 + $0x2a] sm:$0xff] }
 0x108   : > { %v556_v19 = vpop.f32.mrf.mxu0 }
 0x109   : > { %v682_v23 = vpop.f32.mrf.mxu1  ;;  %v557_v27 = vadd.f32 %v10042_v52, %v556_v19  ;;  %v816_v19 = vld [vmem:[#allocation2 + $0xf1] sm:$0xff] }
 0x10a   : > { %v683_v28 = vadd.f32 %v10047_v53, %v682_v23 }
 0x10b   : > { %v606_v33 = vadd.f32 %v604_v22, %v557_v27  ;;  %8916 = vmatmul.msk.f32.gmra.mxu0 %vm354_vm1, %v800_v26  ;;  %v10388_v22 = vld [vmem:[#allocation2 + $0xf0] sm:$0xff]  ;;  %v817_v26 = vld [vmem:[#allocation2 + $0xf9] sm:$0xff] }
 0x10c   : > { %v732_v34 = vadd.f32 %v730_v24, %v683_v28  ;;  %8964 = vmatmul.msk.f32.gmra.mxu1 %vm354_vm1, %v10298_v29  ;;  %v10401_v24 = vld [vmem:[#allocation2 + $0x32] sm:$0xff] }
 0x10d   : > { %608 = vst.msk [vmem:[#allocation2 + $0x169] sm:$0xff] %vm354_vm1, %v606_v33  ;;  %8926 = vmatmul.msk.f32.gmra.mxu2 %vm354_vm1, %v810_v30  ;;  %v10407_v27 = vld [vmem:[#allocation2 + $0xf8] sm:$0xff] }
 0x10e   : > { %8974 = vmatmul.msk.f32.gmra.mxu3 %vm354_vm1, %v10300_v31  ;;  %734 = vst.msk [vmem:[#allocation2 + $0x181] sm:$0xff] %vm354_vm1, %v732_v34 }
 0x110   : > { %v559_v35 = vpop.f32.mrf.mxu0 }
 0x111   : > { %v685_v39 = vpop.f32.mrf.mxu1  ;;  %v560_v42 = vadd.f32 %v10042_v52, %v559_v35  ;;  %v10418_v35 = vld [vmem:[#allocation2 + $0x3a] sm:$0xff] }
 0x112   : > { %v686_v44 = vadd.f32 %v10047_v53, %v685_v39 }
 0x113   : > { %v607_v47 = vadd.f32 %v605_v37, %v560_v42  ;;  %9000 = vmatmul.msk.f32.vlgmr.msra.gmra.mxu0 %vm354_vm1, %v1447_v41  ;;  %v818_v37 = vld [vmem:[#allocation2 + $0x101] sm:$0xff] }
 0x114   : > { %v733_v49 = vadd.f32 %v731_v40, %v686_v44  ;;  %9050 = vmatmul.msk.f32.vlgmr.msra.gmra.mxu1 %vm354_vm1, %v10092_v38  ;;  %v10329_v38 = vld [vmem:[#allocation2 + $0xd0] sm:$0xff] }
 0x115   : > { %609 = vst.msk [vmem:[#allocation2 + $0x171] sm:$0xff] %vm354_vm1, %v607_v47  ;;  %8927 = vmatmul.msk.f32.gmra.mxu2 %vm354_vm1, %v811_v46  ;;  %v10435_v46 = vld [vmem:[#allocation2 + $0x42] sm:$0xff] }
 0x116   : > { %8975 = vmatmul.msk.f32.gmra.mxu3 %vm354_vm1, %v10315_v54  ;;  %735 = vst.msk [vmem:[#allocation2 + $0x189] sm:$0xff] %vm354_vm1, %v733_v49  ;;  %v819_v47 = vld [vmem:[#allocation2 + $0x109] sm:$0xff] }
 0x117   : > { %v10437_v49 = vld [vmem:[#allocation2 + $0x108] sm:$0xff] }
 0x118   : > { %v10322_v52 = vpop.f32.mrf.mxu0 }
 0x119   : > { %v10324_v53 = vpop.f32.mrf.mxu1 }
 0x11b   : > { %9001 = vmatmul.msk.f32.gmra.mxu0 %vm354_vm1, %v1448_v55 }
 0x11c   : > { %9051 = vmatmul.msk.f32.gmra.mxu1 %vm354_vm1, %v10107_v51 }
 0x11d   : > { %8928 = vmatmul.msk.f32.gmra.mxu2 %vm354_vm1, %v812_v56 }
 0x11e   : > { %8976 = vmatmul.msk.f32.gmra.mxu3 %vm354_vm1, %v10329_v38 }
 0x120   : > { %v10334_v57 = vpop.f32.mrf.mxu0 }
 0x121   : > { %v10336_v58 = vpop.f32.mrf.mxu1 }
 0x123   : > { %9002 = vmatmul.msk.f32.gmra.mxu0 %vm354_vm1, %v1449_v60 }
 0x124   : > { %9052 = vmatmul.msk.f32.gmra.mxu1 %vm354_vm1, %v10122_v2  ;;  %v10362_v2 = vld [vmem:[#allocation2 + $0xe0] sm:$0xff] }
 0x125   : > { %8929 = vmatmul.msk.f32.gmra.mxu2 %vm354_vm1, %v813_v62  ;;  %v10452_v62 = vld [vmem:[#allocation2 + $0x4a] sm:$0xff] }
 0x126   : > { %8977 = vmatmul.msk.f32.gmra.mxu3 %vm354_vm1, %v10341_v63 }
 0x128   : > { %v10349_v51 = vpop.f32.mrf.mxu0 }
 0x129   : > { %14289 = vst [vmem:[#allocation4_spill] sm:$0xff] %v10349_v51  ;;  %v10351_v0 = vpop.f32.mrf.mxu1  ;;  %v830_v51 = vld [vmem:[#allocation2 + $0x161] sm:$0xff] }
 0x12a   : > { %14290 = vst [vmem:[#allocation5_spill] sm:$0xff] %v10351_v0  ;;  %v829_v0 = vld [vmem:[#allocation2 + $0x159] sm:$0xff] }
 0x12b   : > { %9003 = vmatmul.msk.f32.gmra.mxu0 %vm354_vm1, %v10353_v4 }
 0x12c   : > { %9053 = vmatmul.msk.f32.gmra.mxu1 %vm354_vm1, %v10142_v17  ;;  %v10377_v17 = vld [vmem:[#allocation2 + $0xe8] sm:$0xff] }
 0x12d   : > { %8930 = vmatmul.msk.f32.gmra.mxu2 %vm354_vm1, %v814_v5  ;;  %v820_v5 = vld [vmem:[#allocation2 + $0x111] sm:$0xff] }
 0x12e   : > { %8978 = vmatmul.msk.f32.gmra.mxu3 %vm354_vm1, %v10362_v2 }
 0x130   : > { %v10367_v9 = vpop.f32.mrf.mxu0 }
 0x131   : > { %14291 = vst [vmem:[#allocation6_spill] sm:$0xff] %v10367_v9  ;;  %v10369_v10 = vpop.f32.mrf.mxu1  ;;  %v10590_v9 = vld [vmem:[#allocation2 + $0x150] sm:$0xff] }
 0x132   : > { %14292 = vst [vmem:[#allocation7_spill] sm:$0xff] %v10369_v10  ;;  %v828_v10 = vld [vmem:[#allocation2 + $0x151] sm:$0xff] }
 0x133   : > { %9004 = vmatmul.msk.f32.gmra.mxu0 %vm354_vm1, %v10371_v11 }
 0x134   : > { %9054 = vmatmul.msk.f32.gmra.mxu1 %vm354_vm1, %v10162_v32 }
 0x135   : > { %8931 = vmatmul.msk.f32.gmra.mxu2 %vm354_vm1, %v815_v12 }
 0x136   : > { %8979 = vmatmul.msk.f32.gmra.mxu3 %vm354_vm1, %v10377_v17 }
 0x138   : > { %v10382_v14 = vpop.f32.mrf.mxu0 }
 0x139   : > { %14293 = vst [vmem:[#allocation8_spill] sm:$0xff] %v10382_v14  ;;  %v10384_v15 = vpop.f32.mrf.mxu1  ;;  %v10588_v14 = vld [vmem:[#allocation2 + $0x8a] sm:$0xff] }
 0x13a   : > { %14294 = vst [vmem:[#allocation9_spill] sm:$0xff] %v10384_v15 }
 0x13b   : > { %9005 = vmatmul.msk.f32.gmra.mxu0 %vm354_vm1, %v10386_v16 }
 0x13c   : > { %9055 = vmatmul.msk.f32.gmra.mxu1 %vm354_vm1, %v10182_v48 }
 0x13d   : > { %8932 = vmatmul.msk.f32.gmra.mxu2 %vm354_vm1, %v816_v19 }
 0x13e   : > { %8980 = vmatmul.msk.f32.gmra.mxu3 %vm354_vm1, %v10388_v22 }
 0x140   : > { %v10397_v32 = vpop.f32.mrf.mxu0 }
 0x141   : > { %14295 = vst [vmem:[#allocation10_spill] sm:$0xff] %v10397_v32  ;;  %v10399_v23 = vpop.f32.mrf.mxu1 }
 0x142   : > { %14296 = vst [vmem:[#allocation11_spill] sm:$0xff] %v10399_v23  ;;  %v827_v23 = vld [vmem:[#allocation2 + $0x149] sm:$0xff] }
 0x143   : > { %9006 = vmatmul.msk.f32.gmra.mxu0 %vm354_vm1, %v10401_v24 }
 0x144   : > { %9056 = vmatmul.msk.f32.gmra.mxu1 %vm354_vm1, %v10202_v3  ;;  %v10424_v3 = vld [vmem:[#allocation2 + $0x100] sm:$0xff] }
 0x145   : > { %8933 = vmatmul.msk.f32.gmra.mxu2 %vm354_vm1, %v817_v26 }
 0x146   : > { %8981 = vmatmul.msk.f32.gmra.mxu3 %vm354_vm1, %v10407_v27 }
 0x148   : > { %v10412_v48 = vpop.f32.mrf.mxu0  ;;  %v1043_v28 = vpop.f32.mrf.mxu2 }
 0x149   : > { %14297 = vst [vmem:[#allocation12_spill] sm:$0xff] %v10412_v48  ;;  %v10414_v30 = vpop.f32.mrf.mxu1  ;;  %v1348_v33 = vpop.f32.mrf.mxu3  ;;  %v10571_v48 = vld [vmem:[#allocation2 + $0x82] sm:$0xff] }
 0x14a   : > { %14298 = vst [vmem:[#allocation13_spill] sm:$0xff] %v10414_v30  ;;  %v10416_v34 = vadd.f32 %v1348_v33, %v1043_v28  ;;  %v10469_v33 = vld [vmem:[#allocation2 + $0x52] sm:$0xff]  ;;  %v826_v30 = vld [vmem:[#allocation2 + $0x141] sm:$0xff] }
 0x14b   : > { %9007 = vmatmul.msk.f32.gmra.mxu0 %vm354_vm1, %v10418_v35 }
 0x14c   : > { %9057 = vmatmul.msk.f32.gmra.mxu1 %vm354_vm1, %v10222_v20 }
 0x14d   : > { %8934 = vmatmul.msk.f32.gmra.mxu2 %vm354_vm1, %v818_v37  ;;  %v821_v37 = vld [vmem:[#allocation2 + $0x119] sm:$0xff] }
 0x14e   : > { %8982 = vmatmul.msk.f32.gmra.mxu3 %vm354_vm1, %v10424_v3 }
 0x150   : > { %v10429_v39 = vpop.f32.mrf.mxu0  ;;  %v1046_v40 = vpop.f32.mrf.mxu2 }
 0x151   : > { %14299 = vst [vmem:[#allocation14_spill] sm:$0xff] %v10429_v39  ;;  %v10431_v41 = vpop.f32.mrf.mxu1  ;;  %v1351_v42 = vpop.f32.mrf.mxu3  ;;  %v10539_v39 = vld [vmem:[#allocation2 + $0x138] sm:$0xff] }
 0x152   : > { %14300 = vst [vmem:[#allocation15_spill] sm:$0xff] %v10431_v41  ;;  %v10433_v44 = vadd.f32 %v1351_v42, %v1046_v40  ;;  %v825_v41 = vld [vmem:[#allocation2 + $0x139] sm:$0xff] }
 0x153   : > { %9008 = vmatmul.msk.f32.gmra.mxu0 %vm354_vm1, %v10435_v46 }
 0x154   : > { %9058 = vmatmul.msk.f32.gmra.mxu1 %vm354_vm1, %v10254_v43  ;;  %v10458_v43 = vld [vmem:[#allocation2 + $0x110] sm:$0xff] }
 0x155   : > { %8935 = vmatmul.msk.f32.gmra.mxu2 %vm354_vm1, %v819_v47 }
 0x156   : > { %8983 = vmatmul.msk.f32.gmra.mxu3 %vm354_vm1, %v10437_v49 }
 0x158   : > { %v10446_v20 = vpop.f32.mrf.mxu0  ;;  %v1049_v55 = vpop.f32.mrf.mxu2 }
 0x159   : > { %14301 = vst [vmem:[#allocation16_spill] sm:$0xff] %v10446_v20  ;;  %v10448_v56 = vpop.f32.mrf.mxu1  ;;  %v1354_v59 = vpop.f32.mrf.mxu3  ;;  %v10537_v20 = vld [vmem:[#allocation2 + $0x72] sm:$0xff] }
 0x15a   : > { %14302 = vst [vmem:[#allocation17_spill] sm:$0xff] %v10448_v56  ;;  %v10450_v60 = vadd.f32 %v1354_v59, %v1049_v55  ;;  %v824_v56 = vld [vmem:[#allocation2 + $0x131] sm:$0xff] }
 0x15b   : > { %9009 = vmatmul.msk.f32.gmra.mxu0 %vm354_vm1, %v10452_v62 }
 0x15c   : > { %9059 = vmatmul.msk.f32.gmra.mxu1 %vm354_vm1, %v10270_v61  ;;  %v10475_v61 = vld [vmem:[#allocation2 + $0x118] sm:$0xff] }
 0x15d   : > { %8936 = vmatmul.msk.f32.gmra.mxu2 %vm354_vm1, %v820_v5  ;;  %v10486_v5 = vld [vmem:[#allocation2 + $0x5a] sm:$0xff] }
 0x15e   : > { %8984 = vmatmul.msk.f32.gmra.mxu3 %vm354_vm1, %v10458_v43 }
 0x160   : > { %v10463_v7 = vpop.f32.mrf.mxu0  ;;  %v1052_v12 = vpop.f32.mrf.mxu2 }
 0x161   : > { %14303 = vst [vmem:[#allocation18_spill] sm:$0xff] %v10463_v7  ;;  %v10465_v19 = vpop.f32.mrf.mxu1  ;;  %v1357_v26 = vpop.f32.mrf.mxu3  ;;  %v10520_v7 = vld [vmem:[#allocation2 + $0x6a] sm:$0xff] }
 0x162   : > { %14304 = vst [vmem:[#allocation19_spill] sm:$0xff] %v10465_v19  ;;  %v10467_v28 = vadd.f32 %v1357_v26, %v1052_v12  ;;  %v822_v12 = vld [vmem:[#allocation2 + $0x121] sm:$0xff]  ;;  %v823_v19 = vld [vmem:[#allocation2 + $0x129] sm:$0xff] }
 0x163   : > { %9010 = vmatmul.msk.f32.gmra.mxu0 %vm354_vm1, %v10469_v33  ;;  %v10488_v26 = vld [vmem:[#allocation2 + $0x120] sm:$0xff] }
 0x164   : > { %9060 = vmatmul.msk.f32.gmra.mxu1 %vm354_vm1, %v10284_v13 }
 0x165   : > { %8937 = vmatmul.msk.f32.gmra.mxu2 %vm354_vm1, %v821_v37 }
 0x166   : > { %8985 = vmatmul.msk.f32.gmra.mxu3 %vm354_vm1, %v10475_v61 }
 0x168   : > { %v10480_v40 = vpop.f32.mrf.mxu0  ;;  %v1055_v42 = vpop.f32.mrf.mxu2 }
 0x169   : > { %14305 = vst [vmem:[#allocation20_spill] sm:$0xff] %v10480_v40  ;;  %v10482_v47 = vpop.f32.mrf.mxu1  ;;  %v1360_v55 = vpop.f32.mrf.mxu3  ;;  %v10503_v40 = vld [vmem:[#allocation2 + $0x62] sm:$0xff] }
 0x16a   : > { %14306 = vst [vmem:[#allocation21_spill] sm:$0xff] %v10482_v47  ;;  %v10484_v59 = vadd.f32 %v1360_v55, %v1055_v42 }
 0x16b   : > { %9011 = vmatmul.msk.f32.gmra.mxu0 %vm354_vm1, %v10486_v5 }
 0x16c   : > { %9061 = vmatmul.msk.f32.gmra.mxu1 %vm354_vm1, %v10298_v29  ;;  %v10509_v29 = vld [vmem:[#allocation2 + $0x128] sm:$0xff] }
 0x16d   : > { %8938 = vmatmul.msk.f32.gmra.mxu2 %vm354_vm1, %v822_v12 }
 0x16e   : > { %8986 = vmatmul.msk.f32.gmra.mxu3 %vm354_vm1, %v10488_v26 }
 0x170   : > { %v10497_v13 = vpop.f32.mrf.mxu0  ;;  %v1058_v37 = vpop.f32.mrf.mxu2 }
 0x171   : > { %14307 = vst [vmem:[#allocation22_spill] sm:$0xff] %v10497_v13  ;;  %v10499_v42 = vpop.f32.mrf.mxu1  ;;  %v1363_v55 = vpop.f32.mrf.mxu3 }
 0x172   : > { %14308 = vst [vmem:[#allocation23_spill] sm:$0xff] %v10499_v42  ;;  %v10501_v47 = vadd.f32 %v1363_v55, %v1058_v37 }
 0x173   : > { %9012 = vmatmul.msk.f32.gmra.mxu0 %vm354_vm1, %v10503_v40 }
 0x174   : > { %9062 = vmatmul.msk.f32.gmra.mxu1 %vm354_vm1, %v10127_v6  ;;  %v10526_v6 = vld [vmem:[#allocation2 + $0x130] sm:$0xff] }
 0x175   : > { %8939 = vmatmul.msk.f32.gmra.mxu2 %vm354_vm1, %v823_v19 }
 0x176   : > { %8987 = vmatmul.msk.f32.gmra.mxu3 %vm354_vm1, %v10509_v29 }
 0x178   : > { %v10514_v12 = vpop.f32.mrf.mxu0  ;;  %v1061_v37 = vpop.f32.mrf.mxu2 }
 0x179   : > { %14309 = vst [vmem:[#allocation24_spill] sm:$0xff] %v10514_v12  ;;  %v10516_v55 = vpop.f32.mrf.mxu1  ;;  %v1366_v42 = vpop.f32.mrf.mxu3 }
 0x17a   : > { %14310 = vst [vmem:[#allocation25_spill] sm:$0xff] %v10516_v55  ;;  %v10518_v13 = vadd.f32 %v1366_v42, %v1061_v37 }
 0x17b   : > { %9013 = vmatmul.msk.f32.gmra.mxu0 %vm354_vm1, %v10520_v7 }
 0x17c   : > { %9063 = vmatmul.msk.f32.gmra.mxu1 %vm354_vm1, %v10147_v21 }
 0x17d   : > { %8940 = vmatmul.msk.f32.gmra.mxu2 %vm354_vm1, %v824_v56 }
 0x17e   : > { %8988 = vmatmul.msk.f32.gmra.mxu3 %vm354_vm1, %v10526_v6 }
 0x180   : > { %v10531_v19 = vpop.f32.mrf.mxu0  ;;  %v1064_v42 = vpop.f32.mrf.mxu2 }
 0x181   : > { %14311 = vst [vmem:[#allocation26_spill] sm:$0xff] %v10531_v19  ;;  %v10533_v37 = vpop.f32.mrf.mxu1  ;;  %v1369_v55 = vpop.f32.mrf.mxu3  ;;  %v10554_v19 = vld [vmem:[#allocation2 + $0x7a] sm:$0xff] }
 0x182   : > { %14312 = vst [vmem:[#allocation27_spill] sm:$0xff] %v10533_v37  ;;  %v10535_v12 = vadd.f32 %v1369_v55, %v1064_v42 }
 0x183   : > { %9014 = vmatmul.msk.f32.gmra.mxu0 %vm354_vm1, %v10537_v20 }
 0x184   : > { %9064 = vmatmul.msk.f32.gmra.mxu1 %vm354_vm1, %v10167_v36  ;;  %v10560_v36 = vld [vmem:[#allocation2 + $0x140] sm:$0xff] }
 0x185   : > { %8941 = vmatmul.msk.f32.gmra.mxu2 %vm354_vm1, %v825_v41 }
 0x186   : > { %8989 = vmatmul.msk.f32.gmra.mxu3 %vm354_vm1, %v10539_v39 }
 0x188   : > { %v10548_v21 = vpop.f32.mrf.mxu0  ;;  %v1067_v56 = vpop.f32.mrf.mxu2 }
 0x189   : > { %14313 = vst [vmem:[#allocation28_spill] sm:$0xff] %v10548_v21  ;;  %v10550_v55 = vpop.f32.mrf.mxu1  ;;  %v1372_v42 = vpop.f32.mrf.mxu3 }
 0x18a   : > { %14314 = vst [vmem:[#allocation29_spill] sm:$0xff] %v10550_v55  ;;  %v10552_v37 = vadd.f32 %v1372_v42, %v1067_v56 }
 0x18b   : > { %9015 = vmatmul.msk.f32.gmra.mxu0 %vm354_vm1, %v10554_v19 }
 0x18c   : > { %9065 = vmatmul.msk.f32.gmra.mxu1 %vm354_vm1, %v10184_v50  ;;  %v10577_v50 = vld [vmem:[#allocation2 + $0x148] sm:$0xff] }
 0x18d   : > { %8942 = vmatmul.msk.f32.gmra.mxu2 %vm354_vm1, %v826_v30 }
 0x18e   : > { %8990 = vmatmul.msk.f32.gmra.mxu3 %vm354_vm1, %v10560_v36 }
 0x190   : > { %v1070_v41 = vpop.f32.mrf.mxu2  ;;  %v10565_v55 = vpop.f32.mrf.mxu0 }
 0x191   : > { %v1375_v56 = vpop.f32.mrf.mxu3  ;;  %v10567_v42 = vpop.f32.mrf.mxu1 }
 0x192   : > { %v10569_v21 = vadd.f32 %v1375_v56, %v1070_v41 }
 0x193   : > { %9016 = vmatmul.msk.f32.gmra.mxu0 %vm354_vm1, %v10571_v48 }
 0x194   : > { %9066 = vmatmul.msk.f32.gmra.mxu1 %vm354_vm1, %v10207_v8 }
 0x195   : > { %8943 = vmatmul.msk.f32.gmra.mxu2 %vm354_vm1, %v827_v23 }
 0x196   : > { %8991 = vmatmul.msk.f32.gmra.mxu3 %vm354_vm1, %v10577_v50 }
 0x198   : > { %v1073_v30 = vpop.f32.mrf.mxu2  ;;  %v10582_v32 = vpop.f32.mrf.mxu0 }
 0x199   : > { %v1378_v41 = vpop.f32.mrf.mxu3  ;;  %v10584_v56 = vpop.f32.mrf.mxu1 }
 0x19a   : > { %14315 = vst [vmem:[#allocation30_spill] sm:$0xff] %v10584_v56  ;;  %v10586_v15 = vadd.f32 %v1378_v41, %v1073_v30  ;;  %v10605_v56 = vld [vmem:[#allocation2 + $0x92] sm:$0xff] }
 0x19b   : > { %9017 = vmatmul.msk.f32.gmra.mxu0 %vm354_vm1, %v10588_v14 }
 0x19c   : > { %14316 = vst [vmem:[#allocation31_spill] sm:$0xff] %v10586_v15  ;;  %9067 = vmatmul.msk.f32.gmra.mxu1 %vm354_vm1, %v10227_v25  ;;  %v10611_v25 = vld [vmem:[#allocation2 + $0x158] sm:$0xff] }
 0x19d   : > { %8944 = vmatmul.msk.f32.gmra.mxu2 %vm354_vm1, %v828_v10  ;;  %14320 = vst [vmem:[#allocation35_spill] sm:$0xff] %v10611_v25  ;;  %v9148_v10 = vld [vmem:[%s14232_s4 + $0x50] sm:$0xff] }
 0x19e   : > { %8992 = vmatmul.msk.f32.gmra.mxu3 %vm354_vm1, %v10590_v9 }
 0x19f   : > { %2869 = vmatpush.msrb.mxu3 %v9148_v10  ;;  %v9199_v10 = vld [vmem:[%s14232_s4 + $0x68] sm:$0xff] }
 0x1a0   : > { %v1076_v8 = vpop.f32.mrf.mxu2  ;;  %v10599_v23 = vpop.f32.mrf.mxu0  ;;  %3272 = vmatpush.msrb.mxu0 %v9199_v10 }
 0x1a1   : > { %14317 = vst [vmem:[#allocation32_spill] sm:$0xff] %v10599_v23  ;;  %v1381_v30 = vpop.f32.mrf.mxu3  ;;  %v10601_v41 = vpop.f32.mrf.mxu1 }
 0x1a2   : > { %14318 = vst [vmem:[#allocation33_spill] sm:$0xff] %v10601_v41  ;;  %v10603_v15 = vadd.f32 %v1381_v30, %v1076_v8 }
 0x1a3   : > { %9018 = vmatmul.msk.f32.gmra.mxu0 %vm354_vm1, %v10605_v56 }
 0x1a4   : > { %14319 = vst [vmem:[#allocation34_spill] sm:$0xff] %v10603_v15  ;;  %9068 = vmatmul.msk.f32.gmra.mxu1 %vm354_vm1, %v10256_v45  ;;  %v10625_v45 = vld [vmem:[#allocation2 + $0x9a] sm:$0xff] }
 0x1a5   : > { %8945 = vmatmul.msk.f32.gmra.mxu2 %vm354_vm1, %v829_v0  ;;  %v10631_v0 = vld [vmem:[#allocation2 + $0x160] sm:$0xff] }
 0x1a6   : > { %8993 = vmatmul.msk.f32.gmra.mxu3 %vm354_vm1, %v10611_v25  ;;  %14324 = vst [vmem:[#allocation39_spill] sm:$0xff] %v10631_v0  ;;  %v10650_v25 = vld [vmem:[#allocation2 + $0x168] sm:$0xff] }
 0x1a7   : > { %14328 = vst [vmem:[#allocation43_spill] sm:$0xff] %v10650_v25 }
 0x1a8   : > { %v1079_v8 = vpop.f32.mrf.mxu2  ;;  %v10619_v30 = vpop.f32.mrf.mxu0 }
 0x1a9   : > { %14321 = vst [vmem:[#allocation36_spill] sm:$0xff] %v10619_v30  ;;  %v1384_v15 = vpop.f32.mrf.mxu3  ;;  %v10621_v41 = vpop.f32.mrf.mxu1  ;;  %v10648_v30 = vld [vmem:[#allocation2 + $0xa2] sm:$0xff] }
 0x1aa   : > { %14322 = vst [vmem:[#allocation37_spill] sm:$0xff] %v10621_v41  ;;  %v10623_v23 = vadd.f32 %v1384_v15, %v1079_v8  ;;  %v9299_v15 = vld [vmem:[%s14232_s4 + $0x88] sm:$0xff] }
 0x1ab   : > { %9019 = vmatmul.msk.f32.gmra.mxu0 %vm354_vm1, %v10625_v45  ;;  %4080 = vmatpush.msra.mxu2 %v9299_v15  ;;  %v9249_v15 = vld [vmem:[%s14232_s4 + $0x78] sm:$0xff] }
 0x1ac   : > { %14323 = vst [vmem:[#allocation38_spill] sm:$0xff] %v10623_v23  ;;  %9069 = vmatmul.msk.f32.gmra.mxu1 %vm354_vm1, %v10275_v1 }
 0x1ad   : > { %8946 = vmatmul.msk.f32.gmra.mxu2 %vm354_vm1, %v830_v51  ;;  %3676 = vmatpush.msrb.mxu1 %v9249_v15 }
 0x1ae   : > { %8994 = vmatmul.msk.f32.gmra.mxu3 %vm354_vm1, %v10631_v0  ;;  %v831_v0 = vld [vmem:[#allocation2 + $0x169] sm:$0xff] }
 0x1b0   : > { %v1082_v8 = vpop.f32.mrf.mxu2  ;;  %v10642_v23 = vpop.f32.mrf.mxu0 }
 0x1b1   : > { %14325 = vst [vmem:[#allocation40_spill] sm:$0xff] %v10642_v23  ;;  %v1387_v1 = vpop.f32.mrf.mxu3  ;;  %v10644_v41 = vpop.f32.mrf.mxu1  ;;  %v10668_v23 = vld [vmem:[#allocation2 + $0xaa] sm:$0xff] }
 0x1b2   : > { %14326 = vst [vmem:[#allocation41_spill] sm:$0xff] %v10644_v41  ;;  %v10646_v51 = vadd.f32 %v1387_v1, %v1082_v8 }
 0x1b3   : > { %9020 = vmatmul.msk.f32.gmra.mxu0 %vm354_vm1, %v10648_v30 }
 0x1b4   : > { %14327 = vst [vmem:[#allocation42_spill] sm:$0xff] %v10646_v51  ;;  %9070 = vmatmul.msk.f32.gmra.mxu1 %vm354_vm1, %v10289_v18  ;;  %v832_v18 = vld [vmem:[#allocation2 + $0x171] sm:$0xff] }
 0x1b5   : > { %8947 = vmatmul.msk.f32.gmra.mxu2 %vm354_vm1, %v831_v0  ;;  %v10674_v0 = vld [vmem:[#allocation2 + $0x170] sm:$0xff] }
 0x1b6   : > { %8995 = vmatmul.msk.f32.gmra.mxu3 %vm354_vm1, %v10650_v25  ;;  %v833_v25 = vld [vmem:[#allocation2 + $0x179] sm:$0xff] }
 0x1b8   : > { %v1085_v10 = vpop.f32.mrf.mxu2  ;;  %v10662_v8 = vpop.f32.mrf.mxu0 }
 0x1b9   : > { %14329 = vst [vmem:[#allocation44_spill] sm:$0xff] %v10662_v8  ;;  %v1390_v1 = vpop.f32.mrf.mxu3  ;;  %v10664_v51 = vpop.f32.mrf.mxu1  ;;  %v10685_v8 = vld [vmem:[#allocation2 + $0xb2] sm:$0xff] }
 0x1ba   : > { %14330 = vst [vmem:[#allocation45_spill] sm:$0xff] %v10664_v51  ;;  %v10666_v41 = vadd.f32 %v1390_v1, %v1085_v10 }
 0x1bb   : > { %9021 = vmatmul.msk.f32.gmra.mxu0 %vm354_vm1, %v10668_v23 }
 0x1bc   : > { %14331 = vst [vmem:[#allocation46_spill] sm:$0xff] %v10666_v41  ;;  %9071 = vmatmul.msk.f32.gmra.mxu1 %vm354_vm1, %v10300_v31  ;;  %v10691_v31 = vld [vmem:[#allocation2 + $0x178] sm:$0xff] }
 0x1bd   : > { %8948 = vmatmul.msk.f32.gmra.mxu2 %vm354_vm1, %v832_v18 }
 0x1be   : > { %8996 = vmatmul.msk.f32.gmra.mxu3 %vm354_vm1, %v10674_v0 }
 0x1c0   : > { %v1088_v15 = vpop.f32.mrf.mxu2  ;;  %v10679_v51 = vpop.f32.mrf.mxu0 }
 0x1c1   : > { %14332 = vst [vmem:[#allocation47_spill] sm:$0xff] %v10679_v51  ;;  %v1393_v10 = vpop.f32.mrf.mxu3  ;;  %v10681_v1 = vpop.f32.mrf.mxu1  ;;  %v10702_v51 = vld [vmem:[#allocation2 + $0xba] sm:$0xff] }
 0x1c2   : > { %14333 = vst [vmem:[#allocation48_spill] sm:$0xff] %v10681_v1  ;;  %v10683_v41 = vadd.f32 %v1393_v10, %v1088_v15 }
 0x1c3   : > { %9022 = vmatmul.msk.f32.gmra.mxu0 %vm354_vm1, %v10685_v8 }
 0x1c4   : > { %14334 = vst [vmem:[#allocation49_spill] sm:$0xff] %v10683_v41  ;;  %9072 = vmatmul.msk.f32.gmra.mxu1 %vm354_vm1, %v10315_v54  ;;  %v2255_v54 = vld [vmem:[#allocation2 + $0x19] sm:$0xff] }
 0x1c5   : > { %8949 = vmatmul.msk.f32.gmra.mxu2 %vm354_vm1, %v833_v25 }
 0x1c6   : > { %8997 = vmatmul.msk.f32.gmra.mxu3 %vm354_vm1, %v10691_v31 }
 0x1c8   : > { %v1091_v18 = vpop.f32.mrf.mxu2  ;;  %v10696_v1 = vpop.f32.mrf.mxu0 }
 0x1c9   : > { %14335 = vst [vmem:[#allocation50_spill] sm:$0xff] %v10696_v1  ;;  %v1396_v15 = vpop.f32.mrf.mxu3  ;;  %v10698_v10 = vpop.f32.mrf.mxu1 }
 0x1ca   : > { %14336 = vst [vmem:[#allocation51_spill] sm:$0xff] %v10698_v10  ;;  %v10700_v41 = vadd.f32 %v1396_v15, %v1091_v18 }
 0x1cb   : > { %9023 = vmatmul.msk.f32.gmra.mxu0 %vm354_vm1, %v10702_v51 }
 0x1cc   : > { %14337 = vst [vmem:[#allocation52_spill] sm:$0xff] %v10700_v41  ;;  %9073 = vmatmul.msk.f32.gmra.mxu1 %vm354_vm1, %v10329_v38  ;;  %v10717_v41 = vld [vmem:[#allocation2 + $0xc2] sm:$0xff] }
 0x1cd   : > { %9100 = vmatmul.msk.f32.vlgmr.msrb.gmra.mxu2 %vm354_vm1, %v2255_v54  ;;  %v2256_v38 = vld [vmem:[#allocation2 + $0x21] sm:$0xff] }
 0x1ce   : > { %9150 = vmatmul.msk.f32.vlgmr.msrb.gmra.mxu3 %vm354_vm1, %v10353_v4 }
 0x1d0   : > { %v1094_v25 = vpop.f32.mrf.mxu2  ;;  %v10711_v1 = vpop.f32.mrf.mxu0 }
 0x1d1   : > { %14338 = vst [vmem:[#allocation53_spill] sm:$0xff] %v10711_v1  ;;  %v1399_v10 = vpop.f32.mrf.mxu3  ;;  %v10713_v18 = vpop.f32.mrf.mxu1  ;;  %v2257_v1 = vld [vmem:[#allocation2 + $0x29] sm:$0xff] }
 0x1d2   : > { %14339 = vst [vmem:[#allocation54_spill] sm:$0xff] %v10713_v18  ;;  %v10715_v15 = vadd.f32 %v1399_v10, %v1094_v25 }
 0x1d3   : > { %9024 = vmatmul.msk.f32.gmra.mxu0 %vm354_vm1, %v10717_v41 }
 0x1d4   : > { %14340 = vst [vmem:[#allocation55_spill] sm:$0xff] %v10715_v15  ;;  %9074 = vmatmul.msk.f32.gmra.mxu1 %vm354_vm1, %v10341_v63  ;;  %v10732_v15 = vld [vmem:[#allocation2 + $0xca] sm:$0xff] }
 0x1d5   : > { %9101 = vmatmul.msk.f32.gmra.mxu2 %vm354_vm1, %v2256_v38 }
 0x1d6   : > { %9151 = vmatmul.msk.f32.gmra.mxu3 %vm354_vm1, %v10371_v11 }
 0x1d8   : > { %v1097_v4 = vpop.f32.mrf.mxu2  ;;  %v10726_v54 = vpop.f32.mrf.mxu0 }
 0x1d9   : > { %v1402_v18 = vpop.f32.mrf.mxu3  ;;  %v10728_v10 = vpop.f32.mrf.mxu1 }
 0x1da   : > { %v10730_v25 = vadd.f32 %v1402_v18, %v1097_v4 }
 0x1db   : > { %9025 = vmatmul.msk.f32.gmra.mxu0 %vm354_vm1, %v10732_v15 }
 0x1dc   : > { %14341 = vst [vmem:[#allocation56_spill] sm:$0xff] %v10730_v25  ;;  %9075 = vmatmul.msk.f32.gmra.mxu1 %vm354_vm1, %v10362_v2  ;;  %v10747_v25 = vld [vmem:[#allocation2 + $0xd2] sm:$0xff] }
 0x1dd   : > { %9102 = vmatmul.msk.f32.gmra.mxu2 %vm354_vm1, %v2257_v1  ;;  %v10753_v2 = vld [vmem:[#allocation2 + $0x31] sm:$0xff] }
 0x1de   : > { %9152 = vmatmul.msk.f32.gmra.mxu3 %vm354_vm1, %v10386_v16 }
 0x1e0   : > { %v1100_v63 = vpop.f32.mrf.mxu2  ;;  %v10741_v11 = vpop.f32.mrf.mxu0 }
 0x1e1   : > { %14342 = vst [vmem:[#allocation57_spill] sm:$0xff] %v10741_v11  ;;  %v1405_v38 = vpop.f32.mrf.mxu3  ;;  %v10743_v18 = vpop.f32.mrf.mxu1  ;;  %v10785_v11 = vld [vmem:[#allocation2 + $0x41] sm:$0xff] }
 0x1e2   : > { %14343 = vst [vmem:[#allocation58_spill] sm:$0xff] %v10743_v18  ;;  %v10745_v4 = vadd.f32 %v1405_v38, %v1100_v63  ;;  %v10765_v18 = vld [vmem:[#allocation2 + $0xda] sm:$0xff] }
 0x1e3   : > { %9026 = vmatmul.msk.f32.gmra.mxu0 %vm354_vm1, %v10747_v25 }
 0x1e4   : > { %14344 = vst [vmem:[#allocation59_spill] sm:$0xff] %v10745_v4  ;;  %9076 = vmatmul.msk.f32.gmra.mxu1 %vm354_vm1, %v10377_v17  ;;  %v10771_v17 = vld [vmem:[#allocation2 + $0x39] sm:$0xff] }
 0x1e5   : > { %9103 = vmatmul.msk.f32.gmra.mxu2 %vm354_vm1, %v10753_v2 }
 0x1e6   : > { %9153 = vmatmul.msk.f32.gmra.mxu3 %vm354_vm1, %v10401_v24 }
 0x1e8   : > { %v1103_v16 = vpop.f32.mrf.mxu2  ;;  %v10759_v1 = vpop.f32.mrf.mxu0 }
 0x1e9   : > { %14345 = vst [vmem:[#allocation60_spill] sm:$0xff] %v10759_v1  ;;  %v1408_v63 = vpop.f32.mrf.mxu3  ;;  %v10761_v38 = vpop.f32.mrf.mxu1  ;;  %v10783_v1 = vld [vmem:[#allocation2 + $0xe2] sm:$0xff] }
 0x1ea   : > { %14346 = vst [vmem:[#allocation61_spill] sm:$0xff] %v10761_v38  ;;  %v10763_v4 = vadd.f32 %v1408_v63, %v1103_v16 }
 0x1eb   : > { %9027 = vmatmul.msk.f32.gmra.mxu0 %vm354_vm1, %v10765_v18 }
 0x1ec   : > { %14347 = vst [vmem:[#allocation62_spill] sm:$0xff] %v10763_v4  ;;  %9077 = vmatmul.msk.f32.gmra.mxu1 %vm354_vm1, %v10388_v22 }
 0x1ed   : > { %9104 = vmatmul.msk.f32.gmra.mxu2 %vm354_vm1, %v10771_v17 }
 0x1ee   : > { %9154 = vmatmul.msk.f32.gmra.mxu3 %vm354_vm1, %v10418_v35 }
 0x1f0   : > { %v1106_v24 = vpop.f32.mrf.mxu2  ;;  %v10777_v38 = vpop.f32.mrf.mxu0 }
 0x1f1   : > { %14348 = vst [vmem:[#allocation63_spill] sm:$0xff] %v10777_v38  ;;  %v1411_v16 = vpop.f32.mrf.mxu3  ;;  %v10779_v63 = vpop.f32.mrf.mxu1  ;;  %v10836_v38 = vld [vmem:[#allocation2 + $0x59] sm:$0xff] }
 0x1f2   : > { %14349 = vst [vmem:[#allocation64_spill] sm:$0xff] %v10779_v63  ;;  %v10781_v4 = vadd.f32 %v1411_v16, %v1106_v24  ;;  %v10801_v63 = vld [vmem:[#allocation2 + $0xea] sm:$0xff] }
 0x1f3   : > { %9028 = vmatmul.msk.f32.gmra.mxu0 %vm354_vm1, %v10783_v1 }
 0x1f4   : > { %14350 = vst [vmem:[#allocation65_spill] sm:$0xff] %v10781_v4  ;;  %9078 = vmatmul.msk.f32.gmra.mxu1 %vm354_vm1, %v10407_v27  ;;  %v10807_v27 = vld [vmem:[#allocation2 + $0x49] sm:$0xff] }
 0x1f5   : > { %9105 = vmatmul.msk.f32.gmra.mxu2 %vm354_vm1, %v10785_v11  ;;  %14354 = vst [vmem:[#allocation69_spill] sm:$0xff] %v10807_v27 }
 0x1f6   : > { %9155 = vmatmul.msk.f32.gmra.mxu3 %vm354_vm1, %v10435_v46 }
 0x1f8   : > { %v1109_v22 = vpop.f32.mrf.mxu2  ;;  %v10795_v35 = vpop.f32.mrf.mxu0 }
 0x1f9   : > { %14351 = vst [vmem:[#allocation66_spill] sm:$0xff] %v10795_v35  ;;  %v1414_v24 = vpop.f32.mrf.mxu3  ;;  %v10797_v16 = vpop.f32.mrf.mxu1  ;;  %v10819_v35 = vld [vmem:[#allocation2 + $0xf2] sm:$0xff] }
 0x1fa   : > { %14352 = vst [vmem:[#allocation67_spill] sm:$0xff] %v10797_v16  ;;  %v10799_v4 = vadd.f32 %v1414_v24, %v1109_v22 }
 0x1fb   : > { %9029 = vmatmul.msk.f32.gmra.mxu0 %vm354_vm1, %v10801_v63 }
 0x1fc   : > { %14353 = vst [vmem:[#allocation68_spill] sm:$0xff] %v10799_v4  ;;  %9079 = vmatmul.msk.f32.gmra.mxu1 %vm354_vm1, %v10424_v3  ;;  %v10825_v3 = vld [vmem:[#allocation2 + $0x51] sm:$0xff] }
 0x1fd   : > { %9106 = vmatmul.msk.f32.gmra.mxu2 %vm354_vm1, %v10807_v27  ;;  %v10834_v27 = vld [vmem:[#allocation2 + $0xfa] sm:$0xff] }
 0x1fe   : > { %9156 = vmatmul.msk.f32.gmra.mxu3 %vm354_vm1, %v10452_v62 }
 0x200   : > { %v1112_v46 = vpop.f32.mrf.mxu2  ;;  %v10813_v16 = vpop.f32.mrf.mxu0 }
 0x201   : > { %14355 = vst [vmem:[#allocation70_spill] sm:$0xff] %v10813_v16  ;;  %v1417_v22 = vpop.f32.mrf.mxu3  ;;  %v10815_v24 = vpop.f32.mrf.mxu1 }
 0x202   : > { %14356 = vst [vmem:[#allocation71_spill] sm:$0xff] %v10815_v24  ;;  %v10817_v4 = vadd.f32 %v1417_v22, %v1112_v46 }
 0x203   : > { %9030 = vmatmul.msk.f32.gmra.mxu0 %vm354_vm1, %v10819_v35 }
 0x204   : > { %14357 = vst [vmem:[#allocation72_spill] sm:$0xff] %v10817_v4  ;;  %9080 = vmatmul.msk.f32.gmra.mxu1 %vm354_vm1, %v10437_v49 }
 0x205   : > { %9107 = vmatmul.msk.f32.gmra.mxu2 %vm354_vm1, %v10825_v3 }
 0x206   : > { %9157 = vmatmul.msk.f32.gmra.mxu3 %vm354_vm1, %v10469_v33 }
 0x208   : > { %v1115_v62 = vpop.f32.mrf.mxu2  ;;  %v1704_v24 = vpop.f32.mrf.mxu0 }
 0x209   : > { %v1420_v46 = vpop.f32.mrf.mxu3  ;;  %v1818_v22 = vadd.f32 %v1704_v24, %v10416_v34  ;;  %v2108_v4 = vpop.f32.mrf.mxu1 }
 0x20a   : > { %v10832_v16 = vadd.f32 %v1420_v46, %v1115_v62 }
 0x20b   : > { %v10838_v49 = vadd.f32 %v2108_v4, %v1818_v22  ;;  %9031 = vmatmul.msk.f32.gmra.mxu0 %vm354_vm1, %v10834_v27  ;;  %v10851_v22 = vld [vmem:[#allocation2 + $0x102] sm:$0xff] }
 0x20c   : > { %9081 = vmatmul.msk.f32.gmra.mxu1 %vm354_vm1, %v10458_v43  ;;  %v10859_v43 = vld [vmem:[#allocation2 + $0x61] sm:$0xff] }
 0x20d   : > { %14358 = vst [vmem:[#allocation73_spill] sm:$0xff] %v10838_v49  ;;  %9108 = vmatmul.msk.f32.gmra.mxu2 %vm354_vm1, %v10836_v38 }
 0x20e   : > { %9158 = vmatmul.msk.f32.gmra.mxu3 %vm354_vm1, %v10486_v5 }
 0x210   : > { %v1118_v34 = vpop.f32.mrf.mxu2  ;;  %v1707_v33 = vpop.f32.mrf.mxu0 }
 0x211   : > { %v1423_v24 = vpop.f32.mrf.mxu3  ;;  %v1819_v62 = vadd.f32 %v1707_v33, %v10433_v44  ;;  %v2111_v46 = vpop.f32.mrf.mxu1 }
 0x212   : > { %v10849_v4 = vadd.f32 %v1423_v24, %v1118_v34 }
 0x213   : > { %v10853_v49 = vadd.f32 %v2111_v46, %v1819_v62  ;;  %9032 = vmatmul.msk.f32.gmra.mxu0 %vm354_vm1, %v10851_v22  ;;  %v10868_v46 = vld [vmem:[#allocation2 + $0x10a] sm:$0xff] }
 0x214   : > { %9082 = vmatmul.msk.f32.gmra.mxu1 %vm354_vm1, %v10475_v61  ;;  %v10876_v61 = vld [vmem:[#allocation2 + $0x69] sm:$0xff] }
 0x215   : > { %14359 = vst [vmem:[#allocation74_spill] sm:$0xff] %v10853_v49  ;;  %9109 = vmatmul.msk.f32.gmra.mxu2 %vm354_vm1, %v10859_v43 }
 0x216   : > { %9159 = vmatmul.msk.f32.gmra.mxu3 %vm354_vm1, %v10503_v40 }
 0x218   : > { %v1121_v44 = vpop.f32.mrf.mxu2  ;;  %v1710_v5 = vpop.f32.mrf.mxu0 }
 0x219   : > { %v1426_v34 = vpop.f32.mrf.mxu3  ;;  %v1820_v33 = vadd.f32 %v1710_v5, %v10450_v60  ;;  %v2114_v24 = vpop.f32.mrf.mxu1 }
 0x21a   : > { %v10866_v62 = vadd.f32 %v1426_v34, %v1121_v44 }
 0x21b   : > { %v10870_v49 = vadd.f32 %v2114_v24, %v1820_v33  ;;  %9033 = vmatmul.msk.f32.gmra.mxu0 %vm354_vm1, %v10868_v46  ;;  %v10885_v24 = vld [vmem:[#allocation2 + $0x112] sm:$0xff] }
 0x21c   : > { %9083 = vmatmul.msk.f32.gmra.mxu1 %vm354_vm1, %v10488_v26 }
 0x21d   : > { %14360 = vst [vmem:[#allocation75_spill] sm:$0xff] %v10870_v49  ;;  %9110 = vmatmul.msk.f32.gmra.mxu2 %vm354_vm1, %v10876_v61  ;;  %v10887_v49 = vld [vmem:[#allocation2 + $0x71] sm:$0xff] }
 0x21e   : > { %9160 = vmatmul.msk.f32.gmra.mxu3 %vm354_vm1, %v10520_v7 }
 0x220   : > { %v1124_v60 = vpop.f32.mrf.mxu2  ;;  %v1713_v40 = vpop.f32.mrf.mxu0 }
 0x221   : > { %v1429_v44 = vpop.f32.mrf.mxu3  ;;  %v1821_v5 = vadd.f32 %v1713_v40, %v10467_v28  ;;  %v2117_v34 = vpop.f32.mrf.mxu1 }
 0x222   : > { %v10883_v33 = vadd.f32 %v1429_v44, %v1124_v60 }
 0x223   : > { %v10889_v26 = vadd.f32 %v2117_v34, %v1821_v5  ;;  %9034 = vmatmul.msk.f32.gmra.mxu0 %vm354_vm1, %v10885_v24  ;;  %v10902_v34 = vld [vmem:[#allocation2 + $0x11a] sm:$0xff] }
 0x224   : > { %9084 = vmatmul.msk.f32.gmra.mxu1 %vm354_vm1, %v10509_v29  ;;  %v10913_v29 = vld [vmem:[#allocation2 + $0x79] sm:$0xff] }
 0x225   : > { %14361 = vst [vmem:[#allocation76_spill] sm:$0xff] %v10889_v26  ;;  %9111 = vmatmul.msk.f32.gmra.mxu2 %vm354_vm1, %v10887_v49 }
 0x226   : > { %9161 = vmatmul.msk.f32.gmra.mxu3 %vm354_vm1, %v10537_v20  ;;  %v9351_v20 = vld [vmem:[%s14232_s4 + $0xa8] sm:$0xff] }
 0x227   : > { %5019 = vmatpush.msra.mxu3 %v9351_v20  ;;  %v10930_v20 = vld [vmem:[#allocation2 + $0x81] sm:$0xff] }
 0x228   : > { %v1127_v7 = vpop.f32.mrf.mxu2  ;;  %v1716_v28 = vpop.f32.mrf.mxu0 }
 0x229   : > { %v1432_v60 = vpop.f32.mrf.mxu3  ;;  %v1822_v40 = vadd.f32 %v1716_v28, %v10484_v59  ;;  %v2120_v44 = vpop.f32.mrf.mxu1 }
 0x22a   : > { %v10900_v5 = vadd.f32 %v1432_v60, %v1127_v7 }
 0x22b   : > { %v10904_v26 = vadd.f32 %v2120_v44, %v1822_v40  ;;  %9035 = vmatmul.msk.f32.gmra.mxu0 %vm354_vm1, %v10902_v34  ;;  %v10922_v44 = vld [vmem:[#allocation2 + $0x122] sm:$0xff] }
 0x22c   : > { %9085 = vmatmul.msk.f32.gmra.mxu1 %vm354_vm1, %v10526_v6 }
 0x22d   : > { %14362 = vst [vmem:[#allocation77_spill] sm:$0xff] %v10904_v26  ;;  %9112 = vmatmul.msk.f32.gmra.mxu2 %vm354_vm1, %v10913_v29 }
 0x22e   : > { %9162 = vmatmul.msk.f32.gmra.mxu3 %vm354_vm1, %v10554_v19 }
 0x230   : > { %v1130_v59 = vpop.f32.mrf.mxu2  ;;  %v1719_v7 = vpop.f32.mrf.mxu0 }
 0x231   : > { %v1435_v28 = vpop.f32.mrf.mxu3  ;;  %v1823_v60 = vadd.f32 %v1719_v7, %v10501_v47  ;;  %v2123_v40 = vpop.f32.mrf.mxu1 }
 0x232   : > { %v10920_v6 = vadd.f32 %v1435_v28, %v1130_v59 }
 0x233   : > { %v10924_v26 = vadd.f32 %v2123_v40, %v1823_v60  ;;  %9036 = vmatmul.msk.f32.gmra.mxu0 %vm354_vm1, %v10922_v44  ;;  %v10939_v40 = vld [vmem:[#allocation2 + $0x12a] sm:$0xff] }
 0x234   : > { %9086 = vmatmul.msk.f32.gmra.mxu1 %vm354_vm1, %v10539_v39 }
 0x235   : > { %14363 = vst [vmem:[#allocation78_spill] sm:$0xff] %v10924_v26  ;;  %9113 = vmatmul.msk.f32.gmra.mxu2 %vm354_vm1, %v10930_v20  ;;  %v10941_v26 = vld [vmem:[#allocation2 + $0x89] sm:$0xff] }
 0x236   : > { %9163 = vmatmul.msk.f32.gmra.mxu3 %vm354_vm1, %v10571_v48 }
 0x238   : > { %v1133_v47 = vpop.f32.mrf.mxu2  ;;  %v1722_v19 = vpop.f32.mrf.mxu0 }
 0x239   : > { %v1438_v59 = vpop.f32.mrf.mxu3  ;;  %v1824_v7 = vadd.f32 %v1722_v19, %v10518_v13  ;;  %v2126_v28 = vpop.f32.mrf.mxu1 }
 0x23a   : > { %v10937_v60 = vadd.f32 %v1438_v59, %v1133_v47 }
 0x23b   : > { %v10943_v39 = vadd.f32 %v2126_v28, %v1824_v7  ;;  %9037 = vmatmul.msk.f32.gmra.mxu0 %vm354_vm1, %v10939_v40  ;;  %v10956_v28 = vld [vmem:[#allocation2 + $0x132] sm:$0xff] }
 0x23c   : > { %14364 = vst [vmem:[#allocation79_spill] sm:$0xff] %v10937_v60  ;;  %9087 = vmatmul.msk.f32.gmra.mxu1 %vm354_vm1, %v10560_v36  ;;  %v10964_v36 = vld [vmem:[#allocation2 + $0x91] sm:$0xff] }
 0x23d   : > { %14365 = vst [vmem:[#allocation80_spill] sm:$0xff] %v10943_v39  ;;  %9114 = vmatmul.msk.f32.gmra.mxu2 %vm354_vm1, %v10941_v26 }
 0x23e   : > { %9164 = vmatmul.msk.f32.gmra.mxu3 %vm354_vm1, %v10588_v14  ;;  %v1304_v14 = vadd.f32 %v10324_v53, %v10322_v52  ;;  %v10987_v52 = vld [vmem:[%s14234_s6] sm:$0xff] }
 0x23f   : > { %v10989_v53 = vld [vmem:[#allocation2 + $0x99] sm:$0xff] }
 0x240   : > { %v1136_v48 = vpop.f32.mrf.mxu2  ;;  %v1725_v13 = vpop.f32.mrf.mxu0  ;;  %14370 = vst [vmem:[#allocation85_spill] sm:$0xff] %v10989_v53 }
 0x241   : > { %v1441_v47 = vpop.f32.mrf.mxu3  ;;  %v1825_v19 = vadd.f32 %v1725_v13, %v10535_v12  ;;  %v2129_v59 = vpop.f32.mrf.mxu1 }
 0x242   : > { %v10954_v7 = vadd.f32 %v1441_v47, %v1136_v48 }
 0x243   : > { %v10958_v39 = vadd.f32 %v2129_v59, %v1825_v19  ;;  %9038 = vmatmul.msk.f32.gmra.mxu0 %vm354_vm1, %v10956_v28 }
 0x244   : > { %14366 = vst [vmem:[#allocation81_spill] sm:$0xff] %v10954_v7  ;;  %9088 = vmatmul.msk.f32.gmra.mxu1 %vm354_vm1, %v10577_v50  ;;  %v10975_v50 = vld [vmem:[#allocation2 + $0x13a] sm:$0xff] }
 0x245   : > { %14367 = vst [vmem:[#allocation82_spill] sm:$0xff] %v10958_v39  ;;  %9115 = vmatmul.msk.f32.gmra.mxu2 %vm354_vm1, %v10964_v36  ;;  %v1803_v39 = vadd.f32 %v10565_v55, %v1304_v14 }
 0x246   : > { %9165 = vmatmul.msk.f32.gmra.mxu3 %vm354_vm1, %v10605_v56 }
 0x247   : > { %v2207_v55 = vadd.f32 %v10567_v42, %v1803_v39  ;;  %v14377_v39 = vld [vmem:[#allocation30_spill] sm:$0xff] }
 0x248   : > { %v1139_v12 = vpop.f32.mrf.mxu2  ;;  %v1728_v48 = vpop.f32.mrf.mxu0 }
 0x249   : > { %v1444_v13 = vpop.f32.mrf.mxu3  ;;  %v1826_v47 = vadd.f32 %v1728_v48, %v10552_v37  ;;  %v2132_v19 = vpop.f32.mrf.mxu1  ;;  %v9835_v37 = vmov 0  }
 0x24a   : > { %v10973_v59 = vadd.f32 %v1444_v13, %v1139_v12  ;;  %9818 = vset.pattern.permute.xlu0 %v9835_v37  ;;  %9819 = vset.pattern.permute.xlu1 %v9835_v37 }
 0x24b   : > { %v10978_v7 = vadd.f32 %v2132_v19, %v1826_v47  ;;  %9039 = vmatmul.msk.f32.gmra.mxu0 %vm354_vm1, %v10975_v50  ;;  %4425 = vperm.xlu0 %9818, %v10987_v52   ;;  %v11000_v19 = vld [vmem:[#allocation2 + $0x142] sm:$0xff] }
 0x24c   : > { %14368 = vst [vmem:[#allocation83_spill] sm:$0xff] %v10973_v59  ;;  %9089 = vmatmul.msk.f32.gmra.mxu1 %vm354_vm1, %v10590_v9  ;;  %9820 = vset.pattern.permute.xlu2 %v9835_v37  ;;  %v1307_v9 = vadd.f32 %v10336_v58, %v10334_v57  ;;  %v14374_v57 = vld [vmem:[#allocation35_spill] sm:$0xff] }
 0x24d   : > { %14369 = vst [vmem:[#allocation84_spill] sm:$0xff] %v10978_v7  ;;  %9116 = vmatmul.msk.f32.gmra.mxu2 %vm354_vm1, %v10989_v53  ;;  %v11002_v7 = vld [vmem:[#allocation2 + $0xa1] sm:$0xff] }
 0x24e   : > { %9166 = vmatmul.msk.f32.gmra.mxu3 %vm354_vm1, %v10625_v45  ;;  %14371 = vst [vmem:[#allocation86_spill] sm:$0xff] %v11002_v7  ;;  %v1804_v45 = vadd.f32 %v10582_v32, %v1307_v9  ;;  %v11016_v58 = vld [vmem:[%s14234_s6 + $0x8] sm:$0xff]  ;;  %v14375_v32 = vld [vmem:[#allocation4_spill] sm:$0xff] }
 0x250   : > { %v1731_v56 = vpop.f32.mrf.mxu0  ;;  %v2467_v14 = vpop.f32.mrf.mxu2  ;;  %v2208_v9 = vadd.f32 %v14377_v39, %v1804_v45  ;;  %v11041_v45 = vld [vmem:[%s14234_s6 + $0x10] sm:$0xff] }
 0x251   : > { %v1827_v12 = vadd.f32 %v1731_v56, %v10569_v21  ;;  %v2135_v48 = vpop.f32.mrf.mxu1  ;;  %v2611_v13 = vadd.f32 %v2467_v14, %v2207_v55  ;;  %v2871_v47 = vpop.f32.mrf.mxu3  ;;  %v14376_v21 = vld [vmem:[#allocation5_spill] sm:$0xff]  ;;  %v14378_v14 = vld [vmem:[#allocation31_spill] sm:$0xff]  ;;  %14384 = vst [vmem:[#allocation30_spill] sm:$0xff] %v11041_v45  ;;  %4435 = vperm.xlu1 %9819, %v11041_v45  }
 0x252   : > { %v1310_v42 = vadd.f32 %v14376_v21, %v14375_v32  ;;  %v14383_v32 = vld [vmem:[#allocation39_spill] sm:$0xff]  ;;  %v11046_v21 = vld [vmem:[%s14234_s6 + $0x30] sm:$0xff] }
 0x253   : > { %v11005_v59 = vadd.f32 %v2135_v48, %v1827_v12  ;;  %v11007_v37 = vadd.f32 %v2871_v47, %v2611_v13  ;;  %9040 = vmatmul.msk.f32.gmra.mxu0 %vm354_vm1, %v11000_v19  ;;  %4430 = vperm.xlu0 %9818, %v11016_v58  }
 0x254   : > { %9090 = vmatmul.msk.f32.gmra.mxu1 %vm354_vm1, %v14374_v57  ;;  %v11027_v57 = vld [vmem:[#allocation2 + $0x14a] sm:$0xff] }
 0x255   : > { %14372 = vst [vmem:[#allocation87_spill] sm:$0xff] %v11005_v59  ;;  %9117 = vmatmul.msk.f32.gmra.mxu2 %vm354_vm1, %v11002_v7 }
 0x256   : > { %14373 = vst [vmem:[#allocation88_spill] sm:$0xff] %v11007_v37  ;;  %9167 = vmatmul.msk.f32.gmra.mxu3 %vm354_vm1, %v10648_v30  ;;  %v14380_v37 = vld [vmem:[#allocation32_spill] sm:$0xff] }
 0x257   : > { %14379 = vst [vmem:[#allocation35_spill] sm:$0xff] %v11027_v57  ;;  %v1805_v59 = vadd.f32 %v14380_v37, %v1310_v42  ;;  %v11048_v37 = vld [vmem:[#allocation2 + $0xa9] sm:$0xff]  ;;  %v14386_v42 = vld [vmem:[#allocation33_spill] sm:$0xff] }
 0x258   : > { %v1734_v55 = vpop.f32.mrf.mxu0  ;;  %v2470_v56 = vpop.f32.mrf.mxu2  ;;  %14385 = vst [vmem:[#allocation31_spill] sm:$0xff] %v11048_v37 }
 0x259   : > { %v1828_v12 = vadd.f32 %v1734_v55, %v14378_v14  ;;  %v2138_v48 = vpop.f32.mrf.mxu1  ;;  %v2612_v13 = vadd.f32 %v2470_v56, %v2208_v9  ;;  %v2874_v47 = vpop.f32.mrf.mxu3  ;;  %v2209_v39 = vadd.f32 %v14386_v42, %v1805_v59  ;;  %v14387_v56 = vld [vmem:[#allocation6_spill] sm:$0xff]  ;;  %v14388_v14 = vld [vmem:[#allocation7_spill] sm:$0xff]  ;;  %v11074_v42 = vld [vmem:[%s14234_s6 + $0x18] sm:$0xff] }
 0x25a   : > { %v14394_v59 = vld [vmem:[#allocation43_spill] sm:$0xff]  ;;  %4440 = vperm.xlu1 %9819, %v11074_v42  }
 0x25b   : > { %v11030_v7 = vadd.f32 %v2138_v48, %v1828_v12  ;;  %v11032_v30 = vadd.f32 %v2874_v47, %v2612_v13  ;;  %9041 = vmatmul.msk.f32.gmra.mxu0 %vm354_vm1, %v11027_v57  ;;  %4455 = vperm.xlu0 %9818, %v11046_v21   ;;  %v1313_v12 = vadd.f32 %v14388_v14, %v14387_v56  ;;  %v14389_v48 = vld [vmem:[#allocation34_spill] sm:$0xff]  ;;  %v14397_v14 = vld [vmem:[#allocation8_spill] sm:$0xff] }
 0x25c   : > { %9091 = vmatmul.msk.f32.gmra.mxu1 %vm354_vm1, %v14383_v32 }
 0x25d   : > { %14381 = vst [vmem:[#allocation4_spill] sm:$0xff] %v11030_v7  ;;  %9118 = vmatmul.msk.f32.gmra.mxu2 %vm354_vm1, %v11048_v37  ;;  %v11060_v7 = vld [vmem:[#allocation2 + $0x152] sm:$0xff] }
 0x25e   : > { %14382 = vst [vmem:[#allocation5_spill] sm:$0xff] %v11032_v30  ;;  %9168 = vmatmul.msk.f32.gmra.mxu3 %vm354_vm1, %v10668_v23  ;;  %v14391_v37 = vld [vmem:[#allocation36_spill] sm:$0xff] }
 0x25f   : > { %14390 = vst [vmem:[#allocation32_spill] sm:$0xff] %v11060_v7  ;;  %v1806_v45 = vadd.f32 %v14391_v37, %v1313_v12  ;;  %v11081_v37 = vld [vmem:[#allocation2 + $0xb1] sm:$0xff] }
 0x260   : > { %v1737_v9 = vpop.f32.mrf.mxu0  ;;  %v2473_v55 = vpop.f32.mrf.mxu2  ;;  %14395 = vst [vmem:[#allocation6_spill] sm:$0xff] %v11081_v37  ;;  %v14398_v12 = vld [vmem:[#allocation9_spill] sm:$0xff] }
 0x261   : > { %v1829_v13 = vadd.f32 %v1737_v9, %v14389_v48  ;;  %v2141_v47 = vpop.f32.mrf.mxu1  ;;  %v2613_v32 = vadd.f32 %v2473_v55, %v2209_v39  ;;  %v2877_v30 = vpop.f32.mrf.mxu3  ;;  %v11079_v39 = vld [vmem:[%s14234_s6 + $0x48] sm:$0xff]  ;;  %v1316_v48 = vadd.f32 %v14398_v12, %v14397_v14  ;;  %v14406_v14 = vld [vmem:[#allocation10_spill] sm:$0xff] }
 0x262   : > { %v14407_v12 = vld [vmem:[#allocation11_spill] sm:$0xff] }
 0x263   : > { %v11063_v57 = vadd.f32 %v2141_v47, %v1829_v13  ;;  %v11065_v23 = vadd.f32 %v2877_v30, %v2613_v32  ;;  %9042 = vmatmul.msk.f32.gmra.mxu0 %vm354_vm1, %v11060_v7  ;;  %4470 = vperm.xlu0 %9818, %v11079_v39   ;;  %v14396_v30 = vld [vmem:[#allocation37_spill] sm:$0xff]  ;;  %v14399_v13 = vld [vmem:[#allocation38_spill] sm:$0xff]  ;;  %v14402_v7 = vld [vmem:[#allocation40_spill] sm:$0xff] }
 0x264   : > { %9092 = vmatmul.msk.f32.gmra.mxu1 %vm354_vm1, %v14394_v59  ;;  %v2210_v9 = vadd.f32 %v14396_v30, %v1806_v45  ;;  %v11109_v45 = vld [vmem:[%s14234_s6 + $0x38] sm:$0xff]  ;;  %v11114_v30 = vld [vmem:[%s14234_s6 + $0x60] sm:$0xff] }
 0x265   : > { %14392 = vst [vmem:[#allocation39_spill] sm:$0xff] %v11063_v57  ;;  %9119 = vmatmul.msk.f32.gmra.mxu2 %vm354_vm1, %v11081_v37  ;;  %v11093_v57 = vld [vmem:[#allocation2 + $0x15a] sm:$0xff]  ;;  %4460 = vperm.xlu1 %9819, %v11109_v45  }
 0x266   : > { %14393 = vst [vmem:[#allocation33_spill] sm:$0xff] %v11065_v23  ;;  %9169 = vmatmul.msk.f32.gmra.mxu3 %vm354_vm1, %v10685_v8  ;;  %v11095_v37 = vld [vmem:[#allocation2 + $0xb9] sm:$0xff]  ;;  %v1807_v8 = vadd.f32 %v14402_v7, %v1316_v48  ;;  %v1319_v48 = vadd.f32 %v14407_v12, %v14406_v14  ;;  %v14415_v14 = vld [vmem:[#allocation12_spill] sm:$0xff] }
 0x267   : > { %14400 = vst [vmem:[#allocation7_spill] sm:$0xff] %v11093_v57  ;;  %v9198_v7 = vld [vmem:[%s14232_s4 + $0x60] sm:$0xff]  ;;  %v14416_v12 = vld [vmem:[#allocation13_spill] sm:$0xff] }
 0x268   : > { %v1740_v55 = vpop.f32.mrf.mxu0  ;;  %v2476_v56 = vpop.f32.mrf.mxu2  ;;  %14401 = vst [vmem:[#allocation34_spill] sm:$0xff] %v11095_v37  ;;  %3273 = vmatpush.msrb.mxu0 %v9198_v7  ;;  %v11149_v7 = vld [vmem:[%s14234_s6 + $0x50] sm:$0xff] }
 0x269   : > { %v1830_v47 = vadd.f32 %v1740_v55, %v14399_v13  ;;  %v2144_v32 = vpop.f32.mrf.mxu1  ;;  %v2614_v59 = vadd.f32 %v2476_v56, %v2210_v9  ;;  %v2880_v23 = vpop.f32.mrf.mxu3 }
 0x26b   : > { %v11098_v53 = vadd.f32 %v2144_v32, %v1830_v47  ;;  %v11100_v60 = vadd.f32 %v2880_v23, %v2614_v59  ;;  %9043 = vmatmul.msk.f32.gmra.mxu0 %vm354_vm1, %v11093_v57  ;;  %4485 = vperm.xlu0 %9818, %v11114_v30   ;;  %v14405_v23 = vld [vmem:[#allocation41_spill] sm:$0xff] }
 0x26c   : > { %9093 = vmatmul.msk.f32.gmra.mxu1 %vm354_vm1, %v10674_v0  ;;  %v9298_v0 = vld [vmem:[%s14232_s4 + $0x80] sm:$0xff]  ;;  %v2211_v9 = vadd.f32 %v14405_v23, %v1807_v8  ;;  %v9248_v8 = vld [vmem:[%s14232_s4 + $0x70] sm:$0xff] }
 0x26d   : > { %14403 = vst [vmem:[#allocation36_spill] sm:$0xff] %v11098_v53  ;;  %9120 = vmatmul.msk.f32.gmra.mxu2 %vm354_vm1, %v11095_v37  ;;  %v14410_v53 = vld [vmem:[#allocation44_spill] sm:$0xff]  ;;  %v11156_v23 = vld [vmem:[#allocation2 + $0xc1] sm:$0xff]  ;;  %3677 = vmatpush.msrb.mxu1 %v9248_v8 }
 0x26e   : > { %14404 = vst [vmem:[#allocation43_spill] sm:$0xff] %v11100_v60  ;;  %9170 = vmatmul.msk.f32.gmra.mxu3 %vm354_vm1, %v10702_v51  ;;  %4081 = vmatpush.msra.mxu2 %v9298_v0  ;;  %v14408_v51 = vld [vmem:[#allocation42_spill] sm:$0xff]  ;;  %v1808_v37 = vadd.f32 %v14410_v53, %v1319_v48  ;;  %v11154_v53 = vld [vmem:[%s14234_s6 + $0x78] sm:$0xff]  ;;  %v1322_v48 = vadd.f32 %v14416_v12, %v14415_v14  ;;  %v11168_v8 = vld [vmem:[#allocation2 + $0x16a] sm:$0xff] }
 0x26f   : > { %v11132_v60 = vld [vmem:[#allocation2 + $0x162] sm:$0xff]  ;;  %14413 = vst [vmem:[#allocation38_spill] sm:$0xff] %v11156_v23  ;;  %4475 = vperm.xlu1 %9819, %v11149_v7  }
 0x270   : > { %v1743_v55 = vpop.f32.mrf.mxu0  ;;  %v2479_v56 = vpop.f32.mrf.mxu2  ;;  %14409 = vst [vmem:[#allocation37_spill] sm:$0xff] %v11132_v60  ;;  %v14425_v14 = vld [vmem:[#allocation14_spill] sm:$0xff]  ;;  %v14426_v12 = vld [vmem:[#allocation15_spill] sm:$0xff] }
 0x271   : > { %v1831_v13 = vadd.f32 %v1743_v55, %v14408_v51  ;;  %v2147_v47 = vpop.f32.mrf.mxu1  ;;  %v2615_v32 = vadd.f32 %v2479_v56, %v2211_v9  ;;  %v2883_v59 = vpop.f32.mrf.mxu3  ;;  %v14417_v51 = vld [vmem:[#allocation46_spill] sm:$0xff]  ;;  %14418 = vst [vmem:[#allocation40_spill] sm:$0xff] %v11168_v8 }
 0x273   : > { %v11135_v57 = vadd.f32 %v2147_v47, %v1831_v13  ;;  %v11137_v0 = vadd.f32 %v2883_v59, %v2615_v32  ;;  %9044 = vmatmul.msk.f32.gmra.mxu0 %vm354_vm1, %v11132_v60  ;;  %4500 = vperm.xlu0 %9818, %v11154_v53  }
 0x274   : > { %9094 = vmatmul.msk.f32.gmra.mxu1 %vm354_vm1, %v10691_v31  ;;  %v14414_v31 = vld [vmem:[#allocation45_spill] sm:$0xff] }
 0x275   : > { %14411 = vst [vmem:[#allocation8_spill] sm:$0xff] %v11135_v57  ;;  %9121 = vmatmul.msk.f32.gmra.mxu2 %vm354_vm1, %v11156_v23  ;;  %v2212_v9 = vadd.f32 %v14414_v31, %v1808_v37  ;;  %v14419_v57 = vld [vmem:[#allocation47_spill] sm:$0xff]  ;;  %v11186_v31 = vld [vmem:[%s14234_s6 + $0x90] sm:$0xff] }
 0x276   : > { %14412 = vst [vmem:[#allocation9_spill] sm:$0xff] %v11137_v0  ;;  %9171 = vmatmul.msk.f32.gmra.mxu3 %vm354_vm1, %v10717_v41  ;;  %v1896_v0 = vld [vmem:[#allocation2 + $0x180] sm:$0xff]  ;;  %v1809_v23 = vadd.f32 %v14419_v57, %v1322_v48  ;;  %v11181_v37 = vld [vmem:[%s14234_s6 + $0x68] sm:$0xff]  ;;  %v1325_v48 = vadd.f32 %v14426_v12, %v14425_v14 }
 0x277   : > { %14422 = vst [vmem:[#allocation11_spill] sm:$0xff] %v11186_v31  ;;  %v11188_v57 = vld [vmem:[#allocation2 + $0xc9] sm:$0xff]  ;;  %4490 = vperm.xlu1 %9819, %v11181_v37  }
 0x278   : > { %v1746_v55 = vpop.f32.mrf.mxu0  ;;  %v2482_v56 = vpop.f32.mrf.mxu2  ;;  %14423 = vst [vmem:[#allocation42_spill] sm:$0xff] %v11188_v57 }
 0x279   : > { %v1832_v13 = vadd.f32 %v1746_v55, %v14417_v51  ;;  %v2150_v47 = vpop.f32.mrf.mxu1  ;;  %v2616_v32 = vadd.f32 %v2482_v56, %v2212_v9  ;;  %v2886_v59 = vpop.f32.mrf.mxu3  ;;  %v14427_v51 = vld [vmem:[#allocation49_spill] sm:$0xff] }
 0x27b   : > { %v11171_v41 = vadd.f32 %v2150_v47, %v1832_v13  ;;  %v11173_v60 = vadd.f32 %v2886_v59, %v2616_v32  ;;  %9045 = vmatmul.msk.f32.gmra.mxu0 %vm354_vm1, %v11168_v8  ;;  %4515 = vperm.xlu0 %9818, %v11186_v31  }
 0x27c   : > { %9095 = vmatmul.msk.f32.gmra.mxu1 %vm354_vm1, %v1896_v0  ;;  %v14424_v0 = vld [vmem:[#allocation48_spill] sm:$0xff] }
 0x27d   : > { %14420 = vst [vmem:[#allocation41_spill] sm:$0xff] %v11171_v41  ;;  %9122 = vmatmul.msk.f32.gmra.mxu2 %vm354_vm1, %v11188_v57  ;;  %v2213_v9 = vadd.f32 %v14424_v0, %v1809_v23  ;;  %v1897_v41 = vld [vmem:[#allocation2 + $0x188] sm:$0xff]  ;;  %v11202_v57 = vld [vmem:[#allocation2 + $0xd1] sm:$0xff]  ;;  %v11215_v0 = vld [vmem:[%s14234_s6 + $0x20] sm:$0xff] }
 0x27e   : > { %14421 = vst [vmem:[#allocation10_spill] sm:$0xff] %v11173_v60  ;;  %9172 = vmatmul.msk.f32.gmra.mxu3 %vm354_vm1, %v10732_v15  ;;  %v11200_v60 = vld [vmem:[#allocation2 + $0x172] sm:$0xff]  ;;  %v14430_v15 = vld [vmem:[#allocation50_spill] sm:$0xff]  ;;  %4445 = vperm.xlu2 %9820, %v11215_v0  }
 0x27f   : > { %14428 = vst [vmem:[#allocation44_spill] sm:$0xff] %v11200_v60  ;;  %v1810_v8 = vadd.f32 %v14430_v15, %v1325_v48  ;;  %v14436_v48 = vld [vmem:[#allocation16_spill] sm:$0xff] }
 0x280   : > { %v1749_v55 = vpop.f32.mrf.mxu0  ;;  %v2485_v56 = vpop.f32.mrf.mxu2  ;;  %14429 = vst [vmem:[#allocation45_spill] sm:$0xff] %v11202_v57 }
 0x281   : > { %v1833_v13 = vadd.f32 %v1749_v55, %v14427_v51  ;;  %v2153_v47 = vpop.f32.mrf.mxu1  ;;  %v2617_v32 = vadd.f32 %v2485_v56, %v2213_v9  ;;  %v2889_v59 = vpop.f32.mrf.mxu3  ;;  %v11220_v9 = vld [vmem:[%s14234_s6 + $0x80] sm:$0xff]  ;;  %v11225_v55 = vld [vmem:[%s14234_s6 + $0xa8] sm:$0xff]  ;;  %v14437_v51 = vld [vmem:[#allocation17_spill] sm:$0xff] }
 0x282   : > { %14433 = vst [vmem:[#allocation46_spill] sm:$0xff] %v11220_v9  ;;  %4505 = vperm.xlu1 %9819, %v11220_v9  }
 0x283   : > { %v11205_v31 = vadd.f32 %v2153_v47, %v1833_v13  ;;  %v11207_v23 = vadd.f32 %v2889_v59, %v2617_v32  ;;  %9046 = vmatmul.msk.f32.gmra.mxu0 %vm354_vm1, %v11200_v60  ;;  %14434 = vst [vmem:[#allocation47_spill] sm:$0xff] %v11225_v55  ;;  %4530 = vperm.xlu0 %9818, %v11225_v55   ;;  %v14438_v47 = vld [vmem:[#allocation52_spill] sm:$0xff]  ;;  %v14440_v60 = vld [vmem:[#allocation53_spill] sm:$0xff] }
 0x284   : > { %9096 = vmatmul.msk.f32.gmra.mxu1 %vm354_vm1, %v1897_v41  ;;  %v14435_v41 = vld [vmem:[#allocation51_spill] sm:$0xff]  ;;  %v1328_v13 = vadd.f32 %v14437_v51, %v14436_v48  ;;  %v14445_v48 = vld [vmem:[#allocation18_spill] sm:$0xff] }
 0x285   : > { %14431 = vst [vmem:[#allocation12_spill] sm:$0xff] %v11205_v31  ;;  %9123 = vmatmul.msk.f32.gmra.mxu2 %vm354_vm1, %v11202_v57  ;;  %v2214_v56 = vadd.f32 %v14435_v41, %v1810_v8  ;;  %v11238_v31 = vld [vmem:[#allocation2 + $0x17a] sm:$0xff]  ;;  %v1898_v57 = vld [vmem:[#allocation2 + $0x190] sm:$0xff]  ;;  %v11251_v8 = vld [vmem:[%s14234_s6 + $0x28] sm:$0xff] }
 0x286   : > { %14432 = vst [vmem:[#allocation13_spill] sm:$0xff] %v11207_v23  ;;  %9173 = vmatmul.msk.f32.gmra.mxu3 %vm354_vm1, %v10747_v25  ;;  %v1811_v9 = vadd.f32 %v14440_v60, %v1328_v13  ;;  %v11256_v41 = vld [vmem:[%s14234_s6 + $0x98] sm:$0xff]  ;;  %v11261_v60 = vld [vmem:[%s14234_s6 + $0xc0] sm:$0xff]  ;;  %4450 = vperm.xlu2 %9820, %v11251_v8   ;;  %v14446_v51 = vld [vmem:[#allocation19_spill] sm:$0xff] }
 0x287   : > { %14439 = vst [vmem:[#allocation48_spill] sm:$0xff] %v11238_v31  ;;  %v1331_v13 = vadd.f32 %v14446_v51, %v14445_v48  ;;  %v14454_v51 = vld [vmem:[#allocation56_spill] sm:$0xff] }
 0x288   : > { %v1752_v14 = vpop.f32.mrf.mxu0  ;;  %v2488_v12 = vpop.f32.mrf.mxu2 }
 0x289   : > { %v1834_v32 = vadd.f32 %v1752_v14, %v14438_v47  ;;  %v2156_v59 = vpop.f32.mrf.mxu1  ;;  %v2618_v15 = vadd.f32 %v2488_v12, %v2214_v56  ;;  %v2892_v23 = vpop.f32.mrf.mxu3  ;;  %v14447_v47 = vld [vmem:[#allocation55_spill] sm:$0xff] }
 0x28a   : > { %4520 = vperm.xlu1 %9819, %v11256_v41  }
 0x28b   : > { %v11241_v25 = vadd.f32 %v2156_v59, %v1834_v32  ;;  %v11243_v55 = vadd.f32 %v2892_v23, %v2618_v15  ;;  %9047 = vmatmul.msk.f32.gmra.mxu0 %vm354_vm1, %v11238_v31  ;;  %v11263_v23 = vld [vmem:[#allocation2 + $0xd9] sm:$0xff]  ;;  %4545 = vperm.xlu0 %9818, %v11261_v60  }
 0x28c   : > { %9097 = vmatmul.msk.f32.gmra.mxu1 %vm354_vm1, %v1898_v57  ;;  %14443 = vst [vmem:[#allocation49_spill] sm:$0xff] %v11263_v23  ;;  %v14444_v57 = vld [vmem:[#allocation54_spill] sm:$0xff] }
 0x28d   : > { %14441 = vst [vmem:[#allocation14_spill] sm:$0xff] %v11241_v25  ;;  %9124 = vmatmul.msk.f32.gmra.mxu2 %vm354_vm1, %v11263_v23  ;;  %v2215_v56 = vadd.f32 %v14444_v57, %v1811_v9  ;;  %v3063_v25 = vld [vmem:[#allocation2 + $0x30] sm:$0xff]  ;;  %v1812_v23 = vadd.f32 %v10726_v54, %v1331_v13  ;;  %v11287_v9 = vld [vmem:[%s14234_s6 + $0x40] sm:$0xff]  ;;  %v11297_v54 = vld [vmem:[%s14234_s6 + $0xd8] sm:$0xff] }
 0x28e   : > { %14442 = vst [vmem:[#allocation15_spill] sm:$0xff] %v11243_v55  ;;  %9174 = vmatmul.msk.f32.gmra.mxu3 %vm354_vm1, %v10765_v18  ;;  %v11292_v57 = vld [vmem:[%s14234_s6 + $0xb0] sm:$0xff]  ;;  %4465 = vperm.xlu2 %9820, %v11287_v9  }
 0x28f   : > { %14450 = vst [vmem:[#allocation16_spill] sm:$0xff] %v11292_v57 }
 0x290   : > { %v1755_v14 = vpop.f32.mrf.mxu0  ;;  %v2491_v12 = vpop.f32.mrf.mxu2 }
 0x291   : > { %v1835_v32 = vadd.f32 %v1755_v14, %v14447_v47  ;;  %v2159_v59 = vpop.f32.mrf.mxu1  ;;  %v2619_v15 = vadd.f32 %v2491_v12, %v2215_v56  ;;  %v2895_v55 = vpop.f32.mrf.mxu3  ;;  %v14452_v14 = vld [vmem:[#allocation20_spill] sm:$0xff]  ;;  %v14453_v12 = vld [vmem:[#allocation21_spill] sm:$0xff] }
 0x292   : > { %4535 = vperm.xlu1 %9819, %v11292_v57   ;;  %v1334_v48 = vadd.f32 %v14453_v12, %v14452_v14  ;;  %v14459_v14 = vld [vmem:[#allocation22_spill] sm:$0xff]  ;;  %v14460_v12 = vld [vmem:[#allocation23_spill] sm:$0xff] }
 0x293   : > { %v11277_v31 = vadd.f32 %v2159_v59, %v1835_v32  ;;  %v11279_v18 = vadd.f32 %v2895_v55, %v2619_v15  ;;  %9200 = vmatmul.msk.f32.vlgmr.msrb.gmra.mxu0 %vm354_vm1, %v3063_v25  ;;  %v11299_v55 = vld [vmem:[#allocation2 + $0xe1] sm:$0xff]  ;;  %4560 = vperm.xlu0 %9818, %v11297_v54   ;;  %v3064_v15 = vld [vmem:[#allocation2 + $0x38] sm:$0xff] }
 0x294   : > { %9250 = vmatmul.msk.f32.vlgmr.msrb.gmra.mxu1 %vm354_vm1, %v10753_v2  ;;  %14451 = vst [vmem:[#allocation17_spill] sm:$0xff] %v11299_v55  ;;  %v2216_v2 = vadd.f32 %v10728_v10, %v1812_v23  ;;  %v11323_v10 = vld [vmem:[%s14234_s6 + $0x58] sm:$0xff]  ;;  %v11328_v23 = vld [vmem:[%s14234_s6 + $0xc8] sm:$0xff] }
 0x295   : > { %14448 = vst [vmem:[#allocation50_spill] sm:$0xff] %v11277_v31  ;;  %9125 = vmatmul.msk.f32.gmra.mxu2 %vm354_vm1, %v11299_v55  ;;  %v14455_v31 = vld [vmem:[#allocation57_spill] sm:$0xff] }
 0x296   : > { %14449 = vst [vmem:[#allocation51_spill] sm:$0xff] %v11279_v18  ;;  %9175 = vmatmul.msk.f32.gmra.mxu3 %vm354_vm1, %v10783_v1  ;;  %v2281_v18 = vld [vmem:[#allocation2 + $0xe9] sm:$0xff]  ;;  %v1813_v55 = vadd.f32 %v14455_v31, %v1334_v48  ;;  %4480 = vperm.xlu2 %9820, %v11323_v10   ;;  %v1337_v48 = vadd.f32 %v14460_v12, %v14459_v14 }
 0x297   : > { %v11333_v31 = vld [vmem:[%s14234_s6 + $0xf0] sm:$0xff] }
 0x298   : > { %v1758_v25 = vpop.f32.mrf.mxu0  ;;  %v2494_v56 = vpop.f32.mrf.mxu2  ;;  %v14468_v12 = vld [vmem:[#allocation24_spill] sm:$0xff] }
 0x299   : > { %v1836_v13 = vadd.f32 %v1758_v25, %v14454_v51  ;;  %v2162_v47 = vpop.f32.mrf.mxu1  ;;  %v2620_v32 = vadd.f32 %v2494_v56, %v2216_v2  ;;  %v2898_v59 = vpop.f32.mrf.mxu3  ;;  %v14461_v51 = vld [vmem:[#allocation59_spill] sm:$0xff] }
 0x29a   : > { %4550 = vperm.xlu1 %9819, %v11328_v23  }
 0x29b   : > { %v11313_v57 = vadd.f32 %v2162_v47, %v1836_v13  ;;  %v11315_v1 = vadd.f32 %v2898_v59, %v2620_v32  ;;  %9201 = vmatmul.msk.f32.gmra.mxu0 %vm354_vm1, %v3064_v15  ;;  %4575 = vperm.xlu0 %9818, %v11333_v31   ;;  %v3065_v15 = vld [vmem:[#allocation2 + $0x40] sm:$0xff] }
 0x29c   : > { %9251 = vmatmul.msk.f32.gmra.mxu1 %vm354_vm1, %v10771_v17  ;;  %v14458_v17 = vld [vmem:[#allocation58_spill] sm:$0xff] }
 0x29d   : > { %14456 = vst [vmem:[#allocation52_spill] sm:$0xff] %v11313_v57  ;;  %9126 = vmatmul.msk.f32.gmra.mxu2 %vm354_vm1, %v2281_v18  ;;  %v2217_v2 = vadd.f32 %v14458_v17, %v1813_v55  ;;  %v11356_v55 = vld [vmem:[%s14234_s6 + $0x70] sm:$0xff]  ;;  %v11361_v17 = vld [vmem:[%s14234_s6 + $0xe0] sm:$0xff] }
 0x29e   : > { %14457 = vst [vmem:[#allocation53_spill] sm:$0xff] %v11315_v1  ;;  %9176 = vmatmul.msk.f32.gmra.mxu3 %vm354_vm1, %v10801_v63  ;;  %v14462_v1 = vld [vmem:[#allocation60_spill] sm:$0xff]  ;;  %4495 = vperm.xlu2 %9820, %v11356_v55  }
 0x29f   : > { %v1814_v18 = vadd.f32 %v14462_v1, %v1337_v48  ;;  %14465 = vst [vmem:[#allocation19_spill] sm:$0xff] %v11361_v17  ;;  %v11366_v1 = vld [vmem:[%s14234_s6 + $0x108] sm:$0xff]  ;;  %v14469_v48 = vld [vmem:[#allocation25_spill] sm:$0xff] }
 0x2a0   : > { %v1761_v25 = vpop.f32.mrf.mxu0  ;;  %v2497_v56 = vpop.f32.mrf.mxu2  ;;  %14466 = vst [vmem:[#allocation55_spill] sm:$0xff] %v11366_v1 }
 0x2a1   : > { %v1837_v13 = vadd.f32 %v1761_v25, %v14461_v51  ;;  %v2165_v47 = vpop.f32.mrf.mxu1  ;;  %v2621_v32 = vadd.f32 %v2497_v56, %v2217_v2  ;;  %v2901_v59 = vpop.f32.mrf.mxu3  ;;  %v2282_v2 = vld [vmem:[#allocation2 + $0xf1] sm:$0xff]  ;;  %v1340_v51 = vadd.f32 %v14469_v48, %v14468_v12 }
 0x2a2   : > { %4565 = vperm.xlu1 %9819, %v11361_v17  }
 0x2a3   : > { %v11346_v57 = vadd.f32 %v2165_v47, %v1837_v13  ;;  %v11348_v63 = vadd.f32 %v2901_v59, %v2621_v32  ;;  %9202 = vmatmul.msk.f32.gmra.mxu0 %vm354_vm1, %v3065_v15  ;;  %4590 = vperm.xlu0 %9818, %v11366_v1   ;;  %v14470_v13 = vld [vmem:[#allocation62_spill] sm:$0xff] }
 0x2a4   : > { %9252 = vmatmul.msk.f32.gmra.mxu1 %vm354_vm1, %v10785_v11  ;;  %v14467_v11 = vld [vmem:[#allocation61_spill] sm:$0xff] }
 0x2a5   : > { %14463 = vst [vmem:[#allocation54_spill] sm:$0xff] %v11346_v57  ;;  %9127 = vmatmul.msk.f32.gmra.mxu2 %vm354_vm1, %v2282_v2  ;;  %v2218_v25 = vadd.f32 %v14467_v11, %v1814_v18  ;;  %v14471_v57 = vld [vmem:[#allocation63_spill] sm:$0xff]  ;;  %v14474_v18 = vld [vmem:[#allocation69_spill] sm:$0xff] }
 0x2a6   : > { %14464 = vst [vmem:[#allocation18_spill] sm:$0xff] %v11348_v63  ;;  %9177 = vmatmul.msk.f32.gmra.mxu3 %vm354_vm1, %v10819_v35  ;;  %v3066_v63 = vld [vmem:[#allocation2 + $0x48] sm:$0xff]  ;;  %v1815_v2 = vadd.f32 %v14471_v57, %v1340_v51  ;;  %v11399_v57 = vld [vmem:[%s14234_s6 + $0x120] sm:$0xff] }
 0x2a7   : > { %v11389_v11 = vld [vmem:[%s14234_s6 + $0x88] sm:$0xff]  ;;  %v14478_v51 = vld [vmem:[#allocation26_spill] sm:$0xff] }
 0x2a8   : > { %v1764_v56 = vpop.f32.mrf.mxu0  ;;  %v2500_v14 = vpop.f32.mrf.mxu2  ;;  %14475 = vst [vmem:[#allocation56_spill] sm:$0xff] %v11389_v11  ;;  %4510 = vperm.xlu2 %9820, %v11389_v11  }
 0x2a9   : > { %v1838_v47 = vadd.f32 %v1764_v56, %v14470_v13  ;;  %v2168_v32 = vpop.f32.mrf.mxu1  ;;  %v2622_v59 = vadd.f32 %v2500_v14, %v2218_v25  ;;  %v2904_v15 = vpop.f32.mrf.mxu3  ;;  %v11394_v25 = vld [vmem:[%s14234_s6 + $0xf8] sm:$0xff]  ;;  %v14479_v13 = vld [vmem:[#allocation27_spill] sm:$0xff] }
 0x2aa   : > { %14476 = vst [vmem:[#allocation57_spill] sm:$0xff] %v11394_v25  ;;  %v2283_v56 = vld [vmem:[#allocation2 + $0xf9] sm:$0xff]  ;;  %4580 = vperm.xlu1 %9819, %v11394_v25   ;;  %v2284_v25 = vld [vmem:[#allocation2 + $0x101] sm:$0xff] }
 0x2ab   : > { %v11379_v17 = vadd.f32 %v2168_v32, %v1838_v47  ;;  %v11381_v35 = vadd.f32 %v2904_v15, %v2622_v59  ;;  %9203 = vmatmul.msk.f32.gmra.mxu0 %vm354_vm1, %v3066_v63  ;;  %4605 = vperm.xlu0 %9818, %v11399_v57   ;;  %v14477_v63 = vld [vmem:[#allocation64_spill] sm:$0xff]  ;;  %v1343_v47 = vadd.f32 %v14479_v13, %v14478_v51  ;;  %v14480_v32 = vld [vmem:[#allocation65_spill] sm:$0xff] }
 0x2ac   : > { %9253 = vmatmul.msk.f32.gmra.mxu1 %vm354_vm1, %v14474_v18  ;;  %v2219_v14 = vadd.f32 %v14477_v63, %v1815_v2  ;;  %v11422_v2 = vld [vmem:[%s14234_s6 + $0xa0] sm:$0xff]  ;;  %v11427_v63 = vld [vmem:[%s14234_s6 + $0x110] sm:$0xff]  ;;  %v14486_v51 = vld [vmem:[#allocation29_spill] sm:$0xff] }
 0x2ad   : > { %14472 = vst [vmem:[#allocation20_spill] sm:$0xff] %v11379_v17  ;;  %9128 = vmatmul.msk.f32.gmra.mxu2 %vm354_vm1, %v2283_v56  ;;  %v3067_v17 = vld [vmem:[#allocation2 + $0x50] sm:$0xff]  ;;  %v14481_v56 = vld [vmem:[#allocation66_spill] sm:$0xff] }
 0x2ae   : > { %14473 = vst [vmem:[#allocation21_spill] sm:$0xff] %v11381_v35  ;;  %9178 = vmatmul.msk.f32.gmra.mxu3 %vm354_vm1, %v10834_v27  ;;  %v1816_v11 = vadd.f32 %v14481_v56, %v1343_v47  ;;  %v14487_v47 = vld [vmem:[#allocation68_spill] sm:$0xff]  ;;  %v3068_v56 = vld [vmem:[#allocation2 + $0x58] sm:$0xff] }
 0x2b0   : > { %v1767_v12 = vpop.f32.mrf.mxu0  ;;  %v2503_v48 = vpop.f32.mrf.mxu2  ;;  %4525 = vperm.xlu2 %9820, %v11422_v2  }
 0x2b1   : > { %v1839_v59 = vadd.f32 %v1767_v12, %v14480_v32  ;;  %v2171_v15 = vpop.f32.mrf.mxu1  ;;  %v2623_v18 = vadd.f32 %v2503_v48, %v2219_v14  ;;  %v2907_v35 = vpop.f32.mrf.mxu3  ;;  %v14485_v48 = vld [vmem:[#allocation28_spill] sm:$0xff] }
 0x2b2   : > { %4595 = vperm.xlu1 %9819, %v11427_v63   ;;  %v1346_v13 = vadd.f32 %v14486_v51, %v14485_v48  ;;  %v14490_v51 = vld [vmem:[#allocation72_spill] sm:$0xff] }
 0x2b3   : > { %v11412_v1 = vadd.f32 %v2171_v15, %v1839_v59  ;;  %v11414_v27 = vadd.f32 %v2907_v35, %v2623_v18  ;;  %9204 = vmatmul.msk.f32.gmra.mxu0 %vm354_vm1, %v3067_v17  ;;  %v11432_v35 = vld [vmem:[%s14234_s6 + $0x138] sm:$0xff] }
 0x2b4   : > { %9254 = vmatmul.msk.f32.gmra.mxu1 %vm354_vm1, %v10825_v3  ;;  %4620 = vperm.xlu0 %9818, %v11432_v35   ;;  %v14484_v3 = vld [vmem:[#allocation67_spill] sm:$0xff] }
 0x2b5   : > { %14482 = vst [vmem:[#allocation58_spill] sm:$0xff] %v11412_v1  ;;  %9129 = vmatmul.msk.f32.gmra.mxu2 %vm354_vm1, %v2284_v25  ;;  %v2220_v17 = vadd.f32 %v14484_v3, %v1816_v11  ;;  %v11455_v11 = vld [vmem:[%s14234_s6 + $0xb8] sm:$0xff]  ;;  %v11460_v3 = vld [vmem:[%s14234_s6 + $0x128] sm:$0xff] }
 0x2b6   : > { %14483 = vst [vmem:[#allocation22_spill] sm:$0xff] %v11414_v27  ;;  %9179 = vmatmul.msk.f32.gmra.mxu3 %vm354_vm1, %v10851_v22  ;;  %v14488_v27 = vld [vmem:[#allocation70_spill] sm:$0xff] }
 0x2b7   : > { %v1817_v25 = vadd.f32 %v14488_v27, %v1346_v13  ;;  %v11465_v27 = vld [vmem:[%s14234_s6 + $0x150] sm:$0xff] }
 0x2b8   : > { %v1770_v14 = vpop.f32.mrf.mxu0  ;;  %v2506_v12 = vpop.f32.mrf.mxu2  ;;  %4540 = vperm.xlu2 %9820, %v11455_v11  }
 0x2b9   : > { %v1840_v32 = vadd.f32 %v1770_v14, %v14487_v47  ;;  %v2174_v59 = vpop.f32.mrf.mxu1  ;;  %v2624_v15 = vadd.f32 %v2506_v12, %v2220_v17  ;;  %v2910_v18 = vpop.f32.mrf.mxu3  ;;  %v2285_v17 = vld [vmem:[#allocation2 + $0x109] sm:$0xff] }
 0x2ba   : > { %4610 = vperm.xlu1 %9819, %v11460_v3  }
 0x2bb   : > { %v11445_v1 = vadd.f32 %v2174_v59, %v1840_v32  ;;  %v11447_v22 = vadd.f32 %v2910_v18, %v2624_v15  ;;  %9205 = vmatmul.msk.f32.gmra.mxu0 %vm354_vm1, %v3068_v56  ;;  %v3069_v15 = vld [vmem:[#allocation2 + $0x60] sm:$0xff] }
 0x2bc   : > { %9255 = vmatmul.msk.f32.gmra.mxu1 %vm354_vm1, %v10836_v38  ;;  %4635 = vperm.xlu0 %9818, %v11465_v27   ;;  %v14489_v38 = vld [vmem:[#allocation71_spill] sm:$0xff] }
 0x2bd   : > { %9130 = vmatmul.msk.f32.gmra.mxu2 %vm354_vm1, %v2285_v17  ;;  %v2221_v14 = vadd.f32 %v14489_v38, %v1817_v25  ;;  %v11490_v25 = vld [vmem:[%s14234_s6 + $0x140] sm:$0xff]  ;;  %v11495_v17 = vld [vmem:[%s14234_s6 + $0x168] sm:$0xff]  ;;  %v2286_v38 = vld [vmem:[#allocation2 + $0x111] sm:$0xff] }
 0x2be   : > { %9180 = vmatmul.msk.f32.gmra.mxu3 %vm354_vm1, %v10868_v46  ;;  %v11485_v46 = vld [vmem:[%s14234_s6 + $0xd0] sm:$0xff] }
 0x2c0   : > { %v1773_v12 = vpop.f32.mrf.mxu0  ;;  %v2509_v48 = vpop.f32.mrf.mxu2  ;;  %4555 = vperm.xlu2 %9820, %v11485_v46  }
 0x2c1   : > { %v1841_v13 = vadd.f32 %v1773_v12, %v14490_v51  ;;  %v2177_v47 = vpop.f32.mrf.mxu1  ;;  %v2625_v32 = vadd.f32 %v2509_v48, %v2221_v14  ;;  %v2913_v59 = vpop.f32.mrf.mxu3  ;;  %v14492_v51 = vld [vmem:[#allocation73_spill] sm:$0xff] }
 0x2c2   : > { %4625 = vperm.xlu1 %9819, %v11490_v25  }
 0x2c3   : > { %v11475_v18 = vadd.f32 %v2177_v47, %v1841_v13  ;;  %v11477_v56 = vadd.f32 %v2913_v59, %v2625_v32  ;;  %9206 = vmatmul.msk.f32.gmra.mxu0 %vm354_vm1, %v3069_v15  ;;  %v3070_v32 = vld [vmem:[#allocation2 + $0x68] sm:$0xff]  ;;  %v2287_v59 = vld [vmem:[#allocation2 + $0x119] sm:$0xff] }
 0x2c4   : > { %9256 = vmatmul.msk.f32.gmra.mxu1 %vm354_vm1, %v10859_v43  ;;  %4650 = vperm.xlu0 %9818, %v11495_v17  }
 0x2c5   : > { %14491 = vst [vmem:[#allocation23_spill] sm:$0xff] %v11477_v56  ;;  %9131 = vmatmul.msk.f32.gmra.mxu2 %vm354_vm1, %v2286_v38 }
 0x2c6   : > { %9181 = vmatmul.msk.f32.gmra.mxu3 %vm354_vm1, %v10885_v24  ;;  %v11515_v24 = vld [vmem:[%s14234_s6 + $0xe8] sm:$0xff] }
 0x2c8   : > { %v1776_v43 = vpop.f32.mrf.mxu0  ;;  %v2512_v14 = vpop.f32.mrf.mxu2  ;;  %4570 = vperm.xlu2 %9820, %v11515_v24  }
 0x2c9   : > { %v1842_v12 = vadd.f32 %v1776_v43, %v10832_v16  ;;  %v2180_v48 = vpop.f32.mrf.mxu1  ;;  %v2626_v13 = vadd.f32 %v2512_v14, %v14492_v51  ;;  %v2916_v47 = vpop.f32.mrf.mxu3  ;;  %v11520_v16 = vld [vmem:[%s14234_s6 + $0x158] sm:$0xff] }
 0x2ca   : > { %4640 = vperm.xlu1 %9819, %v11520_v16  }
 0x2cb   : > { %v11505_v15 = vadd.f32 %v2180_v48, %v1842_v12  ;;  %v11507_v56 = vadd.f32 %v2916_v47, %v2626_v13  ;;  %9207 = vmatmul.msk.f32.gmra.mxu0 %vm354_vm1, %v3070_v32  ;;  %v14493_v12 = vld [vmem:[#allocation74_spill] sm:$0xff]  ;;  %v3071_v13 = vld [vmem:[#allocation2 + $0x70] sm:$0xff] }
 0x2cc   : > { %9257 = vmatmul.msk.f32.gmra.mxu1 %vm354_vm1, %v10876_v61  ;;  %8450 = vperm.xlu0 %9818, %v10987_v52   ;;  %v2288_v52 = vld [vmem:[#allocation2 + $0x121] sm:$0xff] }
 0x2cd   : > { %9132 = vmatmul.msk.f32.gmra.mxu2 %vm354_vm1, %v2287_v59 }
 0x2ce   : > { %9182 = vmatmul.msk.f32.gmra.mxu3 %vm354_vm1, %v10902_v34  ;;  %v11540_v34 = vld [vmem:[%s14234_s6 + $0x100] sm:$0xff] }
 0x2d0   : > { %v1779_v61 = vpop.f32.mrf.mxu0  ;;  %v2515_v38 = vpop.f32.mrf.mxu2  ;;  %4585 = vperm.xlu2 %9820, %v11540_v34  }
 0x2d1   : > { %v1843_v43 = vadd.f32 %v1779_v61, %v10849_v4  ;;  %v2183_v14 = vpop.f32.mrf.mxu1  ;;  %v2627_v48 = vadd.f32 %v2515_v38, %v14493_v12  ;;  %v2919_v51 = vpop.f32.mrf.mxu3  ;;  %v11545_v4 = vld [vmem:[%s14234_s6 + $0x170] sm:$0xff] }
 0x2d2   : > { %4655 = vperm.xlu1 %9819, %v11545_v4  }
 0x2d3   : > { %v11530_v47 = vadd.f32 %v2183_v14, %v1843_v43  ;;  %v11532_v32 = vadd.f32 %v2919_v51, %v2627_v48  ;;  %9208 = vmatmul.msk.f32.gmra.mxu0 %vm354_vm1, %v3071_v13  ;;  %v14494_v43 = vld [vmem:[#allocation75_spill] sm:$0xff]  ;;  %v3072_v48 = vld [vmem:[#allocation2 + $0x78] sm:$0xff] }
 0x2d4   : > { %9258 = vmatmul.msk.f32.gmra.mxu1 %vm354_vm1, %v10887_v49  ;;  %8465 = vperm.xlu0 %9818, %v11074_v42  }
 0x2d5   : > { %9133 = vmatmul.msk.f32.gmra.mxu2 %vm354_vm1, %v2288_v52 }
 0x2d6   : > { %9183 = vmatmul.msk.f32.gmra.mxu3 %vm354_vm1, %v10922_v44  ;;  %v11565_v44 = vld [vmem:[%s14234_s6 + $0x118] sm:$0xff] }
 0x2d8   : > { %v1782_v49 = vpop.f32.mrf.mxu0  ;;  %v2518_v59 = vpop.f32.mrf.mxu2  ;;  %4600 = vperm.xlu2 %9820, %v11565_v44  }
 0x2d9   : > { %v1844_v61 = vadd.f32 %v1782_v49, %v10866_v62  ;;  %v2186_v38 = vpop.f32.mrf.mxu1  ;;  %v2628_v14 = vadd.f32 %v2518_v59, %v14494_v43  ;;  %v2922_v12 = vpop.f32.mrf.mxu3  ;;  %v11567_v62 = vld [vmem:[#allocation2 + $0x129] sm:$0xff]  ;;  %v3073_v43 = vld [vmem:[#allocation2 + $0x80] sm:$0xff] }
 0x2da   : > { %8455 = vperm.xlu1 %9819, %v11016_v58   ;;  %v14495_v59 = vld [vmem:[#allocation76_spill] sm:$0xff] }
 0x2db   : > { %v11555_v51 = vadd.f32 %v2186_v38, %v1844_v61  ;;  %v11557_v13 = vadd.f32 %v2922_v12, %v2628_v14  ;;  %9209 = vmatmul.msk.f32.gmra.mxu0 %vm354_vm1, %v3072_v48  ;;  %v11578_v14 = vld [vmem:[#allocation2 + $0x131] sm:$0xff] }
 0x2dc   : > { %9259 = vmatmul.msk.f32.gmra.mxu1 %vm354_vm1, %v10913_v29  ;;  %8480 = vperm.xlu0 %9818, %v11046_v21  }
 0x2dd   : > { %9134 = vmatmul.msk.f32.gmra.mxu2 %vm354_vm1, %v11567_v62 }
 0x2de   : > { %9184 = vmatmul.msk.f32.gmra.mxu3 %vm354_vm1, %v10939_v40 }
 0x2e0   : > { %v1785_v29 = vpop.f32.mrf.mxu0  ;;  %v2521_v42 = vpop.f32.mrf.mxu2 }
 0x2e1   : > { %v1845_v52 = vadd.f32 %v1785_v29, %v10883_v33  ;;  %v2189_v49 = vpop.f32.mrf.mxu1  ;;  %v2629_v61 = vadd.f32 %v2521_v42, %v14495_v59  ;;  %v2925_v38 = vpop.f32.mrf.mxu3  ;;  %v11590_v33 = vld [vmem:[%s14234_s6 + $0x130] sm:$0xff]  ;;  %v14496_v29 = vld [vmem:[#allocation77_spill] sm:$0xff] }
 0x2e2   : > { %4615 = vperm.xlu2 %9820, %v11590_v33   ;;  %8470 = vperm.xlu1 %9819, %v11215_v0  }
 0x2e3   : > { %v11580_v58 = vadd.f32 %v2189_v49, %v1845_v52  ;;  %v11582_v12 = vadd.f32 %v2925_v38, %v2629_v61  ;;  %9210 = vmatmul.msk.f32.gmra.mxu0 %vm354_vm1, %v3073_v43  ;;  %v3074_v49 = vld [vmem:[#allocation2 + $0x88] sm:$0xff] }
 0x2e4   : > { %9260 = vmatmul.msk.f32.gmra.mxu1 %vm354_vm1, %v10930_v20  ;;  %8495 = vperm.xlu0 %9818, %v11079_v39   ;;  %v11616_v39 = vld [vmem:[#allocation2 + $0x139] sm:$0xff] }
 0x2e5   : > { %9135 = vmatmul.msk.f32.gmra.mxu2 %vm354_vm1, %v11578_v14 }
 0x2e6   : > { %9185 = vmatmul.msk.f32.gmra.mxu3 %vm354_vm1, %v10956_v28  ;;  %v9350_v28 = vld [vmem:[%s14232_s4 + $0xa0] sm:$0xff] }
 0x2e7   : > { %5020 = vmatpush.msra.mxu3 %v9350_v28  ;;  %v14499_v28 = vld [vmem:[#allocation80_spill] sm:$0xff] }
 0x2e8   : > { %v1788_v40 = vpop.f32.mrf.mxu0  ;;  %v2524_v21 = vpop.f32.mrf.mxu2 }
 0x2e9   : > { %v1846_v20 = vadd.f32 %v1788_v40, %v10900_v5  ;;  %v2192_v48 = vpop.f32.mrf.mxu1  ;;  %v2630_v42 = vadd.f32 %v2524_v21, %v14496_v29  ;;  %v2928_v52 = vpop.f32.mrf.mxu3  ;;  %v11614_v5 = vld [vmem:[%s14234_s6 + $0x148] sm:$0xff]  ;;  %v14497_v40 = vld [vmem:[#allocation78_spill] sm:$0xff] }
 0x2ea   : > { %4630 = vperm.xlu2 %9820, %v11614_v5   ;;  %8485 = vperm.xlu1 %9819, %v11109_v45  }
 0x2eb   : > { %v11601_v59 = vadd.f32 %v2192_v48, %v1846_v20  ;;  %v11603_v0 = vadd.f32 %v2928_v52, %v2630_v42  ;;  %9211 = vmatmul.msk.f32.gmra.mxu0 %vm354_vm1, %v3074_v49  ;;  %v3075_v48 = vld [vmem:[#allocation2 + $0x90] sm:$0xff] }
 0x2ec   : > { %9261 = vmatmul.msk.f32.gmra.mxu1 %vm354_vm1, %v10941_v26  ;;  %8510 = vperm.xlu0 %9818, %v11114_v30   ;;  %v14498_v30 = vld [vmem:[#allocation79_spill] sm:$0xff] }
 0x2ed   : > { %9136 = vmatmul.msk.f32.gmra.mxu2 %vm354_vm1, %v11616_v39 }
 0x2ee   : > { %9186 = vmatmul.msk.f32.gmra.mxu3 %vm354_vm1, %v10975_v50  ;;  %v11637_v50 = vld [vmem:[%s14234_s6 + $0x160] sm:$0xff] }
 0x2f0   : > { %v1791_v26 = vpop.f32.mrf.mxu0  ;;  %v2527_v61 = vpop.f32.mrf.mxu2 }
 0x2f1   : > { %v1847_v38 = vadd.f32 %v1791_v26, %v10920_v6  ;;  %v2195_v43 = vpop.f32.mrf.mxu1  ;;  %v2631_v21 = vadd.f32 %v2527_v61, %v14497_v40  ;;  %v2931_v20 = vpop.f32.mrf.mxu3  ;;  %v11639_v6 = vld [vmem:[#allocation2 + $0x141] sm:$0xff] }
 0x2f2   : > { %4645 = vperm.xlu2 %9820, %v11637_v50   ;;  %8500 = vperm.xlu1 %9819, %v11149_v7   ;;  %v11662_v7 = vld [vmem:[%s14234_s6 + $0x178] sm:$0xff] }
 0x2f3   : > { %v11627_v29 = vadd.f32 %v2195_v43, %v1847_v38  ;;  %v11629_v42 = vadd.f32 %v2931_v20, %v2631_v21  ;;  %9212 = vmatmul.msk.f32.gmra.mxu0 %vm354_vm1, %v3075_v48  ;;  %v3076_v38 = vld [vmem:[#allocation2 + $0x98] sm:$0xff]  ;;  %v11650_v43 = vld [vmem:[#allocation2 + $0x149] sm:$0xff] }
 0x2f4   : > { %9262 = vmatmul.msk.f32.gmra.mxu1 %vm354_vm1, %v10964_v36  ;;  %8525 = vperm.xlu0 %9818, %v11154_v53   ;;  %v14502_v53 = vld [vmem:[#allocation35_spill] sm:$0xff] }
 0x2f5   : > { %9137 = vmatmul.msk.f32.gmra.mxu2 %vm354_vm1, %v11639_v6  ;;  %v14503_v20 = vld [vmem:[#allocation11_spill] sm:$0xff] }
 0x2f6   : > { %9187 = vmatmul.msk.f32.gmra.mxu3 %vm354_vm1, %v11000_v19  ;;  %v14501_v19 = vld [vmem:[#allocation85_spill] sm:$0xff] }
 0x2f8   : > { %v1794_v36 = vpop.f32.mrf.mxu0  ;;  %v2530_v45 = vpop.f32.mrf.mxu2 }
 0x2f9   : > { %v1848_v52 = vadd.f32 %v1794_v36, %v14498_v30  ;;  %v2198_v49 = vpop.f32.mrf.mxu1  ;;  %v2632_v26 = vadd.f32 %v2530_v45, %v14499_v28  ;;  %v2934_v61 = vpop.f32.mrf.mxu3  ;;  %v14504_v45 = vld [vmem:[#allocation81_spill] sm:$0xff] }
 0x2fa   : > { %4660 = vperm.xlu2 %9820, %v11662_v7   ;;  %8515 = vperm.xlu1 %9819, %v11181_v37   ;;  %v11680_v37 = vld [vmem:[#allocation2 + $0x151] sm:$0xff] }
 0x2fb   : > { %v11652_v40 = vadd.f32 %v2198_v49, %v1848_v52  ;;  %v11654_v21 = vadd.f32 %v2934_v61, %v2632_v26  ;;  %9213 = vmatmul.msk.f32.gmra.mxu0 %vm354_vm1, %v3076_v38  ;;  %v14505_v49 = vld [vmem:[#allocation82_spill] sm:$0xff] }
 0x2fc   : > { %9263 = vmatmul.msk.f32.gmra.mxu1 %vm354_vm1, %v14501_v19  ;;  %8540 = vperm.xlu0 %9818, %v14503_v20   ;;  %v3077_v61 = vld [vmem:[#allocation2 + $0xa0] sm:$0xff] }
 0x2fd   : > { %14500 = vst [vmem:[#allocation59_spill] sm:$0xff] %v11654_v21  ;;  %9138 = vmatmul.msk.f32.gmra.mxu2 %vm354_vm1, %v11650_v43  ;;  %v14509_v20 = vld [vmem:[#allocation30_spill] sm:$0xff] }
 0x2fe   : > { %9188 = vmatmul.msk.f32.gmra.mxu3 %vm354_vm1, %v14502_v53  ;;  %v14508_v53 = vld [vmem:[#allocation86_spill] sm:$0xff] }
 0x300   : > { %v1797_v48 = vpop.f32.mrf.mxu0  ;;  %v2533_v36 = vpop.f32.mrf.mxu2 }
 0x301   : > { %v1849_v30 = vadd.f32 %v1797_v48, %v14504_v45  ;;  %v2201_v52 = vpop.f32.mrf.mxu1  ;;  %v2633_v28 = vadd.f32 %v2533_v36, %v14505_v49  ;;  %v2937_v26 = vpop.f32.mrf.mxu3  ;;  %v14510_v48 = vld [vmem:[#allocation32_spill] sm:$0xff]  ;;  %v14511_v36 = vld [vmem:[#allocation46_spill] sm:$0xff]  ;;  %v14512_v45 = vld [vmem:[#allocation47_spill] sm:$0xff] }
 0x302   : > { %8460 = vperm.xlu2 %9820, %v14509_v20   ;;  %8530 = vperm.xlu1 %9819, %v14511_v36   ;;  %v14513_v49 = vld [vmem:[#allocation83_spill] sm:$0xff]  ;;  %v11698_v36 = vld [vmem:[#allocation2 + $0x159] sm:$0xff] }
 0x303   : > { %v11673_v38 = vadd.f32 %v2201_v52, %v1849_v30  ;;  %v11675_v19 = vadd.f32 %v2937_v26, %v2633_v28  ;;  %9214 = vmatmul.msk.f32.gmra.mxu0 %vm354_vm1, %v3077_v61  ;;  %v14514_v61 = vld [vmem:[#allocation84_spill] sm:$0xff] }
 0x304   : > { %9264 = vmatmul.msk.f32.gmra.mxu1 %vm354_vm1, %v14508_v53  ;;  %8555 = vperm.xlu0 %9818, %v14512_v45   ;;  %v14516_v45 = vld [vmem:[#allocation7_spill] sm:$0xff] }
 0x305   : > { %14506 = vst [vmem:[#allocation60_spill] sm:$0xff] %v11673_v38  ;;  %9139 = vmatmul.msk.f32.gmra.mxu2 %vm354_vm1, %v11680_v37  ;;  %v3078_v38 = vld [vmem:[#allocation2 + $0xa8] sm:$0xff] }
 0x306   : > { %14507 = vst [vmem:[#allocation61_spill] sm:$0xff] %v11675_v19  ;;  %9189 = vmatmul.msk.f32.gmra.mxu3 %vm354_vm1, %v14510_v48  ;;  %v14515_v48 = vld [vmem:[#allocation31_spill] sm:$0xff] }
 0x308   : > { %v1800_v30 = vpop.f32.mrf.mxu0  ;;  %v2536_v52 = vpop.f32.mrf.mxu2 }
 0x309   : > { %v1850_v28 = vadd.f32 %v1800_v30, %v14513_v49  ;;  %v2204_v26 = vpop.f32.mrf.mxu1  ;;  %v2634_v53 = vadd.f32 %v2536_v52, %v14514_v61  ;;  %v2940_v19 = vpop.f32.mrf.mxu3  ;;  %v14518_v49 = vld [vmem:[#allocation88_spill] sm:$0xff] }
 0x30a   : > { %8475 = vperm.xlu2 %9820, %v11251_v8   ;;  %8545 = vperm.xlu1 %9819, %v11256_v41   ;;  %v3079_v61 = vld [vmem:[#allocation2 + $0xb0] sm:$0xff]  ;;  %v11711_v8 = vld [vmem:[#allocation2 + $0x161] sm:$0xff]  ;;  %v14520_v41 = vld [vmem:[#allocation37_spill] sm:$0xff] }
 0x30b   : > { %v11691_v20 = vadd.f32 %v2204_v26, %v1850_v28  ;;  %v11693_v21 = vadd.f32 %v2940_v19, %v2634_v53  ;;  %9215 = vmatmul.msk.f32.gmra.mxu0 %vm354_vm1, %v3078_v38  ;;  %v14517_v38 = vld [vmem:[#allocation87_spill] sm:$0xff] }
 0x30c   : > { %9265 = vmatmul.msk.f32.gmra.mxu1 %vm354_vm1, %v14515_v48  ;;  %8570 = vperm.xlu0 %9818, %v11261_v60   ;;  %v14519_v48 = vld [vmem:[#allocation6_spill] sm:$0xff]  ;;  %v14521_v60 = vld [vmem:[#allocation16_spill] sm:$0xff] }
 0x30d   : > { %9140 = vmatmul.msk.f32.gmra.mxu2 %vm354_vm1, %v11698_v36 }
 0x30e   : > { %9190 = vmatmul.msk.f32.gmra.mxu3 %vm354_vm1, %v14516_v45 }
 0x310   : > { %v2539_v19 = vpop.f32.mrf.mxu2  ;;  %v3275_v30 = vpop.f32.mrf.mxu0 }
 0x311   : > { %v11708_v52 = vadd.f32 %v2539_v19, %v14517_v38  ;;  %v3419_v28 = vadd.f32 %v3275_v30, %v14518_v49  ;;  %v3679_v26 = vpop.f32.mrf.mxu1  ;;  %v14522_v30 = vld [vmem:[#allocation4_spill] sm:$0xff]  ;;  %v14523_v49 = vld [vmem:[#allocation5_spill] sm:$0xff] }
 0x312   : > { %8490 = vperm.xlu2 %9820, %v11287_v9   ;;  %8560 = vperm.xlu1 %9819, %v14521_v60  }
 0x313   : > { %v11713_v53 = vadd.f32 %v3679_v26, %v3419_v28  ;;  %9216 = vmatmul.msk.f32.gmra.mxu0 %vm354_vm1, %v3079_v61  ;;  %v3080_v61 = vld [vmem:[#allocation2 + $0xb8] sm:$0xff] }
 0x314   : > { %9266 = vmatmul.msk.f32.gmra.mxu1 %vm354_vm1, %v14519_v48  ;;  %8585 = vperm.xlu0 %9818, %v11297_v54   ;;  %v14525_v48 = vld [vmem:[#allocation34_spill] sm:$0xff]  ;;  %v14526_v54 = vld [vmem:[#allocation40_spill] sm:$0xff] }
 0x315   : > { %9141 = vmatmul.msk.f32.gmra.mxu2 %vm354_vm1, %v11711_v8 }
 0x316   : > { %9191 = vmatmul.msk.f32.gmra.mxu3 %vm354_vm1, %v14520_v41  ;;  %v11734_v41 = vld [vmem:[#allocation2 + $0x169] sm:$0xff] }
 0x318   : > { %v2542_v45 = vpop.f32.mrf.mxu2  ;;  %v3278_v19 = vpop.f32.mrf.mxu0 }
 0x319   : > { %v11726_v38 = vadd.f32 %v2542_v45, %v14522_v30  ;;  %v3420_v28 = vadd.f32 %v3278_v19, %v14523_v49  ;;  %v3682_v26 = vpop.f32.mrf.mxu1  ;;  %v14527_v19 = vld [vmem:[#allocation39_spill] sm:$0xff]  ;;  %v14528_v49 = vld [vmem:[#allocation33_spill] sm:$0xff] }
 0x31a   : > { %8505 = vperm.xlu2 %9820, %v11323_v10   ;;  %8575 = vperm.xlu1 %9819, %v11328_v23   ;;  %v350_v10 = vld [vmem:[%s9978_s21 + $0x198] sm:$0xff] }
 0x31b   : > { %v11729_v9 = vadd.f32 %v3682_v26, %v3420_v28  ;;  %9217 = vmatmul.msk.f32.gmra.mxu0 %vm354_vm1, %v3080_v61  ;;  %v3081_v61 = vld [vmem:[#allocation2 + $0xc0] sm:$0xff]  ;;  %406 = vst.msk [vmem:[#allocation2 + $0x198] sm:$0xff] %vm354_vm1, %v350_v10  ;;  %v11754_v23 = vld [vmem:[#allocation2 + $0x171] sm:$0xff]  ;;  %v3082_v10 = vld [vmem:[#allocation2 + $0xc8] sm:$0xff] }
 0x31c   : > { %9267 = vmatmul.msk.f32.gmra.mxu1 %vm354_vm1, %v14525_v48  ;;  %8600 = vperm.xlu0 %9818, %v11333_v31   ;;  %v14531_v31 = vld [vmem:[#allocation44_spill] sm:$0xff] }
 0x31d   : > { %14524 = vst [vmem:[#allocation24_spill] sm:$0xff] %v11729_v9  ;;  %9142 = vmatmul.msk.f32.gmra.mxu2 %vm354_vm1, %v11734_v41  ;;  %v14530_v9 = vld [vmem:[#allocation38_spill] sm:$0xff] }
 0x31e   : > { %9192 = vmatmul.msk.f32.gmra.mxu3 %vm354_vm1, %v14526_v54  ;;  %v14532_v54 = vld [vmem:[#allocation19_spill] sm:$0xff] }
 0x320   : > { %v2545_v60 = vpop.f32.mrf.mxu2  ;;  %v3281_v45 = vpop.f32.mrf.mxu0 }
 0x321   : > { %v11744_v30 = vadd.f32 %v2545_v60, %v14527_v19  ;;  %v3421_v28 = vadd.f32 %v3281_v45, %v14528_v49  ;;  %v3685_v26 = vpop.f32.mrf.mxu1  ;;  %v14533_v60 = vld [vmem:[#allocation55_spill] sm:$0xff]  ;;  %v14534_v49 = vld [vmem:[#allocation36_spill] sm:$0xff] }
 0x322   : > { %8520 = vperm.xlu2 %9820, %v11356_v55   ;;  %8590 = vperm.xlu1 %9819, %v14532_v54   ;;  %v11767_v55 = vld [vmem:[#allocation2 + $0x179] sm:$0xff]  ;;  %v14539_v54 = vld [vmem:[#allocation56_spill] sm:$0xff] }
 0x323   : > { %v11748_v48 = vadd.f32 %v3685_v26, %v3421_v28  ;;  %9218 = vmatmul.msk.f32.gmra.mxu0 %vm354_vm1, %v3081_v61  ;;  %v14536_v28 = vld [vmem:[#allocation43_spill] sm:$0xff] }
 0x324   : > { %9268 = vmatmul.msk.f32.gmra.mxu1 %vm354_vm1, %v14530_v9  ;;  %8615 = vperm.xlu0 %9818, %v14533_v60   ;;  %v14540_v60 = vld [vmem:[#allocation48_spill] sm:$0xff] }
 0x325   : > { %14529 = vst [vmem:[#allocation25_spill] sm:$0xff] %v11748_v48  ;;  %9143 = vmatmul.msk.f32.gmra.mxu2 %vm354_vm1, %v11754_v23 }
 0x326   : > { %9193 = vmatmul.msk.f32.gmra.mxu3 %vm354_vm1, %v14531_v31  ;;  %v14538_v31 = vld [vmem:[#allocation42_spill] sm:$0xff] }
 0x328   : > { %v2548_v45 = vpop.f32.mrf.mxu2  ;;  %v3284_v19 = vpop.f32.mrf.mxu0 }
 0x329   : > { %v11764_v9 = vadd.f32 %v2548_v45, %v14534_v49  ;;  %v3422_v26 = vadd.f32 %v3284_v19, %v14536_v28  ;;  %v3688_v61 = vpop.f32.mrf.mxu1  ;;  %v14541_v45 = vld [vmem:[#allocation57_spill] sm:$0xff]  ;;  %v14542_v28 = vld [vmem:[#allocation8_spill] sm:$0xff] }
 0x32a   : > { %8535 = vperm.xlu2 %9820, %v14539_v54   ;;  %8605 = vperm.xlu1 %9819, %v14541_v45   ;;  %v2704_v45 = vld [vmem:[#allocation2 + $0x182] sm:$0xff] }
 0x32b   : > { %14535 = vst [vmem:[#allocation62_spill] sm:$0xff] %v11764_v9  ;;  %v11769_v48 = vadd.f32 %v3688_v61, %v3422_v26  ;;  %9219 = vmatmul.msk.f32.gmra.mxu0 %vm354_vm1, %v3082_v10  ;;  %v14543_v61 = vld [vmem:[#allocation9_spill] sm:$0xff] }
 0x32c   : > { %9269 = vmatmul.msk.f32.gmra.mxu1 %vm354_vm1, %v14538_v31  ;;  %8630 = vperm.xlu0 %9818, %v11399_v57   ;;  %v14544_v9 = vld [vmem:[#allocation45_spill] sm:$0xff] }
 0x32d   : > { %14537 = vst [vmem:[#allocation63_spill] sm:$0xff] %v11769_v48  ;;  %9144 = vmatmul.msk.f32.gmra.mxu2 %vm354_vm1, %v11767_v55  ;;  %v3083_v48 = vld [vmem:[#allocation2 + $0xd0] sm:$0xff] }
 0x32e   : > { %9194 = vmatmul.msk.f32.gmra.mxu3 %vm354_vm1, %v14540_v60  ;;  %v11790_v60 = vld [vmem:[#allocation2 + $0x181] sm:$0xff] }
 0x330   : > { %v2551_v19 = vpop.f32.mrf.mxu2  ;;  %v3287_v49 = vpop.f32.mrf.mxu0 }
 0x331   : > { %v11782_v26 = vadd.f32 %v2551_v19, %v14542_v28  ;;  %v3423_v10 = vadd.f32 %v3287_v49, %v14543_v61  ;;  %v3691_v31 = vpop.f32.mrf.mxu1 }
 0x332   : > { %8550 = vperm.xlu2 %9820, %v11422_v2   ;;  %8620 = vperm.xlu1 %9819, %v11427_v63   ;;  %v14548_v2 = vld [vmem:[#allocation49_spill] sm:$0xff]  ;;  %v2705_v63 = vld [vmem:[#allocation2 + $0x18a] sm:$0xff] }
 0x333   : > { %v11785_v54 = vadd.f32 %v3691_v31, %v3423_v10  ;;  %9220 = vmatmul.msk.f32.gmra.mxu0 %vm354_vm1, %v3083_v48  ;;  %v14545_v48 = vld [vmem:[#allocation41_spill] sm:$0xff] }
 0x334   : > { %9270 = vmatmul.msk.f32.gmra.mxu1 %vm354_vm1, %v14544_v9  ;;  %8645 = vperm.xlu0 %9818, %v11432_v35   ;;  %v14546_v9 = vld [vmem:[#allocation10_spill] sm:$0xff]  ;;  %v3084_v10 = vld [vmem:[#allocation2 + $0xd8] sm:$0xff] }
 0x335   : > { %9145 = vmatmul.msk.f32.gmra.mxu2 %vm354_vm1, %v11790_v60 }
 0x336   : > { %9195 = vmatmul.msk.f32.gmra.mxu3 %vm354_vm1, %v2704_v45  ;;  %v11807_v45 = vld [vmem:[#allocation2 + $0x189] sm:$0xff] }
 0x338   : > { %v2554_v57 = vpop.f32.mrf.mxu2  ;;  %v3290_v19 = vpop.f32.mrf.mxu0 }
 0x339   : > { %v11799_v49 = vadd.f32 %v2554_v57, %v14545_v48  ;;  %v3424_v28 = vadd.f32 %v3290_v19, %v14546_v9  ;;  %v3694_v61 = vpop.f32.mrf.mxu1  ;;  %v14549_v19 = vld [vmem:[#allocation12_spill] sm:$0xff]  ;;  %v14550_v9 = vld [vmem:[#allocation13_spill] sm:$0xff] }
 0x33a   : > { %8565 = vperm.xlu2 %9820, %v11455_v11   ;;  %8635 = vperm.xlu1 %9819, %v11460_v3   ;;  %v2706_v11 = vld [vmem:[#allocation2 + $0x192] sm:$0xff] }
 0x33b   : > { %v11802_v31 = vadd.f32 %v3694_v61, %v3424_v28  ;;  %9221 = vmatmul.msk.f32.gmra.mxu0 %vm354_vm1, %v3084_v10  ;;  %v3085_v10 = vld [vmem:[#allocation2 + $0xe0] sm:$0xff] }
 0x33c   : > { %9271 = vmatmul.msk.f32.gmra.mxu1 %vm354_vm1, %v14548_v2  ;;  %8660 = vperm.xlu0 %9818, %v11465_v27   ;;  %v11819_v2 = vld [vmem:[#allocation2 + $0x191] sm:$0xff] }
 0x33d   : > { %14547 = vst [vmem:[#allocation69_spill] sm:$0xff] %v11802_v31  ;;  %9146 = vmatmul.msk.f32.gmra.mxu2 %vm354_vm1, %v11807_v45 }
 0x33e   : > { %9196 = vmatmul.msk.f32.gmra.mxu3 %vm354_vm1, %v2705_v63  ;;  %v14551_v63 = vld [vmem:[#allocation17_spill] sm:$0xff] }
 0x340   : > { %v2557_v35 = vpop.f32.mrf.mxu2  ;;  %v3293_v57 = vpop.f32.mrf.mxu0 }
 0x341   : > { %v11816_v48 = vadd.f32 %v2557_v35, %v14549_v19  ;;  %v3425_v28 = vadd.f32 %v3293_v57, %v14550_v9  ;;  %v3697_v61 = vpop.f32.mrf.mxu1  ;;  %v3490_v35 = vld [vmem:[#allocation2 + $0xe9] sm:$0xff]  ;;  %v14552_v57 = vld [vmem:[#allocation14_spill] sm:$0xff] }
 0x342   : > { %8580 = vperm.xlu2 %9820, %v11485_v46   ;;  %8650 = vperm.xlu1 %9819, %v11490_v25   ;;  %v14553_v9 = vld [vmem:[#allocation15_spill] sm:$0xff] }
 0x343   : > { %v11821_v31 = vadd.f32 %v3697_v61, %v3425_v28  ;;  %9222 = vmatmul.msk.f32.gmra.mxu0 %vm354_vm1, %v3085_v10  ;;  %v3086_v10 = vld [vmem:[#allocation2 + $0xe8] sm:$0xff] }
 0x344   : > { %9272 = vmatmul.msk.f32.gmra.mxu1 %vm354_vm1, %v14551_v63  ;;  %8675 = vperm.xlu0 %9818, %v11495_v17   ;;  %v14554_v63 = vld [vmem:[#allocation50_spill] sm:$0xff] }
 0x345   : > { %9147 = vmatmul.msk.f32.gmra.mxu2 %vm354_vm1, %v11819_v2 }
 0x346   : > { %9197 = vmatmul.msk.f32.gmra.mxu3 %vm354_vm1, %v2706_v11  ;;  %v3871_v11 = vld [vmem:[#allocation2 + $0x32] sm:$0xff] }
 0x348   : > { %v2560_v3 = vpop.f32.mrf.mxu2  ;;  %v3296_v27 = vpop.f32.mrf.mxu0 }
 0x349   : > { %v11833_v19 = vadd.f32 %v2560_v3, %v14552_v57  ;;  %v3426_v28 = vadd.f32 %v3296_v27, %v14553_v9  ;;  %v3700_v61 = vpop.f32.mrf.mxu1  ;;  %v14555_v27 = vld [vmem:[#allocation51_spill] sm:$0xff] }
 0x34a   : > { %8595 = vperm.xlu2 %9820, %v11515_v24   ;;  %8665 = vperm.xlu1 %9819, %v11520_v16   ;;  %v3872_v24 = vld [vmem:[#allocation2 + $0x3a] sm:$0xff] }
 0x34b   : > { %v11836_v46 = vadd.f32 %v3700_v61, %v3426_v28  ;;  %9223 = vmatmul.msk.f32.gmra.mxu0 %vm354_vm1, %v3086_v10  ;;  %v3087_v28 = vld [vmem:[#allocation2 + $0xf0] sm:$0xff] }
 0x34c   : > { %9273 = vmatmul.msk.f32.gmra.mxu1 %vm354_vm1, %v3490_v35  ;;  %v3491_v61 = vld [vmem:[#allocation2 + $0xf1] sm:$0xff] }
 0x34d   : > { %9300 = vmatmul.msk.f32.vlgmr.msra.gmra.mxu2 %vm354_vm1, %v3871_v11  ;;  %v11854_v11 = vpop.f32.mrf.mxu3 }
 0x350   : > { %v2563_v25 = vpop.f32.mrf.mxu2  ;;  %v3299_v17 = vpop.f32.mrf.mxu0 }
 0x351   : > { %v11844_v3 = vadd.f32 %v2563_v25, %v14554_v63  ;;  %v3427_v57 = vadd.f32 %v3299_v17, %v14555_v27  ;;  %v3703_v9 = vpop.f32.mrf.mxu1  ;;  %v14557_v25 = vld [vmem:[#allocation52_spill] sm:$0xff]  ;;  %v14559_v63 = vld [vmem:[#allocation53_spill] sm:$0xff] }
 0x352   : > { %8610 = vperm.xlu2 %9820, %v11540_v34   ;;  %8680 = vperm.xlu1 %9819, %v11545_v4   ;;  %v3873_v34 = vld [vmem:[#allocation2 + $0x42] sm:$0xff] }
 0x353   : > { %v11847_v10 = vadd.f32 %v3703_v9, %v3427_v57  ;;  %9224 = vmatmul.msk.f32.gmra.mxu0 %vm354_vm1, %v3087_v28  ;;  %v3088_v9 = vld [vmem:[#allocation2 + $0xf8] sm:$0xff] }
 0x354   : > { %9274 = vmatmul.msk.f32.gmra.mxu1 %vm354_vm1, %v3491_v61  ;;  %v3492_v28 = vld [vmem:[#allocation2 + $0xf9] sm:$0xff] }
 0x355   : > { %14556 = vst [vmem:[#allocation64_spill] sm:$0xff] %v11847_v10  ;;  %9301 = vmatmul.msk.f32.gmra.mxu2 %vm354_vm1, %v3872_v24 }
 0x358   : > { %v2566_v16 = vpop.f32.mrf.mxu2  ;;  %v3302_v35 = vpop.f32.mrf.mxu0 }
 0x359   : > { %v11857_v17 = vadd.f32 %v2566_v16, %v14557_v25  ;;  %v3428_v27 = vadd.f32 %v3302_v35, %v14559_v63  ;;  %v3706_v57 = vpop.f32.mrf.mxu1  ;;  %v3493_v16 = vld [vmem:[#allocation2 + $0x101] sm:$0xff] }
 0x35a   : > { %8625 = vperm.xlu2 %9820, %v11565_v44   ;;  %v14561_v25 = vld [vmem:[#allocation54_spill] sm:$0xff]  ;;  %v3874_v44 = vld [vmem:[#allocation2 + $0x4a] sm:$0xff] }
 0x35b   : > { %14558 = vst [vmem:[#allocation26_spill] sm:$0xff] %v11857_v17  ;;  %v11860_v61 = vadd.f32 %v3706_v57, %v3428_v27  ;;  %9225 = vmatmul.msk.f32.gmra.mxu0 %vm354_vm1, %v3088_v9  ;;  %v14563_v35 = vld [vmem:[#allocation18_spill] sm:$0xff]  ;;  %v11870_v57 = vpop.f32.mrf.mxu3 }
 0x35c   : > { %9275 = vmatmul.msk.f32.gmra.mxu1 %vm354_vm1, %v3492_v28  ;;  %v3089_v27 = vld [vmem:[#allocation2 + $0x100] sm:$0xff] }
 0x35d   : > { %14560 = vst [vmem:[#allocation27_spill] sm:$0xff] %v11860_v61  ;;  %9302 = vmatmul.msk.f32.gmra.mxu2 %vm354_vm1, %v3873_v34  ;;  %v3090_v61 = vld [vmem:[#allocation2 + $0x108] sm:$0xff] }
 0x360   : > { %v2569_v4 = vpop.f32.mrf.mxu2  ;;  %v3305_v24 = vpop.f32.mrf.mxu0 }
 0x361   : > { %v11867_v17 = vadd.f32 %v2569_v4, %v14561_v25  ;;  %v3429_v63 = vadd.f32 %v3305_v24, %v14563_v35  ;;  %v3709_v10 = vpop.f32.mrf.mxu1  ;;  %v14564_v4 = vld [vmem:[#allocation20_spill] sm:$0xff]  ;;  %v14565_v24 = vld [vmem:[#allocation21_spill] sm:$0xff] }
 0x362   : > { %8640 = vperm.xlu2 %9820, %v11590_v33  }
 0x363   : > { %14562 = vst [vmem:[#allocation65_spill] sm:$0xff] %v11867_v17  ;;  %v11872_v9 = vadd.f32 %v3709_v10, %v3429_v63  ;;  %9226 = vmatmul.msk.f32.gmra.mxu0 %vm354_vm1, %v3089_v27  ;;  %v3494_v10 = vld [vmem:[#allocation2 + $0x109] sm:$0xff]  ;;  %v11887_v33 = vpop.f32.mrf.mxu3 }
 0x364   : > { %9276 = vmatmul.msk.f32.gmra.mxu1 %vm354_vm1, %v3493_v16  ;;  %v3875_v16 = vld [vmem:[#allocation2 + $0x52] sm:$0xff] }
 0x365   : > { %9303 = vmatmul.msk.f32.gmra.mxu2 %vm354_vm1, %v3874_v44 }
 0x368   : > { %v2572_v28 = vpop.f32.mrf.mxu2  ;;  %v3308_v34 = vpop.f32.mrf.mxu0 }
 0x369   : > { %v11879_v25 = vadd.f32 %v2572_v28, %v14564_v4  ;;  %v3430_v35 = vadd.f32 %v3308_v34, %v14565_v24  ;;  %v3712_v17 = vpop.f32.mrf.mxu1  ;;  %v14567_v28 = vld [vmem:[#allocation58_spill] sm:$0xff] }
 0x36a   : > { %8655 = vperm.xlu2 %9820, %v11614_v5   ;;  %v14568_v4 = vld [vmem:[#allocation22_spill] sm:$0xff] }
 0x36b   : > { %v11882_v63 = vadd.f32 %v3712_v17, %v3430_v35  ;;  %9227 = vmatmul.msk.f32.gmra.mxu0 %vm354_vm1, %v3090_v61  ;;  %v3091_v35 = vld [vmem:[#allocation2 + $0x110] sm:$0xff]  ;;  %v3876_v5 = vld [vmem:[#allocation2 + $0x5a] sm:$0xff] }
 0x36c   : > { %9277 = vmatmul.msk.f32.gmra.mxu1 %vm354_vm1, %v3494_v10  ;;  %v11900_v10 = vpop.f32.mrf.mxu3 }
 0x36d   : > { %14566 = vst [vmem:[#allocation66_spill] sm:$0xff] %v11882_v63  ;;  %9304 = vmatmul.msk.f32.gmra.mxu2 %vm354_vm1, %v3875_v16  ;;  %v3495_v63 = vld [vmem:[#allocation2 + $0x111] sm:$0xff] }
 0x370   : > { %v2575_v27 = vpop.f32.mrf.mxu2  ;;  %v3311_v44 = vpop.f32.mrf.mxu0 }
 0x371   : > { %v11891_v34 = vadd.f32 %v2575_v27, %v14567_v28  ;;  %v3431_v24 = vadd.f32 %v3311_v44, %v14568_v4  ;;  %v3715_v17 = vpop.f32.mrf.mxu1  ;;  %v3496_v28 = vld [vmem:[#allocation2 + $0x119] sm:$0xff] }
 0x372   : > { %8670 = vperm.xlu2 %9820, %v11637_v50   ;;  %v3877_v50 = vld [vmem:[#allocation2 + $0x62] sm:$0xff] }
 0x373   : > { %v11894_v61 = vadd.f32 %v3715_v17, %v3431_v24  ;;  %9228 = vmatmul.msk.f32.gmra.mxu0 %vm354_vm1, %v3091_v35  ;;  %v3092_v17 = vld [vmem:[#allocation2 + $0x118] sm:$0xff] }
 0x374   : > { %9278 = vmatmul.msk.f32.gmra.mxu1 %vm354_vm1, %v3495_v63 }
 0x375   : > { %14569 = vst [vmem:[#allocation67_spill] sm:$0xff] %v11894_v61  ;;  %9305 = vmatmul.msk.f32.gmra.mxu2 %vm354_vm1, %v3876_v5  ;;  %v11912_v61 = vpop.f32.mrf.mxu3 }
 0x378   : > { %v2578_v16 = vpop.f32.mrf.mxu2  ;;  %v3314_v27 = vpop.f32.mrf.mxu0 }
 0x379   : > { %v11903_v44 = vadd.f32 %v2578_v16, %v11445_v1  ;;  %v3432_v4 = vadd.f32 %v3314_v27, %v11447_v22  ;;  %v3718_v24 = vpop.f32.mrf.mxu1  ;;  %v14571_v22 = vld [vmem:[#allocation23_spill] sm:$0xff] }
 0x37a   : > { %8685 = vperm.xlu2 %9820, %v11662_v7   ;;  %v3878_v7 = vld [vmem:[#allocation2 + $0x6a] sm:$0xff] }
 0x37b   : > { %v11906_v35 = vadd.f32 %v3718_v24, %v3432_v4  ;;  %9229 = vmatmul.msk.f32.gmra.mxu0 %vm354_vm1, %v3092_v17  ;;  %v3093_v4 = vld [vmem:[#allocation2 + $0x120] sm:$0xff] }
 0x37c   : > { %9279 = vmatmul.msk.f32.gmra.mxu1 %vm354_vm1, %v3496_v28  ;;  %v3497_v24 = vld [vmem:[#allocation2 + $0x121] sm:$0xff] }
 0x37d   : > { %14570 = vst [vmem:[#allocation28_spill] sm:$0xff] %v11906_v35  ;;  %9306 = vmatmul.msk.f32.gmra.mxu2 %vm354_vm1, %v3877_v50 }
 0x380   : > { %v2581_v63 = vpop.f32.mrf.mxu2  ;;  %v3317_v5 = vpop.f32.mrf.mxu0 }
 0x381   : > { %v11915_v1 = vadd.f32 %v2581_v63, %v11475_v18  ;;  %v3433_v16 = vadd.f32 %v3317_v5, %v14571_v22  ;;  %v3721_v27 = vpop.f32.mrf.mxu1  ;;  %v3094_v5 = vld [vmem:[#allocation2 + $0x128] sm:$0xff]  ;;  %v11927_v22 = vpop.f32.mrf.mxu3 }
 0x383   : > { %v11918_v17 = vadd.f32 %v3721_v27, %v3433_v16  ;;  %9230 = vmatmul.msk.f32.gmra.mxu0 %vm354_vm1, %v3093_v4  ;;  %v3879_v27 = vld [vmem:[#allocation2 + $0x72] sm:$0xff] }
 0x384   : > { %9280 = vmatmul.msk.f32.gmra.mxu1 %vm354_vm1, %v3497_v24 }
 0x385   : > { %9307 = vmatmul.msk.f32.gmra.mxu2 %vm354_vm1, %v3878_v7 }
 0x388   : > { %v2584_v28 = vpop.f32.mrf.mxu2  ;;  %v3320_v50 = vpop.f32.mrf.mxu0 }
 0x389   : > { %v11924_v35 = vadd.f32 %v2584_v28, %v11505_v15  ;;  %v3434_v18 = vadd.f32 %v3320_v50, %v11507_v56  ;;  %v3724_v63 = vpop.f32.mrf.mxu1  ;;  %v3095_v28 = vld [vmem:[#allocation2 + $0x130] sm:$0xff] }
 0x38b   : > { %v11929_v16 = vadd.f32 %v3724_v63, %v3434_v18  ;;  %9231 = vmatmul.msk.f32.gmra.mxu0 %vm354_vm1, %v3094_v5  ;;  %v11944_v18 = vpop.f32.mrf.mxu3 }
 0x38c   : > { %9281 = vmatmul.msk.f32.gmra.mxu1 %vm354_vm1, %v11567_v62  ;;  %v3880_v62 = vld [vmem:[#allocation2 + $0x7a] sm:$0xff] }
 0x38d   : > { %9308 = vmatmul.msk.f32.gmra.mxu2 %vm354_vm1, %v3879_v27 }
 0x390   : > { %v2587_v4 = vpop.f32.mrf.mxu2  ;;  %v3323_v24 = vpop.f32.mrf.mxu0 }
 0x391   : > { %v11936_v15 = vadd.f32 %v2587_v4, %v11530_v47  ;;  %v3435_v56 = vadd.f32 %v3323_v24, %v11532_v32  ;;  %v3727_v7 = vpop.f32.mrf.mxu1  ;;  %v3096_v4 = vld [vmem:[#allocation2 + $0x138] sm:$0xff] }
 0x393   : > { %v11939_v50 = vadd.f32 %v3727_v7, %v3435_v56  ;;  %9232 = vmatmul.msk.f32.gmra.mxu0 %vm354_vm1, %v3095_v28  ;;  %v11957_v56 = vpop.f32.mrf.mxu3 }
 0x394   : > { %9282 = vmatmul.msk.f32.gmra.mxu1 %vm354_vm1, %v11578_v14  ;;  %v3881_v14 = vld [vmem:[#allocation2 + $0x82] sm:$0xff] }
 0x395   : > { %9309 = vmatmul.msk.f32.gmra.mxu2 %vm354_vm1, %v3880_v62 }
 0x398   : > { %v2590_v63 = vpop.f32.mrf.mxu2  ;;  %v3326_v5 = vpop.f32.mrf.mxu0 }
 0x399   : > { %v11948_v47 = vadd.f32 %v2590_v63, %v11555_v51  ;;  %v3436_v32 = vadd.f32 %v3326_v5, %v11557_v13  ;;  %v3730_v27 = vpop.f32.mrf.mxu1  ;;  %v3097_v63 = vld [vmem:[#allocation2 + $0x140] sm:$0xff] }
 0x39b   : > { %v11951_v24 = vadd.f32 %v3730_v27, %v3436_v32  ;;  %9233 = vmatmul.msk.f32.gmra.mxu0 %vm354_vm1, %v3096_v4  ;;  %v9499_v32 = vld [vmem:[%s14232_s4 + $0xc8] sm:$0xff] }
 0x39c   : > { %9283 = vmatmul.msk.f32.gmra.mxu1 %vm354_vm1, %v11616_v39  ;;  %v3882_v39 = vld [vmem:[#allocation2 + $0x8a] sm:$0xff]  ;;  %6084 = vmatpush.msrb.mxu2 %v9499_v32 }
 0x39d   : > { %9310 = vmatmul.msk.f32.gmra.mxu2 %vm354_vm1, %v3881_v14 }
 0x3a0   : > { %v2593_v7 = vpop.f32.mrf.mxu2  ;;  %v3329_v28 = vpop.f32.mrf.mxu0 }
 0x3a1   : > { %v11960_v51 = vadd.f32 %v2593_v7, %v11580_v58  ;;  %v3437_v13 = vadd.f32 %v3329_v28, %v11582_v12  ;;  %v3733_v62 = vpop.f32.mrf.mxu1  ;;  %v11972_v12 = vpop.f32.mrf.mxu3  ;;  %v14266_v28 = vmov 0.0  }
 0x3a2   : > { %410 = vst.msk [vmem:[#allocation3] sm:$0xff] %vm354_vm1, %v14266_v28 }
 0x3a3   : > { %v11963_v5 = vadd.f32 %v3733_v62, %v3437_v13  ;;  %9234 = vmatmul.msk.f32.gmra.mxu0 %vm354_vm1, %v3097_v63  ;;  %411 = vst.msk [vmem:[#allocation3 + $0x8] sm:$0xff] %vm354_vm1, %v14266_v28  ;;  %v9449_v62 = vld [vmem:[%s14232_s4 + $0xb8] sm:$0xff] }
 0x3a4   : > { %9284 = vmatmul.msk.f32.gmra.mxu1 %vm354_vm1, %v11639_v6  ;;  %v3098_v6 = vld [vmem:[#allocation2 + $0x148] sm:$0xff]  ;;  %412 = vst.msk [vmem:[#allocation3 + $0x10] sm:$0xff] %vm354_vm1, %v14266_v28  ;;  %v3883_v63 = vld [vmem:[#allocation2 + $0x92] sm:$0xff] }
 0x3a5   : > { %9311 = vmatmul.msk.f32.gmra.mxu2 %vm354_vm1, %v3882_v39  ;;  %415 = vst.msk [vmem:[#allocation3 + $0x199] sm:$0xff] %vm354_vm1, %v14266_v28  ;;  %5680 = vmatpush.msra.mxu1 %v9449_v62 }
 0x3a6   : > { %416 = vst.msk [vmem:[#allocation3 + $0x1a1] sm:$0xff] %vm354_vm1, %v14266_v28 }
 0x3a7   : > { %417 = vst.msk [vmem:[#allocation3 + $0x1a9] sm:$0xff] %vm354_vm1, %v14266_v28 }
 0x3a8   : > { %v2596_v58 = vpop.f32.mrf.mxu2  ;;  %v3332_v27 = vpop.f32.mrf.mxu0  ;;  %414 = vst.msk [vmem:[#allocation3 + $0x18] sm:$0x1] %vm413_vm2, %v14266_v28  ;;  %v14574_v28 = vld [vmem:[#allocation61_spill] sm:$0xff] }
 0x3a9   : > { %v11975_v4 = vadd.f32 %v2596_v58, %v11601_v59  ;;  %v3438_v14 = vadd.f32 %v3332_v27, %v11603_v0  ;;  %v3736_v7 = vpop.f32.mrf.mxu1  ;;  %v9349_v59 = vld [vmem:[%s14232_s4 + $0x98] sm:$0xff] }
 0x3aa   : > { %v9549_v0 = vld [vmem:[%s14232_s4 + $0xd8] sm:$0xff]  ;;  %5324 = vmatpush.msra.mxu0 %v9349_v59 }
 0x3ab   : > { %v11982_v13 = vadd.f32 %v3736_v7, %v3438_v14  ;;  %9235 = vmatmul.msk.f32.gmra.mxu0 %vm354_vm1, %v3098_v6  ;;  %6488 = vmatpush.msrb.mxu3 %v9549_v0  ;;  %v4810_v14 = vld [vmem:[#allocation3 + $0x1] sm:$0xff]  ;;  %v3099_v7 = vld [vmem:[#allocation2 + $0x150] sm:$0xff]  ;;  %v12010_v6 = vpop.f32.mrf.mxu3 }
 0x3ac   : > { %9285 = vmatmul.msk.f32.gmra.mxu1 %vm354_vm1, %v11650_v43  ;;  %9352 = vmatmul.msk.f32.vlgmr.msra.gmra.mxu3 %vm354_vm1, %v4810_v14  ;;  %v3884_v0 = vld [vmem:[#allocation2 + $0x9a] sm:$0xff] }
 0x3ad   : > { %9312 = vmatmul.msk.f32.gmra.mxu2 %vm354_vm1, %v3883_v63 }
 0x3b0   : > { %v2599_v43 = vpop.f32.mrf.mxu2  ;;  %v3335_v39 = vpop.f32.mrf.mxu0 }
 0x3b1   : > { %v12006_v32 = vadd.f32 %v2599_v43, %v11627_v29  ;;  %v3439_v58 = vadd.f32 %v3335_v39, %v11629_v42  ;;  %v3739_v27 = vpop.f32.mrf.mxu1  ;;  %v4811_v42 = vld [vmem:[#allocation3 + $0x9] sm:$0xff] }
 0x3b2   : > { %v14572_v43 = vld [vmem:[#allocation59_spill] sm:$0xff] }
 0x3b3   : > { %v12012_v59 = vadd.f32 %v3739_v27, %v3439_v58  ;;  %9236 = vmatmul.msk.f32.gmra.mxu0 %vm354_vm1, %v3099_v7  ;;  %v3100_v58 = vld [vmem:[#allocation2 + $0x158] sm:$0xff]  ;;  %v12029_v7 = vpop.f32.mrf.mxu3 }
 0x3b4   : > { %9286 = vmatmul.msk.f32.gmra.mxu1 %vm354_vm1, %v11680_v37  ;;  %9353 = vmatmul.msk.f32.gmra.mxu3 %vm354_vm1, %v4811_v42  ;;  %v3885_v37 = vld [vmem:[#allocation2 + $0xa2] sm:$0xff] }
 0x3b5   : > { %9313 = vmatmul.msk.f32.gmra.mxu2 %vm354_vm1, %v3884_v0 }
 0x3b8   : > { %v2602_v29 = vpop.f32.mrf.mxu2  ;;  %v3338_v62 = vpop.f32.mrf.mxu0 }
 0x3b9   : > { %v12019_v63 = vadd.f32 %v2602_v29, %v11652_v40  ;;  %v3440_v39 = vadd.f32 %v3338_v62, %v14572_v43  ;;  %v3742_v14 = vpop.f32.mrf.mxu1  ;;  %v4812_v29 = vld [vmem:[#allocation3 + $0x11] sm:$0xff] }
 0x3ba   : > { %v14573_v62 = vld [vmem:[#allocation60_spill] sm:$0xff] }
 0x3bb   : > { %v12024_v27 = vadd.f32 %v3742_v14, %v3440_v39  ;;  %9237 = vmatmul.msk.f32.gmra.mxu0 %vm354_vm1, %v3100_v58  ;;  %v3101_v14 = vld [vmem:[#allocation2 + $0x160] sm:$0xff] }
 0x3bc   : > { %9287 = vmatmul.msk.f32.gmra.mxu1 %vm354_vm1, %v11698_v36  ;;  %9354 = vmatmul.msk.f32.gmra.mxu3 %vm354_vm1, %v4812_v29  ;;  %v3886_v36 = vld [vmem:[#allocation2 + $0xaa] sm:$0xff] }
 0x3bd   : > { %9314 = vmatmul.msk.f32.gmra.mxu2 %vm354_vm1, %v3885_v37  ;;  %v12043_v37 = vpop.f32.mrf.mxu3 }
 0x3c0   : > { %v2605_v40 = vpop.f32.mrf.mxu2  ;;  %v3341_v0 = vpop.f32.mrf.mxu0 }
 0x3c1   : > { %v12033_v43 = vadd.f32 %v2605_v40, %v14573_v62  ;;  %v3441_v42 = vadd.f32 %v3341_v0, %v14574_v28  ;;  %v3745_v39 = vpop.f32.mrf.mxu1 }
 0x3c3   : > { %v12037_v58 = vadd.f32 %v3745_v39, %v3441_v42  ;;  %9238 = vmatmul.msk.f32.gmra.mxu0 %vm354_vm1, %v3101_v14  ;;  %v3102_v42 = vld [vmem:[#allocation2 + $0x168] sm:$0xff]  ;;  %v3039_v14 = vadd.f32 %v11854_v11, %v11708_v52  ;;  %v4426_v52 = vpop.permute.xlu0 %4425  ;;  %v3888_v11 = vld [vmem:[#allocation2 + $0xba] sm:$0xff] }
 0x3c4   : > { %9288 = vmatmul.msk.f32.gmra.mxu1 %vm354_vm1, %v11711_v8  ;;  %v3887_v8 = vld [vmem:[#allocation2 + $0xb2] sm:$0xff] }
 0x3c5   : > { %14575 = vst [vmem:[#allocation29_spill] sm:$0xff] %v12037_v58  ;;  %9315 = vmatmul.msk.f32.gmra.mxu2 %vm354_vm1, %v3886_v36 }
 0x3c8   : > { %v2608_v40 = vpop.f32.mrf.mxu2  ;;  %v3344_v62 = vpop.f32.mrf.mxu0 }
 0x3c9   : > { %v12046_v28 = vadd.f32 %v2608_v40, %v11691_v20  ;;  %v3442_v0 = vadd.f32 %v3344_v62, %v11693_v21  ;;  %v3748_v29 = vpop.f32.mrf.mxu1  ;;  %v12060_v20 = vld [vmem:[%s14233_s5] ss:$0 sm:$0xff]  ;;  %v12062_v40 = vpop.f32.mrf.mxu3 }
 0x3cb   : > { %14576 = vst [vmem:[#allocation68_spill] sm:$0xff] %v12046_v28  ;;  %v12049_v39 = vadd.f32 %v3748_v29, %v3442_v0  ;;  %9239 = vmatmul.msk.f32.gmra.mxu0 %vm354_vm1, %v3102_v42  ;;  %v351_v28 = vld [vmem:[%s9978_s21 + $0x1a0] sm:$0xff] }
 0x3cc   : > { %9289 = vmatmul.msk.f32.gmra.mxu1 %vm354_vm1, %v11734_v41  ;;  %v3103_v41 = vld [vmem:[#allocation2 + $0x170] sm:$0xff]  ;;  %407 = vst.msk [vmem:[#allocation2 + $0x1a0] sm:$0xff] %vm354_vm1, %v351_v28  ;;  %v3105_v28 = vld [vmem:[#allocation2 + $0x180] sm:$0xff] }
 0x3cd   : > { %14577 = vst [vmem:[#allocation70_spill] sm:$0xff] %v12049_v39  ;;  %9316 = vmatmul.msk.f32.gmra.mxu2 %vm354_vm1, %v3887_v8 }
 0x3d0   : > { %v3347_v21 = vpop.f32.mrf.mxu0  ;;  %v4083_v36 = vpop.f32.mrf.mxu2 }
 0x3d1   : > { %v3443_v62 = vadd.f32 %v3347_v21, %v3039_v14  ;;  %v3751_v0 = vpop.f32.mrf.mxu1  ;;  %v4227_v29 = vadd.f32 %v4083_v36, %v11713_v53  ;;  %v3040_v14 = vadd.f32 %v11870_v57, %v11726_v38  ;;  %v3889_v38 = vld [vmem:[#allocation2 + $0xc2] sm:$0xff] }
 0x3d3   : > { %v12065_v42 = vadd.f32 %v3751_v0, %v3443_v62  ;;  %v4279_v8 = vadd.f32 %v12060_v20, %v4227_v29  ;;  %9240 = vmatmul.msk.f32.gmra.mxu0 %vm354_vm1, %v3103_v41  ;;  %v14579_v29 = vld [vmem:[#allocation24_spill] sm:$0xff] }
 0x3d4   : > { %9290 = vmatmul.msk.f32.gmra.mxu1 %vm354_vm1, %v11754_v23  ;;  %v12077_v23 = vpop.f32.mrf.mxu3 }
 0x3d5   : > { %14578 = vst [vmem:[#allocation71_spill] sm:$0xff] %v12065_v42  ;;  %v4327_v39 = vmax.f32 %v4279_v8, 0.0  ;;  %9317 = vmatmul.msk.f32.gmra.mxu2 %vm354_vm1, %v3888_v11  ;;  %v3104_v42 = vld [vmem:[#allocation2 + $0x178] sm:$0xff] }
 0x3d7   : > { %v4663_v53 = vmul.f32 %v4426_v52, %v4327_v39  ;;  %v4431_v39 = vpop.permute.xlu0 %4430  ;;  %v3041_v52 = vadd.f32 %v11887_v33, %v11744_v30  ;;  %v4436_v30 = vpop.permute.xlu1 %4435  ;;  %v3890_v33 = vld [vmem:[#allocation2 + $0xca] sm:$0xff] }
 0x3d8   : > { %v3350_v21 = vpop.f32.mrf.mxu0  ;;  %v4086_v36 = vpop.f32.mrf.mxu2 }
 0x3d9   : > { %4711 = vst.msk [vmem:[#allocation3 + $0x19] sm:$0xff] %vm354_vm1, %v4663_v53  ;;  %v3444_v62 = vadd.f32 %v3350_v21, %v3040_v14  ;;  %v3754_v0 = vpop.f32.mrf.mxu1  ;;  %v4228_v41 = vadd.f32 %v4086_v36, %v14579_v29 }
 0x3db   : > { %v12079_v58 = vadd.f32 %v3754_v0, %v3444_v62  ;;  %v4280_v8 = vadd.f32 %v12060_v20, %v4228_v41  ;;  %9241 = vmatmul.msk.f32.gmra.mxu0 %vm354_vm1, %v3104_v42  ;;  %v352_v0 = vld [vmem:[%s9978_s21 + $0x1a8] sm:$0xff] }
 0x3dc   : > { %9291 = vmatmul.msk.f32.gmra.mxu1 %vm354_vm1, %v11767_v55  ;;  %v14580_v55 = vld [vmem:[#allocation25_spill] sm:$0xff]  ;;  %408 = vst.msk [vmem:[#allocation2 + $0x1a8] sm:$0xff] %vm354_vm1, %v352_v0 }
 0x3dd   : > { %v4328_v57 = vmax.f32 %v4280_v8, 0.0  ;;  %9318 = vmatmul.msk.f32.gmra.mxu2 %vm354_vm1, %v3889_v38  ;;  %v12100_v8 = vpop.f32.mrf.mxu3 }
 0x3df   : > { %v4664_v11 = vmul.f32 %v4431_v39, %v4328_v57  ;;  %v14581_v57 = vld [vmem:[#allocation62_spill] sm:$0xff] }
 0x3e0   : > { %v3353_v14 = vpop.f32.mrf.mxu0  ;;  %v4089_v53 = vpop.f32.mrf.mxu2  ;;  %v4813_v21 = vld [vmem:[#allocation3 + $0x19] sm:$0xff]  ;;  %v3042_v39 = vadd.f32 %v11900_v10, %v14581_v57 }
 0x3e1   : > { %4712 = vst.msk [vmem:[#allocation3 + $0x21] sm:$0xff] %vm354_vm1, %v4664_v11  ;;  %v3445_v42 = vadd.f32 %v3353_v14, %v3041_v52  ;;  %v3757_v36 = vpop.f32.mrf.mxu1  ;;  %v4229_v62 = vadd.f32 %v4089_v53, %v14580_v55  ;;  %9355 = vmatmul.msk.f32.gmra.mxu3 %vm354_vm1, %v4813_v21  ;;  %v3106_v55 = vld [vmem:[#allocation2 + $0x188] sm:$0xff]  ;;  %v3891_v10 = vld [vmem:[#allocation2 + $0xd2] sm:$0xff] }
 0x3e3   : > { %v12093_v29 = vadd.f32 %v3757_v36, %v3445_v42  ;;  %v4281_v41 = vadd.f32 %v12060_v20, %v4229_v62  ;;  %9242 = vmatmul.msk.f32.gmra.mxu0 %vm354_vm1, %v3105_v28  ;;  %v14582_v42 = vld [vmem:[#allocation63_spill] sm:$0xff]  ;;  %v353_v62 = vld [vmem:[%s9978_s21 + $0x1b0] sm:$0xff] }
 0x3e4   : > { %9292 = vmatmul.msk.f32.gmra.mxu1 %vm354_vm1, %v11790_v60  ;;  %409 = vst.msk [vmem:[#allocation2 + $0x1b0] sm:$0xff] %vm354_vm1, %v353_v62 }
 0x3e5   : > { %v4329_v38 = vmax.f32 %v4281_v41, 0.0  ;;  %9319 = vmatmul.msk.f32.gmra.mxu2 %vm354_vm1, %v3890_v33  ;;  %v3043_v33 = vadd.f32 %v11912_v61, %v11782_v26  ;;  %v4446_v26 = vpop.permute.xlu2 %4445  ;;  %v3892_v61 = vld [vmem:[#allocation2 + $0xda] sm:$0xff] }
 0x3e7   : > { %v4665_v52 = vmul.f32 %v4436_v30, %v4329_v38  ;;  %v4441_v30 = vpop.permute.xlu1 %4440  ;;  %v12119_v38 = vpop.f32.mrf.mxu3 }
 0x3e8   : > { %v3356_v11 = vpop.f32.mrf.mxu0  ;;  %v4092_v14 = vpop.f32.mrf.mxu2  ;;  %v4814_v53 = vld [vmem:[#allocation3 + $0x21] sm:$0xff] }
 0x3e9   : > { %4713 = vst.msk [vmem:[#allocation3 + $0x29] sm:$0xff] %vm354_vm1, %v4665_v52  ;;  %v3446_v60 = vadd.f32 %v3356_v11, %v3042_v39  ;;  %v3760_v21 = vpop.f32.mrf.mxu1  ;;  %v4230_v36 = vadd.f32 %v4092_v14, %v14582_v42  ;;  %9356 = vmatmul.msk.f32.gmra.mxu3 %vm354_vm1, %v4814_v53 }
 0x3eb   : > { %v12109_v28 = vadd.f32 %v3760_v21, %v3446_v60  ;;  %v4282_v0 = vadd.f32 %v12060_v20, %v4230_v36  ;;  %9243 = vmatmul.msk.f32.gmra.mxu0 %vm354_vm1, %v3106_v55  ;;  %v3107_v60 = vld [vmem:[#allocation2 + $0x190] sm:$0xff] }
 0x3ec   : > { %9293 = vmatmul.msk.f32.gmra.mxu1 %vm354_vm1, %v11807_v45 }
 0x3ed   : > { %v4330_v41 = vmax.f32 %v4282_v0, 0.0  ;;  %9320 = vmatmul.msk.f32.gmra.mxu2 %vm354_vm1, %v3891_v10 }
 0x3ef   : > { %v4666_v57 = vmul.f32 %v4441_v30, %v4330_v41  ;;  %v3108_v41 = vld [vmem:[#allocation2 + $0x198] sm:$0xff] }
 0x3f0   : > { %v3359_v39 = vpop.f32.mrf.mxu0  ;;  %v4095_v52 = vpop.f32.mrf.mxu2  ;;  %v4815_v11 = vld [vmem:[#allocation3 + $0x29] sm:$0xff]  ;;  %v3512_v30 = vld [vmem:[#allocation2 + $0x199] sm:$0xff] }
 0x3f1   : > { %4714 = vst.msk [vmem:[#allocation3 + $0x31] sm:$0xff] %vm354_vm1, %v4666_v57  ;;  %v3447_v14 = vadd.f32 %v3359_v39, %v3043_v33  ;;  %v3763_v45 = vpop.f32.mrf.mxu1  ;;  %v4231_v53 = vadd.f32 %v4095_v52, %v11785_v54  ;;  %9357 = vmatmul.msk.f32.gmra.mxu3 %vm354_vm1, %v4815_v11  ;;  %v3044_v54 = vadd.f32 %v11927_v22, %v11799_v49  ;;  %v12133_v33 = vpop.f32.mrf.mxu3  ;;  %v14583_v39 = vld [vmem:[#allocation69_spill] sm:$0xff]  ;;  %v9348_v49 = vld [vmem:[%s14232_s4 + $0x90] sm:$0xff] }
 0x3f2   : > { %v9448_v22 = vld [vmem:[%s14232_s4 + $0xb0] sm:$0xff]  ;;  %5325 = vmatpush.msra.mxu0 %v9348_v49 }
 0x3f3   : > { %v12124_v21 = vadd.f32 %v3763_v45, %v3447_v14  ;;  %v4283_v42 = vadd.f32 %v12060_v20, %v4231_v53  ;;  %9244 = vmatmul.msk.f32.gmra.mxu0 %vm354_vm1, %v3107_v60  ;;  %5681 = vmatpush.msra.mxu1 %v9448_v22  ;;  %v3893_v45 = vld [vmem:[#allocation2 + $0xe2] sm:$0xff]  ;;  %v4451_v60 = vpop.permute.xlu2 %4450 }
 0x3f4   : > { %9294 = vmatmul.msk.f32.gmra.mxu1 %vm354_vm1, %v11819_v2 }
 0x3f5   : > { %v4331_v36 = vmax.f32 %v4283_v42, 0.0  ;;  %9321 = vmatmul.msk.f32.gmra.mxu2 %vm354_vm1, %v3892_v61  ;;  %v3045_v42 = vadd.f32 %v11944_v18, %v11816_v48  ;;  %v3894_v18 = vld [vmem:[#allocation2 + $0xea] sm:$0xff] }
 0x3f7   : > { %v4667_v55 = vmul.f32 %v4446_v26, %v4331_v36 }
 0x3f8   : > { %v3362_v62 = vpop.f32.mrf.mxu0  ;;  %v4098_v0 = vpop.f32.mrf.mxu2  ;;  %v4816_v10 = vld [vmem:[#allocation3 + $0x31] sm:$0xff] }
 0x3f9   : > { %4715 = vst.msk [vmem:[#allocation3 + $0x39] sm:$0xff] %vm354_vm1, %v4667_v55  ;;  %v3448_v57 = vadd.f32 %v3362_v62, %v3044_v54  ;;  %v3766_v2 = vpop.f32.mrf.mxu1  ;;  %v4232_v52 = vadd.f32 %v4098_v0, %v14583_v39  ;;  %9358 = vmatmul.msk.f32.gmra.mxu3 %vm354_vm1, %v4816_v10  ;;  %v3109_v55 = vld [vmem:[#allocation2 + $0x1a0] sm:$0xff]  ;;  %v4456_v39 = vpop.permute.xlu0 %4455 }
 0x3fa   : > { %v3513_v62 = vld [vmem:[#allocation2 + $0x1a1] sm:$0xff] }
 0x3fb   : > { %v12144_v11 = vadd.f32 %v3766_v2, %v3448_v57  ;;  %v4284_v14 = vadd.f32 %v12060_v20, %v4232_v52  ;;  %9245 = vmatmul.msk.f32.gmra.mxu0 %vm354_vm1, %v3108_v41 }
 0x3fc   : > { %9295 = vmatmul.msk.f32.gmra.mxu1 %vm354_vm1, %v3512_v30  ;;  %v12155_v30 = vpop.f32.mrf.mxu3 }
 0x3fd   : > { %v4332_v53 = vmax.f32 %v4284_v14, 0.0  ;;  %9322 = vmatmul.msk.f32.gmra.mxu2 %vm354_vm1, %v3893_v45  ;;  %v3110_v45 = vld [vmem:[#allocation2 + $0x1a8] sm:$0xff] }
 0x3ff   : > { %v4668_v26 = vmul.f32 %v4451_v60, %v4332_v53  ;;  %v3514_v53 = vld [vmem:[#allocation2 + $0x1a9] sm:$0xff] }
 0x400   : > { %v3365_v61 = vpop.f32.mrf.mxu0  ;;  %v4101_v36 = vpop.f32.mrf.mxu2  ;;  %v4817_v54 = vld [vmem:[#allocation3 + $0x39] sm:$0xff] }
 0x401   : > { %4716 = vst.msk [vmem:[#allocation3 + $0x41] sm:$0xff] %vm354_vm1, %v4668_v26  ;;  %v3449_v0 = vadd.f32 %v3365_v61, %v3045_v42  ;;  %v3769_v10 = vpop.f32.mrf.mxu1  ;;  %v4233_v41 = vadd.f32 %v4101_v36, %v11821_v31  ;;  %9359 = vmatmul.msk.f32.gmra.mxu3 %vm354_vm1, %v4817_v54  ;;  %v3046_v31 = vadd.f32 %v11957_v56, %v11833_v19  ;;  %v3895_v19 = vld [vmem:[#allocation2 + $0xf2] sm:$0xff] }
 0x403   : > { %v12157_v57 = vadd.f32 %v3769_v10, %v3449_v0  ;;  %v4285_v48 = vadd.f32 %v12060_v20, %v4233_v41  ;;  %9246 = vmatmul.msk.f32.gmra.mxu0 %vm354_vm1, %v3109_v55  ;;  %v4461_v55 = vpop.permute.xlu1 %4460 }
 0x404   : > { %9296 = vmatmul.msk.f32.gmra.mxu1 %vm354_vm1, %v3513_v62  ;;  %v12173_v56 = vpop.f32.mrf.mxu3 }
 0x405   : > { %v4333_v2 = vmax.f32 %v4285_v48, 0.0  ;;  %9323 = vmatmul.msk.f32.gmra.mxu2 %vm354_vm1, %v3894_v18  ;;  %v4759_v48 = vld [vmem:[#allocation3] sm:$0xff] }
 0x406   : > { %v5471_v18 = vld [vmem:[#allocation3 + $0x2] sm:$0xff] }
 0x407   : > { %v4669_v52 = vmul.f32 %v4456_v39, %v4333_v2 }
 0x408   : > { %v3368_v49 = vpop.f32.mrf.mxu0  ;;  %v4104_v22 = vpop.f32.mrf.mxu2  ;;  %v4818_v14 = vld [vmem:[#allocation3 + $0x41] sm:$0xff] }
 0x409   : > { %4717 = vst.msk [vmem:[#allocation3 + $0x49] sm:$0xff] %vm354_vm1, %v4669_v52  ;;  %v3450_v60 = vadd.f32 %v3368_v49, %v3046_v31  ;;  %v3772_v42 = vpop.f32.mrf.mxu1  ;;  %v4234_v26 = vadd.f32 %v4104_v22, %v11836_v46  ;;  %9360 = vmatmul.msk.f32.gmra.mxu3 %vm354_vm1, %v4818_v14  ;;  %v3047_v46 = vadd.f32 %v11972_v12, %v11844_v3  ;;  %v14584_v31 = vld [vmem:[#allocation64_spill] sm:$0xff]  ;;  %v3896_v3 = vld [vmem:[#allocation2 + $0xfa] sm:$0xff]  ;;  %v4466_v14 = vpop.permute.xlu2 %4465 }
 0x40b   : > { %v12168_v61 = vadd.f32 %v3772_v42, %v3450_v60  ;;  %v4286_v36 = vadd.f32 %v12060_v20, %v4234_v26  ;;  %9247 = vmatmul.msk.f32.gmra.mxu0 %vm354_vm1, %v3110_v45  ;;  %v14585_v45 = vld [vmem:[#allocation26_spill] sm:$0xff] }
 0x40c   : > { %9297 = vmatmul.msk.f32.gmra.mxu1 %vm354_vm1, %v3514_v53  ;;  %v3048_v53 = vadd.f32 %v12010_v6, %v14585_v45  ;;  %v12189_v60 = vpop.f32.mrf.mxu3 }
 0x40d   : > { %v4334_v54 = vmax.f32 %v4286_v36, 0.0  ;;  %9324 = vmatmul.msk.f32.gmra.mxu2 %vm354_vm1, %v3895_v19 }
 0x40f   : > { %v4670_v62 = vmul.f32 %v4461_v55, %v4334_v54  ;;  %v4760_v54 = vld [vmem:[#allocation3 + $0x8] sm:$0xff] }
 0x410   : > { %v3371_v0 = vpop.f32.mrf.mxu0  ;;  %v4107_v10 = vpop.f32.mrf.mxu2  ;;  %v4819_v41 = vld [vmem:[#allocation3 + $0x49] sm:$0xff] }
 0x411   : > { %4718 = vst.msk [vmem:[#allocation3 + $0x51] sm:$0xff] %vm354_vm1, %v4670_v62  ;;  %v3451_v2 = vadd.f32 %v3371_v0, %v3047_v46  ;;  %v3775_v39 = vpop.f32.mrf.mxu1  ;;  %v4235_v52 = vadd.f32 %v4107_v10, %v14584_v31  ;;  %9361 = vmatmul.msk.f32.gmra.mxu3 %vm354_vm1, %v4819_v41  ;;  %v5472_v55 = vld [vmem:[#allocation3 + $0xa] sm:$0xff] }
 0x412   : > { %v14586_v0 = vld [vmem:[#allocation27_spill] sm:$0xff] }
 0x413   : > { %v12181_v49 = vadd.f32 %v3775_v39, %v3451_v2  ;;  %v4287_v22 = vadd.f32 %v12060_v20, %v4235_v52  ;;  %9400 = vmatmul.msk.f32.vlgmr.msra.gmra.mxu0 %vm354_vm1, %v4759_v48  ;;  %v3897_v48 = vld [vmem:[#allocation2 + $0x102] sm:$0xff]  ;;  %v4471_v2 = vpop.permute.xlu0 %4470  ;;  %v14587_v39 = vld [vmem:[#allocation65_spill] sm:$0xff] }
 0x414   : > { %9450 = vmatmul.msk.f32.vlgmr.msra.gmra.mxu1 %vm354_vm1, %v5471_v18  ;;  %v3049_v31 = vadd.f32 %v12029_v7, %v14587_v39  ;;  %v12202_v45 = vpop.f32.mrf.mxu3 }
 0x415   : > { %v4335_v12 = vmax.f32 %v4287_v22, 0.0  ;;  %9325 = vmatmul.msk.f32.gmra.mxu2 %vm354_vm1, %v3896_v3 }
 0x417   : > { %v4671_v42 = vmul.f32 %v4466_v14, %v4335_v12  ;;  %v4761_v14 = vld [vmem:[#allocation3 + $0x10] sm:$0xff] }
 0x418   : > { %v3374_v26 = vpop.f32.mrf.mxu0  ;;  %v4110_v36 = vpop.f32.mrf.mxu2  ;;  %v4820_v19 = vld [vmem:[#allocation3 + $0x51] sm:$0xff] }
 0x419   : > { %4719 = vst.msk [vmem:[#allocation3 + $0x59] sm:$0xff] %vm354_vm1, %v4671_v42  ;;  %v3452_v46 = vadd.f32 %v3374_v26, %v3048_v53  ;;  %v3778_v62 = vpop.f32.mrf.mxu1  ;;  %v4236_v10 = vadd.f32 %v4110_v36, %v14586_v0  ;;  %9362 = vmatmul.msk.f32.gmra.mxu3 %vm354_vm1, %v4820_v19  ;;  %v5473_v36 = vld [vmem:[#allocation3 + $0x12] sm:$0xff] }
 0x41b   : > { %v12194_v41 = vadd.f32 %v3778_v62, %v3452_v46  ;;  %v4288_v6 = vadd.f32 %v12060_v20, %v4236_v10  ;;  %9401 = vmatmul.msk.f32.gmra.mxu0 %vm354_vm1, %v4760_v54  ;;  %v3898_v54 = vld [vmem:[#allocation2 + $0x10a] sm:$0xff]  ;;  %v4476_v46 = vpop.permute.xlu1 %4475  ;;  %v3050_v62 = vadd.f32 %v12043_v37, %v11879_v25  ;;  %v3899_v37 = vld [vmem:[#allocation2 + $0x112] sm:$0xff] }
 0x41c   : > { %9451 = vmatmul.msk.f32.gmra.mxu1 %vm354_vm1, %v5472_v55 }
 0x41d   : > { %v4336_v18 = vmax.f32 %v4288_v6, 0.0  ;;  %9326 = vmatmul.msk.f32.gmra.mxu2 %vm354_vm1, %v3897_v48 }
 0x41f   : > { %v4672_v52 = vmul.f32 %v4471_v2, %v4336_v18  ;;  %v14588_v2 = vld [vmem:[#allocation66_spill] sm:$0xff] }
 0x420   : > { %v3377_v22 = vpop.f32.mrf.mxu0  ;;  %v4113_v3 = vpop.f32.mrf.mxu2  ;;  %v4821_v12 = vld [vmem:[#allocation3 + $0x59] sm:$0xff] }
 0x421   : > { %4720 = vst.msk [vmem:[#allocation3 + $0x61] sm:$0xff] %vm354_vm1, %v4672_v52  ;;  %v3453_v53 = vadd.f32 %v3377_v22, %v3049_v31  ;;  %v3781_v42 = vpop.f32.mrf.mxu1  ;;  %v4237_v26 = vadd.f32 %v4113_v3, %v11872_v9  ;;  %9363 = vmatmul.msk.f32.gmra.mxu3 %vm354_vm1, %v4821_v12  ;;  %v12218_v31 = vld [vmem:[#allocation3 + $0x18] sm:$0xff]  ;;  %v12220_v22 = vpop.f32.mrf.mxu3 }
 0x422   : > { %v5474_v52 = vld [vmem:[#allocation3 + $0x1a] sm:$0xff] }
 0x423   : > { %v12207_v19 = vadd.f32 %v3781_v42, %v3453_v53  ;;  %v4289_v7 = vadd.f32 %v12060_v20, %v4237_v26  ;;  %9402 = vmatmul.msk.f32.gmra.mxu0 %vm354_vm1, %v4761_v14  ;;  %v4481_v14 = vpop.permute.xlu2 %4480  ;;  %v3051_v53 = vadd.f32 %v12062_v40, %v11891_v34  ;;  %v3900_v34 = vld [vmem:[#allocation2 + $0x11a] sm:$0xff] }
 0x424   : > { %9452 = vmatmul.msk.f32.gmra.mxu1 %vm354_vm1, %v5473_v36 }
 0x425   : > { %v4337_v55 = vmax.f32 %v4289_v7, 0.0  ;;  %9327 = vmatmul.msk.f32.gmra.mxu2 %vm354_vm1, %v3898_v54 }
 0x427   : > { %v4673_v9 = vmul.f32 %v4476_v46, %v4337_v55  ;;  %v14589_v46 = vld [vmem:[#allocation67_spill] sm:$0xff] }
 0x428   : > { %v3380_v0 = vpop.f32.mrf.mxu0  ;;  %v4116_v10 = vpop.f32.mrf.mxu2  ;;  %v4822_v6 = vld [vmem:[#allocation3 + $0x61] sm:$0xff] }
 0x429   : > { %4721 = vst.msk [vmem:[#allocation3 + $0x69] sm:$0xff] %vm354_vm1, %v4673_v9  ;;  %v3454_v48 = vadd.f32 %v3380_v0, %v3050_v62  ;;  %v3784_v18 = vpop.f32.mrf.mxu1  ;;  %v4238_v39 = vadd.f32 %v4116_v10, %v14588_v2  ;;  %9364 = vmatmul.msk.f32.gmra.mxu3 %vm354_vm1, %v4822_v6  ;;  %v12234_v9 = vld [vmem:[#allocation3 + $0x20] sm:$0xff]  ;;  %v12242_v40 = vpop.f32.mrf.mxu3  ;;  %v3052_v2 = vadd.f32 %v12077_v23, %v11903_v44  ;;  %v3901_v44 = vld [vmem:[#allocation2 + $0x122] sm:$0xff] }
 0x42a   : > { %v5475_v0 = vld [vmem:[#allocation3 + $0x22] sm:$0xff] }
 0x42b   : > { %v12222_v3 = vadd.f32 %v3784_v18, %v3454_v48  ;;  %v4290_v25 = vadd.f32 %v12060_v20, %v4238_v39  ;;  %9403 = vmatmul.msk.f32.gmra.mxu0 %vm354_vm1, %v12218_v31  ;;  %v4486_v18 = vpop.permute.xlu0 %4485 }
 0x42c   : > { %9453 = vmatmul.msk.f32.gmra.mxu1 %vm354_vm1, %v5474_v52 }
 0x42d   : > { %v4338_v12 = vmax.f32 %v4290_v25, 0.0  ;;  %9328 = vmatmul.msk.f32.gmra.mxu2 %vm354_vm1, %v3899_v37 }
 0x42f   : > { %v4674_v42 = vmul.f32 %v4481_v14, %v4338_v12 }
 0x430   : > { %v3383_v26 = vpop.f32.mrf.mxu0  ;;  %v4119_v36 = vpop.f32.mrf.mxu2  ;;  %v4823_v7 = vld [vmem:[#allocation3 + $0x69] sm:$0xff] }
 0x431   : > { %4722 = vst.msk [vmem:[#allocation3 + $0x71] sm:$0xff] %vm354_vm1, %v4674_v42  ;;  %v3455_v54 = vadd.f32 %v3383_v26, %v3051_v53  ;;  %v3787_v55 = vpop.f32.mrf.mxu1  ;;  %v4239_v62 = vadd.f32 %v4119_v36, %v14589_v46  ;;  %9365 = vmatmul.msk.f32.gmra.mxu3 %vm354_vm1, %v4823_v7  ;;  %v14590_v53 = vld [vmem:[#allocation28_spill] sm:$0xff]  ;;  %v12250_v26 = vld [vmem:[#allocation3 + $0x28] sm:$0xff]  ;;  %v12258_v23 = vpop.f32.mrf.mxu3 }
 0x432   : > { %v5476_v36 = vld [vmem:[#allocation3 + $0x2a] sm:$0xff]  ;;  %v4491_v46 = vpop.permute.xlu1 %4490 }
 0x433   : > { %v12236_v10 = vadd.f32 %v3787_v55, %v3455_v54  ;;  %v4291_v6 = vadd.f32 %v12060_v20, %v4239_v62  ;;  %9404 = vmatmul.msk.f32.gmra.mxu0 %vm354_vm1, %v12234_v9  ;;  %v3053_v62 = vadd.f32 %v12100_v8, %v11915_v1  ;;  %v3902_v1 = vld [vmem:[#allocation2 + $0x12a] sm:$0xff] }
 0x434   : > { %9454 = vmatmul.msk.f32.gmra.mxu1 %vm354_vm1, %v5475_v0 }
 0x435   : > { %v4339_v48 = vmax.f32 %v4291_v6, 0.0  ;;  %9329 = vmatmul.msk.f32.gmra.mxu2 %vm354_vm1, %v3900_v34 }
 0x437   : > { %v4675_v39 = vmul.f32 %v4486_v18, %v4339_v48 }
 0x438   : > { %v3386_v52 = vpop.f32.mrf.mxu0  ;;  %v4122_v25 = vpop.f32.mrf.mxu2  ;;  %v4824_v37 = vld [vmem:[#allocation3 + $0x71] sm:$0xff] }
 0x439   : > { %4723 = vst.msk [vmem:[#allocation3 + $0x79] sm:$0xff] %vm354_vm1, %v4675_v39  ;;  %v3456_v12 = vadd.f32 %v3386_v52, %v3052_v2  ;;  %v3790_v14 = vpop.f32.mrf.mxu1  ;;  %v4240_v42 = vadd.f32 %v4122_v25, %v14590_v53  ;;  %9366 = vmatmul.msk.f32.gmra.mxu3 %vm354_vm1, %v4824_v37  ;;  %v12266_v52 = vld [vmem:[#allocation3 + $0x30] sm:$0xff]  ;;  %v3054_v53 = vadd.f32 %v12119_v38, %v11924_v35  ;;  %v3903_v35 = vld [vmem:[#allocation2 + $0x132] sm:$0xff] }
 0x43a   : > { %v5477_v25 = vld [vmem:[#allocation3 + $0x32] sm:$0xff] }
 0x43b   : > { %v12252_v7 = vadd.f32 %v3790_v14, %v3456_v12  ;;  %v4292_v54 = vadd.f32 %v12060_v20, %v4240_v42  ;;  %9405 = vmatmul.msk.f32.gmra.mxu0 %vm354_vm1, %v12250_v26  ;;  %v12275_v14 = vpop.f32.mrf.mxu3 }
 0x43c   : > { %9455 = vmatmul.msk.f32.gmra.mxu1 %vm354_vm1, %v5476_v36 }
 0x43d   : > { %v4340_v55 = vmax.f32 %v4292_v54, 0.0  ;;  %9330 = vmatmul.msk.f32.gmra.mxu2 %vm354_vm1, %v3901_v44 }
 0x43f   : > { %v4676_v0 = vmul.f32 %v4491_v46, %v4340_v55 }
 0x440   : > { %v3389_v6 = vpop.f32.mrf.mxu0  ;;  %v4125_v34 = vpop.f32.mrf.mxu2  ;;  %v4825_v48 = vld [vmem:[#allocation3 + $0x79] sm:$0xff] }
 0x441   : > { %4724 = vst.msk [vmem:[#allocation3 + $0x81] sm:$0xff] %vm354_vm1, %v4676_v0  ;;  %v3457_v18 = vadd.f32 %v3389_v6, %v3053_v62  ;;  %v3793_v2 = vpop.f32.mrf.mxu1  ;;  %v4241_v39 = vadd.f32 %v4125_v34, %v11918_v17  ;;  %9367 = vmatmul.msk.f32.gmra.mxu3 %vm354_vm1, %v4825_v48  ;;  %v4496_v17 = vpop.permute.xlu2 %4495  ;;  %v12282_v0 = vld [vmem:[#allocation3 + $0x38] sm:$0xff] }
 0x442   : > { %v5478_v6 = vld [vmem:[#allocation3 + $0x3a] sm:$0xff] }
 0x443   : > { %v12268_v37 = vadd.f32 %v3793_v2, %v3457_v18  ;;  %v4293_v12 = vadd.f32 %v12060_v20, %v4241_v39  ;;  %9406 = vmatmul.msk.f32.gmra.mxu0 %vm354_vm1, %v12266_v52  ;;  %v4501_v18 = vpop.permute.xlu0 %4500  ;;  %v12293_v39 = vpop.f32.mrf.mxu3 }
 0x444   : > { %9456 = vmatmul.msk.f32.gmra.mxu1 %vm354_vm1, %v5477_v25  ;;  %14591 = vst [vmem:[#allocation72_spill] sm:$0xff] %v12293_v39 }
 0x445   : > { %v4341_v8 = vmax.f32 %v4293_v12, 0.0  ;;  %9331 = vmatmul.msk.f32.gmra.mxu2 %vm354_vm1, %v3902_v1 }
 0x447   : > { %v4677_v42 = vmul.f32 %v4496_v17, %v4341_v8 }
 0x448   : > { %v3392_v36 = vpop.f32.mrf.mxu0  ;;  %v4128_v54 = vpop.f32.mrf.mxu2  ;;  %v4826_v44 = vld [vmem:[#allocation3 + $0x81] sm:$0xff] }
 0x449   : > { %4725 = vst.msk [vmem:[#allocation3 + $0x89] sm:$0xff] %vm354_vm1, %v4677_v42  ;;  %v3458_v55 = vadd.f32 %v3392_v36, %v3054_v53  ;;  %v3796_v46 = vpop.f32.mrf.mxu1  ;;  %v4242_v62 = vadd.f32 %v4128_v54, %v11929_v16  ;;  %9368 = vmatmul.msk.f32.gmra.mxu3 %vm354_vm1, %v4826_v44  ;;  %v3055_v16 = vadd.f32 %v12133_v33, %v11936_v15  ;;  %v12298_v42 = vld [vmem:[#allocation3 + $0x40] sm:$0xff] }
 0x44a   : > { %v5479_v36 = vld [vmem:[#allocation3 + $0x42] sm:$0xff] }
 0x44b   : > { %v12284_v34 = vadd.f32 %v3796_v46, %v3458_v55  ;;  %v4294_v48 = vadd.f32 %v12060_v20, %v4242_v62  ;;  %9407 = vmatmul.msk.f32.gmra.mxu0 %vm354_vm1, %v12282_v0  ;;  %v3904_v33 = vld [vmem:[#allocation2 + $0x13a] sm:$0xff]  ;;  %v4506_v55 = vpop.permute.xlu1 %4505 }
 0x44c   : > { %9457 = vmatmul.msk.f32.gmra.mxu1 %vm354_vm1, %v5478_v6 }
 0x44d   : > { %v4342_v38 = vmax.f32 %v4294_v48, 0.0  ;;  %9332 = vmatmul.msk.f32.gmra.mxu2 %vm354_vm1, %v3903_v35 }
 0x44f   : > { %v4678_v2 = vmul.f32 %v4501_v18, %v4342_v38 }
 0x450   : > { %v3395_v25 = vpop.f32.mrf.mxu0  ;;  %v4131_v12 = vpop.f32.mrf.mxu2  ;;  %v4827_v1 = vld [vmem:[#allocation3 + $0x89] sm:$0xff] }
 0x451   : > { %4726 = vst.msk [vmem:[#allocation3 + $0x91] sm:$0xff] %vm354_vm1, %v4678_v2  ;;  %v3459_v8 = vadd.f32 %v3395_v25, %v3055_v16  ;;  %v3799_v17 = vpop.f32.mrf.mxu1  ;;  %v4243_v53 = vadd.f32 %v4131_v12, %v11939_v50  ;;  %9369 = vmatmul.msk.f32.gmra.mxu3 %vm354_vm1, %v4827_v1  ;;  %v3056_v50 = vadd.f32 %v12155_v30, %v11948_v47  ;;  %v12312_v16 = vld [vmem:[#allocation3 + $0x48] sm:$0xff]  ;;  %v12314_v25 = vpop.f32.mrf.mxu3 }
 0x452   : > { %v5480_v2 = vld [vmem:[#allocation3 + $0x4a] sm:$0xff] }
 0x453   : > { %v12300_v54 = vadd.f32 %v3799_v17, %v3459_v8  ;;  %v4295_v15 = vadd.f32 %v12060_v20, %v4243_v53  ;;  %9408 = vmatmul.msk.f32.gmra.mxu0 %vm354_vm1, %v12298_v42  ;;  %v3905_v30 = vld [vmem:[#allocation2 + $0x142] sm:$0xff]  ;;  %v3057_v8 = vadd.f32 %v12173_v56, %v11960_v51  ;;  %v3906_v56 = vld [vmem:[#allocation2 + $0x14a] sm:$0xff] }
 0x454   : > { %9458 = vmatmul.msk.f32.gmra.mxu1 %vm354_vm1, %v5479_v36 }
 0x455   : > { %v4343_v44 = vmax.f32 %v4295_v15, 0.0  ;;  %9333 = vmatmul.msk.f32.gmra.mxu2 %vm354_vm1, %v3904_v33 }
 0x457   : > { %v4679_v46 = vmul.f32 %v4506_v55, %v4343_v44 }
 0x458   : > { %v3398_v62 = vpop.f32.mrf.mxu0  ;;  %v4134_v6 = vpop.f32.mrf.mxu2  ;;  %v4828_v48 = vld [vmem:[#allocation3 + $0x91] sm:$0xff] }
 0x459   : > { %4727 = vst.msk [vmem:[#allocation3 + $0x99] sm:$0xff] %vm354_vm1, %v4679_v46  ;;  %v3460_v35 = vadd.f32 %v3398_v62, %v3056_v50  ;;  %v3802_v38 = vpop.f32.mrf.mxu1  ;;  %v4244_v18 = vadd.f32 %v4134_v6, %v11951_v24  ;;  %9370 = vmatmul.msk.f32.gmra.mxu3 %vm354_vm1, %v4828_v48  ;;  %v4511_v24 = vpop.permute.xlu2 %4510  ;;  %v12328_v50 = vld [vmem:[#allocation3 + $0x50] sm:$0xff] }
 0x45a   : > { %v5481_v46 = vld [vmem:[#allocation3 + $0x52] sm:$0xff] }
 0x45b   : > { %v12316_v12 = vadd.f32 %v3802_v38, %v3460_v35  ;;  %v4296_v47 = vadd.f32 %v12060_v20, %v4244_v18  ;;  %9409 = vmatmul.msk.f32.gmra.mxu0 %vm354_vm1, %v12312_v16  ;;  %v3058_v35 = vadd.f32 %v12189_v60, %v11975_v4 }
 0x45c   : > { %9459 = vmatmul.msk.f32.gmra.mxu1 %vm354_vm1, %v5480_v2 }
 0x45d   : > { %v4344_v1 = vmax.f32 %v4296_v47, 0.0  ;;  %9334 = vmatmul.msk.f32.gmra.mxu2 %vm354_vm1, %v3905_v30 }
 0x45f   : > { %v4680_v17 = vmul.f32 %v4511_v24, %v4344_v1 }
 0x460   : > { %v3401_v53 = vpop.f32.mrf.mxu0  ;;  %v4137_v36 = vpop.f32.mrf.mxu2  ;;  %v4829_v15 = vld [vmem:[#allocation3 + $0x99] sm:$0xff] }
 0x461   : > { %4728 = vst.msk [vmem:[#allocation3 + $0xa1] sm:$0xff] %vm354_vm1, %v4680_v17  ;;  %v3461_v33 = vadd.f32 %v3401_v53, %v3057_v8  ;;  %v3805_v44 = vpop.f32.mrf.mxu1  ;;  %v4245_v55 = vadd.f32 %v4137_v36, %v11963_v5  ;;  %9371 = vmatmul.msk.f32.gmra.mxu3 %vm354_vm1, %v4829_v15  ;;  %v4516_v5 = vpop.permute.xlu0 %4515  ;;  %v9498_v8 = vld [vmem:[%s14232_s4 + $0xc0] sm:$0xff]  ;;  %v12347_v17 = vld [vmem:[#allocation3 + $0x58] sm:$0xff] }
 0x462   : > { %v5482_v53 = vld [vmem:[#allocation3 + $0x5a] sm:$0xff]  ;;  %6085 = vmatpush.msrb.mxu2 %v9498_v8 }
 0x463   : > { %v12330_v62 = vadd.f32 %v3805_v44, %v3461_v33  ;;  %v4297_v6 = vadd.f32 %v12060_v20, %v4245_v55  ;;  %9410 = vmatmul.msk.f32.gmra.mxu0 %vm354_vm1, %v12328_v50  ;;  %v3907_v36 = vld [vmem:[#allocation2 + $0x152] sm:$0xff]  ;;  %v4521_v33 = vpop.permute.xlu1 %4520  ;;  %v3059_v44 = vadd.f32 %v12202_v45, %v12006_v32 }
 0x464   : > { %9460 = vmatmul.msk.f32.gmra.mxu1 %vm354_vm1, %v5481_v46  ;;  %v12336_v51 = vpop.f32.mrf.mxu3 }
 0x465   : > { %v4345_v48 = vmax.f32 %v4297_v6, 0.0  ;;  %9335 = vmatmul.msk.f32.gmra.mxu2 %vm354_vm1, %v3906_v56 }
 0x467   : > { %v4681_v38 = vmul.f32 %v4516_v5, %v4345_v48 }
 0x468   : > { %v3404_v18 = vpop.f32.mrf.mxu0  ;;  %v4140_v2 = vpop.f32.mrf.mxu2  ;;  %v4830_v47 = vld [vmem:[#allocation3 + $0xa1] sm:$0xff] }
 0x469   : > { %4729 = vst.msk [vmem:[#allocation3 + $0xa9] sm:$0xff] %vm354_vm1, %v4681_v38  ;;  %v3462_v30 = vadd.f32 %v3404_v18, %v3058_v35  ;;  %v3808_v1 = vpop.f32.mrf.mxu1  ;;  %v4246_v24 = vadd.f32 %v4140_v2, %v11982_v13  ;;  %9372 = vmatmul.msk.f32.gmra.mxu3 %vm354_vm1, %v4830_v47  ;;  %v9548_v38 = vld [vmem:[%s14232_s4 + $0xd0] sm:$0xff]  ;;  %v12366_v18 = vld [vmem:[#allocation3 + $0x60] sm:$0xff] }
 0x46a   : > { %v5483_v2 = vld [vmem:[#allocation3 + $0x62] sm:$0xff]  ;;  %6489 = vmatpush.msrb.mxu3 %v9548_v38 }
 0x46b   : > { %v12349_v4 = vadd.f32 %v3808_v1, %v3462_v30  ;;  %v4298_v60 = vadd.f32 %v12060_v20, %v4246_v24  ;;  %9411 = vmatmul.msk.f32.gmra.mxu0 %vm354_vm1, %v12347_v17  ;;  %v3908_v47 = vld [vmem:[#allocation2 + $0x15a] sm:$0xff]  ;;  %v4526_v1 = vpop.permute.xlu2 %4525  ;;  %v3060_v24 = vadd.f32 %v12220_v22, %v12019_v63  ;;  %v3909_v22 = vld [vmem:[#allocation2 + $0x162] sm:$0xff] }
 0x46c   : > { %9461 = vmatmul.msk.f32.gmra.mxu1 %vm354_vm1, %v5482_v53  ;;  %v12355_v13 = vpop.f32.mrf.mxu3 }
 0x46d   : > { %v4346_v15 = vmax.f32 %v4298_v60, 0.0  ;;  %9336 = vmatmul.msk.f32.gmra.mxu2 %vm354_vm1, %v3907_v36 }
 0x46f   : > { %v4682_v55 = vmul.f32 %v4521_v33, %v4346_v15 }
 0x470   : > { %v3407_v46 = vpop.f32.mrf.mxu0  ;;  %v4143_v6 = vpop.f32.mrf.mxu2  ;;  %v4831_v56 = vld [vmem:[#allocation3 + $0xa9] sm:$0xff] }
 0x471   : > { %4730 = vst.msk [vmem:[#allocation3 + $0xb1] sm:$0xff] %vm354_vm1, %v4682_v55  ;;  %v3463_v48 = vadd.f32 %v3407_v46, %v3059_v44  ;;  %v3811_v5 = vpop.f32.mrf.mxu1  ;;  %v4247_v35 = vadd.f32 %v4143_v6, %v12012_v59  ;;  %9373 = vmatmul.msk.f32.gmra.mxu3 %vm354_vm1, %v4831_v56  ;;  %v12382_v55 = vld [vmem:[#allocation3 + $0x68] sm:$0xff] }
 0x472   : > { %v5484_v46 = vld [vmem:[#allocation3 + $0x6a] sm:$0xff] }
 0x473   : > { %v12368_v32 = vadd.f32 %v3811_v5, %v3463_v48  ;;  %v4299_v45 = vadd.f32 %v12060_v20, %v4247_v35  ;;  %9412 = vmatmul.msk.f32.gmra.mxu0 %vm354_vm1, %v12366_v18  ;;  %v3061_v5 = vadd.f32 %v12242_v40, %v12033_v43  ;;  %v3910_v40 = vld [vmem:[#allocation2 + $0x16a] sm:$0xff] }
 0x474   : > { %9462 = vmatmul.msk.f32.gmra.mxu1 %vm354_vm1, %v5483_v2  ;;  %v12374_v59 = vpop.f32.mrf.mxu3 }
 0x475   : > { %v4347_v30 = vmax.f32 %v4299_v45, 0.0  ;;  %9337 = vmatmul.msk.f32.gmra.mxu2 %vm354_vm1, %v3908_v47 }
 0x477   : > { %v4683_v8 = vmul.f32 %v4526_v1, %v4347_v30  ;;  %v14592_v1 = vld [vmem:[#allocation29_spill] sm:$0xff] }
 0x478   : > { %v3410_v53 = vpop.f32.mrf.mxu0  ;;  %v4146_v60 = vpop.f32.mrf.mxu2  ;;  %v4832_v36 = vld [vmem:[#allocation3 + $0xb1] sm:$0xff] }
 0x479   : > { %4731 = vst.msk [vmem:[#allocation3 + $0xb9] sm:$0xff] %vm354_vm1, %v4683_v8  ;;  %v3464_v15 = vadd.f32 %v3410_v53, %v3060_v24  ;;  %v3814_v33 = vpop.f32.mrf.mxu1  ;;  %v4248_v44 = vadd.f32 %v4146_v60, %v12024_v27  ;;  %9374 = vmatmul.msk.f32.gmra.mxu3 %vm354_vm1, %v4832_v36  ;;  %v4531_v27 = vpop.permute.xlu0 %4530  ;;  %v12398_v8 = vld [vmem:[#allocation3 + $0x70] sm:$0xff] }
 0x47a   : > { %v5485_v53 = vld [vmem:[#allocation3 + $0x72] sm:$0xff] }
 0x47b   : > { %v12384_v6 = vadd.f32 %v3814_v33, %v3464_v15  ;;  %v4300_v56 = vadd.f32 %v12060_v20, %v4248_v44  ;;  %9413 = vmatmul.msk.f32.gmra.mxu0 %vm354_vm1, %v12382_v55  ;;  %v4536_v33 = vpop.permute.xlu1 %4535  ;;  %v14593_v44 = vld [vmem:[#allocation68_spill] sm:$0xff] }
 0x47c   : > { %9463 = vmatmul.msk.f32.gmra.mxu1 %vm354_vm1, %v5484_v46  ;;  %v12390_v63 = vpop.f32.mrf.mxu3  ;;  %v3062_v46 = vadd.f32 %v12258_v23, %v14593_v44 }
 0x47d   : > { %v4348_v48 = vmax.f32 %v4300_v56, 0.0  ;;  %9338 = vmatmul.msk.f32.gmra.mxu2 %vm354_vm1, %v3909_v22 }
 0x47f   : > { %v4684_v35 = vmul.f32 %v4531_v27, %v4348_v48 }
 0x480   : > { %v3413_v38 = vpop.f32.mrf.mxu0  ;;  %v4149_v2 = vpop.f32.mrf.mxu2  ;;  %v4833_v45 = vld [vmem:[#allocation3 + $0xb9] sm:$0xff] }
 0x481   : > { %4732 = vst.msk [vmem:[#allocation3 + $0xc1] sm:$0xff] %vm354_vm1, %v4684_v35  ;;  %v3465_v47 = vadd.f32 %v3413_v38, %v3061_v5  ;;  %v3817_v30 = vpop.f32.mrf.mxu1  ;;  %v4249_v24 = vadd.f32 %v4149_v2, %v14592_v1  ;;  %9375 = vmatmul.msk.f32.gmra.mxu3 %vm354_vm1, %v4833_v45  ;;  %v14594_v38 = vld [vmem:[#allocation70_spill] sm:$0xff]  ;;  %v12414_v45 = vld [vmem:[#allocation3 + $0x78] sm:$0xff] }
 0x483   : > { %v12400_v60 = vadd.f32 %v3817_v30, %v3465_v47  ;;  %v4301_v36 = vadd.f32 %v12060_v20, %v4249_v24  ;;  %9414 = vmatmul.msk.f32.gmra.mxu0 %vm354_vm1, %v12398_v8  ;;  %v5486_v47 = vld [vmem:[#allocation3 + $0x7a] sm:$0xff] }
 0x484   : > { %9464 = vmatmul.msk.f32.gmra.mxu1 %vm354_vm1, %v5485_v53  ;;  %v12406_v43 = vpop.f32.mrf.mxu3  ;;  %v3911_v24 = vld [vmem:[#allocation2 + $0x172] sm:$0xff] }
 0x485   : > { %v4349_v15 = vmax.f32 %v4301_v36, 0.0  ;;  %9339 = vmatmul.msk.f32.gmra.mxu2 %vm354_vm1, %v3910_v40  ;;  %v4541_v36 = vpop.permute.xlu2 %4540 }
 0x487   : > { %v4685_v56 = vmul.f32 %v4536_v33, %v4349_v15 }
 0x488   : > { %v3416_v22 = vpop.f32.mrf.mxu0  ;;  %v4152_v48 = vpop.f32.mrf.mxu2  ;;  %v4834_v27 = vld [vmem:[#allocation3 + $0xc1] sm:$0xff] }
 0x489   : > { %4733 = vst.msk [vmem:[#allocation3 + $0xc9] sm:$0xff] %vm354_vm1, %v4685_v56  ;;  %v3466_v5 = vadd.f32 %v3416_v22, %v3062_v46  ;;  %v3820_v35 = vpop.f32.mrf.mxu1  ;;  %v4250_v2 = vadd.f32 %v4152_v48, %v14594_v38  ;;  %9376 = vmatmul.msk.f32.gmra.mxu3 %vm354_vm1, %v4834_v27  ;;  %v12432_v22 = vld [vmem:[#allocation3 + $0x80] sm:$0xff]  ;;  %v12437_v27 = vld [vmem:[%s14233_s5] ss:$0 sm:$0xff] }
 0x48a   : > { %v5487_v48 = vld [vmem:[#allocation3 + $0x82] sm:$0xff] }
 0x48b   : > { %v12416_v30 = vadd.f32 %v3820_v35, %v3466_v5  ;;  %v4302_v1 = vadd.f32 %v12060_v20, %v4250_v2  ;;  %9415 = vmatmul.msk.f32.gmra.mxu0 %vm354_vm1, %v12414_v45  ;;  %v14595_v20 = vld [vmem:[#allocation71_spill] sm:$0xff]  ;;  %v3912_v38 = vld [vmem:[#allocation2 + $0x17a] sm:$0xff] }
 0x48c   : > { %9465 = vmatmul.msk.f32.gmra.mxu1 %vm354_vm1, %v5486_v47  ;;  %v12422_v23 = vpop.f32.mrf.mxu3  ;;  %v4546_v47 = vpop.permute.xlu0 %4545 }
 0x48d   : > { %v4350_v53 = vmax.f32 %v4302_v1, 0.0  ;;  %9340 = vmatmul.msk.f32.gmra.mxu2 %vm354_vm1, %v3911_v24 }
 0x48f   : > { %v4686_v40 = vmul.f32 %v4541_v36, %v4350_v53 }
 0x490   : > { %v4155_v15 = vpop.f32.mrf.mxu2  ;;  %v12425_v33 = vpop.f32.mrf.mxu0  ;;  %v4835_v44 = vld [vmem:[#allocation3 + $0xc9] sm:$0xff] }
 0x491   : > { %4734 = vst.msk [vmem:[#allocation3 + $0xd1] sm:$0xff] %vm354_vm1, %v4686_v40  ;;  %v4251_v46 = vadd.f32 %v4155_v15, %v14595_v20  ;;  %v12429_v56 = vpop.f32.mrf.mxu1  ;;  %9377 = vmatmul.msk.f32.gmra.mxu3 %vm354_vm1, %v4835_v44  ;;  %v12453_v44 = vld [vmem:[#allocation3 + $0x88] sm:$0xff] }
 0x492   : > { %v5488_v20 = vld [vmem:[#allocation3 + $0x8a] sm:$0xff] }
 0x493   : > { %v4303_v5 = vadd.f32 %v12437_v27, %v4251_v46  ;;  %9416 = vmatmul.msk.f32.gmra.mxu0 %vm354_vm1, %v12432_v22 }
 0x494   : > { %9466 = vmatmul.msk.f32.gmra.mxu1 %vm354_vm1, %v5487_v48  ;;  %v12443_v35 = vpop.f32.mrf.mxu3 }
 0x495   : > { %v4351_v2 = vmax.f32 %v4303_v5, 0.0  ;;  %9341 = vmatmul.msk.f32.gmra.mxu2 %vm354_vm1, %v3912_v38  ;;  %v3913_v5 = vld [vmem:[#allocation2 + $0x182] sm:$0xff] }
 0x497   : > { %v4687_v1 = vmul.f32 %v4546_v47, %v4351_v2 }
 0x498   : > { %v4158_v24 = vpop.f32.mrf.mxu2  ;;  %v12446_v53 = vpop.f32.mrf.mxu0  ;;  %v4836_v36 = vld [vmem:[#allocation3 + $0xd1] sm:$0xff] }
 0x499   : > { %14596 = vst [vmem:[#allocation73_spill] sm:$0xff] %v12446_v53  ;;  %v4252_v40 = vadd.f32 %v4158_v24, %v12079_v58  ;;  %v12450_v15 = vpop.f32.mrf.mxu1  ;;  %9378 = vmatmul.msk.f32.gmra.mxu3 %vm354_vm1, %v4836_v36  ;;  %v4551_v58 = vpop.permute.xlu1 %4550  ;;  %v5489_v53 = vld [vmem:[#allocation3 + $0x92] sm:$0xff] }
 0x49a   : > { %4735 = vst.msk [vmem:[#allocation3 + $0xd9] sm:$0xff] %vm354_vm1, %v4687_v1 }
 0x49b   : > { %14597 = vst [vmem:[#allocation74_spill] sm:$0xff] %v12450_v15  ;;  %v4304_v46 = vadd.f32 %v12437_v27, %v4252_v40  ;;  %9417 = vmatmul.msk.f32.gmra.mxu0 %vm354_vm1, %v12453_v44 }
 0x49c   : > { %9467 = vmatmul.msk.f32.gmra.mxu1 %vm354_vm1, %v5488_v20  ;;  %v12459_v48 = vpop.f32.mrf.mxu3  ;;  %v12466_v20 = vld [vmem:[#allocation3 + $0x90] sm:$0xff] }
 0x49d   : > { %v4352_v38 = vmax.f32 %v4304_v46, 0.0  ;;  %9342 = vmatmul.msk.f32.gmra.mxu2 %vm354_vm1, %v3913_v5 }
 0x49f   : > { %v4688_v2 = vmul.f32 %v4551_v58, %v4352_v38 }
 0x4a0   : > { %v4161_v47 = vpop.f32.mrf.mxu2  ;;  %v5333_v1 = vpop.f32.mrf.mxu0 }
 0x4a1   : > { %v4837_v24 = vld [vmem:[#allocation3 + $0xd9] sm:$0xff]  ;;  %4736 = vst.msk [vmem:[#allocation3 + $0xe1] sm:$0xff] %vm354_vm1, %v4688_v2  ;;  %v4253_v36 = vadd.f32 %v4161_v47, %v12093_v29  ;;  %v5334_v40 = vadd.f32 %v5333_v1, %v12314_v25  ;;  %v5689_v15 = vpop.f32.mrf.mxu1  ;;  %v4556_v25 = vpop.permute.xlu2 %4555 }
 0x4a2   : > { %9379 = vmatmul.msk.f32.gmra.mxu3 %vm354_vm1, %v4837_v24  ;;  %v3914_v29 = vld [vmem:[#allocation2 + $0x18a] sm:$0xff] }
 0x4a3   : > { %v4305_v46 = vadd.f32 %v12437_v27, %v4253_v36  ;;  %v12469_v5 = vadd.f32 %v5689_v15, %v5334_v40  ;;  %9418 = vmatmul.msk.f32.gmra.mxu0 %vm354_vm1, %v12466_v20 }
 0x4a4   : > { %9468 = vmatmul.msk.f32.gmra.mxu1 %vm354_vm1, %v5489_v53  ;;  %v12474_v38 = vpop.f32.mrf.mxu3  ;;  %v12481_v53 = vld [vmem:[#allocation3 + $0x98] sm:$0xff] }
 0x4a5   : > { %14598 = vst [vmem:[#allocation75_spill] sm:$0xff] %v12469_v5  ;;  %v4353_v58 = vmax.f32 %v4305_v46, 0.0  ;;  %9343 = vmatmul.msk.f32.gmra.mxu2 %vm354_vm1, %v3914_v29  ;;  %v5490_v5 = vld [vmem:[#allocation3 + $0x9a] sm:$0xff] }
 0x4a6   : > { %v3915_v46 = vld [vmem:[#allocation2 + $0x192] sm:$0xff] }
 0x4a7   : > { %v4689_v2 = vmul.f32 %v4556_v25, %v4353_v58 }
 0x4a8   : > { %v4164_v47 = vpop.f32.mrf.mxu2  ;;  %v5336_v1 = vpop.f32.mrf.mxu0  ;;  %v4838_v24 = vld [vmem:[#allocation3 + $0xe1] sm:$0xff] }
 0x4a9   : > { %4737 = vst.msk [vmem:[#allocation3 + $0xe9] sm:$0xff] %vm354_vm1, %v4689_v2  ;;  %v4254_v15 = vadd.f32 %v4164_v47, %v12109_v28  ;;  %v5337_v36 = vadd.f32 %v5336_v1, %v12336_v51  ;;  %v5692_v40 = vpop.f32.mrf.mxu1  ;;  %v4561_v51 = vpop.permute.xlu0 %4560 }
 0x4aa   : > { %9380 = vmatmul.msk.f32.gmra.mxu3 %vm354_vm1, %v4838_v24 }
 0x4ab   : > { %v4306_v29 = vadd.f32 %v12437_v27, %v4254_v15  ;;  %v12484_v39 = vadd.f32 %v5692_v40, %v5337_v36  ;;  %9419 = vmatmul.msk.f32.gmra.mxu0 %vm354_vm1, %v12481_v53  ;;  %v5491_v40 = vld [vmem:[#allocation3 + $0xa2] sm:$0xff] }
 0x4ac   : > { %9469 = vmatmul.msk.f32.gmra.mxu1 %vm354_vm1, %v5490_v5  ;;  %v12489_v58 = vpop.f32.mrf.mxu3  ;;  %v12496_v5 = vld [vmem:[#allocation3 + $0xa0] sm:$0xff] }
 0x4ad   : > { %14599 = vst [vmem:[#allocation76_spill] sm:$0xff] %v12484_v39  ;;  %v4354_v28 = vmax.f32 %v4306_v29, 0.0  ;;  %9344 = vmatmul.msk.f32.gmra.mxu2 %vm354_vm1, %v3915_v46  ;;  %v3916_v29 = vld [vmem:[#allocation2 + $0x19a] sm:$0xff] }
 0x4af   : > { %v4690_v25 = vmul.f32 %v4561_v51, %v4354_v28 }
 0x4b0   : > { %v4167_v2 = vpop.f32.mrf.mxu2  ;;  %v5339_v47 = vpop.f32.mrf.mxu0  ;;  %v4839_v1 = vld [vmem:[#allocation3 + $0xe9] sm:$0xff] }
 0x4b1   : > { %4738 = vst.msk [vmem:[#allocation3 + $0xf1] sm:$0xff] %vm354_vm1, %v4690_v25  ;;  %v4255_v24 = vadd.f32 %v4167_v2, %v12124_v21  ;;  %v5340_v15 = vadd.f32 %v5339_v47, %v12355_v13  ;;  %v5695_v36 = vpop.f32.mrf.mxu1  ;;  %v4566_v13 = vpop.permute.xlu1 %4565 }
 0x4b2   : > { %9381 = vmatmul.msk.f32.gmra.mxu3 %vm354_vm1, %v4839_v1 }
 0x4b3   : > { %v4307_v46 = vadd.f32 %v12437_v27, %v4255_v24  ;;  %v12499_v39 = vadd.f32 %v5695_v36, %v5340_v15  ;;  %9420 = vmatmul.msk.f32.gmra.mxu0 %vm354_vm1, %v12496_v5  ;;  %v12511_v36 = vld [vmem:[#allocation3 + $0xa8] sm:$0xff] }
 0x4b4   : > { %9470 = vmatmul.msk.f32.gmra.mxu1 %vm354_vm1, %v5491_v40  ;;  %v12504_v28 = vpop.f32.mrf.mxu3  ;;  %v5492_v40 = vld [vmem:[#allocation3 + $0xaa] sm:$0xff] }
 0x4b5   : > { %14600 = vst [vmem:[#allocation77_spill] sm:$0xff] %v12499_v39  ;;  %v4355_v21 = vmax.f32 %v4307_v46, 0.0  ;;  %9345 = vmatmul.msk.f32.gmra.mxu2 %vm354_vm1, %v3916_v29  ;;  %v3917_v46 = vld [vmem:[#allocation2 + $0x1a2] sm:$0xff] }
 0x4b7   : > { %v4691_v51 = vmul.f32 %v4566_v13, %v4355_v21 }
 0x4b8   : > { %v4170_v25 = vpop.f32.mrf.mxu2  ;;  %v5342_v2 = vpop.f32.mrf.mxu0  ;;  %v4840_v47 = vld [vmem:[#allocation3 + $0xf1] sm:$0xff] }
 0x4b9   : > { %4739 = vst.msk [vmem:[#allocation3 + $0xf9] sm:$0xff] %vm354_vm1, %v4691_v51  ;;  %v4256_v1 = vadd.f32 %v4170_v25, %v12144_v11  ;;  %v5343_v24 = vadd.f32 %v5342_v2, %v12374_v59  ;;  %v5698_v15 = vpop.f32.mrf.mxu1  ;;  %v4571_v59 = vpop.permute.xlu2 %4570 }
 0x4ba   : > { %9382 = vmatmul.msk.f32.gmra.mxu3 %vm354_vm1, %v4840_v47 }
 0x4bb   : > { %v4308_v29 = vadd.f32 %v12437_v27, %v4256_v1  ;;  %v12514_v39 = vadd.f32 %v5698_v15, %v5343_v24  ;;  %9421 = vmatmul.msk.f32.gmra.mxu0 %vm354_vm1, %v12511_v36  ;;  %v12526_v15 = vld [vmem:[#allocation3 + $0xb0] sm:$0xff] }
 0x4bc   : > { %9471 = vmatmul.msk.f32.gmra.mxu1 %vm354_vm1, %v5492_v40  ;;  %v12519_v21 = vpop.f32.mrf.mxu3  ;;  %v5493_v40 = vld [vmem:[#allocation3 + $0xb2] sm:$0xff] }
 0x4bd   : > { %14601 = vst [vmem:[#allocation78_spill] sm:$0xff] %v12514_v39  ;;  %v4356_v11 = vmax.f32 %v4308_v29, 0.0  ;;  %9346 = vmatmul.msk.f32.gmra.mxu2 %vm354_vm1, %v3917_v46  ;;  %v3918_v29 = vld [vmem:[#allocation2 + $0x1aa] sm:$0xff] }
 0x4bf   : > { %v4692_v13 = vmul.f32 %v4571_v59, %v4356_v11 }
 0x4c0   : > { %v4173_v51 = vpop.f32.mrf.mxu2  ;;  %v5345_v25 = vpop.f32.mrf.mxu0  ;;  %v4841_v2 = vld [vmem:[#allocation3 + $0xf9] sm:$0xff] }
 0x4c1   : > { %4740 = vst.msk [vmem:[#allocation3 + $0x101] sm:$0xff] %vm354_vm1, %v4692_v13  ;;  %v4257_v47 = vadd.f32 %v4173_v51, %v12157_v57  ;;  %v5346_v1 = vadd.f32 %v5345_v25, %v12390_v63  ;;  %v5701_v24 = vpop.f32.mrf.mxu1  ;;  %v4576_v63 = vpop.permute.xlu0 %4575 }
 0x4c2   : > { %9383 = vmatmul.msk.f32.gmra.mxu3 %vm354_vm1, %v4841_v2 }
 0x4c3   : > { %v4309_v46 = vadd.f32 %v12437_v27, %v4257_v47  ;;  %v12529_v39 = vadd.f32 %v5701_v24, %v5346_v1  ;;  %9422 = vmatmul.msk.f32.gmra.mxu0 %vm354_vm1, %v12526_v15  ;;  %v12541_v24 = vld [vmem:[#allocation3 + $0xb8] sm:$0xff] }
 0x4c4   : > { %9472 = vmatmul.msk.f32.gmra.mxu1 %vm354_vm1, %v5493_v40  ;;  %v12534_v11 = vpop.f32.mrf.mxu3  ;;  %v5494_v40 = vld [vmem:[#allocation3 + $0xba] sm:$0xff] }
 0x4c5   : > { %v4357_v57 = vmax.f32 %v4309_v46, 0.0  ;;  %9347 = vmatmul.msk.f32.gmra.mxu2 %vm354_vm1, %v3918_v29 }
 0x4c7   : > { %v4693_v59 = vmul.f32 %v4576_v63, %v4357_v57 }
 0x4c8   : > { %v4176_v13 = vpop.f32.mrf.mxu2  ;;  %v5348_v51 = vpop.f32.mrf.mxu0  ;;  %v4842_v25 = vld [vmem:[#allocation3 + $0x101] sm:$0xff] }
 0x4c9   : > { %4741 = vst.msk [vmem:[#allocation3 + $0x109] sm:$0xff] %vm354_vm1, %v4693_v59  ;;  %v4258_v2 = vadd.f32 %v4176_v13, %v12168_v61  ;;  %v5349_v47 = vadd.f32 %v5348_v51, %v12406_v43  ;;  %v5704_v1 = vpop.f32.mrf.mxu1  ;;  %v4581_v43 = vpop.permute.xlu1 %4580 }
 0x4ca   : > { %9384 = vmatmul.msk.f32.gmra.mxu3 %vm354_vm1, %v4842_v25 }
 0x4cb   : > { %v4310_v46 = vadd.f32 %v12437_v27, %v4258_v2  ;;  %v12544_v29 = vadd.f32 %v5704_v1, %v5349_v47  ;;  %9423 = vmatmul.msk.f32.gmra.mxu0 %vm354_vm1, %v12541_v24  ;;  %v12557_v1 = vld [vmem:[#allocation3 + $0xc0] sm:$0xff] }
 0x4cc   : > { %9473 = vmatmul.msk.f32.gmra.mxu1 %vm354_vm1, %v5494_v40  ;;  %v12549_v57 = vpop.f32.mrf.mxu3  ;;  %v5495_v40 = vld [vmem:[#allocation3 + $0xc2] sm:$0xff] }
 0x4cd   : > { %v4358_v61 = vmax.f32 %v4310_v46, 0.0  ;;  %9500 = vmatmul.msk.f32.vlgmr.msrb.gmra.mxu2 %vm354_vm1, %v12218_v31 }
 0x4cf   : > { %v4694_v63 = vmul.f32 %v4581_v43, %v4358_v61 }
 0x4d0   : > { %v4179_v59 = vpop.f32.mrf.mxu2  ;;  %v5351_v13 = vpop.f32.mrf.mxu0  ;;  %v4843_v51 = vld [vmem:[#allocation3 + $0x109] sm:$0xff] }
 0x4d1   : > { %4742 = vst.msk [vmem:[#allocation3 + $0x111] sm:$0xff] %vm354_vm1, %v4694_v63  ;;  %v4259_v25 = vadd.f32 %v4179_v59, %v12181_v49  ;;  %v5352_v2 = vadd.f32 %v5351_v13, %v12422_v23  ;;  %v5707_v47 = vpop.f32.mrf.mxu1  ;;  %v4586_v23 = vpop.permute.xlu2 %4585 }
 0x4d2   : > { %9385 = vmatmul.msk.f32.gmra.mxu3 %vm354_vm1, %v4843_v51 }
 0x4d3   : > { %v4311_v46 = vadd.f32 %v12437_v27, %v4259_v25  ;;  %v12560_v31 = vadd.f32 %v5707_v47, %v5352_v2  ;;  %9424 = vmatmul.msk.f32.gmra.mxu0 %vm354_vm1, %v12557_v1  ;;  %v12573_v47 = vld [vmem:[#allocation3 + $0xc8] sm:$0xff] }
 0x4d4   : > { %9474 = vmatmul.msk.f32.gmra.mxu1 %vm354_vm1, %v5495_v40  ;;  %v12565_v61 = vpop.f32.mrf.mxu3  ;;  %v5496_v40 = vld [vmem:[#allocation3 + $0xca] sm:$0xff] }
 0x4d5   : > { %v4359_v49 = vmax.f32 %v4311_v46, 0.0  ;;  %9501 = vmatmul.msk.f32.gmra.mxu2 %vm354_vm1, %v12234_v9 }
 0x4d7   : > { %v4695_v43 = vmul.f32 %v4586_v23, %v4359_v49 }
 0x4d8   : > { %v4182_v63 = vpop.f32.mrf.mxu2  ;;  %v5354_v59 = vpop.f32.mrf.mxu0  ;;  %v4844_v13 = vld [vmem:[#allocation3 + $0x111] sm:$0xff] }
 0x4d9   : > { %4743 = vst.msk [vmem:[#allocation3 + $0x119] sm:$0xff] %vm354_vm1, %v4695_v43  ;;  %v4260_v51 = vadd.f32 %v4182_v63, %v12194_v41  ;;  %v5355_v25 = vadd.f32 %v5354_v59, %v12443_v35  ;;  %v5710_v2 = vpop.f32.mrf.mxu1  ;;  %v4591_v35 = vpop.permute.xlu0 %4590 }
 0x4da   : > { %9386 = vmatmul.msk.f32.gmra.mxu3 %vm354_vm1, %v4844_v13 }
 0x4db   : > { %v4312_v46 = vadd.f32 %v12437_v27, %v4260_v51  ;;  %v12576_v9 = vadd.f32 %v5710_v2, %v5355_v25  ;;  %9425 = vmatmul.msk.f32.gmra.mxu0 %vm354_vm1, %v12573_v47  ;;  %v12589_v2 = vld [vmem:[#allocation3 + $0xd0] sm:$0xff] }
 0x4dc   : > { %9475 = vmatmul.msk.f32.gmra.mxu1 %vm354_vm1, %v5496_v40  ;;  %v12581_v49 = vpop.f32.mrf.mxu3  ;;  %v5497_v40 = vld [vmem:[#allocation3 + $0xd2] sm:$0xff] }
 0x4dd   : > { %v4360_v41 = vmax.f32 %v4312_v46, 0.0  ;;  %9502 = vmatmul.msk.f32.gmra.mxu2 %vm354_vm1, %v12250_v26 }
 0x4df   : > { %v4696_v23 = vmul.f32 %v4591_v35, %v4360_v41 }
 0x4e0   : > { %v4185_v43 = vpop.f32.mrf.mxu2  ;;  %v5357_v63 = vpop.f32.mrf.mxu0  ;;  %v4845_v59 = vld [vmem:[#allocation3 + $0x119] sm:$0xff] }
 0x4e1   : > { %4744 = vst.msk [vmem:[#allocation3 + $0x121] sm:$0xff] %vm354_vm1, %v4696_v23  ;;  %v4261_v13 = vadd.f32 %v4185_v43, %v12207_v19  ;;  %v5358_v51 = vadd.f32 %v5357_v63, %v12459_v48  ;;  %v5713_v25 = vpop.f32.mrf.mxu1  ;;  %v4596_v48 = vpop.permute.xlu1 %4595 }
 0x4e2   : > { %9387 = vmatmul.msk.f32.gmra.mxu3 %vm354_vm1, %v4845_v59 }
 0x4e3   : > { %v4313_v46 = vadd.f32 %v12437_v27, %v4261_v13  ;;  %v12592_v26 = vadd.f32 %v5713_v25, %v5358_v51  ;;  %9426 = vmatmul.msk.f32.gmra.mxu0 %vm354_vm1, %v12589_v2  ;;  %v12605_v25 = vld [vmem:[#allocation3 + $0xd8] sm:$0xff] }
 0x4e4   : > { %9476 = vmatmul.msk.f32.gmra.mxu1 %vm354_vm1, %v5497_v40  ;;  %v12597_v41 = vpop.f32.mrf.mxu3  ;;  %v5498_v40 = vld [vmem:[#allocation3 + $0xda] sm:$0xff] }
 0x4e5   : > { %v4361_v19 = vmax.f32 %v4313_v46, 0.0  ;;  %9503 = vmatmul.msk.f32.gmra.mxu2 %vm354_vm1, %v12266_v52 }
 0x4e7   : > { %v4697_v35 = vmul.f32 %v4596_v48, %v4361_v19 }
 0x4e8   : > { %v4188_v23 = vpop.f32.mrf.mxu2  ;;  %v5360_v43 = vpop.f32.mrf.mxu0  ;;  %v4846_v63 = vld [vmem:[#allocation3 + $0x121] sm:$0xff] }
 0x4e9   : > { %4745 = vst.msk [vmem:[#allocation3 + $0x129] sm:$0xff] %vm354_vm1, %v4697_v35  ;;  %v4262_v59 = vadd.f32 %v4188_v23, %v12222_v3  ;;  %v5361_v13 = vadd.f32 %v5360_v43, %v12474_v38  ;;  %v5716_v51 = vpop.f32.mrf.mxu1  ;;  %v4601_v38 = vpop.permute.xlu2 %4600 }
 0x4ea   : > { %9388 = vmatmul.msk.f32.gmra.mxu3 %vm354_vm1, %v4846_v63 }
 0x4eb   : > { %v4314_v46 = vadd.f32 %v12437_v27, %v4262_v59  ;;  %v12608_v52 = vadd.f32 %v5716_v51, %v5361_v13  ;;  %9427 = vmatmul.msk.f32.gmra.mxu0 %vm354_vm1, %v12605_v25  ;;  %v12621_v51 = vld [vmem:[#allocation3 + $0xe0] sm:$0xff] }
 0x4ec   : > { %9477 = vmatmul.msk.f32.gmra.mxu1 %vm354_vm1, %v5498_v40  ;;  %v12613_v19 = vpop.f32.mrf.mxu3  ;;  %v5499_v40 = vld [vmem:[#allocation3 + $0xe2] sm:$0xff] }
 0x4ed   : > { %v4362_v3 = vmax.f32 %v4314_v46, 0.0  ;;  %9504 = vmatmul.msk.f32.gmra.mxu2 %vm354_vm1, %v12282_v0 }
 0x4ef   : > { %v4698_v48 = vmul.f32 %v4601_v38, %v4362_v3 }
 0x4f0   : > { %v4191_v35 = vpop.f32.mrf.mxu2  ;;  %v5363_v23 = vpop.f32.mrf.mxu0  ;;  %v4847_v43 = vld [vmem:[#allocation3 + $0x129] sm:$0xff] }
 0x4f1   : > { %4746 = vst.msk [vmem:[#allocation3 + $0x131] sm:$0xff] %vm354_vm1, %v4698_v48  ;;  %v4263_v63 = vadd.f32 %v4191_v35, %v12236_v10  ;;  %v5364_v59 = vadd.f32 %v5363_v23, %v12489_v58  ;;  %v5719_v13 = vpop.f32.mrf.mxu1  ;;  %v4606_v58 = vpop.permute.xlu0 %4605 }
 0x4f2   : > { %9389 = vmatmul.msk.f32.gmra.mxu3 %vm354_vm1, %v4847_v43 }
 0x4f3   : > { %v4315_v46 = vadd.f32 %v12437_v27, %v4263_v63  ;;  %v12624_v0 = vadd.f32 %v5719_v13, %v5364_v59  ;;  %9428 = vmatmul.msk.f32.gmra.mxu0 %vm354_vm1, %v12621_v51  ;;  %v12637_v13 = vld [vmem:[#allocation3 + $0xe8] sm:$0xff] }
 0x4f4   : > { %9478 = vmatmul.msk.f32.gmra.mxu1 %vm354_vm1, %v5499_v40  ;;  %v12629_v3 = vpop.f32.mrf.mxu3  ;;  %v5500_v40 = vld [vmem:[#allocation3 + $0xea] sm:$0xff] }
 0x4f5   : > { %v4363_v10 = vmax.f32 %v4315_v46, 0.0  ;;  %9505 = vmatmul.msk.f32.gmra.mxu2 %vm354_vm1, %v12298_v42 }
 0x4f7   : > { %v4699_v38 = vmul.f32 %v4606_v58, %v4363_v10 }
 0x4f8   : > { %v4194_v48 = vpop.f32.mrf.mxu2  ;;  %v5366_v35 = vpop.f32.mrf.mxu0  ;;  %v4848_v23 = vld [vmem:[#allocation3 + $0x131] sm:$0xff] }
 0x4f9   : > { %4747 = vst.msk [vmem:[#allocation3 + $0x139] sm:$0xff] %vm354_vm1, %v4699_v38  ;;  %v4264_v43 = vadd.f32 %v4194_v48, %v12252_v7  ;;  %v5367_v63 = vadd.f32 %v5366_v35, %v12504_v28  ;;  %v5722_v59 = vpop.f32.mrf.mxu1  ;;  %v4611_v28 = vpop.permute.xlu1 %4610 }
 0x4fa   : > { %9390 = vmatmul.msk.f32.gmra.mxu3 %vm354_vm1, %v4848_v23 }
 0x4fb   : > { %v4316_v46 = vadd.f32 %v12437_v27, %v4264_v43  ;;  %v12640_v42 = vadd.f32 %v5722_v59, %v5367_v63  ;;  %9429 = vmatmul.msk.f32.gmra.mxu0 %vm354_vm1, %v12637_v13  ;;  %v12653_v59 = vld [vmem:[#allocation3 + $0xf0] sm:$0xff] }
 0x4fc   : > { %9479 = vmatmul.msk.f32.gmra.mxu1 %vm354_vm1, %v5500_v40  ;;  %v12645_v10 = vpop.f32.mrf.mxu3  ;;  %v5501_v40 = vld [vmem:[#allocation3 + $0xf2] sm:$0xff] }
 0x4fd   : > { %v4364_v7 = vmax.f32 %v4316_v46, 0.0  ;;  %9506 = vmatmul.msk.f32.gmra.mxu2 %vm354_vm1, %v12312_v16 }
 0x4ff   : > { %v4700_v58 = vmul.f32 %v4611_v28, %v4364_v7 }
 0x500   : > { %v4197_v38 = vpop.f32.mrf.mxu2  ;;  %v5369_v48 = vpop.f32.mrf.mxu0  ;;  %v4849_v35 = vld [vmem:[#allocation3 + $0x139] sm:$0xff] }
 0x501   : > { %4748 = vst.msk [vmem:[#allocation3 + $0x141] sm:$0xff] %vm354_vm1, %v4700_v58  ;;  %v4265_v23 = vadd.f32 %v4197_v38, %v12268_v37  ;;  %v5370_v43 = vadd.f32 %v5369_v48, %v12519_v21  ;;  %v5725_v63 = vpop.f32.mrf.mxu1  ;;  %v4616_v21 = vpop.permute.xlu2 %4615 }
 0x502   : > { %9391 = vmatmul.msk.f32.gmra.mxu3 %vm354_vm1, %v4849_v35 }
 0x503   : > { %v4317_v46 = vadd.f32 %v12437_v27, %v4265_v23  ;;  %v12656_v16 = vadd.f32 %v5725_v63, %v5370_v43  ;;  %9430 = vmatmul.msk.f32.gmra.mxu0 %vm354_vm1, %v12653_v59  ;;  %v12669_v63 = vld [vmem:[#allocation3 + $0xf8] sm:$0xff] }
 0x504   : > { %9480 = vmatmul.msk.f32.gmra.mxu1 %vm354_vm1, %v5501_v40  ;;  %v12661_v7 = vpop.f32.mrf.mxu3  ;;  %v5502_v40 = vld [vmem:[#allocation3 + $0xfa] sm:$0xff] }
 0x505   : > { %v4365_v37 = vmax.f32 %v4317_v46, 0.0  ;;  %9507 = vmatmul.msk.f32.gmra.mxu2 %vm354_vm1, %v12328_v50 }
 0x507   : > { %v4701_v28 = vmul.f32 %v4616_v21, %v4365_v37 }
 0x508   : > { %v4200_v58 = vpop.f32.mrf.mxu2  ;;  %v5372_v38 = vpop.f32.mrf.mxu0  ;;  %v4850_v48 = vld [vmem:[#allocation3 + $0x141] sm:$0xff] }
 0x509   : > { %4749 = vst.msk [vmem:[#allocation3 + $0x149] sm:$0xff] %vm354_vm1, %v4701_v28  ;;  %v4266_v35 = vadd.f32 %v4200_v58, %v12284_v34  ;;  %v5373_v23 = vadd.f32 %v5372_v38, %v12534_v11  ;;  %v5728_v43 = vpop.f32.mrf.mxu1  ;;  %v4621_v11 = vpop.permute.xlu0 %4620 }
 0x50a   : > { %9392 = vmatmul.msk.f32.gmra.mxu3 %vm354_vm1, %v4850_v48 }
 0x50b   : > { %v4318_v46 = vadd.f32 %v12437_v27, %v4266_v35  ;;  %v12672_v50 = vadd.f32 %v5728_v43, %v5373_v23  ;;  %9431 = vmatmul.msk.f32.gmra.mxu0 %vm354_vm1, %v12669_v63  ;;  %v12685_v43 = vld [vmem:[#allocation3 + $0x100] sm:$0xff] }
 0x50c   : > { %9481 = vmatmul.msk.f32.gmra.mxu1 %vm354_vm1, %v5502_v40  ;;  %v12677_v37 = vpop.f32.mrf.mxu3  ;;  %v5503_v40 = vld [vmem:[#allocation3 + $0x102] sm:$0xff] }
 0x50d   : > { %v4366_v34 = vmax.f32 %v4318_v46, 0.0  ;;  %9508 = vmatmul.msk.f32.gmra.mxu2 %vm354_vm1, %v12347_v17 }
 0x50f   : > { %v4702_v21 = vmul.f32 %v4621_v11, %v4366_v34 }
 0x510   : > { %v4203_v28 = vpop.f32.mrf.mxu2  ;;  %v5375_v58 = vpop.f32.mrf.mxu0  ;;  %v4851_v38 = vld [vmem:[#allocation3 + $0x149] sm:$0xff] }
 0x511   : > { %4750 = vst.msk [vmem:[#allocation3 + $0x151] sm:$0xff] %vm354_vm1, %v4702_v21  ;;  %v4267_v48 = vadd.f32 %v4203_v28, %v12300_v54  ;;  %v5376_v35 = vadd.f32 %v5375_v58, %v12549_v57  ;;  %v5731_v23 = vpop.f32.mrf.mxu1  ;;  %v4626_v57 = vpop.permute.xlu1 %4625 }
 0x512   : > { %9393 = vmatmul.msk.f32.gmra.mxu3 %vm354_vm1, %v4851_v38 }
 0x513   : > { %v4319_v46 = vadd.f32 %v12437_v27, %v4267_v48  ;;  %v12688_v17 = vadd.f32 %v5731_v23, %v5376_v35  ;;  %9432 = vmatmul.msk.f32.gmra.mxu0 %vm354_vm1, %v12685_v43  ;;  %v12701_v23 = vld [vmem:[#allocation3 + $0x108] sm:$0xff] }
 0x514   : > { %9482 = vmatmul.msk.f32.gmra.mxu1 %vm354_vm1, %v5503_v40  ;;  %v12693_v34 = vpop.f32.mrf.mxu3  ;;  %v5504_v40 = vld [vmem:[#allocation3 + $0x10a] sm:$0xff] }
 0x515   : > { %v4367_v54 = vmax.f32 %v4319_v46, 0.0  ;;  %9509 = vmatmul.msk.f32.gmra.mxu2 %vm354_vm1, %v12366_v18 }
 0x517   : > { %v4703_v11 = vmul.f32 %v4626_v57, %v4367_v54 }
 0x518   : > { %v4206_v21 = vpop.f32.mrf.mxu2  ;;  %v5378_v28 = vpop.f32.mrf.mxu0  ;;  %v4852_v58 = vld [vmem:[#allocation3 + $0x151] sm:$0xff] }
 0x519   : > { %4751 = vst.msk [vmem:[#allocation3 + $0x159] sm:$0xff] %vm354_vm1, %v4703_v11  ;;  %v4268_v38 = vadd.f32 %v4206_v21, %v12316_v12  ;;  %v5379_v48 = vadd.f32 %v5378_v28, %v12565_v61  ;;  %v5734_v35 = vpop.f32.mrf.mxu1  ;;  %v4631_v61 = vpop.permute.xlu2 %4630 }
 0x51a   : > { %9394 = vmatmul.msk.f32.gmra.mxu3 %vm354_vm1, %v4852_v58 }
 0x51b   : > { %v4320_v46 = vadd.f32 %v12437_v27, %v4268_v38  ;;  %v12704_v18 = vadd.f32 %v5734_v35, %v5379_v48  ;;  %9433 = vmatmul.msk.f32.gmra.mxu0 %vm354_vm1, %v12701_v23  ;;  %v12717_v35 = vld [vmem:[#allocation3 + $0x110] sm:$0xff] }
 0x51c   : > { %9483 = vmatmul.msk.f32.gmra.mxu1 %vm354_vm1, %v5504_v40  ;;  %v12709_v54 = vpop.f32.mrf.mxu3  ;;  %v5505_v40 = vld [vmem:[#allocation3 + $0x112] sm:$0xff] }
 0x51d   : > { %v4368_v12 = vmax.f32 %v4320_v46, 0.0  ;;  %9510 = vmatmul.msk.f32.gmra.mxu2 %vm354_vm1, %v12382_v55 }
 0x51f   : > { %v4704_v57 = vmul.f32 %v4631_v61, %v4368_v12 }
 0x520   : > { %v4209_v11 = vpop.f32.mrf.mxu2  ;;  %v5381_v21 = vpop.f32.mrf.mxu0  ;;  %v4853_v28 = vld [vmem:[#allocation3 + $0x159] sm:$0xff] }
 0x521   : > { %4752 = vst.msk [vmem:[#allocation3 + $0x161] sm:$0xff] %vm354_vm1, %v4704_v57  ;;  %v4269_v58 = vadd.f32 %v4209_v11, %v12330_v62  ;;  %v5382_v38 = vadd.f32 %v5381_v21, %v12581_v49  ;;  %v5737_v48 = vpop.f32.mrf.mxu1  ;;  %v4636_v49 = vpop.permute.xlu0 %4635 }
 0x522   : > { %9395 = vmatmul.msk.f32.gmra.mxu3 %vm354_vm1, %v4853_v28 }
 0x523   : > { %v4321_v46 = vadd.f32 %v12437_v27, %v4269_v58  ;;  %v12720_v55 = vadd.f32 %v5737_v48, %v5382_v38  ;;  %9434 = vmatmul.msk.f32.gmra.mxu0 %vm354_vm1, %v12717_v35  ;;  %v9699_v48 = vld [vmem:[%s14232_s4 + $0x108] sm:$0xff] }
 0x524   : > { %9484 = vmatmul.msk.f32.gmra.mxu1 %vm354_vm1, %v5505_v40  ;;  %v12736_v40 = vld [vmem:[#allocation3 + $0x118] sm:$0xff]  ;;  %7700 = vmatpush.msra.mxu2 %v9699_v48  ;;  %v9599_v48 = vld [vmem:[%s14232_s4 + $0xe8] sm:$0xff] }
 0x525   : > { %v12725_v12 = vpop.f32.mrf.mxu3  ;;  %v4369_v62 = vmax.f32 %v4321_v46, 0.0  ;;  %9511 = vmatmul.msk.f32.gmra.mxu2 %vm354_vm1, %v12398_v8  ;;  %v5506_v8 = vld [vmem:[#allocation3 + $0x11a] sm:$0xff]  ;;  %6892 = vmatpush.msrb.mxu0 %v9599_v48 }
 0x527   : > { %v4705_v61 = vmul.f32 %v4636_v49, %v4369_v62  ;;  %v4641_v49 = vpop.permute.xlu1 %4640 }
 0x528   : > { %v4212_v57 = vpop.f32.mrf.mxu2  ;;  %v5384_v11 = vpop.f32.mrf.mxu0  ;;  %v4854_v21 = vld [vmem:[#allocation3 + $0x161] sm:$0xff] }
 0x529   : > { %4753 = vst.msk [vmem:[#allocation3 + $0x169] sm:$0xff] %vm354_vm1, %v4705_v61  ;;  %v4270_v28 = vadd.f32 %v4212_v57, %v12349_v4  ;;  %v5385_v58 = vadd.f32 %v5384_v11, %v12597_v41  ;;  %v5740_v38 = vpop.f32.mrf.mxu1 }
 0x52a   : > { %9396 = vmatmul.msk.f32.gmra.mxu3 %vm354_vm1, %v4854_v21 }
 0x52b   : > { %v4322_v46 = vadd.f32 %v12437_v27, %v4270_v28  ;;  %v12739_v62 = vadd.f32 %v5740_v38, %v5385_v58  ;;  %9435 = vmatmul.msk.f32.gmra.mxu0 %vm354_vm1, %v12736_v40 }
 0x52c   : > { %9485 = vmatmul.msk.f32.gmra.mxu1 %vm354_vm1, %v5506_v8  ;;  %v9649_v8 = vld [vmem:[%s14232_s4 + $0xf8] sm:$0xff] }
 0x52d   : > { %v12744_v4 = vpop.f32.mrf.mxu3  ;;  %v4370_v41 = vmax.f32 %v4322_v46, 0.0  ;;  %9512 = vmatmul.msk.f32.gmra.mxu2 %vm354_vm1, %v12414_v45  ;;  %v9749_v45 = vld [vmem:[%s14232_s4 + $0x118] sm:$0xff]  ;;  %7296 = vmatpush.msrb.mxu1 %v9649_v8  ;;  %v5508_v8 = vld [vmem:[#allocation3 + $0x12a] sm:$0xff] }
 0x52e   : > { %v12761_v46 = vld [vmem:[#allocation3 + $0x120] sm:$0xff]  ;;  %8104 = vmatpush.msra.mxu3 %v9749_v45 }
 0x52f   : > { %v4706_v61 = vmul.f32 %v4641_v49, %v4370_v41 }
 0x530   : > { %v4215_v57 = vpop.f32.mrf.mxu2  ;;  %v5387_v11 = vpop.f32.mrf.mxu0  ;;  %v4855_v21 = vld [vmem:[#allocation3 + $0x169] sm:$0xff] }
 0x531   : > { %4754 = vst.msk [vmem:[#allocation3 + $0x171] sm:$0xff] %vm354_vm1, %v4706_v61  ;;  %v4271_v28 = vadd.f32 %v4215_v57, %v12368_v32  ;;  %v5388_v58 = vadd.f32 %v5387_v11, %v12613_v19  ;;  %v5743_v38 = vpop.f32.mrf.mxu1  ;;  %v5507_v32 = vld [vmem:[#allocation3 + $0x122] sm:$0xff]  ;;  %v4646_v57 = vpop.permute.xlu2 %4645 }
 0x532   : > { %9397 = vmatmul.msk.f32.gmra.mxu3 %vm354_vm1, %v4855_v21 }
 0x533   : > { %v4323_v19 = vadd.f32 %v12437_v27, %v4271_v28  ;;  %v12764_v41 = vadd.f32 %v5743_v38, %v5388_v58  ;;  %9436 = vmatmul.msk.f32.gmra.mxu0 %vm354_vm1, %v12761_v46 }
 0x534   : > { %9486 = vmatmul.msk.f32.gmra.mxu1 %vm354_vm1, %v5507_v32  ;;  %v12777_v32 = vld [vmem:[#allocation3 + $0x128] sm:$0xff] }
 0x535   : > { %v12769_v49 = vpop.f32.mrf.mxu3  ;;  %v4371_v61 = vmax.f32 %v4323_v19, 0.0  ;;  %9513 = vmatmul.msk.f32.gmra.mxu2 %vm354_vm1, %v12432_v22 }
 0x537   : > { %v4707_v11 = vmul.f32 %v4646_v57, %v4371_v61 }
 0x538   : > { %v4218_v21 = vpop.f32.mrf.mxu2  ;;  %v5390_v48 = vpop.f32.mrf.mxu0  ;;  %v4856_v45 = vld [vmem:[#allocation3 + $0x171] sm:$0xff] }
 0x539   : > { %4755 = vst.msk [vmem:[#allocation3 + $0x179] sm:$0xff] %vm354_vm1, %v4707_v11  ;;  %v4272_v28 = vadd.f32 %v4218_v21, %v12384_v6  ;;  %v5391_v58 = vadd.f32 %v5390_v48, %v12629_v3  ;;  %v5746_v38 = vpop.f32.mrf.mxu1  ;;  %v4651_v3 = vpop.permute.xlu0 %4650 }
 0x53a   : > { %9398 = vmatmul.msk.f32.gmra.mxu3 %vm354_vm1, %v4856_v45 }
 0x53b   : > { %v4324_v19 = vadd.f32 %v12437_v27, %v4272_v28  ;;  %v12780_v22 = vadd.f32 %v5746_v38, %v5391_v58  ;;  %9437 = vmatmul.msk.f32.gmra.mxu0 %vm354_vm1, %v12777_v32  ;;  %v12793_v38 = vld [vmem:[#allocation3 + $0x130] sm:$0xff] }
 0x53c   : > { %9487 = vmatmul.msk.f32.gmra.mxu1 %vm354_vm1, %v5508_v8  ;;  %v5509_v8 = vld [vmem:[#allocation3 + $0x132] sm:$0xff] }
 0x53d   : > { %v12785_v61 = vpop.f32.mrf.mxu3  ;;  %v4372_v6 = vmax.f32 %v4324_v19, 0.0  ;;  %9514 = vmatmul.msk.f32.gmra.mxu2 %vm354_vm1, %v12453_v44 }
 0x53f   : > { %v4708_v57 = vmul.f32 %v4651_v3, %v4372_v6 }
 0x540   : > { %v4221_v11 = vpop.f32.mrf.mxu2  ;;  %v5393_v21 = vpop.f32.mrf.mxu0  ;;  %v4857_v48 = vld [vmem:[#allocation3 + $0x179] sm:$0xff] }
 0x541   : > { %4756 = vst.msk [vmem:[#allocation3 + $0x181] sm:$0xff] %vm354_vm1, %v4708_v57  ;;  %v4273_v45 = vadd.f32 %v4221_v11, %v12400_v60  ;;  %v5394_v28 = vadd.f32 %v5393_v21, %v12645_v10  ;;  %v5749_v58 = vpop.f32.mrf.mxu1  ;;  %v4656_v10 = vpop.permute.xlu1 %4655  ;;  %v6279_v21 = vld [vmem:[#allocation3 + $0x19] sm:$0xff] }
 0x542   : > { %9399 = vmatmul.msk.f32.gmra.mxu3 %vm354_vm1, %v4857_v48 }
 0x543   : > { %v4325_v19 = vadd.f32 %v12437_v27, %v4273_v45  ;;  %v12796_v44 = vadd.f32 %v5749_v58, %v5394_v28  ;;  %9438 = vmatmul.msk.f32.gmra.mxu0 %vm354_vm1, %v12793_v38  ;;  %v12809_v58 = vld [vmem:[#allocation3 + $0x138] sm:$0xff] }
 0x544   : > { %9488 = vmatmul.msk.f32.gmra.mxu1 %vm354_vm1, %v5509_v8  ;;  %v5510_v8 = vld [vmem:[#allocation3 + $0x13a] sm:$0xff] }
 0x545   : > { %v12801_v6 = vpop.f32.mrf.mxu3  ;;  %v4373_v60 = vmax.f32 %v4325_v19, 0.0  ;;  %9515 = vmatmul.msk.f32.gmra.mxu2 %vm354_vm1, %v12466_v20  ;;  %v5328_v20 = vadd.f32 %v12425_v33, %v12275_v14 }
 0x547   : > { %v4709_v3 = vmul.f32 %v4656_v10, %v4373_v60  ;;  %v4661_v10 = vpop.permute.xlu2 %4660 }
 0x548   : > { %v4224_v57 = vpop.f32.mrf.mxu2  ;;  %v5396_v11 = vpop.f32.mrf.mxu0 }
 0x549   : > { %4757 = vst.msk [vmem:[#allocation3 + $0x189] sm:$0xff] %vm354_vm1, %v4709_v3  ;;  %v4274_v48 = vadd.f32 %v4224_v57, %v12416_v30  ;;  %v5397_v45 = vadd.f32 %v5396_v11, %v12661_v7  ;;  %v5752_v28 = vpop.f32.mrf.mxu1  ;;  %v5827_v3 = vadd.f32 %v12429_v56, %v5328_v20 }
 0x54a   : > { %9550 = vmatmul.msk.f32.vlgmr.msrb.gmra.mxu3 %vm354_vm1, %v6279_v21 }
 0x54b   : > { %v4326_v19 = vadd.f32 %v12437_v27, %v4274_v48  ;;  %v12814_v60 = vadd.f32 %v5752_v28, %v5397_v45  ;;  %9439 = vmatmul.msk.f32.gmra.mxu0 %vm354_vm1, %v12809_v58  ;;  %v6280_v27 = vld [vmem:[#allocation3 + $0x21] sm:$0xff] }
 0x54c   : > { %9489 = vmatmul.msk.f32.gmra.mxu1 %vm354_vm1, %v5510_v8  ;;  %v12829_v45 = vld [vmem:[#allocation3 + $0x140] sm:$0xff] }
 0x54d   : > { %v12819_v30 = vpop.f32.mrf.mxu3  ;;  %v4374_v7 = vmax.f32 %v4326_v19, 0.0  ;;  %9516 = vmatmul.msk.f32.gmra.mxu2 %vm354_vm1, %v12481_v53  ;;  %v5511_v28 = vld [vmem:[#allocation3 + $0x142] sm:$0xff]  ;;  %v14602_v53 = vld [vmem:[#allocation72_spill] sm:$0xff] }
 0x54e   : > { %v14603_v8 = vld [vmem:[#allocation73_spill] sm:$0xff] }
 0x54f   : > { %v4710_v57 = vmul.f32 %v4661_v10, %v4374_v7  ;;  %v5331_v19 = vadd.f32 %v14603_v8, %v14602_v53  ;;  %v12858_v8 = vld [vmem:[#allocation3 + $0x31] sm:$0xff] }
 0x550   : > { %v5399_v14 = vpop.f32.mrf.mxu0  ;;  %v6087_v33 = vpop.f32.mrf.mxu2  ;;  %14606 = vst [vmem:[#allocation80_spill] sm:$0xff] %v12858_v8 }
 0x551   : > { %4758 = vst.msk [vmem:[#allocation3 + $0x191] sm:$0xff] %vm354_vm1, %v4710_v57  ;;  %v5400_v11 = vadd.f32 %v5399_v14, %v12677_v37  ;;  %v5755_v21 = vpop.f32.mrf.mxu1  ;;  %v12826_v48 = vadd.f32 %v6087_v33, %v5827_v3  ;;  %v14604_v37 = vld [vmem:[#allocation74_spill] sm:$0xff] }
 0x552   : > { %9551 = vmatmul.msk.f32.gmra.mxu3 %vm354_vm1, %v6280_v27  ;;  %v5828_v7 = vadd.f32 %v14604_v37, %v5331_v19  ;;  %v6281_v57 = vld [vmem:[#allocation3 + $0x29] sm:$0xff] }
 0x553   : > { %v12833_v56 = vadd.f32 %v5755_v21, %v5400_v11  ;;  %9440 = vmatmul.msk.f32.gmra.mxu0 %vm354_vm1, %v12829_v45  ;;  %v12847_v11 = vld [vmem:[#allocation3 + $0x148] sm:$0xff] }
 0x554   : > { %9490 = vmatmul.msk.f32.gmra.mxu1 %vm354_vm1, %v5511_v28  ;;  %v5512_v21 = vld [vmem:[#allocation3 + $0x14a] sm:$0xff] }
 0x555   : > { %v12838_v20 = vpop.f32.mrf.mxu3  ;;  %9517 = vmatmul.msk.f32.gmra.mxu2 %vm354_vm1, %v12496_v5 }
 0x558   : > { %v5402_v10 = vpop.f32.mrf.mxu0  ;;  %v6090_v3 = vpop.f32.mrf.mxu2 }
 0x559   : > { %v5403_v14 = vadd.f32 %v5402_v10, %v12693_v34  ;;  %v5758_v33 = vpop.f32.mrf.mxu1  ;;  %v12844_v27 = vadd.f32 %v6090_v3, %v5828_v7  ;;  %v14607_v7 = vld [vmem:[#allocation75_spill] sm:$0xff] }
 0x55a   : > { %9552 = vmatmul.msk.f32.gmra.mxu3 %vm354_vm1, %v6281_v57  ;;  %v12866_v3 = vld [vmem:[#allocation3 + $0x150] sm:$0xff] }
 0x55b   : > { %v12849_v28 = vadd.f32 %v5758_v33, %v5403_v14  ;;  %9441 = vmatmul.msk.f32.gmra.mxu0 %vm354_vm1, %v12847_v11  ;;  %v5513_v57 = vld [vmem:[#allocation3 + $0x152] sm:$0xff] }
 0x55c   : > { %9491 = vmatmul.msk.f32.gmra.mxu1 %vm354_vm1, %v5512_v21  ;;  %v12877_v21 = vld [vmem:[#allocation3 + $0x39] sm:$0xff] }
 0x55d   : > { %14605 = vst [vmem:[#allocation79_spill] sm:$0xff] %v12849_v28  ;;  %v12854_v5 = vpop.f32.mrf.mxu3  ;;  %9518 = vmatmul.msk.f32.gmra.mxu2 %vm354_vm1, %v12511_v36  ;;  %v12929_v28 = vld [vmem:[#allocation3 + $0x168] sm:$0xff] }
 0x55e   : > { %14609 = vst [vmem:[#allocation35_spill] sm:$0xff] %v12877_v21 }
 0x560   : > { %v5405_v34 = vpop.f32.mrf.mxu0  ;;  %v6093_v53 = vpop.f32.mrf.mxu2 }
 0x561   : > { %v5406_v19 = vadd.f32 %v5405_v34, %v12709_v54  ;;  %v5761_v37 = vpop.f32.mrf.mxu1  ;;  %v12862_v10 = vadd.f32 %v6093_v53, %v14607_v7  ;;  %v14610_v7 = vld [vmem:[#allocation76_spill] sm:$0xff] }
 0x562   : > { %9553 = vmatmul.msk.f32.gmra.mxu3 %vm354_vm1, %v12858_v8 }
 0x563   : > { %v12868_v14 = vadd.f32 %v5761_v37, %v5406_v19  ;;  %9442 = vmatmul.msk.f32.gmra.mxu0 %vm354_vm1, %v12866_v3  ;;  %v12885_v37 = vld [vmem:[#allocation3 + $0x158] sm:$0xff] }
 0x564   : > { %9492 = vmatmul.msk.f32.gmra.mxu1 %vm354_vm1, %v5513_v57  ;;  %v5514_v57 = vld [vmem:[#allocation3 + $0x15a] sm:$0xff] }
 0x565   : > { %14608 = vst [vmem:[#allocation85_spill] sm:$0xff] %v12868_v14  ;;  %v12873_v36 = vpop.f32.mrf.mxu3  ;;  %9519 = vmatmul.msk.f32.gmra.mxu2 %vm354_vm1, %v12526_v15  ;;  %v14613_v14 = vld [vmem:[#allocation77_spill] sm:$0xff] }
 0x568   : > { %v5408_v54 = vpop.f32.mrf.mxu0  ;;  %v6096_v33 = vpop.f32.mrf.mxu2 }
 0x569   : > { %v5409_v34 = vadd.f32 %v5408_v54, %v12725_v12  ;;  %v5764_v53 = vpop.f32.mrf.mxu1  ;;  %v12881_v19 = vadd.f32 %v6096_v33, %v14610_v7  ;;  %v12896_v33 = vld [vmem:[#allocation3 + $0x41] sm:$0xff] }
 0x56a   : > { %9554 = vmatmul.msk.f32.gmra.mxu3 %vm354_vm1, %v12877_v21  ;;  %14612 = vst [vmem:[#allocation81_spill] sm:$0xff] %v12896_v33 }
 0x56b   : > { %v12887_v8 = vadd.f32 %v5764_v53, %v5409_v34  ;;  %9443 = vmatmul.msk.f32.gmra.mxu0 %vm354_vm1, %v12885_v37  ;;  %v12904_v53 = vld [vmem:[#allocation3 + $0x160] sm:$0xff] }
 0x56c   : > { %9493 = vmatmul.msk.f32.gmra.mxu1 %vm354_vm1, %v5514_v57  ;;  %v5515_v57 = vld [vmem:[#allocation3 + $0x162] sm:$0xff] }
 0x56d   : > { %14611 = vst [vmem:[#allocation11_spill] sm:$0xff] %v12887_v8  ;;  %v12892_v15 = vpop.f32.mrf.mxu3  ;;  %9520 = vmatmul.msk.f32.gmra.mxu2 %vm354_vm1, %v12541_v24  ;;  %v9598_v24 = vld [vmem:[%s14232_s4 + $0xe0] sm:$0xff] }
 0x56e   : > { %6893 = vmatpush.msrb.mxu0 %v9598_v24  ;;  %v5516_v24 = vld [vmem:[#allocation3 + $0x16a] sm:$0xff] }
 0x570   : > { %v5411_v12 = vpop.f32.mrf.mxu0  ;;  %v6099_v54 = vpop.f32.mrf.mxu2 }
 0x571   : > { %v5412_v7 = vadd.f32 %v5411_v12, %v12744_v4  ;;  %v5767_v21 = vpop.f32.mrf.mxu1  ;;  %v12900_v34 = vadd.f32 %v6099_v54, %v14613_v14  ;;  %v9648_v4 = vld [vmem:[%s14232_s4 + $0xf0] sm:$0xff]  ;;  %v12921_v54 = vld [vmem:[#allocation3 + $0x49] sm:$0xff] }
 0x572   : > { %9555 = vmatmul.msk.f32.gmra.mxu3 %vm354_vm1, %v12896_v33  ;;  %7297 = vmatpush.msrb.mxu1 %v9648_v4  ;;  %14615 = vst [vmem:[#allocation86_spill] sm:$0xff] %v12921_v54  ;;  %v14616_v33 = vld [vmem:[#allocation78_spill] sm:$0xff] }
 0x573   : > { %v12906_v8 = vadd.f32 %v5767_v21, %v5412_v7  ;;  %9444 = vmatmul.msk.f32.gmra.mxu0 %vm354_vm1, %v12904_v53 }
 0x574   : > { %9494 = vmatmul.msk.f32.gmra.mxu1 %vm354_vm1, %v5515_v57 }
 0x575   : > { %14614 = vst [vmem:[#allocation82_spill] sm:$0xff] %v12906_v8  ;;  %v12917_v14 = vpop.f32.mrf.mxu3  ;;  %9521 = vmatmul.msk.f32.gmra.mxu2 %vm354_vm1, %v12557_v1 }
 0x578   : > { %v5414_v21 = vpop.f32.mrf.mxu0  ;;  %v6102_v12 = vpop.f32.mrf.mxu2 }
 0x579   : > { %v5415_v7 = vadd.f32 %v5414_v21, %v12769_v49  ;;  %v5770_v57 = vpop.f32.mrf.mxu1  ;;  %v12925_v8 = vadd.f32 %v6102_v12, %v14616_v33  ;;  %v12940_v21 = vld [vmem:[#allocation3 + $0x51] sm:$0xff] }
 0x57a   : > { %9556 = vmatmul.msk.f32.gmra.mxu3 %vm354_vm1, %v12921_v54  ;;  %14618 = vst [vmem:[#allocation32_spill] sm:$0xff] %v12940_v21 }
 0x57b   : > { %v12931_v4 = vadd.f32 %v5770_v57, %v5415_v7  ;;  %9445 = vmatmul.msk.f32.gmra.mxu0 %vm354_vm1, %v12929_v28  ;;  %v12948_v57 = vld [vmem:[#allocation3 + $0x170] sm:$0xff] }
 0x57c   : > { %9495 = vmatmul.msk.f32.gmra.mxu1 %vm354_vm1, %v5516_v24  ;;  %v5517_v24 = vld [vmem:[#allocation3 + $0x172] sm:$0xff] }
 0x57d   : > { %14617 = vst [vmem:[#allocation30_spill] sm:$0xff] %v12931_v4  ;;  %v12936_v1 = vpop.f32.mrf.mxu3  ;;  %9522 = vmatmul.msk.f32.gmra.mxu2 %vm354_vm1, %v12573_v47 }
 0x580   : > { %v5417_v49 = vpop.f32.mrf.mxu0  ;;  %v6105_v33 = vpop.f32.mrf.mxu2 }
 0x581   : > { %v5418_v12 = vadd.f32 %v5417_v49, %v12785_v61  ;;  %v5773_v54 = vpop.f32.mrf.mxu1  ;;  %v12944_v7 = vadd.f32 %v6105_v33, %v12529_v39  ;;  %v12959_v49 = vld [vmem:[#allocation3 + $0x59] sm:$0xff] }
 0x582   : > { %9557 = vmatmul.msk.f32.gmra.mxu3 %vm354_vm1, %v12940_v21  ;;  %14620 = vst [vmem:[#allocation47_spill] sm:$0xff] %v12959_v49 }
 0x583   : > { %v12950_v4 = vadd.f32 %v5773_v54, %v5418_v12  ;;  %9446 = vmatmul.msk.f32.gmra.mxu0 %vm354_vm1, %v12948_v57  ;;  %v12967_v12 = vld [vmem:[#allocation3 + $0x178] sm:$0xff] }
 0x584   : > { %9496 = vmatmul.msk.f32.gmra.mxu1 %vm354_vm1, %v5517_v24  ;;  %14621 = vst [vmem:[#allocation83_spill] sm:$0xff] %v12967_v12  ;;  %v5518_v24 = vld [vmem:[#allocation3 + $0x17a] sm:$0xff] }
 0x585   : > { %14619 = vst [vmem:[#allocation46_spill] sm:$0xff] %v12950_v4  ;;  %v12955_v47 = vpop.f32.mrf.mxu3  ;;  %9523 = vmatmul.msk.f32.gmra.mxu2 %vm354_vm1, %v12589_v2 }
 0x588   : > { %v5420_v39 = vpop.f32.mrf.mxu0  ;;  %v6108_v61 = vpop.f32.mrf.mxu2 }
 0x589   : > { %v5421_v33 = vadd.f32 %v5420_v39, %v12801_v6  ;;  %v5776_v21 = vpop.f32.mrf.mxu1  ;;  %v12963_v54 = vadd.f32 %v6108_v61, %v12544_v29  ;;  %v12978_v39 = vld [vmem:[#allocation3 + $0x61] sm:$0xff] }
 0x58a   : > { %9558 = vmatmul.msk.f32.gmra.mxu3 %vm354_vm1, %v12959_v49  ;;  %14623 = vst [vmem:[#allocation31_spill] sm:$0xff] %v12978_v39 }
 0x58b   : > { %v12969_v4 = vadd.f32 %v5776_v21, %v5421_v33  ;;  %9447 = vmatmul.msk.f32.gmra.mxu0 %vm354_vm1, %v12967_v12  ;;  %v6683_v33 = vld [vmem:[#allocation3 + $0x1a] sm:$0xff] }
 0x58c   : > { %9497 = vmatmul.msk.f32.gmra.mxu1 %vm354_vm1, %v5518_v24  ;;  %v7087_v24 = vld [vmem:[#allocation3 + $0x30] sm:$0xff] }
 0x58d   : > { %14622 = vst [vmem:[#allocation84_spill] sm:$0xff] %v12969_v4  ;;  %v12974_v2 = vpop.f32.mrf.mxu3  ;;  %9524 = vmatmul.msk.f32.gmra.mxu2 %vm354_vm1, %v12605_v25 }
 0x590   : > { %v5423_v29 = vpop.f32.mrf.mxu0  ;;  %v6111_v6 = vpop.f32.mrf.mxu2 }
 0x591   : > { %v5424_v61 = vadd.f32 %v5423_v29, %v12819_v30  ;;  %v5779_v49 = vpop.f32.mrf.mxu1  ;;  %v12982_v21 = vadd.f32 %v6111_v6, %v12560_v31  ;;  %v12994_v31 = vld [vmem:[#allocation3 + $0x69] sm:$0xff] }
 0x592   : > { %9559 = vmatmul.msk.f32.gmra.mxu3 %vm354_vm1, %v12978_v39  ;;  %14624 = vst [vmem:[#allocation7_spill] sm:$0xff] %v12994_v31 }
 0x593   : > { %v12986_v4 = vadd.f32 %v5779_v49, %v5424_v61  ;;  %9600 = vmatmul.msk.f32.vlgmr.msrb.gmra.mxu0 %vm354_vm1, %v6683_v33  ;;  %v6684_v49 = vld [vmem:[#allocation3 + $0x22] sm:$0xff]  ;;  %v7088_v61 = vld [vmem:[#allocation3 + $0x38] sm:$0xff] }
 0x594   : > { %9650 = vmatmul.msk.f32.vlgmr.msrb.gmra.mxu1 %vm354_vm1, %v7087_v24 }
 0x595   : > { %v12990_v25 = vpop.f32.mrf.mxu3  ;;  %9525 = vmatmul.msk.f32.gmra.mxu2 %vm354_vm1, %v12621_v51 }
 0x598   : > { %v5426_v30 = vpop.f32.mrf.mxu0  ;;  %v6114_v29 = vpop.f32.mrf.mxu2 }
 0x599   : > { %v5427_v6 = vadd.f32 %v5426_v30, %v12838_v20  ;;  %v5782_v39 = vpop.f32.mrf.mxu1  ;;  %v12998_v12 = vadd.f32 %v6114_v29, %v12576_v9  ;;  %v13010_v9 = vld [vmem:[#allocation3 + $0x71] sm:$0xff] }
 0x59a   : > { %9560 = vmatmul.msk.f32.gmra.mxu3 %vm354_vm1, %v12994_v31  ;;  %14625 = vst [vmem:[#allocation87_spill] sm:$0xff] %v13010_v9 }
 0x59b   : > { %v13002_v33 = vadd.f32 %v5782_v39, %v5427_v6  ;;  %9601 = vmatmul.msk.f32.gmra.mxu0 %vm354_vm1, %v6684_v49  ;;  %v6685_v39 = vld [vmem:[#allocation3 + $0x2a] sm:$0xff]  ;;  %v7089_v6 = vld [vmem:[#allocation3 + $0x40] sm:$0xff] }
 0x59c   : > { %9651 = vmatmul.msk.f32.gmra.mxu1 %vm354_vm1, %v7088_v61 }
 0x59d   : > { %v13006_v51 = vpop.f32.mrf.mxu3  ;;  %9526 = vmatmul.msk.f32.gmra.mxu2 %vm354_vm1, %v12637_v13 }
 0x5a0   : > { %v5429_v20 = vpop.f32.mrf.mxu0  ;;  %v6117_v24 = vpop.f32.mrf.mxu2 }
 0x5a1   : > { %v5430_v30 = vadd.f32 %v5429_v20, %v12854_v5  ;;  %v5785_v29 = vpop.f32.mrf.mxu1  ;;  %v13014_v31 = vadd.f32 %v6117_v24, %v12592_v26  ;;  %v13026_v26 = vld [vmem:[#allocation3 + $0x79] sm:$0xff] }
 0x5a2   : > { %9561 = vmatmul.msk.f32.gmra.mxu3 %vm354_vm1, %v13010_v9  ;;  %14626 = vst [vmem:[#allocation88_spill] sm:$0xff] %v13026_v26 }
 0x5a3   : > { %v13018_v49 = vadd.f32 %v5785_v29, %v5430_v30  ;;  %9602 = vmatmul.msk.f32.gmra.mxu0 %vm354_vm1, %v6685_v39  ;;  %v6686_v30 = vld [vmem:[#allocation3 + $0x32] sm:$0xff]  ;;  %v7090_v29 = vld [vmem:[#allocation3 + $0x48] sm:$0xff] }
 0x5a4   : > { %9652 = vmatmul.msk.f32.gmra.mxu1 %vm354_vm1, %v7089_v6 }
 0x5a5   : > { %v13022_v13 = vpop.f32.mrf.mxu3  ;;  %9527 = vmatmul.msk.f32.gmra.mxu2 %vm354_vm1, %v12653_v59 }
 0x5a8   : > { %v5432_v5 = vpop.f32.mrf.mxu0  ;;  %v6120_v61 = vpop.f32.mrf.mxu2 }
 0x5a9   : > { %v5433_v20 = vadd.f32 %v5432_v5, %v12873_v36  ;;  %v5788_v24 = vpop.f32.mrf.mxu1  ;;  %v13030_v9 = vadd.f32 %v6120_v61, %v12608_v52  ;;  %v13042_v52 = vld [vmem:[#allocation3 + $0x81] sm:$0xff] }
 0x5aa   : > { %9562 = vmatmul.msk.f32.gmra.mxu3 %vm354_vm1, %v13026_v26  ;;  %14627 = vst [vmem:[#allocation6_spill] sm:$0xff] %v13042_v52 }
 0x5ab   : > { %v13034_v39 = vadd.f32 %v5788_v24, %v5433_v20  ;;  %9603 = vmatmul.msk.f32.gmra.mxu0 %vm354_vm1, %v6686_v30  ;;  %v6687_v20 = vld [vmem:[#allocation3 + $0x3a] sm:$0xff]  ;;  %v7091_v24 = vld [vmem:[#allocation3 + $0x50] sm:$0xff] }
 0x5ac   : > { %9653 = vmatmul.msk.f32.gmra.mxu1 %vm354_vm1, %v7090_v29 }
 0x5ad   : > { %v13038_v59 = vpop.f32.mrf.mxu3  ;;  %9528 = vmatmul.msk.f32.gmra.mxu2 %vm354_vm1, %v12669_v63 }
 0x5b0   : > { %v5435_v36 = vpop.f32.mrf.mxu0  ;;  %v6123_v6 = vpop.f32.mrf.mxu2 }
 0x5b1   : > { %v5436_v5 = vadd.f32 %v5435_v36, %v12892_v15  ;;  %v5791_v61 = vpop.f32.mrf.mxu1  ;;  %v13046_v26 = vadd.f32 %v6123_v6, %v12624_v0  ;;  %v13058_v0 = vld [vmem:[#allocation3 + $0x89] sm:$0xff] }
 0x5b2   : > { %9563 = vmatmul.msk.f32.gmra.mxu3 %vm354_vm1, %v13042_v52  ;;  %14628 = vst [vmem:[#allocation37_spill] sm:$0xff] %v13058_v0 }
 0x5b3   : > { %v13050_v30 = vadd.f32 %v5791_v61, %v5436_v5  ;;  %9604 = vmatmul.msk.f32.gmra.mxu0 %vm354_vm1, %v6687_v20  ;;  %v6688_v5 = vld [vmem:[#allocation3 + $0x42] sm:$0xff]  ;;  %v7092_v61 = vld [vmem:[#allocation3 + $0x58] sm:$0xff] }
 0x5b4   : > { %9654 = vmatmul.msk.f32.gmra.mxu1 %vm354_vm1, %v7091_v24 }
 0x5b5   : > { %v13054_v63 = vpop.f32.mrf.mxu3  ;;  %9529 = vmatmul.msk.f32.gmra.mxu2 %vm354_vm1, %v12685_v43 }
 0x5b8   : > { %v5438_v15 = vpop.f32.mrf.mxu0  ;;  %v6126_v29 = vpop.f32.mrf.mxu2 }
 0x5b9   : > { %v5439_v36 = vadd.f32 %v5438_v15, %v12917_v14  ;;  %v5794_v6 = vpop.f32.mrf.mxu1  ;;  %v13062_v52 = vadd.f32 %v6126_v29, %v12640_v42  ;;  %v13074_v42 = vld [vmem:[#allocation3 + $0x91] sm:$0xff] }
 0x5ba   : > { %9564 = vmatmul.msk.f32.gmra.mxu3 %vm354_vm1, %v13058_v0  ;;  %14629 = vst [vmem:[#allocation16_spill] sm:$0xff] %v13074_v42 }
 0x5bb   : > { %v13066_v20 = vadd.f32 %v5794_v6, %v5439_v36  ;;  %9605 = vmatmul.msk.f32.gmra.mxu0 %vm354_vm1, %v6688_v5  ;;  %v6689_v36 = vld [vmem:[#allocation3 + $0x4a] sm:$0xff]  ;;  %v7093_v6 = vld [vmem:[#allocation3 + $0x60] sm:$0xff] }
 0x5bc   : > { %9655 = vmatmul.msk.f32.gmra.mxu1 %vm354_vm1, %v7092_v61 }
 0x5bd   : > { %v13070_v43 = vpop.f32.mrf.mxu3  ;;  %9530 = vmatmul.msk.f32.gmra.mxu2 %vm354_vm1, %v12701_v23 }
 0x5c0   : > { %v5441_v14 = vpop.f32.mrf.mxu0  ;;  %v6129_v24 = vpop.f32.mrf.mxu2 }
 0x5c1   : > { %v5442_v15 = vadd.f32 %v5441_v14, %v12936_v1  ;;  %v5797_v29 = vpop.f32.mrf.mxu1  ;;  %v13078_v0 = vadd.f32 %v6129_v24, %v12656_v16  ;;  %v13090_v16 = vld [vmem:[#allocation3 + $0x99] sm:$0xff] }
 0x5c2   : > { %9565 = vmatmul.msk.f32.gmra.mxu3 %vm354_vm1, %v13074_v42  ;;  %14630 = vst [vmem:[#allocation4_spill] sm:$0xff] %v13090_v16 }
 0x5c3   : > { %v13082_v5 = vadd.f32 %v5797_v29, %v5442_v15  ;;  %9606 = vmatmul.msk.f32.gmra.mxu0 %vm354_vm1, %v6689_v36  ;;  %v6690_v15 = vld [vmem:[#allocation3 + $0x52] sm:$0xff]  ;;  %v7094_v29 = vld [vmem:[#allocation3 + $0x68] sm:$0xff] }
 0x5c4   : > { %9656 = vmatmul.msk.f32.gmra.mxu1 %vm354_vm1, %v7093_v6 }
 0x5c5   : > { %v13086_v23 = vpop.f32.mrf.mxu3  ;;  %9531 = vmatmul.msk.f32.gmra.mxu2 %vm354_vm1, %v12717_v35 }
 0x5c8   : > { %v5444_v1 = vpop.f32.mrf.mxu0  ;;  %v6132_v61 = vpop.f32.mrf.mxu2 }
 0x5c9   : > { %v5445_v14 = vadd.f32 %v5444_v1, %v12955_v47  ;;  %v5800_v24 = vpop.f32.mrf.mxu1  ;;  %v13094_v42 = vadd.f32 %v6132_v61, %v12672_v50  ;;  %v13107_v1 = vld [vmem:[#allocation3 + $0xa1] sm:$0xff] }
 0x5ca   : > { %9566 = vmatmul.msk.f32.gmra.mxu3 %vm354_vm1, %v13090_v16 }
 0x5cb   : > { %v13098_v36 = vadd.f32 %v5800_v24, %v5445_v14  ;;  %9607 = vmatmul.msk.f32.gmra.mxu0 %vm354_vm1, %v6690_v15  ;;  %v6691_v24 = vld [vmem:[#allocation3 + $0x5a] sm:$0xff]  ;;  %v7095_v15 = vld [vmem:[#allocation3 + $0x70] sm:$0xff] }
 0x5cc   : > { %9657 = vmatmul.msk.f32.gmra.mxu1 %vm354_vm1, %v7094_v29 }
 0x5cd   : > { %v6491_v35 = vpop.f32.mrf.mxu3  ;;  %9532 = vmatmul.msk.f32.gmra.mxu2 %vm354_vm1, %v12736_v40 }
 0x5ce   : > { %v13103_v6 = vadd.f32 %v6491_v35, %v12826_v48  ;;  %v13124_v35 = vld [vmem:[#allocation3 + $0xa9] sm:$0xff] }
 0x5d0   : > { %v5447_v50 = vpop.f32.mrf.mxu0  ;;  %v6135_v47 = vpop.f32.mrf.mxu2 }
 0x5d1   : > { %v5448_v61 = vadd.f32 %v5447_v50, %v12974_v2  ;;  %v5803_v16 = vpop.f32.mrf.mxu1  ;;  %v13111_v14 = vadd.f32 %v6135_v47, %v12688_v17 }
 0x5d2   : > { %9567 = vmatmul.msk.f32.gmra.mxu3 %vm354_vm1, %v13107_v1 }
 0x5d3   : > { %v13115_v48 = vadd.f32 %v5803_v16, %v5448_v61  ;;  %9608 = vmatmul.msk.f32.gmra.mxu0 %vm354_vm1, %v6691_v24  ;;  %v6692_v61 = vld [vmem:[#allocation3 + $0x62] sm:$0xff]  ;;  %v7096_v24 = vld [vmem:[#allocation3 + $0x78] sm:$0xff] }
 0x5d4   : > { %9658 = vmatmul.msk.f32.gmra.mxu1 %vm354_vm1, %v7095_v15 }
 0x5d5   : > { %v6494_v40 = vpop.f32.mrf.mxu3  ;;  %9533 = vmatmul.msk.f32.gmra.mxu2 %vm354_vm1, %v12761_v46 }
 0x5d6   : > { %v13120_v29 = vadd.f32 %v6494_v40, %v12844_v27  ;;  %v13141_v40 = vld [vmem:[#allocation3 + $0xb1] sm:$0xff] }
 0x5d8   : > { %v5450_v17 = vpop.f32.mrf.mxu0  ;;  %v6138_v2 = vpop.f32.mrf.mxu2 }
 0x5d9   : > { %v5451_v50 = vadd.f32 %v5450_v17, %v12990_v25  ;;  %v5806_v47 = vpop.f32.mrf.mxu1  ;;  %v13128_v16 = vadd.f32 %v6138_v2, %v12704_v18 }
 0x5da   : > { %9568 = vmatmul.msk.f32.gmra.mxu3 %vm354_vm1, %v13124_v35 }
 0x5db   : > { %v13132_v27 = vadd.f32 %v5806_v47, %v5451_v50  ;;  %9609 = vmatmul.msk.f32.gmra.mxu0 %vm354_vm1, %v6692_v61  ;;  %v6693_v47 = vld [vmem:[#allocation3 + $0x6a] sm:$0xff]  ;;  %v7097_v61 = vld [vmem:[#allocation3 + $0x80] sm:$0xff] }
 0x5dc   : > { %9659 = vmatmul.msk.f32.gmra.mxu1 %vm354_vm1, %v7096_v24 }
 0x5dd   : > { %v6497_v46 = vpop.f32.mrf.mxu3  ;;  %9534 = vmatmul.msk.f32.gmra.mxu2 %vm354_vm1, %v12777_v32 }
 0x5de   : > { %v13137_v15 = vadd.f32 %v6497_v46, %v12862_v10 }
 0x5e0   : > { %v5453_v18 = vpop.f32.mrf.mxu0  ;;  %v6141_v25 = vpop.f32.mrf.mxu2 }
 0x5e1   : > { %v5454_v17 = vadd.f32 %v5453_v18, %v13006_v51  ;;  %v5809_v2 = vpop.f32.mrf.mxu1  ;;  %v13145_v50 = vadd.f32 %v6141_v25, %v12720_v55  ;;  %v9698_v55 = vld [vmem:[%s14232_s4 + $0x100] sm:$0xff]  ;;  %v13161_v18 = vld [vmem:[#allocation3 + $0xb9] sm:$0xff] }
 0x5e2   : > { %9569 = vmatmul.msk.f32.gmra.mxu3 %vm354_vm1, %v13141_v40  ;;  %7701 = vmatpush.msra.mxu2 %v9698_v55 }
 0x5e3   : > { %v13149_v10 = vadd.f32 %v5809_v2, %v5454_v17  ;;  %9610 = vmatmul.msk.f32.gmra.mxu0 %vm354_vm1, %v6693_v47 }
 0x5e4   : > { %9660 = vmatmul.msk.f32.gmra.mxu1 %vm354_vm1, %v7097_v61  ;;  %v9748_v61 = vld [vmem:[%s14232_s4 + $0x110] sm:$0xff] }
 0x5e5   : > { %v6500_v32 = vpop.f32.mrf.mxu3  ;;  %9535 = vmatmul.msk.f32.gmra.mxu2 %vm354_vm1, %v12793_v38  ;;  %v7098_v38 = vld [vmem:[#allocation3 + $0x88] sm:$0xff]  ;;  %8105 = vmatpush.msra.mxu3 %v9748_v61 }
 0x5e6   : > { %v13154_v24 = vadd.f32 %v6500_v32, %v12881_v19  ;;  %v6694_v19 = vld [vmem:[#allocation3 + $0x72] sm:$0xff] }
 0x5e8   : > { %v5456_v51 = vpop.f32.mrf.mxu0  ;;  %v6144_v46 = vpop.f32.mrf.mxu2 }
 0x5e9   : > { %v5457_v25 = vadd.f32 %v5456_v51, %v13022_v13  ;;  %v5812_v17 = vpop.f32.mrf.mxu1  ;;  %v13165_v2 = vadd.f32 %v6144_v46, %v12739_v62  ;;  %v13181_v51 = vld [vmem:[#allocation3 + $0xc1] sm:$0xff] }
 0x5ea   : > { %9570 = vmatmul.msk.f32.gmra.mxu3 %vm354_vm1, %v13161_v18 }
 0x5eb   : > { %v13169_v47 = vadd.f32 %v5812_v17, %v5457_v25  ;;  %9611 = vmatmul.msk.f32.gmra.mxu0 %vm354_vm1, %v6694_v19  ;;  %v6695_v19 = vld [vmem:[#allocation3 + $0x7a] sm:$0xff] }
 0x5ec   : > { %9661 = vmatmul.msk.f32.gmra.mxu1 %vm354_vm1, %v7098_v38  ;;  %v7099_v38 = vld [vmem:[#allocation3 + $0x90] sm:$0xff] }
 0x5ed   : > { %v6503_v13 = vpop.f32.mrf.mxu3  ;;  %9536 = vmatmul.msk.f32.gmra.mxu2 %vm354_vm1, %v12809_v58 }
 0x5ee   : > { %v13177_v62 = vadd.f32 %v6503_v13, %v12900_v34  ;;  %v13198_v13 = vld [vmem:[#allocation3 + $0xc9] sm:$0xff] }
 0x5f0   : > { %v5459_v32 = vpop.f32.mrf.mxu0  ;;  %v6147_v55 = vpop.f32.mrf.mxu2 }
 0x5f1   : > { %v5460_v46 = vadd.f32 %v5459_v32, %v13038_v59  ;;  %v5815_v25 = vpop.f32.mrf.mxu1  ;;  %v13185_v17 = vadd.f32 %v6147_v55, %v12764_v41 }
 0x5f2   : > { %9571 = vmatmul.msk.f32.gmra.mxu3 %vm354_vm1, %v13181_v51 }
 0x5f3   : > { %v13189_v34 = vadd.f32 %v5815_v25, %v5460_v46  ;;  %9612 = vmatmul.msk.f32.gmra.mxu0 %vm354_vm1, %v6695_v19  ;;  %v6696_v25 = vld [vmem:[#allocation3 + $0x82] sm:$0xff]  ;;  %v7100_v19 = vld [vmem:[#allocation3 + $0x98] sm:$0xff] }
 0x5f4   : > { %9662 = vmatmul.msk.f32.gmra.mxu1 %vm354_vm1, %v7099_v38 }
 0x5f5   : > { %v6506_v58 = vpop.f32.mrf.mxu3  ;;  %9537 = vmatmul.msk.f32.gmra.mxu2 %vm354_vm1, %v12829_v45 }
 0x5f6   : > { %v13194_v61 = vadd.f32 %v6506_v58, %v12925_v8  ;;  %v13215_v58 = vld [vmem:[#allocation3 + $0xd1] sm:$0xff] }
 0x5f8   : > { %v5462_v41 = vpop.f32.mrf.mxu0  ;;  %v6150_v59 = vpop.f32.mrf.mxu2 }
 0x5f9   : > { %v5463_v32 = vadd.f32 %v5462_v41, %v13054_v63  ;;  %v5818_v55 = vpop.f32.mrf.mxu1  ;;  %v13202_v46 = vadd.f32 %v6150_v59, %v12780_v22 }
 0x5fa   : > { %9572 = vmatmul.msk.f32.gmra.mxu3 %vm354_vm1, %v13198_v13 }
 0x5fb   : > { %v13206_v8 = vadd.f32 %v5818_v55, %v5463_v32  ;;  %9613 = vmatmul.msk.f32.gmra.mxu0 %vm354_vm1, %v6696_v25  ;;  %v6697_v55 = vld [vmem:[#allocation3 + $0x8a] sm:$0xff]  ;;  %v7101_v25 = vld [vmem:[#allocation3 + $0xa0] sm:$0xff] }
 0x5fc   : > { %9663 = vmatmul.msk.f32.gmra.mxu1 %vm354_vm1, %v7100_v19 }
 0x5fd   : > { %v6509_v45 = vpop.f32.mrf.mxu3  ;;  %9538 = vmatmul.msk.f32.gmra.mxu2 %vm354_vm1, %v12847_v11 }
 0x5fe   : > { %v13211_v38 = vadd.f32 %v6509_v45, %v12944_v7  ;;  %v13232_v45 = vld [vmem:[#allocation3 + $0xd9] sm:$0xff] }
 0x600   : > { %v5465_v22 = vpop.f32.mrf.mxu0  ;;  %v6153_v63 = vpop.f32.mrf.mxu2 }
 0x601   : > { %v5466_v41 = vadd.f32 %v5465_v22, %v13070_v43  ;;  %v5821_v59 = vpop.f32.mrf.mxu1  ;;  %v13219_v32 = vadd.f32 %v6153_v63, %v12796_v44 }
 0x602   : > { %9573 = vmatmul.msk.f32.gmra.mxu3 %vm354_vm1, %v13215_v58 }
 0x603   : > { %v13223_v7 = vadd.f32 %v5821_v59, %v5466_v41  ;;  %9614 = vmatmul.msk.f32.gmra.mxu0 %vm354_vm1, %v6697_v55  ;;  %v6698_v59 = vld [vmem:[#allocation3 + $0x92] sm:$0xff]  ;;  %v7102_v55 = vld [vmem:[#allocation3 + $0xa8] sm:$0xff] }
 0x604   : > { %9664 = vmatmul.msk.f32.gmra.mxu1 %vm354_vm1, %v7101_v25 }
 0x605   : > { %v6512_v11 = vpop.f32.mrf.mxu3  ;;  %9539 = vmatmul.msk.f32.gmra.mxu2 %vm354_vm1, %v12866_v3 }
 0x606   : > { %v13228_v19 = vadd.f32 %v6512_v11, %v12963_v54  ;;  %v13249_v11 = vld [vmem:[#allocation3 + $0xe1] sm:$0xff] }
 0x608   : > { %v5468_v44 = vpop.f32.mrf.mxu0  ;;  %v6156_v43 = vpop.f32.mrf.mxu2 }
 0x609   : > { %v5469_v22 = vadd.f32 %v5468_v44, %v13086_v23  ;;  %v5824_v63 = vpop.f32.mrf.mxu1  ;;  %v13236_v41 = vadd.f32 %v6156_v43, %v12814_v60 }
 0x60a   : > { %9574 = vmatmul.msk.f32.gmra.mxu3 %vm354_vm1, %v13232_v45 }
 0x60b   : > { %v13240_v54 = vadd.f32 %v5824_v63, %v5469_v22  ;;  %9615 = vmatmul.msk.f32.gmra.mxu0 %vm354_vm1, %v6698_v59  ;;  %v6699_v63 = vld [vmem:[#allocation3 + $0x9a] sm:$0xff]  ;;  %v7103_v59 = vld [vmem:[#allocation3 + $0xb0] sm:$0xff] }
 0x60c   : > { %9665 = vmatmul.msk.f32.gmra.mxu1 %vm354_vm1, %v7102_v55 }
 0x60d   : > { %v6515_v3 = vpop.f32.mrf.mxu3  ;;  %9540 = vmatmul.msk.f32.gmra.mxu2 %vm354_vm1, %v12885_v37 }
 0x60e   : > { %v13245_v25 = vadd.f32 %v6515_v3, %v12982_v21  ;;  %v13266_v3 = vld [vmem:[#allocation3 + $0xe9] sm:$0xff] }
 0x60f   : > { %14632 = vst [vmem:[#allocation34_spill] sm:$0xff] %v13266_v3 }
 0x610   : > { %v6159_v60 = vpop.f32.mrf.mxu2  ;;  %v6895_v23 = vpop.f32.mrf.mxu0 }
 0x611   : > { %v13252_v44 = vadd.f32 %v6159_v60, %v12833_v56  ;;  %v7039_v43 = vadd.f32 %v6895_v23, %v13103_v6  ;;  %v7299_v22 = vpop.f32.mrf.mxu1  ;;  %v14633_v60 = vld [vmem:[#allocation79_spill] sm:$0xff] }
 0x612   : > { %9575 = vmatmul.msk.f32.gmra.mxu3 %vm354_vm1, %v13249_v11 }
 0x613   : > { %v13257_v21 = vadd.f32 %v7299_v22, %v7039_v43  ;;  %9616 = vmatmul.msk.f32.gmra.mxu0 %vm354_vm1, %v6699_v63  ;;  %v6700_v63 = vld [vmem:[#allocation3 + $0xa2] sm:$0xff] }
 0x614   : > { %9666 = vmatmul.msk.f32.gmra.mxu1 %vm354_vm1, %v7103_v59  ;;  %v7104_v59 = vld [vmem:[#allocation3 + $0xb8] sm:$0xff] }
 0x615   : > { %14631 = vst [vmem:[#allocation5_spill] sm:$0xff] %v13257_v21  ;;  %v6518_v37 = vpop.f32.mrf.mxu3  ;;  %9541 = vmatmul.msk.f32.gmra.mxu2 %vm354_vm1, %v12904_v53 }
 0x616   : > { %v13262_v55 = vadd.f32 %v6518_v37, %v12998_v12 }
 0x618   : > { %v6162_v56 = vpop.f32.mrf.mxu2  ;;  %v6898_v6 = vpop.f32.mrf.mxu0 }
 0x619   : > { %v13269_v23 = vadd.f32 %v6162_v56, %v14633_v60  ;;  %v7040_v43 = vadd.f32 %v6898_v6, %v13120_v29  ;;  %v7302_v22 = vpop.f32.mrf.mxu1  ;;  %v13283_v6 = vld [vmem:[#allocation3 + $0xf1] sm:$0xff]  ;;  %v14636_v60 = vld [vmem:[#allocation85_spill] sm:$0xff] }
 0x61a   : > { %9576 = vmatmul.msk.f32.gmra.mxu3 %vm354_vm1, %v13266_v3  ;;  %14635 = vst [vmem:[#allocation39_spill] sm:$0xff] %v13283_v6 }
 0x61b   : > { %v13274_v12 = vadd.f32 %v7302_v22, %v7040_v43  ;;  %9617 = vmatmul.msk.f32.gmra.mxu0 %vm354_vm1, %v6700_v63  ;;  %v6701_v63 = vld [vmem:[#allocation3 + $0xaa] sm:$0xff] }
 0x61c   : > { %9667 = vmatmul.msk.f32.gmra.mxu1 %vm354_vm1, %v7104_v59  ;;  %v7105_v59 = vld [vmem:[#allocation3 + $0xc0] sm:$0xff] }
 0x61d   : > { %14634 = vst [vmem:[#allocation40_spill] sm:$0xff] %v13274_v12  ;;  %v6521_v53 = vpop.f32.mrf.mxu3  ;;  %9542 = vmatmul.msk.f32.gmra.mxu2 %vm354_vm1, %v12929_v28 }
 0x61e   : > { %v13279_v37 = vadd.f32 %v6521_v53, %v13014_v31 }
 0x620   : > { %v6165_v29 = vpop.f32.mrf.mxu2  ;;  %v6901_v56 = vpop.f32.mrf.mxu0 }
 0x621   : > { %v13286_v21 = vadd.f32 %v6165_v29, %v14636_v60  ;;  %v7041_v43 = vadd.f32 %v6901_v56, %v13137_v15  ;;  %v7305_v22 = vpop.f32.mrf.mxu1  ;;  %v13300_v56 = vld [vmem:[#allocation3 + $0xf9] sm:$0xff]  ;;  %v14639_v60 = vld [vmem:[#allocation11_spill] sm:$0xff] }
 0x622   : > { %9577 = vmatmul.msk.f32.gmra.mxu3 %vm354_vm1, %v13283_v6  ;;  %14638 = vst [vmem:[#allocation38_spill] sm:$0xff] %v13300_v56  ;;  %v13367_v6 = vld [vmem:[#allocation3 + $0x190] sm:$0xff] }
 0x623   : > { %v13291_v31 = vadd.f32 %v7305_v22, %v7041_v43  ;;  %9618 = vmatmul.msk.f32.gmra.mxu0 %vm354_vm1, %v6701_v63  ;;  %v6702_v63 = vld [vmem:[#allocation3 + $0xb2] sm:$0xff] }
 0x624   : > { %9668 = vmatmul.msk.f32.gmra.mxu1 %vm354_vm1, %v7105_v59  ;;  %v7106_v59 = vld [vmem:[#allocation3 + $0xc8] sm:$0xff] }
 0x625   : > { %14637 = vst [vmem:[#allocation33_spill] sm:$0xff] %v13291_v31  ;;  %v6524_v28 = vpop.f32.mrf.mxu3  ;;  %9543 = vmatmul.msk.f32.gmra.mxu2 %vm354_vm1, %v12948_v57  ;;  %v14643_v31 = vld [vmem:[#allocation82_spill] sm:$0xff] }
 0x626   : > { %v13296_v53 = vadd.f32 %v6524_v28, %v13030_v9 }
 0x628   : > { %v6168_v15 = vpop.f32.mrf.mxu2  ;;  %v6904_v29 = vpop.f32.mrf.mxu0 }
 0x629   : > { %v13303_v12 = vadd.f32 %v6168_v15, %v14639_v60  ;;  %v7042_v43 = vadd.f32 %v6904_v29, %v13154_v24  ;;  %v7308_v22 = vpop.f32.mrf.mxu1  ;;  %v14641_v15 = vld [vmem:[#allocation83_spill] sm:$0xff]  ;;  %v13317_v60 = vld [vmem:[#allocation3 + $0x101] sm:$0xff] }
 0x62a   : > { %9578 = vmatmul.msk.f32.gmra.mxu3 %vm354_vm1, %v13300_v56  ;;  %14642 = vst [vmem:[#allocation19_spill] sm:$0xff] %v13317_v60 }
 0x62b   : > { %v13308_v9 = vadd.f32 %v7308_v22, %v7042_v43  ;;  %9619 = vmatmul.msk.f32.gmra.mxu0 %vm354_vm1, %v6702_v63  ;;  %v6703_v63 = vld [vmem:[#allocation3 + $0xba] sm:$0xff] }
 0x62c   : > { %9669 = vmatmul.msk.f32.gmra.mxu1 %vm354_vm1, %v7106_v59  ;;  %v7107_v59 = vld [vmem:[#allocation3 + $0xd0] sm:$0xff] }
 0x62d   : > { %14640 = vst [vmem:[#allocation44_spill] sm:$0xff] %v13308_v9  ;;  %v6527_v57 = vpop.f32.mrf.mxu3  ;;  %9544 = vmatmul.msk.f32.gmra.mxu2 %vm354_vm1, %v14641_v15  ;;  %v13329_v15 = vld [vmem:[#allocation3 + $0x180] sm:$0xff]  ;;  %v14646_v9 = vld [vmem:[#allocation30_spill] sm:$0xff] }
 0x62e   : > { %v13313_v28 = vadd.f32 %v6527_v57, %v13046_v26 }
 0x630   : > { %v6171_v24 = vpop.f32.mrf.mxu2  ;;  %v6907_v29 = vpop.f32.mrf.mxu0 }
 0x631   : > { %v13320_v56 = vadd.f32 %v6171_v24, %v14643_v31  ;;  %v7043_v43 = vadd.f32 %v6907_v29, %v13177_v62  ;;  %v7311_v22 = vpop.f32.mrf.mxu1  ;;  %v13336_v29 = vld [vmem:[#allocation3 + $0x109] sm:$0xff] }
 0x632   : > { %9579 = vmatmul.msk.f32.gmra.mxu3 %vm354_vm1, %v13317_v60  ;;  %14645 = vst [vmem:[#allocation36_spill] sm:$0xff] %v13336_v29  ;;  %v13348_v60 = vld [vmem:[#allocation3 + $0x188] sm:$0xff] }
 0x633   : > { %v13325_v26 = vadd.f32 %v7311_v22, %v7043_v43  ;;  %9620 = vmatmul.msk.f32.gmra.mxu0 %vm354_vm1, %v6703_v63 }
 0x634   : > { %9670 = vmatmul.msk.f32.gmra.mxu1 %vm354_vm1, %v7107_v59  ;;  %v6704_v59 = vld [vmem:[#allocation3 + $0xc2] sm:$0xff] }
 0x635   : > { %14644 = vst [vmem:[#allocation55_spill] sm:$0xff] %v13325_v26  ;;  %v6530_v57 = vpop.f32.mrf.mxu3  ;;  %9545 = vmatmul.msk.f32.gmra.mxu2 %vm354_vm1, %v13329_v15  ;;  %v7108_v26 = vld [vmem:[#allocation3 + $0xd8] sm:$0xff] }
 0x636   : > { %v13332_v31 = vadd.f32 %v6530_v57, %v13062_v52 }
 0x638   : > { %v6174_v62 = vpop.f32.mrf.mxu2  ;;  %v6910_v24 = vpop.f32.mrf.mxu0 }
 0x639   : > { %v13339_v43 = vadd.f32 %v6174_v62, %v14646_v9  ;;  %v7044_v22 = vadd.f32 %v6910_v24, %v13194_v61  ;;  %v7314_v63 = vpop.f32.mrf.mxu1  ;;  %v13355_v24 = vld [vmem:[#allocation3 + $0x111] sm:$0xff] }
 0x63a   : > { %9580 = vmatmul.msk.f32.gmra.mxu3 %vm354_vm1, %v13336_v29  ;;  %14648 = vst [vmem:[#allocation42_spill] sm:$0xff] %v13355_v24  ;;  %v14649_v29 = vld [vmem:[#allocation46_spill] sm:$0xff] }
 0x63b   : > { %v13344_v52 = vadd.f32 %v7314_v63, %v7044_v22  ;;  %9621 = vmatmul.msk.f32.gmra.mxu0 %vm354_vm1, %v6704_v59 }
 0x63c   : > { %9671 = vmatmul.msk.f32.gmra.mxu1 %vm354_vm1, %v7108_v26  ;;  %v6705_v26 = vld [vmem:[#allocation3 + $0xca] sm:$0xff] }
 0x63d   : > { %14647 = vst [vmem:[#allocation43_spill] sm:$0xff] %v13344_v52  ;;  %v6533_v57 = vpop.f32.mrf.mxu3  ;;  %9546 = vmatmul.msk.f32.gmra.mxu2 %vm354_vm1, %v13348_v60  ;;  %v7109_v52 = vld [vmem:[#allocation3 + $0xe0] sm:$0xff] }
 0x63e   : > { %v13351_v9 = vadd.f32 %v6533_v57, %v13078_v0 }
 0x640   : > { %v6177_v61 = vpop.f32.mrf.mxu2  ;;  %v6913_v62 = vpop.f32.mrf.mxu0 }
 0x641   : > { %v13358_v22 = vadd.f32 %v6177_v61, %v14649_v29  ;;  %v7045_v63 = vadd.f32 %v6913_v62, %v13211_v38  ;;  %v7317_v59 = vpop.f32.mrf.mxu1  ;;  %v13374_v62 = vld [vmem:[#allocation3 + $0x119] sm:$0xff] }
 0x642   : > { %9581 = vmatmul.msk.f32.gmra.mxu3 %vm354_vm1, %v13355_v24  ;;  %14651 = vst [vmem:[#allocation48_spill] sm:$0xff] %v13374_v62  ;;  %v14652_v24 = vld [vmem:[#allocation84_spill] sm:$0xff] }
 0x643   : > { %v13363_v0 = vadd.f32 %v7317_v59, %v7045_v63  ;;  %9622 = vmatmul.msk.f32.gmra.mxu0 %vm354_vm1, %v6705_v26 }
 0x644   : > { %9672 = vmatmul.msk.f32.gmra.mxu1 %vm354_vm1, %v7109_v52  ;;  %v6706_v52 = vld [vmem:[#allocation3 + $0xd2] sm:$0xff] }
 0x645   : > { %14650 = vst [vmem:[#allocation56_spill] sm:$0xff] %v13363_v0  ;;  %v6536_v57 = vpop.f32.mrf.mxu3  ;;  %9547 = vmatmul.msk.f32.gmra.mxu2 %vm354_vm1, %v13367_v6  ;;  %v7110_v0 = vld [vmem:[#allocation3 + $0xe8] sm:$0xff] }
 0x646   : > { %v13370_v29 = vadd.f32 %v6536_v57, %v13094_v42 }
 0x648   : > { %v6180_v38 = vpop.f32.mrf.mxu2  ;;  %v6916_v61 = vpop.f32.mrf.mxu0 }
 0x649   : > { %v13377_v63 = vadd.f32 %v6180_v38, %v14652_v24  ;;  %v7046_v59 = vadd.f32 %v6916_v61, %v13228_v19  ;;  %v7320_v26 = vpop.f32.mrf.mxu1  ;;  %v14654_v24 = vld [vmem:[#allocation80_spill] sm:$0xff]  ;;  %v13391_v61 = vld [vmem:[#allocation3 + $0x121] sm:$0xff] }
 0x64a   : > { %9582 = vmatmul.msk.f32.gmra.mxu3 %vm354_vm1, %v13374_v62 }
 0x64b   : > { %v13382_v42 = vadd.f32 %v7320_v26, %v7046_v59  ;;  %9623 = vmatmul.msk.f32.gmra.mxu0 %vm354_vm1, %v6706_v52  ;;  %v7111_v52 = vld [vmem:[#allocation3 + $0xf0] sm:$0xff] }
 0x64c   : > { %9673 = vmatmul.msk.f32.gmra.mxu1 %vm354_vm1, %v7110_v0  ;;  %v6707_v0 = vld [vmem:[#allocation3 + $0xda] sm:$0xff] }
 0x64d   : > { %14653 = vst [vmem:[#allocation57_spill] sm:$0xff] %v13382_v42  ;;  %v6539_v57 = vpop.f32.mrf.mxu3  ;;  %9700 = vmatmul.msk.f32.vlgmr.msra.gmra.mxu2 %vm354_vm1, %v14654_v24 }
 0x64e   : > { %v13387_v3 = vadd.f32 %v6539_v57, %v13111_v14 }
 0x650   : > { %v6183_v19 = vpop.f32.mrf.mxu2  ;;  %v6919_v38 = vpop.f32.mrf.mxu0 }
 0x651   : > { %v13394_v62 = vadd.f32 %v6183_v19, %v12986_v4  ;;  %v7047_v59 = vadd.f32 %v6919_v38, %v13245_v25  ;;  %v7323_v26 = vpop.f32.mrf.mxu1  ;;  %v14656_v4 = vld [vmem:[#allocation35_spill] sm:$0xff] }
 0x652   : > { %9583 = vmatmul.msk.f32.gmra.mxu3 %vm354_vm1, %v13391_v61  ;;  %v13408_v38 = vld [vmem:[#allocation3 + $0x129] sm:$0xff] }
 0x653   : > { %v13399_v14 = vadd.f32 %v7323_v26, %v7047_v59  ;;  %9624 = vmatmul.msk.f32.gmra.mxu0 %vm354_vm1, %v6707_v0  ;;  %v6708_v0 = vld [vmem:[#allocation3 + $0xe2] sm:$0xff] }
 0x654   : > { %9674 = vmatmul.msk.f32.gmra.mxu1 %vm354_vm1, %v7111_v52  ;;  %v7112_v52 = vld [vmem:[#allocation3 + $0xf8] sm:$0xff] }
 0x655   : > { %14655 = vst [vmem:[#allocation8_spill] sm:$0xff] %v13399_v14  ;;  %v6542_v57 = vpop.f32.mrf.mxu3  ;;  %9701 = vmatmul.msk.f32.gmra.mxu2 %vm354_vm1, %v14656_v4 }
 0x656   : > { %v13404_v24 = vadd.f32 %v6542_v57, %v13128_v16 }
 0x658   : > { %v6186_v25 = vpop.f32.mrf.mxu2  ;;  %v6922_v19 = vpop.f32.mrf.mxu0 }
 0x659   : > { %v13411_v42 = vadd.f32 %v6186_v25, %v13002_v33  ;;  %v7048_v59 = vadd.f32 %v6922_v19, %v13262_v55  ;;  %v7326_v26 = vpop.f32.mrf.mxu1  ;;  %v14658_v33 = vld [vmem:[#allocation81_spill] sm:$0xff]  ;;  %v13425_v19 = vld [vmem:[#allocation3 + $0x131] sm:$0xff] }
 0x65a   : > { %9584 = vmatmul.msk.f32.gmra.mxu3 %vm354_vm1, %v13408_v38 }
 0x65b   : > { %v13416_v16 = vadd.f32 %v7326_v26, %v7048_v59  ;;  %9625 = vmatmul.msk.f32.gmra.mxu0 %vm354_vm1, %v6708_v0  ;;  %v6709_v0 = vld [vmem:[#allocation3 + $0xea] sm:$0xff] }
 0x65c   : > { %9675 = vmatmul.msk.f32.gmra.mxu1 %vm354_vm1, %v7112_v52  ;;  %v7113_v52 = vld [vmem:[#allocation3 + $0x100] sm:$0xff] }
 0x65d   : > { %14657 = vst [vmem:[#allocation9_spill] sm:$0xff] %v13416_v16  ;;  %v6545_v57 = vpop.f32.mrf.mxu3  ;;  %9702 = vmatmul.msk.f32.gmra.mxu2 %vm354_vm1, %v14658_v33 }
 0x65e   : > { %v13421_v4 = vadd.f32 %v6545_v57, %v13145_v50 }
 0x660   : > { %v6189_v55 = vpop.f32.mrf.mxu2  ;;  %v6925_v25 = vpop.f32.mrf.mxu0 }
 0x661   : > { %v13428_v14 = vadd.f32 %v6189_v55, %v13018_v49  ;;  %v7049_v59 = vadd.f32 %v6925_v25, %v13279_v37  ;;  %v7329_v26 = vpop.f32.mrf.mxu1  ;;  %v14660_v49 = vld [vmem:[#allocation86_spill] sm:$0xff]  ;;  %v13442_v25 = vld [vmem:[#allocation3 + $0x139] sm:$0xff] }
 0x662   : > { %9585 = vmatmul.msk.f32.gmra.mxu3 %vm354_vm1, %v13425_v19 }
 0x663   : > { %v13433_v50 = vadd.f32 %v7329_v26, %v7049_v59  ;;  %9626 = vmatmul.msk.f32.gmra.mxu0 %vm354_vm1, %v6709_v0  ;;  %v6710_v0 = vld [vmem:[#allocation3 + $0xf2] sm:$0xff] }
 0x664   : > { %9676 = vmatmul.msk.f32.gmra.mxu1 %vm354_vm1, %v7113_v52  ;;  %v7114_v52 = vld [vmem:[#allocation3 + $0x108] sm:$0xff] }
 0x665   : > { %14659 = vst [vmem:[#allocation45_spill] sm:$0xff] %v13433_v50  ;;  %v6548_v57 = vpop.f32.mrf.mxu3  ;;  %9703 = vmatmul.msk.f32.gmra.mxu2 %vm354_vm1, %v14660_v49 }
 0x666   : > { %v13438_v33 = vadd.f32 %v6548_v57, %v13165_v2 }
 0x668   : > { %v6192_v37 = vpop.f32.mrf.mxu2  ;;  %v6928_v55 = vpop.f32.mrf.mxu0 }
 0x669   : > { %v13445_v16 = vadd.f32 %v6192_v37, %v13034_v39  ;;  %v7050_v59 = vadd.f32 %v6928_v55, %v13296_v53  ;;  %v7332_v26 = vpop.f32.mrf.mxu1  ;;  %v14662_v39 = vld [vmem:[#allocation32_spill] sm:$0xff]  ;;  %v13459_v55 = vld [vmem:[#allocation3 + $0x141] sm:$0xff] }
 0x66a   : > { %9586 = vmatmul.msk.f32.gmra.mxu3 %vm354_vm1, %v13442_v25 }
 0x66b   : > { %v13450_v2 = vadd.f32 %v7332_v26, %v7050_v59  ;;  %9627 = vmatmul.msk.f32.gmra.mxu0 %vm354_vm1, %v6710_v0  ;;  %v6711_v0 = vld [vmem:[#allocation3 + $0xfa] sm:$0xff] }
 0x66c   : > { %9677 = vmatmul.msk.f32.gmra.mxu1 %vm354_vm1, %v7114_v52  ;;  %v7115_v52 = vld [vmem:[#allocation3 + $0x110] sm:$0xff] }
 0x66d   : > { %14661 = vst [vmem:[#allocation41_spill] sm:$0xff] %v13450_v2  ;;  %v6551_v57 = vpop.f32.mrf.mxu3  ;;  %9704 = vmatmul.msk.f32.gmra.mxu2 %vm354_vm1, %v14662_v39 }
 0x66e   : > { %v13455_v49 = vadd.f32 %v6551_v57, %v13185_v17 }
 0x670   : > { %v6195_v53 = vpop.f32.mrf.mxu2  ;;  %v6931_v37 = vpop.f32.mrf.mxu0 }
 0x671   : > { %v13462_v50 = vadd.f32 %v6195_v53, %v13050_v30  ;;  %v7051_v59 = vadd.f32 %v6931_v37, %v13313_v28  ;;  %v7335_v26 = vpop.f32.mrf.mxu1  ;;  %v14664_v30 = vld [vmem:[#allocation47_spill] sm:$0xff] }
 0x672   : > { %9587 = vmatmul.msk.f32.gmra.mxu3 %vm354_vm1, %v13459_v55  ;;  %v13476_v37 = vld [vmem:[#allocation3 + $0x149] sm:$0xff] }
 0x673   : > { %v13467_v17 = vadd.f32 %v7335_v26, %v7051_v59  ;;  %9628 = vmatmul.msk.f32.gmra.mxu0 %vm354_vm1, %v6711_v0  ;;  %v6712_v0 = vld [vmem:[#allocation3 + $0x102] sm:$0xff] }
 0x674   : > { %9678 = vmatmul.msk.f32.gmra.mxu1 %vm354_vm1, %v7115_v52  ;;  %v7116_v52 = vld [vmem:[#allocation3 + $0x118] sm:$0xff] }
 0x675   : > { %14663 = vst [vmem:[#allocation10_spill] sm:$0xff] %v13467_v17  ;;  %v6554_v57 = vpop.f32.mrf.mxu3  ;;  %9705 = vmatmul.msk.f32.gmra.mxu2 %vm354_vm1, %v14664_v30 }
 0x676   : > { %v13472_v39 = vadd.f32 %v6554_v57, %v13202_v46 }
 0x678   : > { %v6198_v28 = vpop.f32.mrf.mxu2  ;;  %v6934_v53 = vpop.f32.mrf.mxu0 }
 0x679   : > { %v13479_v2 = vadd.f32 %v6198_v28, %v13066_v20  ;;  %v7052_v59 = vadd.f32 %v6934_v53, %v13332_v31  ;;  %v7338_v26 = vpop.f32.mrf.mxu1  ;;  %v14666_v20 = vld [vmem:[#allocation31_spill] sm:$0xff] }
 0x67a   : > { %9588 = vmatmul.msk.f32.gmra.mxu3 %vm354_vm1, %v13476_v37  ;;  %v13493_v53 = vld [vmem:[#allocation3 + $0x151] sm:$0xff] }
 0x67b   : > { %v13484_v46 = vadd.f32 %v7338_v26, %v7052_v59  ;;  %9629 = vmatmul.msk.f32.gmra.mxu0 %vm354_vm1, %v6712_v0  ;;  %v6713_v0 = vld [vmem:[#allocation3 + $0x10a] sm:$0xff] }
 0x67c   : > { %9679 = vmatmul.msk.f32.gmra.mxu1 %vm354_vm1, %v7116_v52  ;;  %v7117_v52 = vld [vmem:[#allocation3 + $0x120] sm:$0xff] }
 0x67d   : > { %14665 = vst [vmem:[#allocation49_spill] sm:$0xff] %v13484_v46  ;;  %v6557_v57 = vpop.f32.mrf.mxu3  ;;  %9706 = vmatmul.msk.f32.gmra.mxu2 %vm354_vm1, %v14666_v20 }
 0x67e   : > { %v13489_v30 = vadd.f32 %v6557_v57, %v13219_v32 }
 0x680   : > { %v6201_v31 = vpop.f32.mrf.mxu2  ;;  %v6937_v28 = vpop.f32.mrf.mxu0 }
 0x681   : > { %v13496_v17 = vadd.f32 %v6201_v31, %v13082_v5  ;;  %v7053_v59 = vadd.f32 %v6937_v28, %v13351_v9  ;;  %v7341_v26 = vpop.f32.mrf.mxu1  ;;  %v14668_v5 = vld [vmem:[#allocation7_spill] sm:$0xff]  ;;  %v13510_v28 = vld [vmem:[#allocation3 + $0x159] sm:$0xff] }
 0x682   : > { %9589 = vmatmul.msk.f32.gmra.mxu3 %vm354_vm1, %v13493_v53 }
 0x683   : > { %v13501_v32 = vadd.f32 %v7341_v26, %v7053_v59  ;;  %9630 = vmatmul.msk.f32.gmra.mxu0 %vm354_vm1, %v6713_v0  ;;  %v6714_v0 = vld [vmem:[#allocation3 + $0x112] sm:$0xff] }
 0x684   : > { %9680 = vmatmul.msk.f32.gmra.mxu1 %vm354_vm1, %v7117_v52  ;;  %v7118_v52 = vld [vmem:[#allocation3 + $0x128] sm:$0xff] }
 0x685   : > { %14667 = vst [vmem:[#allocation12_spill] sm:$0xff] %v13501_v32  ;;  %v6560_v57 = vpop.f32.mrf.mxu3  ;;  %9707 = vmatmul.msk.f32.gmra.mxu2 %vm354_vm1, %v14668_v5 }
 0x686   : > { %v13506_v20 = vadd.f32 %v6560_v57, %v13236_v41 }
 0x688   : > { %v6204_v9 = vpop.f32.mrf.mxu2  ;;  %v6940_v31 = vpop.f32.mrf.mxu0 }
 0x689   : > { %v13513_v46 = vadd.f32 %v6204_v9, %v13098_v36  ;;  %v7054_v59 = vadd.f32 %v6940_v31, %v13370_v29  ;;  %v7344_v26 = vpop.f32.mrf.mxu1  ;;  %v14670_v36 = vld [vmem:[#allocation87_spill] sm:$0xff]  ;;  %v13527_v31 = vld [vmem:[#allocation3 + $0x161] sm:$0xff] }
 0x68a   : > { %9590 = vmatmul.msk.f32.gmra.mxu3 %vm354_vm1, %v13510_v28 }
 0x68b   : > { %v13518_v41 = vadd.f32 %v7344_v26, %v7054_v59  ;;  %9631 = vmatmul.msk.f32.gmra.mxu0 %vm354_vm1, %v6714_v0  ;;  %v6715_v0 = vld [vmem:[#allocation3 + $0x11a] sm:$0xff] }
 0x68c   : > { %9681 = vmatmul.msk.f32.gmra.mxu1 %vm354_vm1, %v7118_v52  ;;  %v7119_v52 = vld [vmem:[#allocation3 + $0x130] sm:$0xff] }
 0x68d   : > { %v6563_v57 = vpop.f32.mrf.mxu3  ;;  %9708 = vmatmul.msk.f32.gmra.mxu2 %vm354_vm1, %v14670_v36 }
 0x68e   : > { %v13523_v5 = vadd.f32 %v6563_v57, %v13252_v44 }
 0x690   : > { %14669 = vst [vmem:[#allocation13_spill] sm:$0xff] %v13523_v5  ;;  %v6207_v29 = vpop.f32.mrf.mxu2  ;;  %v6943_v9 = vpop.f32.mrf.mxu0 }
 0x691   : > { %v13530_v32 = vadd.f32 %v6207_v29, %v13115_v48  ;;  %v7055_v59 = vadd.f32 %v6943_v9, %v13387_v3  ;;  %v7347_v26 = vpop.f32.mrf.mxu1  ;;  %v14672_v48 = vld [vmem:[#allocation88_spill] sm:$0xff]  ;;  %v13544_v9 = vld [vmem:[#allocation3 + $0x169] sm:$0xff] }
 0x692   : > { %9591 = vmatmul.msk.f32.gmra.mxu3 %vm354_vm1, %v13527_v31 }
 0x693   : > { %v13535_v44 = vadd.f32 %v7347_v26, %v7055_v59  ;;  %9632 = vmatmul.msk.f32.gmra.mxu0 %vm354_vm1, %v6715_v0  ;;  %v6716_v0 = vld [vmem:[#allocation3 + $0x122] sm:$0xff] }
 0x694   : > { %9682 = vmatmul.msk.f32.gmra.mxu1 %vm354_vm1, %v7119_v52  ;;  %v7120_v52 = vld [vmem:[#allocation3 + $0x138] sm:$0xff] }
 0x695   : > { %v6566_v57 = vpop.f32.mrf.mxu3  ;;  %9709 = vmatmul.msk.f32.gmra.mxu2 %vm354_vm1, %v14672_v48 }
 0x696   : > { %v13540_v36 = vadd.f32 %v6566_v57, %v13269_v23 }
 0x698   : > { %14671 = vst [vmem:[#allocation17_spill] sm:$0xff] %v13540_v36  ;;  %v6210_v3 = vpop.f32.mrf.mxu2  ;;  %v6946_v29 = vpop.f32.mrf.mxu0 }
 0x699   : > { %v13547_v5 = vadd.f32 %v6210_v3, %v13132_v27  ;;  %v7056_v59 = vadd.f32 %v6946_v29, %v13404_v24  ;;  %v7350_v26 = vpop.f32.mrf.mxu1  ;;  %v14674_v27 = vld [vmem:[#allocation6_spill] sm:$0xff]  ;;  %v13561_v29 = vld [vmem:[#allocation3 + $0x171] sm:$0xff] }
 0x69a   : > { %9592 = vmatmul.msk.f32.gmra.mxu3 %vm354_vm1, %v13544_v9 }
 0x69b   : > { %v13552_v23 = vadd.f32 %v7350_v26, %v7056_v59  ;;  %9633 = vmatmul.msk.f32.gmra.mxu0 %vm354_vm1, %v6716_v0  ;;  %v6717_v0 = vld [vmem:[#allocation3 + $0x12a] sm:$0xff] }
 0x69c   : > { %9683 = vmatmul.msk.f32.gmra.mxu1 %vm354_vm1, %v7120_v52  ;;  %v7121_v52 = vld [vmem:[#allocation3 + $0x140] sm:$0xff] }
 0x69d   : > { %v6569_v57 = vpop.f32.mrf.mxu3  ;;  %9710 = vmatmul.msk.f32.gmra.mxu2 %vm354_vm1, %v14674_v27 }
 0x69e   : > { %v13557_v48 = vadd.f32 %v6569_v57, %v13286_v21 }
 0x6a0   : > { %14673 = vst [vmem:[#allocation14_spill] sm:$0xff] %v13557_v48  ;;  %v6213_v24 = vpop.f32.mrf.mxu2  ;;  %v6949_v3 = vpop.f32.mrf.mxu0 }
 0x6a1   : > { %v13564_v36 = vadd.f32 %v6213_v24, %v13149_v10  ;;  %v7057_v59 = vadd.f32 %v6949_v3, %v13421_v4  ;;  %v7353_v26 = vpop.f32.mrf.mxu1  ;;  %v14676_v10 = vld [vmem:[#allocation37_spill] sm:$0xff] }
 0x6a2   : > { %9593 = vmatmul.msk.f32.gmra.mxu3 %vm354_vm1, %v13561_v29  ;;  %v13578_v3 = vld [vmem:[#allocation3 + $0x179] sm:$0xff] }
 0x6a3   : > { %v13569_v21 = vadd.f32 %v7353_v26, %v7057_v59  ;;  %9634 = vmatmul.msk.f32.gmra.mxu0 %vm354_vm1, %v6717_v0  ;;  %v6718_v0 = vld [vmem:[#allocation3 + $0x132] sm:$0xff] }
 0x6a4   : > { %9684 = vmatmul.msk.f32.gmra.mxu1 %vm354_vm1, %v7121_v52  ;;  %v7122_v52 = vld [vmem:[#allocation3 + $0x148] sm:$0xff] }
 0x6a5   : > { %v6572_v57 = vpop.f32.mrf.mxu3  ;;  %9711 = vmatmul.msk.f32.gmra.mxu2 %vm354_vm1, %v14676_v10 }
 0x6a6   : > { %v13574_v27 = vadd.f32 %v6572_v57, %v13303_v12 }
 0x6a8   : > { %14675 = vst [vmem:[#allocation15_spill] sm:$0xff] %v13574_v27  ;;  %v6216_v4 = vpop.f32.mrf.mxu2  ;;  %v6952_v24 = vpop.f32.mrf.mxu0 }
 0x6a9   : > { %v13581_v48 = vadd.f32 %v6216_v4, %v13169_v47  ;;  %v7058_v59 = vadd.f32 %v6952_v24, %v13438_v33  ;;  %v7356_v26 = vpop.f32.mrf.mxu1  ;;  %v14678_v47 = vld [vmem:[#allocation16_spill] sm:$0xff]  ;;  %v13595_v24 = vld [vmem:[#allocation3 + $0x181] sm:$0xff] }
 0x6aa   : > { %9594 = vmatmul.msk.f32.gmra.mxu3 %vm354_vm1, %v13578_v3 }
 0x6ab   : > { %v13586_v12 = vadd.f32 %v7356_v26, %v7058_v59  ;;  %9635 = vmatmul.msk.f32.gmra.mxu0 %vm354_vm1, %v6718_v0  ;;  %v13603_v0 = vld [vmem:[#allocation3 + $0x13a] sm:$0xff] }
 0x6ac   : > { %9685 = vmatmul.msk.f32.gmra.mxu1 %vm354_vm1, %v7122_v52 }
 0x6ad   : > { %v6575_v57 = vpop.f32.mrf.mxu3  ;;  %9712 = vmatmul.msk.f32.gmra.mxu2 %vm354_vm1, %v14678_v47  ;;  %v14680_v47 = vld [vmem:[#allocation4_spill] sm:$0xff] }
 0x6ae   : > { %v13591_v10 = vadd.f32 %v6575_v57, %v13320_v56  ;;  %v7123_v56 = vld [vmem:[#allocation3 + $0x150] sm:$0xff] }
 0x6b0   : > { %14677 = vst [vmem:[#allocation50_spill] sm:$0xff] %v13591_v10  ;;  %v6219_v33 = vpop.f32.mrf.mxu2  ;;  %v6955_v4 = vpop.f32.mrf.mxu0 }
 0x6b1   : > { %v13598_v27 = vadd.f32 %v6219_v33, %v13189_v34  ;;  %v7059_v59 = vadd.f32 %v6955_v4, %v13455_v49  ;;  %v7359_v26 = vpop.f32.mrf.mxu1  ;;  %v13615_v4 = vld [vmem:[#allocation3 + $0x189] sm:$0xff] }
 0x6b2   : > { %9595 = vmatmul.msk.f32.gmra.mxu3 %vm354_vm1, %v13595_v24 }
 0x6b3   : > { %v13605_v52 = vadd.f32 %v7359_v26, %v7059_v59  ;;  %9636 = vmatmul.msk.f32.gmra.mxu0 %vm354_vm1, %v13603_v0 }
 0x6b4   : > { %9686 = vmatmul.msk.f32.gmra.mxu1 %vm354_vm1, %v7123_v56  ;;  %v13623_v56 = vld [vmem:[#allocation3 + $0x142] sm:$0xff] }
 0x6b5   : > { %v6578_v57 = vpop.f32.mrf.mxu3  ;;  %9713 = vmatmul.msk.f32.gmra.mxu2 %vm354_vm1, %v14680_v47 }
 0x6b6   : > { %v13611_v34 = vadd.f32 %v6578_v57, %v13339_v43  ;;  %v7124_v43 = vld [vmem:[#allocation3 + $0x158] sm:$0xff] }
 0x6b8   : > { %14679 = vst [vmem:[#allocation51_spill] sm:$0xff] %v13611_v34  ;;  %v6222_v49 = vpop.f32.mrf.mxu2  ;;  %v6958_v33 = vpop.f32.mrf.mxu0 }
 0x6b9   : > { %v13618_v10 = vadd.f32 %v6222_v49, %v13206_v8  ;;  %v7060_v59 = vadd.f32 %v6958_v33, %v13472_v39  ;;  %v7362_v26 = vpop.f32.mrf.mxu1  ;;  %v13635_v33 = vld [vmem:[#allocation3 + $0x191] sm:$0xff] }
 0x6ba   : > { %9596 = vmatmul.msk.f32.gmra.mxu3 %vm354_vm1, %v13615_v4 }
 0x6bb   : > { %v13625_v57 = vadd.f32 %v7362_v26, %v7060_v59  ;;  %9637 = vmatmul.msk.f32.gmra.mxu0 %vm354_vm1, %v13623_v56 }
 0x6bc   : > { %9687 = vmatmul.msk.f32.gmra.mxu1 %vm354_vm1, %v7124_v43  ;;  %v13643_v43 = vld [vmem:[#allocation3 + $0x14a] sm:$0xff] }
 0x6bd   : > { %14681 = vst [vmem:[#allocation52_spill] sm:$0xff] %v13625_v57  ;;  %v6581_v47 = vpop.f32.mrf.mxu3  ;;  %9714 = vmatmul.msk.f32.gmra.mxu2 %vm354_vm1, %v13107_v1 }
 0x6be   : > { %v13631_v8 = vadd.f32 %v6581_v47, %v13358_v22  ;;  %v7125_v22 = vld [vmem:[#allocation3 + $0x160] sm:$0xff] }
 0x6c0   : > { %14682 = vst [vmem:[#allocation53_spill] sm:$0xff] %v13631_v8  ;;  %v6225_v39 = vpop.f32.mrf.mxu2  ;;  %v6961_v49 = vpop.f32.mrf.mxu0 }
 0x6c1   : > { %v13638_v34 = vadd.f32 %v6225_v39, %v13223_v7  ;;  %v7061_v59 = vadd.f32 %v6961_v49, %v13489_v30  ;;  %v7365_v26 = vpop.f32.mrf.mxu1  ;;  %v7895_v49 = vld [vmem:[#allocation3 + $0x32] sm:$0xff] }
 0x6c2   : > { %9597 = vmatmul.msk.f32.gmra.mxu3 %vm354_vm1, %v13635_v33 }
 0x6c3   : > { %v13645_v47 = vadd.f32 %v7365_v26, %v7061_v59  ;;  %9638 = vmatmul.msk.f32.gmra.mxu0 %vm354_vm1, %v13643_v43 }
 0x6c4   : > { %9688 = vmatmul.msk.f32.gmra.mxu1 %vm354_vm1, %v7125_v22  ;;  %v7126_v22 = vld [vmem:[#allocation3 + $0x168] sm:$0xff] }
 0x6c5   : > { %14683 = vst [vmem:[#allocation54_spill] sm:$0xff] %v13645_v47  ;;  %v6584_v1 = vpop.f32.mrf.mxu3  ;;  %9715 = vmatmul.msk.f32.gmra.mxu2 %vm354_vm1, %v13124_v35  ;;  %v13660_v47 = vld [vmem:[#allocation3 + $0x152] sm:$0xff] }
 0x6c6   : > { %v13651_v7 = vadd.f32 %v6584_v1, %v13377_v63  ;;  %v7127_v1 = vld [vmem:[#allocation3 + $0x170] sm:$0xff] }
 0x6c8   : > { %v6228_v30 = vpop.f32.mrf.mxu2  ;;  %v6964_v39 = vpop.f32.mrf.mxu0 }
 0x6c9   : > { %v13656_v8 = vadd.f32 %v6228_v30, %v13240_v54  ;;  %v7062_v59 = vadd.f32 %v6964_v39, %v13506_v20  ;;  %v7368_v26 = vpop.f32.mrf.mxu1  ;;  %v7896_v54 = vld [vmem:[#allocation3 + $0x3a] sm:$0xff] }
 0x6ca   : > { %9750 = vmatmul.msk.f32.vlgmr.msra.gmra.mxu3 %vm354_vm1, %v7895_v49  ;;  %v13673_v20 = vld [vmem:[#allocation3 + $0x15a] sm:$0xff] }
 0x6cb   : > { %v13662_v57 = vadd.f32 %v7368_v26, %v7062_v59  ;;  %9639 = vmatmul.msk.f32.gmra.mxu0 %vm354_vm1, %v13660_v47  ;;  %v7128_v49 = vld [vmem:[#allocation3 + $0x178] sm:$0xff] }
 0x6cc   : > { %9689 = vmatmul.msk.f32.gmra.mxu1 %vm354_vm1, %v7126_v22  ;;  %v13697_v22 = vld [vmem:[#allocation3 + $0x16a] sm:$0xff] }
 0x6cd   : > { %v6587_v35 = vpop.f32.mrf.mxu3  ;;  %9716 = vmatmul.msk.f32.gmra.mxu2 %vm354_vm1, %v13141_v40  ;;  %v13684_v40 = vld [vmem:[#allocation3 + $0x162] sm:$0xff] }
 0x6ce   : > { %v13668_v63 = vadd.f32 %v6587_v35, %v13394_v62  ;;  %v7897_v62 = vld [vmem:[#allocation3 + $0x42] sm:$0xff] }
 0x6d2   : > { %9751 = vmatmul.msk.f32.gmra.mxu3 %vm354_vm1, %v7896_v54 }
 0x6d3   : > { %9640 = vmatmul.msk.f32.gmra.mxu0 %vm354_vm1, %v13673_v20 }
 0x6d4   : > { %9690 = vmatmul.msk.f32.gmra.mxu1 %vm354_vm1, %v7127_v1  ;;  %v13711_v1 = vld [vmem:[#allocation3 + $0x172] sm:$0xff] }
 0x6d5   : > { %v6590_v30 = vpop.f32.mrf.mxu3  ;;  %9717 = vmatmul.msk.f32.gmra.mxu2 %vm354_vm1, %v13161_v18  ;;  %v7898_v18 = vld [vmem:[#allocation3 + $0x4a] sm:$0xff] }
 0x6d6   : > { %v13679_v39 = vadd.f32 %v6590_v30, %v13411_v42  ;;  %v13694_v42 = vpop.f32.mrf.mxu2  ;;  %v13723_v30 = vld [vmem:[#allocation3 + $0x17a] sm:$0xff] }
 0x6da   : > { %9752 = vmatmul.msk.f32.gmra.mxu3 %vm354_vm1, %v7897_v62 }
 0x6db   : > { %9641 = vmatmul.msk.f32.gmra.mxu0 %vm354_vm1, %v13684_v40 }
 0x6dc   : > { %9691 = vmatmul.msk.f32.gmra.mxu1 %vm354_vm1, %v7128_v49  ;;  %v13737_v49 = vld [vmem:[#allocation3 + $0x182] sm:$0xff] }
 0x6dd   : > { %v6593_v59 = vpop.f32.mrf.mxu3  ;;  %9718 = vmatmul.msk.f32.gmra.mxu2 %vm354_vm1, %v13181_v51  ;;  %v7899_v51 = vld [vmem:[#allocation3 + $0x52] sm:$0xff] }
 0x6de   : > { %v13690_v26 = vadd.f32 %v6593_v59, %v13428_v14  ;;  %v13708_v54 = vpop.f32.mrf.mxu2  ;;  %v7132_v59 = vld [vmem:[#allocation3 + $0x198] sm:$0xff] }
 0x6e2   : > { %9753 = vmatmul.msk.f32.gmra.mxu3 %vm354_vm1, %v7898_v18 }
 0x6e3   : > { %9642 = vmatmul.msk.f32.gmra.mxu0 %vm354_vm1, %v13697_v22 }
 0x6e4   : > { %9692 = vmatmul.msk.f32.gmra.mxu1 %vm354_vm1, %v13329_v15 }
 0x6e5   : > { %v6596_v35 = vpop.f32.mrf.mxu3  ;;  %9719 = vmatmul.msk.f32.gmra.mxu2 %vm354_vm1, %v13198_v13  ;;  %v7900_v13 = vld [vmem:[#allocation3 + $0x5a] sm:$0xff] }
 0x6e6   : > { %v13704_v14 = vadd.f32 %v6596_v35, %v13445_v16  ;;  %v13725_v62 = vpop.f32.mrf.mxu2  ;;  %v7133_v35 = vld [vmem:[#allocation3 + $0x1a0] sm:$0xff] }
 0x6ea   : > { %9754 = vmatmul.msk.f32.gmra.mxu3 %vm354_vm1, %v7899_v51  ;;  %v13750_v51 = vld [vmem:[#allocation3 + $0x18a] sm:$0xff] }
 0x6eb   : > { %9643 = vmatmul.msk.f32.gmra.mxu0 %vm354_vm1, %v13711_v1 }
 0x6ec   : > { %9693 = vmatmul.msk.f32.gmra.mxu1 %vm354_vm1, %v13348_v60 }
 0x6ed   : > { %v6599_v15 = vpop.f32.mrf.mxu3  ;;  %9720 = vmatmul.msk.f32.gmra.mxu2 %vm354_vm1, %v13215_v58  ;;  %v7901_v58 = vld [vmem:[#allocation3 + $0x62] sm:$0xff] }
 0x6ee   : > { %v13718_v16 = vadd.f32 %v6599_v15, %v13462_v50 }
 0x6f2   : > { %9755 = vmatmul.msk.f32.gmra.mxu3 %vm354_vm1, %v7900_v13 }
 0x6f3   : > { %9644 = vmatmul.msk.f32.gmra.mxu0 %vm354_vm1, %v13723_v30 }
 0x6f4   : > { %9694 = vmatmul.msk.f32.gmra.mxu1 %vm354_vm1, %v13367_v6  ;;  %v13742_v6 = vpop.f32.mrf.mxu2 }
 0x6f5   : > { %v6602_v60 = vpop.f32.mrf.mxu3  ;;  %9721 = vmatmul.msk.f32.gmra.mxu2 %vm354_vm1, %v13232_v45  ;;  %v7902_v45 = vld [vmem:[#allocation3 + $0x6a] sm:$0xff] }
 0x6f6   : > { %v13732_v50 = vadd.f32 %v6602_v60, %v13479_v2 }
 0x6fa   : > { %9756 = vmatmul.msk.f32.gmra.mxu3 %vm354_vm1, %v7901_v58  ;;  %v7134_v58 = vld [vmem:[#allocation3 + $0x1a8] sm:$0xff] }
 0x6fb   : > { %9645 = vmatmul.msk.f32.gmra.mxu0 %vm354_vm1, %v13737_v49 }
 0x6fc   : > { %9695 = vmatmul.msk.f32.gmra.mxu1 %vm354_vm1, %v7132_v59  ;;  %v13760_v60 = vpop.f32.mrf.mxu2  ;;  %v13763_v59 = vld [vmem:[#allocation3 + $0x192] sm:$0xff] }
 0x6fd   : > { %v6605_v18 = vpop.f32.mrf.mxu3  ;;  %9722 = vmatmul.msk.f32.gmra.mxu2 %vm354_vm1, %v13249_v11  ;;  %v7903_v11 = vld [vmem:[#allocation3 + $0x72] sm:$0xff] }
 0x6fe   : > { %v13745_v2 = vadd.f32 %v6605_v18, %v13496_v17  ;;  %v14685_v17 = vld [vmem:[#allocation34_spill] sm:$0xff] }
 0x702   : > { %9757 = vmatmul.msk.f32.gmra.mxu3 %vm354_vm1, %v7902_v45  ;;  %v14687_v45 = vld [vmem:[#allocation39_spill] sm:$0xff] }
 0x703   : > { %9646 = vmatmul.msk.f32.gmra.mxu0 %vm354_vm1, %v13750_v51 }
 0x704   : > { %9696 = vmatmul.msk.f32.gmra.mxu1 %vm354_vm1, %v7133_v35  ;;  %v7904_v35 = vld [vmem:[#allocation3 + $0x7a] sm:$0xff] }
 0x705   : > { %v6608_v15 = vpop.f32.mrf.mxu3  ;;  %9723 = vmatmul.msk.f32.gmra.mxu2 %vm354_vm1, %v14685_v17 }
 0x706   : > { %v13756_v13 = vadd.f32 %v6608_v15, %v13513_v46  ;;  %v13773_v15 = vpop.f32.mrf.mxu2 }
 0x708   : > { %14684 = vst [vmem:[#allocation18_spill] sm:$0xff] %v13756_v13  ;;  %v14689_v13 = vld [vmem:[#allocation38_spill] sm:$0xff] }
 0x70a   : > { %9758 = vmatmul.msk.f32.gmra.mxu3 %vm354_vm1, %v7903_v11 }
 0x70b   : > { %9647 = vmatmul.msk.f32.gmra.mxu0 %vm354_vm1, %v13763_v59 }
 0x70c   : > { %9697 = vmatmul.msk.f32.gmra.mxu1 %vm354_vm1, %v7134_v58  ;;  %v7905_v58 = vld [vmem:[#allocation3 + $0x82] sm:$0xff] }
 0x70d   : > { %v6611_v18 = vpop.f32.mrf.mxu3  ;;  %9724 = vmatmul.msk.f32.gmra.mxu2 %vm354_vm1, %v14687_v45 }
 0x70e   : > { %v13769_v46 = vadd.f32 %v6611_v18, %v13530_v32  ;;  %v13782_v32 = vpop.f32.mrf.mxu2 }
 0x710   : > { %14686 = vst [vmem:[#allocation20_spill] sm:$0xff] %v13769_v46  ;;  %v14691_v46 = vld [vmem:[#allocation19_spill] sm:$0xff] }
 0x712   : > { %9759 = vmatmul.msk.f32.gmra.mxu3 %vm354_vm1, %v7904_v35  ;;  %v7906_v35 = vld [vmem:[#allocation3 + $0x8a] sm:$0xff] }
 0x715   : > { %v6614_v17 = vpop.f32.mrf.mxu3  ;;  %9725 = vmatmul.msk.f32.gmra.mxu2 %vm354_vm1, %v14689_v13 }
 0x716   : > { %v13777_v11 = vadd.f32 %v6614_v17, %v13547_v5  ;;  %v13790_v17 = vpop.f32.mrf.mxu2 }
 0x718   : > { %14688 = vst [vmem:[#allocation21_spill] sm:$0xff] %v13777_v11  ;;  %v14693_v11 = vld [vmem:[#allocation36_spill] sm:$0xff] }
 0x71a   : > { %9760 = vmatmul.msk.f32.gmra.mxu3 %vm354_vm1, %v7905_v58  ;;  %v7907_v58 = vld [vmem:[#allocation3 + $0x92] sm:$0xff] }
 0x71d   : > { %v6617_v18 = vpop.f32.mrf.mxu3  ;;  %9726 = vmatmul.msk.f32.gmra.mxu2 %vm354_vm1, %v14691_v46  ;;  %v14695_v46 = vld [vmem:[#allocation42_spill] sm:$0xff] }
 0x71e   : > { %v13785_v45 = vadd.f32 %v6617_v18, %v13564_v36 }
 0x720   : > { %14690 = vst [vmem:[#allocation58_spill] sm:$0xff] %v13785_v45  ;;  %v7908_v45 = vld [vmem:[#allocation3 + $0x9a] sm:$0xff] }
 0x722   : > { %9761 = vmatmul.msk.f32.gmra.mxu3 %vm354_vm1, %v7906_v35  ;;  %v13803_v35 = vpop.f32.mrf.mxu2 }
 0x725   : > { %v6620_v5 = vpop.f32.mrf.mxu3  ;;  %9727 = vmatmul.msk.f32.gmra.mxu2 %vm354_vm1, %v14693_v11  ;;  %v14697_v11 = vld [vmem:[#allocation48_spill] sm:$0xff] }
 0x726   : > { %v13793_v13 = vadd.f32 %v6620_v5, %v13581_v48 }
 0x728   : > { %14692 = vst [vmem:[#allocation22_spill] sm:$0xff] %v13793_v13 }
 0x72a   : > { %9762 = vmatmul.msk.f32.gmra.mxu3 %vm354_vm1, %v7907_v58  ;;  %v7909_v58 = vld [vmem:[#allocation3 + $0xa2] sm:$0xff]  ;;  %v13811_v13 = vpop.f32.mrf.mxu2 }
 0x72d   : > { %v6623_v36 = vpop.f32.mrf.mxu3  ;;  %9728 = vmatmul.msk.f32.gmra.mxu2 %vm354_vm1, %v14695_v46 }
 0x72e   : > { %v13799_v18 = vadd.f32 %v6623_v36, %v13598_v27 }
 0x730   : > { %14694 = vst [vmem:[#allocation23_spill] sm:$0xff] %v13799_v18  ;;  %v14702_v18 = vld [vmem:[#allocation33_spill] sm:$0xff] }
 0x732   : > { %9763 = vmatmul.msk.f32.gmra.mxu3 %vm354_vm1, %v7908_v45  ;;  %v7910_v45 = vld [vmem:[#allocation3 + $0xaa] sm:$0xff] }
 0x735   : > { %v6626_v48 = vpop.f32.mrf.mxu3  ;;  %9729 = vmatmul.msk.f32.gmra.mxu2 %vm354_vm1, %v14697_v11  ;;  %v7911_v11 = vld [vmem:[#allocation3 + $0xb2] sm:$0xff] }
 0x736   : > { %v13807_v5 = vadd.f32 %v6626_v48, %v13618_v10  ;;  %v13820_v10 = vpop.f32.mrf.mxu2 }
 0x738   : > { %14696 = vst [vmem:[#allocation59_spill] sm:$0xff] %v13807_v5  ;;  %v8456_v5 = vpop.permute.xlu1 %8455 }
 0x73a   : > { %9764 = vmatmul.msk.f32.gmra.mxu3 %vm354_vm1, %v7909_v58 }
 0x73d   : > { %v6629_v27 = vpop.f32.mrf.mxu3  ;;  %9730 = vmatmul.msk.f32.gmra.mxu2 %vm354_vm1, %v13391_v61  ;;  %v13833_v61 = vld [vmem:[%s14233_s5 + $0x1] ss:$0 sm:$0xff] }
 0x73e   : > { %v13815_v36 = vadd.f32 %v6629_v27, %v13638_v34  ;;  %v14700_v34 = vld [vmem:[#allocation5_spill] sm:$0xff] }
 0x73f   : > { %v7847_v58 = vadd.f32 %v13694_v42, %v14700_v34  ;;  %v8451_v42 = vpop.permute.xlu0 %8450 }
 0x740   : > { %14698 = vst [vmem:[#allocation60_spill] sm:$0xff] %v13815_v36 }
 0x742   : > { %9765 = vmatmul.msk.f32.gmra.mxu3 %vm354_vm1, %v7910_v45  ;;  %v13835_v45 = vpop.f32.mrf.mxu2 }
 0x745   : > { %v6632_v46 = vpop.f32.mrf.mxu3  ;;  %9731 = vmatmul.msk.f32.gmra.mxu2 %vm354_vm1, %v13408_v38 }
 0x746   : > { %v13823_v48 = vadd.f32 %v6632_v46, %v13656_v8  ;;  %v7912_v8 = vld [vmem:[#allocation3 + $0xba] sm:$0xff] }
 0x748   : > { %14699 = vst [vmem:[#allocation61_spill] sm:$0xff] %v13823_v48 }
 0x74a   : > { %9766 = vmatmul.msk.f32.gmra.mxu3 %vm354_vm1, %v7911_v11  ;;  %v14701_v11 = vld [vmem:[#allocation40_spill] sm:$0xff] }
 0x74b   : > { %v7848_v34 = vadd.f32 %v13708_v54, %v14701_v11  ;;  %v7849_v54 = vadd.f32 %v13725_v62, %v14702_v18 }
 0x74d   : > { %v8107_v27 = vpop.f32.mrf.mxu3  ;;  %9732 = vmatmul.msk.f32.gmra.mxu2 %vm354_vm1, %v13425_v19 }
 0x74e   : > { %v8251_v36 = vadd.f32 %v8107_v27, %v7847_v58  ;;  %v13853_v27 = vpop.f32.mrf.mxu2 }
 0x750   : > { %v8304_v38 = vadd.f32 %v13833_v61, %v8251_v36 }
 0x752   : > { %v8352_v46 = vmax.f32 %v8304_v38, 0.0  ;;  %9767 = vmatmul.msk.f32.gmra.mxu3 %vm354_vm1, %v7912_v8  ;;  %v7913_v8 = vld [vmem:[#allocation3 + $0xc2] sm:$0xff] }
 0x754   : > { %v8688_v58 = vmul.f32 %v8451_v42, %v8352_v46 }
 0x755   : > { %v8110_v19 = vpop.f32.mrf.mxu3  ;;  %9733 = vmatmul.msk.f32.gmra.mxu2 %vm354_vm1, %v13442_v25 }
 0x756   : > { %8736 = vst.msk [vmem:[%s13845_s20] sm:$0xff] %vm354_vm1, %v8688_v58  ;;  %v8252_v36 = vadd.f32 %v8110_v19, %v7848_v34  ;;  %v7914_v34 = vld [vmem:[#allocation3 + $0xca] sm:$0xff]  ;;  %v13864_v58 = vpop.f32.mrf.mxu2 }
 0x758   : > { %v8305_v38 = vadd.f32 %v13833_v61, %v8252_v36  ;;  %v8461_v36 = vpop.permute.xlu2 %8460 }
 0x75a   : > { %v8353_v48 = vmax.f32 %v8305_v38, 0.0  ;;  %9768 = vmatmul.msk.f32.gmra.mxu3 %vm354_vm1, %v7913_v8  ;;  %v14703_v38 = vld [vmem:[#allocation44_spill] sm:$0xff] }
 0x75b   : > { %v7850_v62 = vadd.f32 %v13742_v6, %v14703_v38  ;;  %v7915_v8 = vld [vmem:[#allocation3 + $0xd2] sm:$0xff] }
 0x75c   : > { %v8689_v46 = vmul.f32 %v8456_v5, %v8353_v48 }
 0x75d   : > { %v8113_v42 = vpop.f32.mrf.mxu3  ;;  %9734 = vmatmul.msk.f32.gmra.mxu2 %vm354_vm1, %v13459_v55 }
 0x75e   : > { %8737 = vst.msk [vmem:[%s13845_s20 + $0x8] sm:$0xff] %vm354_vm1, %v8689_v46  ;;  %v8253_v11 = vadd.f32 %v8113_v42, %v7849_v54  ;;  %v8466_v46 = vpop.permute.xlu0 %8465  ;;  %v14704_v42 = vld [vmem:[#allocation55_spill] sm:$0xff]  ;;  %v13877_v6 = vpop.f32.mrf.mxu2 }
 0x760   : > { %v8306_v25 = vadd.f32 %v13833_v61, %v8253_v11  ;;  %v7851_v11 = vadd.f32 %v13760_v60, %v14704_v42  ;;  %v8476_v42 = vpop.permute.xlu2 %8475 }
 0x762   : > { %v8354_v19 = vmax.f32 %v8306_v25, 0.0  ;;  %9769 = vmatmul.msk.f32.gmra.mxu3 %vm354_vm1, %v7914_v34 }
 0x764   : > { %v8690_v18 = vmul.f32 %v8461_v36, %v8354_v19  ;;  %v7916_v36 = vld [vmem:[#allocation3 + $0xda] sm:$0xff] }
 0x765   : > { %v8116_v5 = vpop.f32.mrf.mxu3  ;;  %9735 = vmatmul.msk.f32.gmra.mxu2 %vm354_vm1, %v13476_v37 }
 0x766   : > { %8738 = vst.msk [vmem:[%s13845_s20 + $0x10] sm:$0xff] %vm354_vm1, %v8690_v18  ;;  %v8254_v48 = vadd.f32 %v8116_v5, %v7850_v62  ;;  %v8471_v62 = vpop.permute.xlu1 %8470  ;;  %v14705_v18 = vld [vmem:[#allocation43_spill] sm:$0xff] }
 0x767   : > { %v7852_v60 = vadd.f32 %v13773_v15, %v14705_v18  ;;  %v14707_v18 = vld [vmem:[#allocation57_spill] sm:$0xff] }
 0x768   : > { %v8307_v55 = vadd.f32 %v13833_v61, %v8254_v48 }
 0x76a   : > { %v8355_v54 = vmax.f32 %v8307_v55, 0.0  ;;  %9770 = vmatmul.msk.f32.gmra.mxu3 %vm354_vm1, %v7915_v8  ;;  %v13887_v55 = vpop.f32.mrf.mxu2 }
 0x76c   : > { %v8691_v25 = vmul.f32 %v8466_v46, %v8355_v54  ;;  %v7917_v54 = vld [vmem:[#allocation3 + $0xe2] sm:$0xff] }
 0x76d   : > { %v8119_v34 = vpop.f32.mrf.mxu3  ;;  %9736 = vmatmul.msk.f32.gmra.mxu2 %vm354_vm1, %v13493_v53 }
 0x76e   : > { %8739 = vst.msk [vmem:[%s13845_s20 + $0x18] sm:$0xff] %vm354_vm1, %v8691_v25  ;;  %v8255_v19 = vadd.f32 %v8119_v34, %v7851_v11  ;;  %v14706_v11 = vld [vmem:[#allocation56_spill] sm:$0xff] }
 0x76f   : > { %v7853_v15 = vadd.f32 %v13782_v32, %v14706_v11  ;;  %v7854_v32 = vadd.f32 %v13790_v17, %v14707_v18 }
 0x770   : > { %v8308_v37 = vadd.f32 %v13833_v61, %v8255_v19 }
 0x772   : > { %v8356_v38 = vmax.f32 %v8308_v37, 0.0  ;;  %9771 = vmatmul.msk.f32.gmra.mxu3 %vm354_vm1, %v7916_v36  ;;  %v7918_v36 = vld [vmem:[#allocation3 + $0xea] sm:$0xff] }
 0x774   : > { %v8692_v5 = vmul.f32 %v8471_v62, %v8356_v38  ;;  %v8481_v62 = vpop.permute.xlu0 %8480 }
 0x775   : > { %v8122_v48 = vpop.f32.mrf.mxu3  ;;  %9737 = vmatmul.msk.f32.gmra.mxu2 %vm354_vm1, %v13510_v28  ;;  %v13901_v28 = vpop.f32.mrf.mxu2 }
 0x776   : > { %8740 = vst.msk [vmem:[%s13845_s20 + $0x20] sm:$0xff] %vm354_vm1, %v8692_v5  ;;  %v8256_v8 = vadd.f32 %v8122_v48, %v7852_v60 }
 0x778   : > { %v8309_v53 = vadd.f32 %v13833_v61, %v8256_v8  ;;  %v7919_v8 = vld [vmem:[#allocation3 + $0xf2] sm:$0xff] }
 0x77a   : > { %v8357_v46 = vmax.f32 %v8309_v53, 0.0  ;;  %9772 = vmatmul.msk.f32.gmra.mxu3 %vm354_vm1, %v7917_v54 }
 0x77c   : > { %v8693_v25 = vmul.f32 %v8476_v42, %v8357_v46  ;;  %v8486_v46 = vpop.permute.xlu1 %8485  ;;  %v14708_v42 = vld [vmem:[#allocation8_spill] sm:$0xff] }
 0x77d   : > { %v8125_v34 = vpop.f32.mrf.mxu3  ;;  %9738 = vmatmul.msk.f32.gmra.mxu2 %vm354_vm1, %v13527_v31  ;;  %v13912_v53 = vpop.f32.mrf.mxu2  ;;  %v7855_v17 = vadd.f32 %v13803_v35, %v14708_v42 }
 0x77e   : > { %8741 = vst.msk [vmem:[%s13845_s20 + $0x28] sm:$0xff] %vm354_vm1, %v8693_v25  ;;  %v8257_v19 = vadd.f32 %v8125_v34, %v7853_v15  ;;  %v7920_v34 = vld [vmem:[#allocation3 + $0xfa] sm:$0xff] }
 0x780   : > { %v8310_v37 = vadd.f32 %v13833_v61, %v8257_v19 }
 0x782   : > { %v8358_v38 = vmax.f32 %v8310_v37, 0.0  ;;  %9773 = vmatmul.msk.f32.gmra.mxu3 %vm354_vm1, %v7918_v36  ;;  %v8491_v37 = vpop.permute.xlu2 %8490  ;;  %v14709_v36 = vld [vmem:[#allocation9_spill] sm:$0xff] }
 0x784   : > { %v8694_v60 = vmul.f32 %v8481_v62, %v8358_v38  ;;  %v7856_v38 = vadd.f32 %v13811_v13, %v14709_v36  ;;  %v7923_v36 = vld [vmem:[#allocation3 + $0x112] sm:$0xff] }
 0x785   : > { %v8128_v5 = vpop.f32.mrf.mxu3  ;;  %9739 = vmatmul.msk.f32.gmra.mxu2 %vm354_vm1, %v13544_v9  ;;  %v13925_v35 = vpop.f32.mrf.mxu2 }
 0x786   : > { %8742 = vst.msk [vmem:[%s13845_s20 + $0x30] sm:$0xff] %vm354_vm1, %v8694_v60  ;;  %v8258_v48 = vadd.f32 %v8128_v5, %v7854_v32  ;;  %v7921_v60 = vld [vmem:[#allocation3 + $0x102] sm:$0xff] }
 0x788   : > { %v8311_v31 = vadd.f32 %v13833_v61, %v8258_v48  ;;  %v8496_v48 = vpop.permute.xlu0 %8495 }
 0x78a   : > { %v8359_v54 = vmax.f32 %v8311_v31, 0.0  ;;  %9774 = vmatmul.msk.f32.gmra.mxu3 %vm354_vm1, %v7919_v8  ;;  %v14710_v31 = vld [vmem:[#allocation45_spill] sm:$0xff] }
 0x78b   : > { %v7857_v13 = vadd.f32 %v13820_v10, %v14710_v31 }
 0x78c   : > { %v8695_v11 = vmul.f32 %v8486_v46, %v8359_v54 }
 0x78d   : > { %v8131_v15 = vpop.f32.mrf.mxu3  ;;  %9740 = vmatmul.msk.f32.gmra.mxu2 %vm354_vm1, %v13561_v29  ;;  %v13935_v46 = vpop.f32.mrf.mxu2 }
 0x78e   : > { %8743 = vst.msk [vmem:[%s13845_s20 + $0x38] sm:$0xff] %vm354_vm1, %v8695_v11  ;;  %v8259_v25 = vadd.f32 %v8131_v15, %v7855_v17  ;;  %v7922_v17 = vld [vmem:[#allocation3 + $0x10a] sm:$0xff]  ;;  %v8501_v15 = vpop.permute.xlu1 %8500 }
 0x790   : > { %v8312_v9 = vadd.f32 %v13833_v61, %v8259_v25  ;;  %v14711_v25 = vld [vmem:[#allocation41_spill] sm:$0xff] }
 0x791   : > { %v7858_v10 = vadd.f32 %v13835_v45, %v14711_v25 }
 0x792   : > { %v8360_v19 = vmax.f32 %v8312_v9, 0.0  ;;  %9775 = vmatmul.msk.f32.gmra.mxu3 %vm354_vm1, %v7920_v34 }
 0x794   : > { %v8696_v62 = vmul.f32 %v8491_v37, %v8360_v19 }
 0x795   : > { %v8134_v18 = vpop.f32.mrf.mxu3  ;;  %9741 = vmatmul.msk.f32.gmra.mxu2 %vm354_vm1, %v13578_v3 }
 0x796   : > { %8744 = vst.msk [vmem:[%s13845_s20 + $0x40] sm:$0xff] %vm354_vm1, %v8696_v62  ;;  %v8260_v32 = vadd.f32 %v8134_v18, %v7856_v38  ;;  %v8506_v62 = vpop.permute.xlu2 %8505  ;;  %v14712_v18 = vld [vmem:[#allocation10_spill] sm:$0xff]  ;;  %v8516_v25 = vpop.permute.xlu1 %8515 }
 0x797   : > { %v7859_v45 = vadd.f32 %v13853_v27, %v14712_v18  ;;  %v14713_v27 = vld [vmem:[#allocation49_spill] sm:$0xff] }
 0x798   : > { %v8313_v29 = vadd.f32 %v13833_v61, %v8260_v32 }
 0x79a   : > { %v8361_v5 = vmax.f32 %v8313_v29, 0.0  ;;  %9776 = vmatmul.msk.f32.gmra.mxu3 %vm354_vm1, %v7921_v60 }
 0x79c   : > { %v8697_v8 = vmul.f32 %v8496_v48, %v8361_v5  ;;  %v7924_v5 = vld [vmem:[#allocation3 + $0x11a] sm:$0xff] }
 0x79d   : > { %v8137_v54 = vpop.f32.mrf.mxu3  ;;  %9742 = vmatmul.msk.f32.gmra.mxu2 %vm354_vm1, %v13595_v24  ;;  %v13949_v24 = vpop.f32.mrf.mxu2 }
 0x79e   : > { %8745 = vst.msk [vmem:[%s13845_s20 + $0x48] sm:$0xff] %vm354_vm1, %v8697_v8  ;;  %v8261_v42 = vadd.f32 %v8137_v54, %v7857_v13  ;;  %v8511_v13 = vpop.permute.xlu0 %8510  ;;  %v7536_v8 = vld [vmem:[#allocation3 + $0x199] sm:$0xff]  ;;  %v7860_v54 = vadd.f32 %v13864_v58, %v14713_v27 }
 0x7a0   : > { %v8314_v3 = vadd.f32 %v13833_v61, %v8261_v42 }
 0x7a2   : > { %v8362_v11 = vmax.f32 %v8314_v3, 0.0  ;;  %9777 = vmatmul.msk.f32.gmra.mxu3 %vm354_vm1, %v7922_v17 }
 0x7a4   : > { %v8698_v9 = vmul.f32 %v8501_v15, %v8362_v11  ;;  %v7925_v11 = vld [vmem:[#allocation3 + $0x122] sm:$0xff] }
 0x7a5   : > { %v8140_v34 = vpop.f32.mrf.mxu3  ;;  %9743 = vmatmul.msk.f32.gmra.mxu2 %vm354_vm1, %v13615_v4  ;;  %v13960_v48 = vpop.f32.mrf.mxu2 }
 0x7a6   : > { %8746 = vst.msk [vmem:[%s13845_s20 + $0x50] sm:$0xff] %vm354_vm1, %v8698_v9  ;;  %v8262_v19 = vadd.f32 %v8140_v34, %v7858_v10  ;;  %v7537_v10 = vld [vmem:[#allocation3 + $0x1a1] sm:$0xff]  ;;  %v14714_v9 = vld [vmem:[#allocation12_spill] sm:$0xff]  ;;  %v8526_v27 = vpop.permute.xlu0 %8525 }
 0x7a7   : > { %v7861_v34 = vadd.f32 %v13877_v6, %v14714_v9  ;;  %v7862_v6 = vadd.f32 %v13887_v55, %v13518_v41  ;;  %v7863_v41 = vadd.f32 %v13901_v28, %v13535_v44  ;;  %v14002_v9 = vpop.f32.mrf.mxu1 }
 0x7a8   : > { %v8315_v37 = vadd.f32 %v13833_v61, %v8262_v19 }
 0x7aa   : > { %v8363_v38 = vmax.f32 %v8315_v37, 0.0  ;;  %9778 = vmatmul.msk.f32.gmra.mxu3 %vm354_vm1, %v7923_v36 }
 0x7ac   : > { %v8699_v32 = vmul.f32 %v8506_v62, %v8363_v38  ;;  %v7926_v62 = vld [vmem:[#allocation3 + $0x12a] sm:$0xff] }
 0x7ad   : > { %v8143_v29 = vpop.f32.mrf.mxu3  ;;  %9744 = vmatmul.msk.f32.gmra.mxu2 %vm354_vm1, %v13635_v33  ;;  %v13972_v58 = vpop.f32.mrf.mxu2 }
 0x7ae   : > { %8747 = vst.msk [vmem:[%s13845_s20 + $0x58] sm:$0xff] %vm354_vm1, %v8699_v32  ;;  %v8263_v60 = vadd.f32 %v8143_v29, %v7859_v45  ;;  %v8521_v45 = vpop.permute.xlu2 %8520  ;;  %v7538_v32 = vld [vmem:[#allocation3 + $0x1a9] sm:$0xff] }
 0x7b0   : > { %v8316_v4 = vadd.f32 %v13833_v61, %v8263_v60 }
 0x7b2   : > { %v8364_v31 = vmax.f32 %v8316_v4, 0.0  ;;  %9779 = vmatmul.msk.f32.gmra.mxu3 %vm354_vm1, %v7924_v5 }
 0x7b4   : > { %v8700_v42 = vmul.f32 %v8511_v13, %v8364_v31  ;;  %v7927_v13 = vld [vmem:[#allocation3 + $0x132] sm:$0xff] }
 0x7b5   : > { %v8146_v3 = vpop.f32.mrf.mxu3  ;;  %9745 = vmatmul.msk.f32.gmra.mxu2 %vm354_vm1, %v7536_v8  ;;  %v13981_v4 = vpop.f32.mrf.mxu2 }
 0x7b6   : > { %8748 = vst.msk [vmem:[%s13845_s20 + $0x60] sm:$0xff] %vm354_vm1, %v8700_v42  ;;  %v8264_v17 = vadd.f32 %v8146_v3, %v7860_v54 }
 0x7b8   : > { %v8317_v33 = vadd.f32 %v13833_v61, %v8264_v17 }
 0x7ba   : > { %v8365_v15 = vmax.f32 %v8317_v33, 0.0  ;;  %9780 = vmatmul.msk.f32.gmra.mxu3 %vm354_vm1, %v7925_v11  ;;  %v8531_v33 = vpop.permute.xlu1 %8530  ;;  %v7864_v11 = vadd.f32 %v13912_v53, %v13552_v23  ;;  %v7865_v23 = vadd.f32 %v13925_v35, %v13569_v21  ;;  %v7866_v21 = vadd.f32 %v13935_v46, %v13586_v12 }
 0x7bb   : > { %v7867_v12 = vadd.f32 %v13949_v24, %v13605_v52 }
 0x7bc   : > { %v8701_v19 = vmul.f32 %v8516_v25, %v8365_v15  ;;  %v13997_v25 = vpop.f32.mrf.mxu0 }
 0x7bd   : > { %v8149_v37 = vpop.f32.mrf.mxu3  ;;  %9746 = vmatmul.msk.f32.gmra.mxu2 %vm354_vm1, %v7537_v10 }
 0x7be   : > { %8749 = vst.msk [vmem:[%s13845_s20 + $0x68] sm:$0xff] %vm354_vm1, %v8701_v19  ;;  %v8265_v36 = vadd.f32 %v8149_v37, %v7861_v34  ;;  %v14006_v19 = vpop.f32.mrf.mxu2 }
 0x7c0   : > { %v8318_v38 = vadd.f32 %v13833_v61, %v8265_v36 }
 0x7c2   : > { %v8366_v18 = vmax.f32 %v8318_v38, 0.0  ;;  %9781 = vmatmul.msk.f32.gmra.mxu3 %vm354_vm1, %v7926_v62 }
 0x7c4   : > { %v8702_v29 = vmul.f32 %v8521_v45, %v8366_v18  ;;  %v14012_v38 = vpop.f32.mrf.mxu0  ;;  %v14017_v45 = vpop.f32.mrf.mxu1 }
 0x7c5   : > { %v8152_v60 = vpop.f32.mrf.mxu3  ;;  %9747 = vmatmul.msk.f32.gmra.mxu2 %vm354_vm1, %v7538_v32 }
 0x7c6   : > { %8750 = vst.msk [vmem:[%s13845_s20 + $0x70] sm:$0xff] %vm354_vm1, %v8702_v29  ;;  %v8266_v5 = vadd.f32 %v8152_v60, %v7862_v6  ;;  %v14021_v32 = vpop.f32.mrf.mxu2 }
 0x7c8   : > { %v8319_v31 = vadd.f32 %v13833_v61, %v8266_v5 }
 0x7ca   : > { %v8367_v8 = vmax.f32 %v8319_v31, 0.0  ;;  %9782 = vmatmul.msk.f32.gmra.mxu3 %vm354_vm1, %v7927_v13 }
 0x7cc   : > { %v8703_v55 = vmul.f32 %v8526_v27, %v8367_v8  ;;  %v14026_v5 = vpop.f32.mrf.mxu0  ;;  %v14032_v8 = vpop.f32.mrf.mxu1 }
 0x7cd   : > { %v8155_v54 = vpop.f32.mrf.mxu3 }
 0x7ce   : > { %8751 = vst.msk [vmem:[%s13845_s20 + $0x78] sm:$0xff] %vm354_vm1, %v8703_v55  ;;  %v8267_v42 = vadd.f32 %v8155_v54, %v7863_v41  ;;  %v14036_v41 = vpop.f32.mrf.mxu2 }
 0x7d0   : > { %v8320_v3 = vadd.f32 %v13833_v61, %v8267_v42 }
 0x7d2   : > { %v8368_v17 = vmax.f32 %v8320_v3, 0.0  ;;  %9783 = vmatmul.msk.f32.gmra.mxu3 %vm354_vm1, %v13603_v0  ;;  %v8536_v0 = vpop.permute.xlu2 %8535  ;;  %v14715_v3 = vld [vmem:[#allocation52_spill] sm:$0xff] }
 0x7d3   : > { %v7868_v52 = vadd.f32 %v13960_v48, %v14715_v3 }
 0x7d4   : > { %v8704_v15 = vmul.f32 %v8531_v33, %v8368_v17  ;;  %v14041_v42 = vpop.f32.mrf.mxu0 }
 0x7d5   : > { %v8158_v44 = vpop.f32.mrf.mxu3 }
 0x7d6   : > { %8752 = vst.msk [vmem:[%s13845_s20 + $0x80] sm:$0xff] %vm354_vm1, %v8704_v15  ;;  %v8268_v28 = vadd.f32 %v8158_v44, %v7864_v11  ;;  %v14047_v11 = vpop.f32.mrf.mxu1  ;;  %v14050_v44 = vpop.f32.mrf.mxu2 }
 0x7d8   : > { %v8321_v10 = vadd.f32 %v13833_v61, %v8268_v28 }
 0x7da   : > { %v8369_v34 = vmax.f32 %v8321_v10, 0.0  ;;  %9784 = vmatmul.msk.f32.gmra.mxu3 %vm354_vm1, %v13623_v56  ;;  %v8541_v56 = vpop.permute.xlu0 %8540  ;;  %v14716_v10 = vld [vmem:[#allocation54_spill] sm:$0xff] }
 0x7dc   : > { %v8705_v53 = vmul.f32 %v8536_v0, %v8369_v34  ;;  %v7869_v34 = vadd.f32 %v13972_v58, %v14716_v10  ;;  %v14056_v0 = vpop.f32.mrf.mxu0  ;;  %v7870_v58 = vadd.f32 %v13981_v4, %v13662_v57 }
 0x7dd   : > { %v8161_v37 = vpop.f32.mrf.mxu3 }
 0x7de   : > { %8753 = vst.msk [vmem:[%s13845_s20 + $0x88] sm:$0xff] %vm354_vm1, %v8705_v53  ;;  %v8269_v36 = vadd.f32 %v8161_v37, %v7865_v23 }
 0x7e0   : > { %v8322_v62 = vadd.f32 %v13833_v61, %v8269_v36  ;;  %v14061_v36 = vpop.f32.mrf.mxu1 }
 0x7e2   : > { %v8370_v18 = vmax.f32 %v8322_v62, 0.0  ;;  %9785 = vmatmul.msk.f32.gmra.mxu3 %vm354_vm1, %v13643_v43  ;;  %v8546_v43 = vpop.permute.xlu1 %8545 }
 0x7e4   : > { %v8706_v35 = vmul.f32 %v8541_v56, %v8370_v18  ;;  %v14065_v18 = vpop.f32.mrf.mxu2 }
 0x7e5   : > { %v8164_v6 = vpop.f32.mrf.mxu3 }
 0x7e6   : > { %8754 = vst.msk [vmem:[%s13845_s20 + $0x90] sm:$0xff] %vm354_vm1, %v8706_v35  ;;  %v8270_v29 = vadd.f32 %v8164_v6, %v7866_v21  ;;  %v14717_v35 = vld [vmem:[#allocation13_spill] sm:$0xff] }
 0x7e7   : > { %v7063_v6 = vadd.f32 %v13997_v25, %v14717_v35 }
 0x7e8   : > { %v8323_v60 = vadd.f32 %v13833_v61, %v8270_v29  ;;  %v14079_v4 = vpop.f32.mrf.mxu1 }
 0x7ea   : > { %v8371_v31 = vmax.f32 %v8323_v60, 0.0  ;;  %9786 = vmatmul.msk.f32.gmra.mxu3 %vm354_vm1, %v13660_v47  ;;  %v8551_v47 = vpop.permute.xlu2 %8550  ;;  %v14073_v60 = vpop.f32.mrf.mxu0 }
 0x7ec   : > { %v8707_v46 = vmul.f32 %v8546_v43, %v8371_v31  ;;  %v14082_v25 = vpop.f32.mrf.mxu2 }
 0x7ed   : > { %v8167_v13 = vpop.f32.mrf.mxu3 }
 0x7ee   : > { %8755 = vst.msk [vmem:[%s13845_s20 + $0x98] sm:$0xff] %vm354_vm1, %v8707_v46  ;;  %v8271_v27 = vadd.f32 %v8167_v13, %v7867_v12 }
 0x7f0   : > { %v8324_v55 = vadd.f32 %v13833_v61, %v8271_v27  ;;  %v14718_v27 = vld [vmem:[#allocation17_spill] sm:$0xff] }
 0x7f2   : > { %v8372_v54 = vmax.f32 %v8324_v55, 0.0  ;;  %9787 = vmatmul.msk.f32.gmra.mxu3 %vm354_vm1, %v13673_v20  ;;  %v8556_v20 = vpop.permute.xlu0 %8555  ;;  %v8566_v57 = vpop.permute.xlu2 %8565  ;;  %v7064_v55 = vadd.f32 %v14012_v38, %v14718_v27 }
 0x7f4   : > { %v8708_v24 = vmul.f32 %v8551_v47, %v8372_v54  ;;  %v14089_v47 = vpop.f32.mrf.mxu0 }
 0x7f5   : > { %v8170_v17 = vpop.f32.mrf.mxu3 }
 0x7f6   : > { %8756 = vst.msk [vmem:[%s13845_s20 + $0xa0] sm:$0xff] %vm354_vm1, %v8708_v24  ;;  %v8272_v33 = vadd.f32 %v8170_v17, %v7868_v52 }
 0x7f8   : > { %v8325_v15 = vadd.f32 %v13833_v61, %v8272_v33  ;;  %v14719_v33 = vld [vmem:[#allocation14_spill] sm:$0xff] }
 0x7f9   : > { %v7065_v38 = vadd.f32 %v14026_v5, %v14719_v33 }
 0x7fa   : > { %v8373_v28 = vmax.f32 %v8325_v15, 0.0  ;;  %9788 = vmatmul.msk.f32.gmra.mxu3 %vm354_vm1, %v13684_v40  ;;  %v8561_v40 = vpop.permute.xlu1 %8560  ;;  %v14097_v15 = vpop.f32.mrf.mxu1 }
 0x7fc   : > { %v8709_v48 = vmul.f32 %v8556_v20, %v8373_v28  ;;  %v14101_v20 = vpop.f32.mrf.mxu2 }
 0x7fd   : > { %v8173_v23 = vpop.f32.mrf.mxu3 }
 0x7fe   : > { %8757 = vst.msk [vmem:[%s13845_s20 + $0xa8] sm:$0xff] %vm354_vm1, %v8709_v48  ;;  %v8273_v53 = vadd.f32 %v8173_v23, %v7869_v34  ;;  %v6988_v34 = vpop.f32.mrf.mxu0 }
 0x800   : > { %v8326_v37 = vadd.f32 %v13833_v61, %v8273_v53  ;;  %v14720_v53 = vld [vmem:[#allocation15_spill] sm:$0xff] }
 0x802   : > { %v8374_v62 = vmax.f32 %v8326_v37, 0.0  ;;  %9789 = vmatmul.msk.f32.gmra.mxu3 %vm354_vm1, %v13697_v22  ;;  %v7467_v22 = vadd.f32 %v14002_v9, %v7063_v6  ;;  %v7066_v37 = vadd.f32 %v14041_v42, %v14720_v53 }
 0x804   : > { %v8710_v56 = vmul.f32 %v8561_v40, %v8374_v62  ;;  %v7871_v12 = vadd.f32 %v14006_v19, %v7467_v22  ;;  %v8571_v19 = vpop.permute.xlu0 %8570  ;;  %v7392_v40 = vpop.f32.mrf.mxu1 }
 0x805   : > { %v8176_v21 = vpop.f32.mrf.mxu3 }
 0x806   : > { %8758 = vst.msk [vmem:[%s13845_s20 + $0xb0] sm:$0xff] %vm354_vm1, %v8710_v56  ;;  %v8274_v29 = vadd.f32 %v8176_v21, %v7870_v58  ;;  %v14113_v58 = vpop.f32.mrf.mxu2  ;;  %v8581_v21 = vpop.permute.xlu2 %8580 }
 0x807   : > { %v6991_v6 = vpop.f32.mrf.mxu0 }
 0x808   : > { %v8327_v31 = vadd.f32 %v13833_v61, %v8274_v29 }
 0x80a   : > { %v8375_v43 = vmax.f32 %v8327_v31, 0.0  ;;  %9790 = vmatmul.msk.f32.gmra.mxu3 %vm354_vm1, %v13711_v1  ;;  %v7468_v1 = vadd.f32 %v14017_v45, %v7064_v55  ;;  %v14722_v31 = vld [vmem:[#allocation50_spill] sm:$0xff] }
 0x80b   : > { %v7067_v22 = vadd.f32 %v14056_v0, %v14722_v31 }
 0x80c   : > { %v8711_v46 = vmul.f32 %v8566_v57, %v8375_v43  ;;  %v7872_v52 = vadd.f32 %v14021_v32, %v7468_v1  ;;  %v8576_v32 = vpop.permute.xlu1 %8575 }
 0x80d   : > { %v8179_v13 = vpop.f32.mrf.mxu3  ;;  %v7471_v57 = vadd.f32 %v14061_v36, %v7067_v22  ;;  %v7940_v36 = vld [vmem:[#allocation3 + $0x19a] sm:$0xff] }
 0x80e   : > { %8759 = vst.msk [vmem:[%s13845_s20 + $0xb8] sm:$0xff] %vm354_vm1, %v8711_v46  ;;  %v8275_v9 = vadd.f32 %v8179_v13, %v7871_v12  ;;  %v7799_v46 = vpop.f32.mrf.mxu2 }
 0x80f   : > { %v7875_v13 = vadd.f32 %v14065_v18, %v7471_v57  ;;  %v6994_v1 = vpop.f32.mrf.mxu0 }
 0x810   : > { %v8328_v54 = vadd.f32 %v13833_v61, %v8275_v9  ;;  %v14723_v9 = vld [vmem:[#allocation51_spill] sm:$0xff] }
 0x811   : > { %v7068_v0 = vadd.f32 %v14073_v60, %v14723_v9 }
 0x812   : > { %v8376_v3 = vmax.f32 %v8328_v54, 0.0  ;;  %9791 = vmatmul.msk.f32.gmra.mxu3 %vm354_vm1, %v13723_v30  ;;  %v7469_v30 = vadd.f32 %v14032_v8, %v7065_v38  ;;  %v14724_v38 = vld [vmem:[#allocation53_spill] sm:$0xff] }
 0x814   : > { %v8712_v24 = vmul.f32 %v8571_v19, %v8376_v3  ;;  %v7873_v48 = vadd.f32 %v14036_v41, %v7469_v30  ;;  %v14721_v41 = vmov 0.0   ;;  %v7472_v19 = vadd.f32 %v14079_v4, %v7068_v0  ;;  %v7941_v30 = vld [vmem:[#allocation3 + $0x1a2] sm:$0xff] }
 0x815   : > { %v8182_v17 = vpop.f32.mrf.mxu3  ;;  %419 = vst.msk [vmem:[#allocation3 + $0x1b1] sm:$0x7f] %vm418_vm3, %v14721_v41 }
 0x816   : > { %8760 = vst.msk [vmem:[%s13845_s20 + $0xc0] sm:$0xff] %vm354_vm1, %v8712_v24  ;;  %v8276_v28 = vadd.f32 %v8182_v17, %v7872_v52  ;;  %v8591_v52 = vpop.permute.xlu1 %8590  ;;  %v7876_v24 = vadd.f32 %v14082_v25, %v7472_v19  ;;  %v7802_v33 = vpop.f32.mrf.mxu2 }
 0x817   : > { %v8596_v25 = vpop.permute.xlu2 %8595 }
 0x818   : > { %v8329_v45 = vadd.f32 %v13833_v61, %v8276_v28  ;;  %v7069_v28 = vadd.f32 %v14089_v47, %v14724_v38 }
 0x81a   : > { %v8377_v10 = vmax.f32 %v8329_v45, 0.0  ;;  %9792 = vmatmul.msk.f32.gmra.mxu3 %vm354_vm1, %v13737_v49  ;;  %v7470_v49 = vadd.f32 %v14047_v11, %v7066_v37  ;;  %v7070_v37 = vadd.f32 %v6988_v34, %v13651_v7  ;;  %v7071_v34 = vadd.f32 %v6991_v6, %v13668_v63 }
 0x81c   : > { %v8713_v5 = vmul.f32 %v8576_v32, %v8377_v10  ;;  %v7874_v42 = vadd.f32 %v14050_v44, %v7470_v49  ;;  %v8586_v44 = vpop.permute.xlu0 %8585  ;;  %v6997_v10 = vpop.f32.mrf.mxu0  ;;  %v7473_v32 = vadd.f32 %v14097_v15, %v7069_v28  ;;  %v7942_v49 = vld [vmem:[#allocation3 + $0x1aa] sm:$0xff]  ;;  %v7474_v15 = vadd.f32 %v7392_v40, %v7070_v37 }
 0x81d   : > { %v8185_v23 = vpop.f32.mrf.mxu3  ;;  %v7073_v19 = vadd.f32 %v6997_v10, %v13690_v26 }
 0x81e   : > { %8761 = vst.msk [vmem:[%s13845_s20 + $0xc8] sm:$0xff] %vm354_vm1, %v8713_v5  ;;  %v8277_v62 = vadd.f32 %v8185_v23, %v7873_v48  ;;  %v7877_v5 = vadd.f32 %v14101_v20, %v7473_v32  ;;  %v7878_v20 = vadd.f32 %v14113_v58, %v7474_v15  ;;  %v8606_v57 = vpop.permute.xlu1 %8605 }
 0x820   : > { %v8330_v8 = vadd.f32 %v13833_v61, %v8277_v62 }
 0x822   : > { %v8378_v56 = vmax.f32 %v8330_v8, 0.0  ;;  %9793 = vmatmul.msk.f32.gmra.mxu3 %vm354_vm1, %v13750_v51  ;;  %v7395_v51 = vpop.f32.mrf.mxu1  ;;  %v7805_v8 = vpop.f32.mrf.mxu2 }
 0x823   : > { %v7475_v40 = vadd.f32 %v7395_v51, %v7071_v34 }
 0x824   : > { %v8714_v35 = vmul.f32 %v8581_v21, %v8378_v56  ;;  %v8601_v21 = vpop.permute.xlu0 %8600 }
 0x825   : > { %v8188_v29 = vpop.f32.mrf.mxu3 }
 0x826   : > { %8762 = vst.msk [vmem:[%s13845_s20 + $0xd0] sm:$0xff] %vm354_vm1, %v8714_v35  ;;  %v8278_v43 = vadd.f32 %v8188_v29, %v7874_v42  ;;  %v7000_v42 = vpop.f32.mrf.mxu0 }
 0x828   : > { %v8331_v11 = vadd.f32 %v13833_v61, %v8278_v43 }
 0x82a   : > { %v8379_v12 = vmax.f32 %v8331_v11, 0.0  ;;  %9794 = vmatmul.msk.f32.gmra.mxu3 %vm354_vm1, %v13763_v59  ;;  %v7398_v18 = vpop.f32.mrf.mxu1  ;;  %v7808_v43 = vpop.f32.mrf.mxu2 }
 0x82c   : > { %v8715_v27 = vmul.f32 %v8586_v44, %v8379_v12  ;;  %v7879_v12 = vadd.f32 %v7799_v46, %v7475_v40 }
 0x82d   : > { %v8191_v55 = vpop.f32.mrf.mxu3 }
 0x82e   : > { %8763 = vst.msk [vmem:[%s13845_s20 + $0xd8] sm:$0xff] %vm354_vm1, %v8715_v27  ;;  %v8279_v54 = vadd.f32 %v8191_v55, %v7875_v13  ;;  %v7003_v13 = vpop.f32.mrf.mxu0  ;;  %v7072_v27 = vadd.f32 %v6994_v1, %v13679_v39 }
 0x830   : > { %v8332_v3 = vadd.f32 %v13833_v61, %v8279_v54  ;;  %v7476_v55 = vadd.f32 %v7398_v18, %v7072_v27  ;;  %v8611_v54 = vpop.permute.xlu2 %8610 }
 0x832   : > { %v8380_v59 = vmax.f32 %v8332_v3, 0.0  ;;  %9795 = vmatmul.msk.f32.gmra.mxu3 %vm354_vm1, %v7940_v36  ;;  %v7401_v47 = vpop.f32.mrf.mxu1  ;;  %v7811_v36 = vpop.f32.mrf.mxu2  ;;  %v7880_v51 = vadd.f32 %v7802_v33, %v7476_v55 }
 0x834   : > { %v8716_v17 = vmul.f32 %v8591_v52, %v8380_v59  ;;  %v7477_v52 = vadd.f32 %v7401_v47, %v7073_v19 }
 0x835   : > { %v8194_v60 = vpop.f32.mrf.mxu3 }
 0x836   : > { %8764 = vst.msk [vmem:[%s13845_s20 + $0xe0] sm:$0xff] %vm354_vm1, %v8716_v17  ;;  %v8280_v45 = vadd.f32 %v8194_v60, %v7876_v24  ;;  %v7006_v39 = vpop.f32.mrf.mxu0  ;;  %v8616_v17 = vpop.permute.xlu0 %8615  ;;  %v7881_v60 = vadd.f32 %v7805_v8, %v7477_v52 }
 0x838   : > { %v8333_v4 = vadd.f32 %v13833_v61, %v8280_v45  ;;  %v7074_v45 = vadd.f32 %v7000_v42, %v13704_v14 }
 0x83a   : > { %v8381_v48 = vmax.f32 %v8333_v4, 0.0  ;;  %9796 = vmatmul.msk.f32.gmra.mxu3 %vm354_vm1, %v7941_v30  ;;  %v7404_v31 = vpop.f32.mrf.mxu1  ;;  %v7814_v28 = vpop.f32.mrf.mxu2 }
 0x83b   : > { %v7478_v10 = vadd.f32 %v7404_v31, %v7074_v45 }
 0x83c   : > { %v8717_v23 = vmul.f32 %v8596_v25, %v8381_v48  ;;  %v8621_v48 = vpop.permute.xlu1 %8620 }
 0x83d   : > { %v8197_v53 = vpop.f32.mrf.mxu3  ;;  %v7882_v25 = vadd.f32 %v7808_v43, %v7478_v10 }
 0x83e   : > { %8765 = vst.msk [vmem:[%s13845_s20 + $0xe8] sm:$0xff] %vm354_vm1, %v8717_v23  ;;  %v8281_v62 = vadd.f32 %v8197_v53, %v7877_v5  ;;  %v7009_v4 = vpop.f32.mrf.mxu0  ;;  %v7075_v53 = vadd.f32 %v7003_v13, %v13718_v16 }
 0x840   : > { %v8334_v56 = vadd.f32 %v13833_v61, %v8281_v62 }
 0x842   : > { %v8382_v41 = vmax.f32 %v8334_v56, 0.0  ;;  %9797 = vmatmul.msk.f32.gmra.mxu3 %vm354_vm1, %v7942_v49  ;;  %v7407_v9 = vpop.f32.mrf.mxu1  ;;  %v7817_v14 = vpop.f32.mrf.mxu2 }
 0x843   : > { %v7479_v8 = vadd.f32 %v7407_v9, %v7075_v53  ;;  %v8626_v56 = vpop.permute.xlu2 %8625 }
 0x844   : > { %v8718_v35 = vmul.f32 %v8601_v21, %v8382_v41 }
 0x845   : > { %v8200_v7 = vpop.f32.mrf.mxu3  ;;  %v7883_v41 = vadd.f32 %v7811_v36, %v7479_v8 }
 0x846   : > { %8766 = vst.msk [vmem:[%s13845_s20 + $0xf0] sm:$0xff] %vm354_vm1, %v8718_v35  ;;  %v8282_v29 = vadd.f32 %v8200_v7, %v7878_v20  ;;  %v7012_v15 = vpop.f32.mrf.mxu0  ;;  %v7076_v20 = vadd.f32 %v7006_v39, %v13732_v50 }
 0x848   : > { %v8335_v22 = vadd.f32 %v13833_v61, %v8282_v29 }
 0x84a   : > { %v8383_v11 = vmax.f32 %v8335_v22, 0.0  ;;  %v7410_v18 = vpop.f32.mrf.mxu1  ;;  %v7820_v34 = vpop.f32.mrf.mxu2 }
 0x84b   : > { %v7480_v29 = vadd.f32 %v7410_v18, %v7076_v20  ;;  %v8631_v22 = vpop.permute.xlu0 %8630  ;;  %v14726_v18 = vld [vmem:[#allocation20_spill] sm:$0xff] }
 0x84c   : > { %v8719_v44 = vmul.f32 %v8606_v57, %v8383_v11 }
 0x84d   : > { %v8203_v58 = vpop.f32.mrf.mxu3  ;;  %v7884_v43 = vadd.f32 %v7814_v28, %v7480_v29 }
 0x84e   : > { %8767 = vst.msk [vmem:[%s13845_s20 + $0xf8] sm:$0xff] %vm354_vm1, %v8719_v44  ;;  %v8283_v63 = vadd.f32 %v8203_v58, %v7879_v12  ;;  %v7015_v11 = vpop.f32.mrf.mxu0  ;;  %v7077_v12 = vadd.f32 %v7009_v4, %v13745_v2 }
 0x850   : > { %v8336_v6 = vadd.f32 %v13833_v61, %v8283_v63  ;;  %v8636_v63 = vpop.permute.xlu1 %8635 }
 0x852   : > { %v8384_v0 = vmax.f32 %v8336_v6, 0.0  ;;  %v7413_v37 = vpop.f32.mrf.mxu1  ;;  %v7823_v6 = vpop.f32.mrf.mxu2 }
 0x853   : > { %v7481_v13 = vadd.f32 %v7413_v37, %v7077_v12 }
 0x854   : > { %v8720_v3 = vmul.f32 %v8611_v54, %v8384_v0  ;;  %v14725_v54 = vld [vmem:[#allocation18_spill] sm:$0xff] }
 0x855   : > { %v8206_v46 = vpop.f32.mrf.mxu3  ;;  %v7885_v55 = vadd.f32 %v7817_v14, %v7481_v13  ;;  %v7078_v36 = vadd.f32 %v7012_v15, %v14725_v54 }
 0x856   : > { %8768 = vst.msk [vmem:[%s13845_s20 + $0x100] sm:$0xff] %vm354_vm1, %v8720_v3  ;;  %v8284_v59 = vadd.f32 %v8206_v46, %v7880_v51  ;;  %v7018_v2 = vpop.f32.mrf.mxu0 }
 0x858   : > { %v8337_v1 = vadd.f32 %v13833_v61, %v8284_v59  ;;  %v8641_v59 = vpop.permute.xlu2 %8640 }
 0x85a   : > { %v8385_v24 = vmax.f32 %v8337_v1, 0.0  ;;  %v7416_v35 = vpop.f32.mrf.mxu1 }
 0x85b   : > { %v7482_v46 = vadd.f32 %v7416_v35, %v7078_v36 }
 0x85c   : > { %v8721_v38 = vmul.f32 %v8616_v17, %v8385_v24  ;;  %v7826_v24 = vpop.f32.mrf.mxu2 }
 0x85d   : > { %v8209_v33 = vpop.f32.mrf.mxu3  ;;  %v7886_v1 = vadd.f32 %v7820_v34, %v7482_v46 }
 0x85e   : > { %8769 = vst.msk [vmem:[%s13845_s20 + $0x108] sm:$0xff] %vm354_vm1, %v8721_v38  ;;  %v8285_v26 = vadd.f32 %v8209_v33, %v7881_v60  ;;  %v7079_v60 = vadd.f32 %v7015_v11, %v14726_v18  ;;  %v7021_v33 = vpop.f32.mrf.mxu0  ;;  %v14729_v11 = vld [vmem:[#allocation22_spill] sm:$0xff] }
 0x860   : > { %v8338_v30 = vadd.f32 %v13833_v61, %v8285_v26  ;;  %v8656_v29 = vpop.permute.xlu2 %8655 }
 0x862   : > { %v8386_v32 = vmax.f32 %v8338_v30, 0.0  ;;  %v7419_v58 = vpop.f32.mrf.mxu1  ;;  %v8646_v30 = vpop.permute.xlu0 %8645 }
 0x863   : > { %v7483_v45 = vadd.f32 %v7419_v58, %v7079_v60 }
 0x864   : > { %v8722_v5 = vmul.f32 %v8621_v48, %v8386_v32  ;;  %v14727_v48 = vld [vmem:[#allocation21_spill] sm:$0xff]  ;;  %v7829_v53 = vpop.f32.mrf.mxu2 }
 0x865   : > { %v8212_v23 = vpop.f32.mrf.mxu3  ;;  %v7887_v4 = vadd.f32 %v7823_v6, %v7483_v45 }
 0x866   : > { %8770 = vst.msk [vmem:[%s13845_s20 + $0x110] sm:$0xff] %vm354_vm1, %v8722_v5  ;;  %v8286_v47 = vadd.f32 %v8212_v23, %v7882_v25  ;;  %v7080_v25 = vadd.f32 %v7018_v2, %v14727_v48  ;;  %v7024_v8 = vpop.f32.mrf.mxu0  ;;  %v14732_v48 = vld [vmem:[#allocation60_spill] sm:$0xff] }
 0x868   : > { %v8339_v62 = vadd.f32 %v13833_v61, %v8286_v47 }
 0x86a   : > { %v8387_v49 = vmax.f32 %v8339_v62, 0.0  ;;  %v7422_v39 = vpop.f32.mrf.mxu1  ;;  %v8651_v62 = vpop.permute.xlu1 %8650 }
 0x86b   : > { %v7484_v47 = vadd.f32 %v7422_v39, %v7080_v25 }
 0x86c   : > { %v8723_v21 = vmul.f32 %v8626_v56, %v8387_v49  ;;  %v7832_v35 = vpop.f32.mrf.mxu2 }
 0x86d   : > { %v8215_v42 = vpop.f32.mrf.mxu3  ;;  %v7888_v49 = vadd.f32 %v7826_v24, %v7484_v47 }
 0x86e   : > { %8771 = vst.msk [vmem:[%s13845_s20 + $0x118] sm:$0xff] %vm354_vm1, %v8723_v21  ;;  %v8287_v16 = vadd.f32 %v8215_v42, %v7883_v41  ;;  %v14728_v41 = vld [vmem:[#allocation58_spill] sm:$0xff] }
 0x86f   : > { %v7081_v21 = vadd.f32 %v7021_v33, %v14728_v41 }
 0x870   : > { %v8340_v7 = vadd.f32 %v13833_v61, %v8287_v16  ;;  %v14197_v16 = vld [vmem:[%s14233_s5 + $0x1] ss:$0 sm:$0xff] }
 0x872   : > { %v8388_v31 = vmax.f32 %v8340_v7, 0.0  ;;  %v7425_v5 = vpop.f32.mrf.mxu1 }
 0x873   : > { %v7485_v7 = vadd.f32 %v7425_v5, %v7081_v21 }
 0x874   : > { %v8724_v40 = vmul.f32 %v8631_v22, %v8388_v31 }
 0x875   : > { %v8218_v57 = vpop.f32.mrf.mxu3  ;;  %v7889_v31 = vadd.f32 %v7829_v53, %v7485_v7 }
 0x876   : > { %8772 = vst.msk [vmem:[%s13845_s20 + $0x120] sm:$0xff] %vm354_vm1, %v8724_v40  ;;  %v8288_v50 = vadd.f32 %v8218_v57, %v7884_v43  ;;  %v7027_v43 = vpop.f32.mrf.mxu0  ;;  %v7082_v57 = vadd.f32 %v7024_v8, %v14729_v11 }
 0x878   : > { %v8341_v44 = vadd.f32 %v13833_v61, %v8288_v50 }
 0x87a   : > { %v8389_v27 = vmax.f32 %v8341_v44, 0.0  ;;  %v7428_v20 = vpop.f32.mrf.mxu1 }
 0x87b   : > { %v7486_v44 = vadd.f32 %v7428_v20, %v7082_v57 }
 0x87c   : > { %v8725_v9 = vmul.f32 %v8636_v63, %v8389_v27  ;;  %v8661_v27 = vpop.permute.xlu0 %8660  ;;  %v7835_v63 = vpop.f32.mrf.mxu2 }
 0x87d   : > { %v8221_v0 = vpop.f32.mrf.mxu3  ;;  %v7890_v6 = vadd.f32 %v7832_v35, %v7486_v44 }
 0x87e   : > { %8773 = vst.msk [vmem:[%s13845_s20 + $0x128] sm:$0xff] %vm354_vm1, %v8725_v9  ;;  %v8289_v51 = vadd.f32 %v8221_v0, %v7885_v55  ;;  %v14730_v0 = vld [vmem:[#allocation23_spill] sm:$0xff] }
 0x87f   : > { %v7083_v54 = vadd.f32 %v7027_v43, %v14730_v0 }
 0x880   : > { %v8342_v3 = vadd.f32 %v13833_v61, %v8289_v51  ;;  %v7030_v51 = vpop.f32.mrf.mxu0 }
 0x882   : > { %v8390_v19 = vmax.f32 %v8342_v3, 0.0  ;;  %v7431_v13 = vpop.f32.mrf.mxu1 }
 0x883   : > { %v7487_v3 = vadd.f32 %v7431_v13, %v7083_v54 }
 0x884   : > { %v8726_v52 = vmul.f32 %v8641_v59, %v8390_v19  ;;  %v8666_v19 = vpop.permute.xlu1 %8665 }
 0x885   : > { %v8224_v17 = vpop.f32.mrf.mxu3  ;;  %v7891_v39 = vadd.f32 %v7835_v63, %v7487_v3 }
 0x886   : > { %8774 = vst.msk [vmem:[%s13845_s20 + $0x130] sm:$0xff] %vm354_vm1, %v8726_v52  ;;  %v8290_v38 = vadd.f32 %v8224_v17, %v7886_v1  ;;  %v7838_v52 = vpop.f32.mrf.mxu2  ;;  %v14731_v17 = vld [vmem:[#allocation59_spill] sm:$0xff] }
 0x887   : > { %v7084_v18 = vadd.f32 %v7030_v51, %v14731_v17 }
 0x888   : > { %v8343_v28 = vadd.f32 %v13833_v61, %v8290_v38 }
 0x88a   : > { %v8391_v26 = vmax.f32 %v8343_v28, 0.0  ;;  %v7434_v59 = vpop.f32.mrf.mxu1  ;;  %v7033_v28 = vpop.f32.mrf.mxu0 }
 0x88b   : > { %v7488_v33 = vadd.f32 %v7434_v59, %v7084_v18  ;;  %v7085_v25 = vadd.f32 %v7033_v28, %v14732_v48 }
 0x88c   : > { %v8727_v10 = vmul.f32 %v8646_v30, %v8391_v26  ;;  %v8671_v26 = vpop.permute.xlu2 %8670 }
 0x88d   : > { %v8227_v32 = vpop.f32.mrf.mxu3  ;;  %v7892_v30 = vadd.f32 %v7838_v52, %v7488_v33 }
 0x88e   : > { %8775 = vst.msk [vmem:[%s13845_s20 + $0x138] sm:$0xff] %vm354_vm1, %v8727_v10  ;;  %v8291_v23 = vadd.f32 %v8227_v32, %v7887_v4 }
 0x890   : > { %v8344_v37 = vadd.f32 %v13833_v61, %v8291_v23  ;;  %v7841_v23 = vpop.f32.mrf.mxu2 }
 0x892   : > { %v8392_v14 = vmax.f32 %v8344_v37, 0.0  ;;  %v7437_v10 = vpop.f32.mrf.mxu1 }
 0x893   : > { %v7489_v37 = vadd.f32 %v7437_v10, %v7085_v25 }
 0x894   : > { %v8728_v56 = vmul.f32 %v8651_v62, %v8392_v14  ;;  %v8676_v14 = vpop.permute.xlu0 %8675  ;;  %v7036_v62 = vpop.f32.mrf.mxu0 }
 0x895   : > { %v8230_v15 = vpop.f32.mrf.mxu3  ;;  %v7893_v8 = vadd.f32 %v7841_v23, %v7489_v37  ;;  %v8686_v57 = vpop.permute.xlu2 %8685 }
 0x896   : > { %8776 = vst.msk [vmem:[%s13845_s20 + $0x140] sm:$0xff] %vm354_vm1, %v8728_v56  ;;  %v8292_v42 = vadd.f32 %v8230_v15, %v7888_v49  ;;  %v14733_v15 = vld [vmem:[#allocation61_spill] sm:$0xff] }
 0x897   : > { %v7086_v41 = vadd.f32 %v7036_v62, %v14733_v15 }
 0x898   : > { %v8345_v61 = vadd.f32 %v14197_v16, %v8292_v42 }
 0x89a   : > { %v8393_v34 = vmax.f32 %v8345_v61, 0.0  ;;  %v7440_v42 = vpop.f32.mrf.mxu1  ;;  %v7844_v61 = vpop.f32.mrf.mxu2 }
 0x89b   : > { %v7490_v35 = vadd.f32 %v7440_v42, %v7086_v41 }
 0x89c   : > { %v8729_v22 = vmul.f32 %v8656_v29, %v8393_v34  ;;  %v8681_v34 = vpop.permute.xlu1 %8680 }
 0x89d   : > { %v8233_v40 = vpop.f32.mrf.mxu3  ;;  %v7894_v29 = vadd.f32 %v7844_v61, %v7490_v35 }
 0x89e   : > { %8777 = vst.msk [vmem:[%s13845_s20 + $0x148] sm:$0xff] %vm354_vm1, %v8729_v22  ;;  %v8293_v12 = vadd.f32 %v8233_v40, %v7889_v31 }
 0x8a0   : > { %v8346_v50 = vadd.f32 %v14197_v16, %v8293_v12 }
 0x8a2   : > { %v8394_v58 = vmax.f32 %v8346_v50, 0.0 }
 0x8a4   : > { %v8730_v55 = vmul.f32 %v8661_v27, %v8394_v58 }
 0x8a5   : > { %v8236_v9 = vpop.f32.mrf.mxu3 }
 0x8a6   : > { %8778 = vst.msk [vmem:[%s13845_s20 + $0x150] sm:$0xff] %vm354_vm1, %v8730_v55  ;;  %v8294_v36 = vadd.f32 %v8236_v9, %v7890_v6 }
 0x8a8   : > { %v8347_v2 = vadd.f32 %v14197_v16, %v8294_v36 }
 0x8aa   : > { %v8395_v46 = vmax.f32 %v8347_v2, 0.0 }
 0x8ac   : > { %v8731_v1 = vmul.f32 %v8666_v19, %v8395_v46 }
 0x8ad   : > { %v8239_v24 = vpop.f32.mrf.mxu3 }
 0x8ae   : > { %8779 = vst.msk [vmem:[%s13845_s20 + $0x158] sm:$0xff] %vm354_vm1, %v8731_v1  ;;  %v8295_v60 = vadd.f32 %v8239_v24, %v7891_v39 }
 0x8b0   : > { %v8348_v38 = vadd.f32 %v14197_v16, %v8295_v60 }
 0x8b2   : > { %v8396_v45 = vmax.f32 %v8348_v38, 0.0 }
 0x8b4   : > { %v8732_v4 = vmul.f32 %v8671_v26, %v8396_v45 }
 0x8b5   : > { %v8242_v32 = vpop.f32.mrf.mxu3 }
 0x8b6   : > { %8780 = vst.msk [vmem:[%s13845_s20 + $0x160] sm:$0xff] %vm354_vm1, %v8732_v4  ;;  %v8296_v5 = vadd.f32 %v8242_v32, %v7892_v30 }
 0x8b8   : > { %v8349_v53 = vadd.f32 %v14197_v16, %v8296_v5 }
 0x8ba   : > { %v8397_v47 = vmax.f32 %v8349_v53, 0.0 }
 0x8bc   : > { %v8733_v49 = vmul.f32 %v8676_v14, %v8397_v47 }
 0x8bd   : > { %v8245_v56 = vpop.f32.mrf.mxu3 }
 0x8be   : > { %8781 = vst.msk [vmem:[%s13845_s20 + $0x168] sm:$0xff] %vm354_vm1, %v8733_v49  ;;  %v8297_v21 = vadd.f32 %v8245_v56, %v7893_v8 }
 0x8c0   : > { %v8350_v20 = vadd.f32 %v14197_v16, %v8297_v21 }
 0x8c2   : > { %v8398_v7 = vmax.f32 %v8350_v20, 0.0 }
 0x8c4   : > { %v8734_v31 = vmul.f32 %v8681_v34, %v8398_v7 }
 0x8c5   : > { %v8248_v22 = vpop.f32.mrf.mxu3 }
 0x8c6   : > { %8782 = vst.msk [vmem:[%s13845_s20 + $0x170] sm:$0xff] %vm354_vm1, %v8734_v31  ;;  %v8298_v43 = vadd.f32 %v8248_v22, %v7894_v29 }
 0x8c8   : > { %v8351_v40 = vadd.f32 %v14197_v16, %v8298_v43 }
 0x8ca   : > { %v8399_v11 = vmax.f32 %v8351_v40, 0.0 }
 0x8cc   : > { %v8735_v12 = vmul.f32 %v8686_v57, %v8399_v11 }
 0x8ce   : > { %8783 = vst.msk [vmem:[%s13845_s20 + $0x178] sm:$0xff] %vm354_vm1, %v8735_v12 }
 0x8cf PF: > { %s17_s24 = sadd.s32 1, %s9833_s24  }
 0x8d0   : > { %p14_p4 = scmp.ge.s32.totalorder %s17_s24, 6  }
 0x8d2   :  { %16 = sbr.rel (!%p14_p4) target bundleno = 1 (0x1), region = 100 }

</bundles_post_ra>
